<compile_context>
chip_gen: v5e
topology: v5e:2x2
jax: 0.10.0
libtpu: 0.0.40
codegen_flags: <defaults>
</compile_context>

<pallas_src>
import functools

import jax
import jax.numpy as jnp
from jax.experimental import pallas as pl
from jax.experimental.pallas import tpu as pltpu


# -----------------------------------------------------------------------------
# Pallas kernels
# -----------------------------------------------------------------------------

def _conv_mm_kernel(a_ref, w_ref, b_ref, o_ref):
    """out = relu(patches @ W + b) for one (M-tile, O-tile); BN folded into W,b."""
    acc = jnp.dot(a_ref[...], w_ref[...], preferred_element_type=jnp.float32)
    o_ref[...] = jnp.maximum(acc + b_ref[...], 0.0).astype(o_ref.dtype)


def _conv4_head_kernel(p_ref, w4_ref, b4_ref, w1_ref, b1_ref, w2_ref, b2_ref, o_ref,
                       *, n, hw):
    """relu(bn4(conv4)) -> global-avg-pool -> fc1 -> relu -> fc2 -> log_softmax."""
    x = jnp.dot(p_ref[...], w4_ref[...], preferred_element_type=jnp.float32)
    x = jnp.maximum(x + b4_ref[...], 0.0)          # (Mp, 512); padded rows dropped below
    x = x[:n * hw]                                 # (n*hw, 512)
    if hw > 1:
        # TODO(synk): dead for 1x1 conv4 output; verify layout cost before reuse.
        x = jnp.mean(x.reshape(n, hw, x.shape[-1]), axis=1)   # global average pool
    # hw == 1: GAP is the identity, x is already (n, 512)
    h = jnp.dot(x.astype(jnp.bfloat16), w1_ref[...],
                preferred_element_type=jnp.float32) + b1_ref[...]
    h = jnp.maximum(h, 0.0)
    y = jnp.dot(h.astype(jnp.bfloat16), w2_ref[...],
                preferred_element_type=jnp.float32) + b2_ref[...]
    z = y - jnp.max(y, axis=-1, keepdims=True)
    o_ref[...] = z - jnp.log(jnp.sum(jnp.exp(z), axis=-1, keepdims=True))


# -----------------------------------------------------------------------------
# Wrappers (JAX glue: im2col, padding, parameter folding)
# -----------------------------------------------------------------------------

def _im2col(x, k, pad):
    """x: (N, H, W, C) -> (N*Ho*Wo, k*k*C); patch ordering is (ki, kj, c)."""
    if pad > 0:
        x = jnp.pad(x, ((0, 0), (pad, pad), (pad, pad), (0, 0)))
    N, H, W, C = x.shape
    Ho, Wo = H - k + 1, W - k + 1
    cols = []
    for i in range(k):
        for j in range(k):
            cols.append(x[:, i:i + Ho, j:j + Wo, :])
    p = jnp.stack(cols, axis=3)                    # (N, Ho, Wo, k*k, C)
    return p.reshape(N * Ho * Wo, k * k * C), (N, Ho, Wo)


def _fold_bn(w, b, bn):
    if bn is None:
        return w, b
    gamma, beta, mean, var, eps = bn
    scale = gamma / jnp.sqrt(var + eps)
    return w * scale[:, None, None, None], (b - mean) * scale + beta


def _pad_to(n, mult):
    return ((n + mult - 1) // mult) * mult


def conv2d_bn_relu(x, w, b, bn, pad):
    """x: (N,H,W,C) NHWC.  w: (O,C,k,k) PyTorch OIHW.  Returns relu(bn(conv)) in bf16."""
    w, b = _fold_bn(w, b, bn)
    O, C, k, _ = w.shape
    patches, (N, Ho, Wo) = _im2col(x, k, pad)
    M, Kd = patches.shape

    # Output-channel tiling: lane-dense 128-wide tiles when O is a multiple of 128,
    # otherwise a single full-width (e.g. 32-lane) block -- no channel padding.
    if O % 128 == 0:
        tn, n_o = 128, O // 128
    else:
        tn, n_o = O, 1

    # M tiling: split M across 2 "parallel" tiles when the channel grid is 1 so both
    # v7x TensorCores get work (one extra cheap grid step on v5e/v6e).
    num_m = 2 if (n_o == 1 and M >= 128) else 1
    tm = _pad_to(-(-M // num_m), 16)               # 16-aligned (bf16 sublane pack)
    Mp = tm * num_m

    Kdp = _pad_to(Kd, 128)                         # lane-aligned contraction dim
    patches = jnp.pad(patches, ((0, Mp - M), (0, Kdp - Kd))).astype(jnp.bfloat16)

    wm = jnp.transpose(w, (2, 3, 1, 0)).reshape(Kd, O)      # match (ki,kj,c) ordering
    wm = jnp.pad(wm, ((0, Kdp - Kd), (0, 0))).astype(jnp.bfloat16)
    bm = b.reshape(1, O).astype(jnp.float32)

    out = pl.pallas_call(
        _conv_mm_kernel,
        out_shape=jax.ShapeDtypeStruct((Mp, O), jnp.bfloat16),
        grid=(num_m, n_o),
        in_specs=[
            pl.BlockSpec((tm, Kdp), lambda i, j: (i, 0)),
            pl.BlockSpec((Kdp, tn), lambda i, j: (0, j)),
            pl.BlockSpec((1, tn), lambda i, j: (0, j)),
        ],
        out_specs=pl.BlockSpec((tm, tn), lambda i, j: (i, j)),
        compiler_params=pltpu.CompilerParams(
            dimension_semantics=("parallel", "parallel"),
        ),
    )(patches, wm, bm)
    return out[:M, :].reshape(N, Ho, Wo, O)


def maxpool2x2(x):
    """nn.MaxPool2d(2, 2) on NHWC (floor mode) as fused glue: no extra pallas_call."""
    N, H, W, C = x.shape
    Hh, Wh = H // 2, W // 2
    xc = x[:, :Hh * 2, :Wh * 2, :]
    return jnp.maximum(
        jnp.maximum(xc[:, 0::2, 0::2, :], xc[:, 0::2, 1::2, :]),
        jnp.maximum(xc[:, 1::2, 0::2, :], xc[:, 1::2, 1::2, :]))


def conv4_head(x, w4, b4, bn4, fc1_w, fc1_b, fc2_w, fc2_b):
    """Fused conv4 + bn4 + relu + global-avg-pool + fc1 + relu + fc2 + log_softmax."""
    w4, b4 = _fold_bn(w4, b4, bn4)
    O, C, k, _ = w4.shape
    patches, (N, Ho, Wo) = _im2col(x, k, pad=0)
    M, Kd = patches.shape
    Mp = _pad_to(M, 16)
    Kdp = _pad_to(Kd, 128)
    patches = jnp.pad(patches, ((0, Mp - M), (0, Kdp - Kd))).astype(jnp.bfloat16)
    w4m = jnp.transpose(w4, (2, 3, 1, 0)).reshape(Kd, O)
    w4m = jnp.pad(w4m, ((0, Kdp - Kd), (0, 0))).astype(jnp.bfloat16)
    b4m = b4.reshape(1, O).astype(jnp.float32)

    kernel = functools.partial(_conv4_head_kernel, n=N, hw=Ho * Wo)
    nclass = fc2_w.shape[1]
    return pl.pallas_call(
        kernel,
        out_shape=jax.ShapeDtypeStruct((N, nclass), jnp.float32),
        in_specs=[pl.BlockSpec(memory_space=pltpu.MemorySpace.VMEM)] * 7,
        out_specs=pl.BlockSpec(memory_space=pltpu.MemorySpace.VMEM),
    )(patches, w4m, b4m,
      fc1_w.astype(jnp.bfloat16), fc1_b.astype(jnp.float32),
      fc2_w.astype(jnp.bfloat16), fc2_b.astype(jnp.float32))


# -----------------------------------------------------------------------------
# Model: parameters + forward
# -----------------------------------------------------------------------------

def _gaussian_kernel_2d(k=5, sigma=1.0):
    ax = jnp.arange(k, dtype=jnp.float32) - (k - 1) / 2.0
    g = jnp.exp(-(ax ** 2) / (2.0 * sigma ** 2))
    k2 = jnp.outer(g, g)
    return k2 / jnp.sum(k2)


def _init_conv(key, o, c, k):
    kw, kb = jax.random.split(key)
    fan_in = c * k * k
    w = jax.random.normal(kw, (o, c, k, k), jnp.float32) / jnp.sqrt(fan_in)
    b = 0.01 * jax.random.normal(kb, (o,), jnp.float32)
    return w, b


def _init_bn(key, c):
    k1, k2, k3, k4 = jax.random.split(key, 4)
    gamma = 1.0 + 0.1 * jax.random.normal(k1, (c,), jnp.float32)
    beta = 0.1 * jax.random.normal(k2, (c,), jnp.float32)
    mean = 0.1 * jax.random.normal(k3, (c,), jnp.float32)
    var = 1.0 + 0.1 * jnp.abs(jax.random.normal(k4, (c,), jnp.float32))
    return gamma, beta, mean, var, 1e-5


def _init_linear(key, fin, fout):
    kw, kb = jax.random.split(key)
    w = jax.random.normal(kw, (fin, fout), jnp.float32) / jnp.sqrt(fin)
    b = 0.01 * jax.random.normal(kb, (1, fout), jnp.float32)
    return w, b


def init_params(seed=0):
    keys = jax.random.split(jax.random.PRNGKey(seed), 8)
    p = {}
    # conv1: fixed Gaussian "Constolution2D" kernel, 3 -> 32, 5x5, no bias.
    g = _gaussian_kernel_2d(5, 1.0)
    p["w1"] = jnp.broadcast_to(g, (32, 3, 5, 5)).astype(jnp.float32)
    p["b1"] = jnp.zeros((32,), jnp.float32)
    p["w2"], p["b2"] = _init_conv(keys[0], 128, 32, 3)
    p["w3"], p["b3"] = _init_conv(keys[1], 256, 128, 3)
    p["w4"], p["b4"] = _init_conv(keys[2], 512, 256, 3)
    p["bn2"] = _init_bn(keys[3], 128)
    p["bn3"] = _init_bn(keys[4], 256)
    p["bn4"] = _init_bn(keys[5], 512)
    p["fc1_w"], p["fc1_b"] = _init_linear(keys[6], 512, 128)
    p["fc2_w"], p["fc2_b"] = _init_linear(keys[7], 128, 10)
    return p


@jax.jit
def forward(x_nchw, params):
    x = jnp.transpose(x_nchw, (0, 2, 3, 1)).astype(jnp.float32)   # NCHW -> NHWC
    x = maxpool2x2(conv2d_bn_relu(x, params["w1"], params["b1"], None, pad=0))
    x = maxpool2x2(conv2d_bn_relu(x, params["w2"], params["b2"], params["bn2"], pad=1))
    x = maxpool2x2(conv2d_bn_relu(x, params["w3"], params["b3"], params["bn3"], pad=1))
    return conv4_head(x, params["w4"], params["b4"], params["bn4"],
                      params["fc1_w"], params["fc1_b"],
                      params["fc2_w"], params["fc2_b"])


if __name__ == "__main__":
    params = init_params(0)
    x = jax.random.normal(jax.random.PRNGKey(0), (2, 3, 32, 32), jnp.float32)

    out = forward(x, params)
    out = jax.block_until_ready(out)

    assert out.shape == (2, 10), out.shape
    # log_softmax rows must exponentiate-sum to 1
    row_sums = jnp.exp(out).sum(axis=1)
    assert bool(jnp.all(jnp.abs(row_sums - 1.0) < 1e-4)), row_sums
    assert bool(jnp.all(jnp.isfinite(out)))

    print("KERNEL_OK")
</pallas_src>

<mosaic_0001>
module attributes {stable_mosaic.version = 11 : i64} {
  func.func @_conv_mm_kernel(%arg0: i32, %arg1: i32, %arg2: memref<784x128xbf16, #tpu.memory_space<vmem>>, %arg3: memref<128x32xbf16, #tpu.memory_space<vmem>>, %arg4: memref<1x32xf32, #tpu.memory_space<vmem>>, %arg5: memref<784x32xbf16, #tpu.memory_space<vmem>>) attributes {dimension_semantics = [#tpu.dimension_semantics<parallel>, #tpu.dimension_semantics<parallel>], iteration_bounds = array<i64: 2, 1>, scalar_prefetch = 0 : i64, scratch_operands = 0 : i64, tpu.core_type = #tpu.core_type<tc>, window_params = [{transform_indices = @transform_0, window_bounds = array<i64: 784, 128>}, {transform_indices = @transform_1, window_bounds = array<i64: 128, 32>}, {transform_indices = @transform_2, window_bounds = array<i64: 1, 32>}, {transform_indices = @transform_3, window_bounds = array<i64: 784, 32>}]} {
    %c0 = arith.constant 0 : index
    %c0_0 = arith.constant 0 : index
    %0 = vector.load %arg2[%c0, %c0_0] : memref<784x128xbf16, #tpu.memory_space<vmem>>, vector<784x128xbf16>
    %c0_1 = arith.constant 0 : index
    %c0_2 = arith.constant 0 : index
    %1 = vector.load %arg3[%c0_1, %c0_2] : memref<128x32xbf16, #tpu.memory_space<vmem>>, vector<128x32xbf16>
    %cst = arith.constant dense<0.000000e+00> : vector<784x32xf32>
    %2 = tpu.matmul %0, %1, %cst {dimension_numbers = #tpu.dot_dimension_numbers<[1], [0], [0], [1], [0, 0, 1, 1], [], []>} : vector<784x128xbf16>, vector<128x32xbf16>, vector<784x32xf32> -> vector<784x32xf32>
    %c0_3 = arith.constant 0 : index
    %c0_4 = arith.constant 0 : index
    %3 = vector.load %arg4[%c0_3, %c0_4] : memref<1x32xf32, #tpu.memory_space<vmem>>, vector<1x32xf32>
    %4 = vector.broadcast %3 : vector<1x32xf32> to vector<784x32xf32>
    %5 = arith.addf %2, %4 : vector<784x32xf32>
    %cst_5 = arith.constant 0.000000e+00 : f32
    %6 = vector.broadcast %cst_5 : f32 to vector<784x32xf32>
    %7 = arith.maximumf %5, %6 : vector<784x32xf32>
    %8 = arith.truncf %7 : vector<784x32xf32> to vector<784x32xbf16>
    %c0_6 = arith.constant 0 : index
    %c0_7 = arith.constant 0 : index
    %9 = vector.load %arg5[%c0_6, %c0_7] : memref<784x32xbf16, #tpu.memory_space<vmem>>, vector<784x32xbf16>
    tpu.vector_store %arg5[%c0_6, %c0_7], %8 {strides = array<i32>} : memref<784x32xbf16, #tpu.memory_space<vmem>>, vector<784x32xbf16>,
    return
  }
  func.func @transform_0(%arg0: i32, %arg1: i32) -> (i32, i32) {
    %c0_i32 = arith.constant 0 : i32
    %c0_i32_0 = arith.constant 0 : i32
    return %arg0, %c0_i32 : i32, i32
  }
  func.func @transform_1(%arg0: i32, %arg1: i32) -> (i32, i32) {
    %c0_i32 = arith.constant 0 : i32
    %c0_i32_0 = arith.constant 0 : i32
    return %c0_i32, %arg1 : i32, i32
  }
  func.func @transform_2(%arg0: i32, %arg1: i32) -> (i32, i32) {
    %c0_i32 = arith.constant 0 : i32
    %c0_i32_0 = arith.constant 0 : i32
    return %c0_i32, %arg1 : i32, i32
  }
  func.func @transform_3(%arg0: i32, %arg1: i32) -> (i32, i32) {
    %c0_i32 = arith.constant 0 : i32
    return %arg0, %arg1 : i32, i32
  }
}

module attributes {stable_mosaic.version = 11 : i64} {
  func.func @_conv_mm_kernel(%arg0: i32, %arg1: i32, %arg2: memref<208x384xbf16, #tpu.memory_space<vmem>>, %arg3: memref<384x128xbf16, #tpu.memory_space<vmem>>, %arg4: memref<1x128xf32, #tpu.memory_space<vmem>>, %arg5: memref<208x128xbf16, #tpu.memory_space<vmem>>) attributes {dimension_semantics = [#tpu.dimension_semantics<parallel>, #tpu.dimension_semantics<parallel>], iteration_bounds = array<i64: 2, 1>, scalar_prefetch = 0 : i64, scratch_operands = 0 : i64, tpu.core_type = #tpu.core_type<tc>, window_params = [{transform_indices = @transform_0, window_bounds = array<i64: 208, 384>}, {transform_indices = @transform_1, window_bounds = array<i64: 384, 128>}, {transform_indices = @transform_2, window_bounds = array<i64: 1, 128>}, {transform_indices = @transform_3, window_bounds = array<i64: 208, 128>}]} {
    %c0 = arith.constant 0 : index
    %c0_0 = arith.constant 0 : index
    %0 = vector.load %arg2[%c0, %c0_0] : memref<208x384xbf16, #tpu.memory_space<vmem>>, vector<208x384xbf16>
    %c0_1 = arith.constant 0 : index
    %c0_2 = arith.constant 0 : index
    %1 = vector.load %arg3[%c0_1, %c0_2] : memref<384x128xbf16, #tpu.memory_space<vmem>>, vector<384x128xbf16>
    %cst = arith.constant dense<0.000000e+00> : vector<208x128xf32>
    %2 = tpu.matmul %0, %1, %cst {dimension_numbers = #tpu.dot_dimension_numbers<[1], [0], [0], [1], [0, 0, 1, 1], [], []>} : vector<208x384xbf16>, vector<384x128xbf16>, vector<208x128xf32> -> vector<208x128xf32>
    %c0_3 = arith.constant 0 : index
    %c0_4 = arith.constant 0 : index
    %3 = vector.load %arg4[%c0_3, %c0_4] : memref<1x128xf32, #tpu.memory_space<vmem>>, vector<1x128xf32>
    %4 = vector.broadcast %3 : vector<1x128xf32> to vector<208x128xf32>
    %5 = arith.addf %2, %4 : vector<208x128xf32>
    %cst_5 = arith.constant 0.000000e+00 : f32
    %6 = vector.broadcast %cst_5 : f32 to vector<208x128xf32>
    %7 = arith.maximumf %5, %6 : vector<208x128xf32>
    %8 = arith.truncf %7 : vector<208x128xf32> to vector<208x128xbf16>
    %c0_6 = arith.constant 0 : index
    %c0_7 = arith.constant 0 : index
    %9 = vector.load %arg5[%c0_6, %c0_7] : memref<208x128xbf16, #tpu.memory_space<vmem>>, vector<208x128xbf16>
    tpu.vector_store %arg5[%c0_6, %c0_7], %8 {strides = array<i32>} : memref<208x128xbf16, #tpu.memory_space<vmem>>, vector<208x128xbf16>,
    return
  }
  func.func @transform_0(%arg0: i32, %arg1: i32) -> (i32, i32) {
    %c0_i32 = arith.constant 0 : i32
    %c0_i32_0 = arith.constant 0 : i32
    return %arg0, %c0_i32 : i32, i32
  }
  func.func @transform_1(%arg0: i32, %arg1: i32) -> (i32, i32) {
    %c0_i32 = arith.constant 0 : i32
    %c0_i32_0 = arith.constant 0 : i32
    return %c0_i32, %arg1 : i32, i32
  }
  func.func @transform_2(%arg0: i32, %arg1: i32) -> (i32, i32) {
    %c0_i32 = arith.constant 0 : i32
    %c0_i32_0 = arith.constant 0 : i32
    return %c0_i32, %arg1 : i32, i32
  }
  func.func @transform_3(%arg0: i32, %arg1: i32) -> (i32, i32) {
    %c0_i32 = arith.constant 0 : i32
    return %arg0, %arg1 : i32, i32
  }
}

module attributes {stable_mosaic.version = 11 : i64} {
  func.func @_conv_mm_kernel(%arg0: i32, %arg1: i32, %arg2: memref<112x1152xbf16, #tpu.memory_space<vmem>>, %arg3: memref<1152x128xbf16, #tpu.memory_space<vmem>>, %arg4: memref<1x128xf32, #tpu.memory_space<vmem>>, %arg5: memref<112x128xbf16, #tpu.memory_space<vmem>>) attributes {dimension_semantics = [#tpu.dimension_semantics<parallel>, #tpu.dimension_semantics<parallel>], iteration_bounds = array<i64: 1, 2>, scalar_prefetch = 0 : i64, scratch_operands = 0 : i64, tpu.core_type = #tpu.core_type<tc>, window_params = [{transform_indices = @transform_0, window_bounds = array<i64: 112, 1152>}, {transform_indices = @transform_1, window_bounds = array<i64: 1152, 128>}, {transform_indices = @transform_2, window_bounds = array<i64: 1, 128>}, {transform_indices = @transform_3, window_bounds = array<i64: 112, 128>}]} {
    %c0 = arith.constant 0 : index
    %c0_0 = arith.constant 0 : index
    %0 = vector.load %arg2[%c0, %c0_0] : memref<112x1152xbf16, #tpu.memory_space<vmem>>, vector<112x1152xbf16>
    %c0_1 = arith.constant 0 : index
    %c0_2 = arith.constant 0 : index
    %1 = vector.load %arg3[%c0_1, %c0_2] : memref<1152x128xbf16, #tpu.memory_space<vmem>>, vector<1152x128xbf16>
    %cst = arith.constant dense<0.000000e+00> : vector<112x128xf32>
    %2 = tpu.matmul %0, %1, %cst {dimension_numbers = #tpu.dot_dimension_numbers<[1], [0], [0], [1], [0, 0, 1, 1], [], []>} : vector<112x1152xbf16>, vector<1152x128xbf16>, vector<112x128xf32> -> vector<112x128xf32>
    %c0_3 = arith.constant 0 : index
    %c0_4 = arith.constant 0 : index
    %3 = vector.load %arg4[%c0_3, %c0_4] : memref<1x128xf32, #tpu.memory_space<vmem>>, vector<1x128xf32>
    %4 = vector.broadcast %3 : vector<1x128xf32> to vector<112x128xf32>
    %5 = arith.addf %2, %4 : vector<112x128xf32>
    %cst_5 = arith.constant 0.000000e+00 : f32
    %6 = vector.broadcast %cst_5 : f32 to vector<112x128xf32>
    %7 = arith.maximumf %5, %6 : vector<112x128xf32>
    %8 = arith.truncf %7 : vector<112x128xf32> to vector<112x128xbf16>
    %c0_6 = arith.constant 0 : index
    %c0_7 = arith.constant 0 : index
    %9 = vector.load %arg5[%c0_6, %c0_7] : memref<112x128xbf16, #tpu.memory_space<vmem>>, vector<112x128xbf16>
    tpu.vector_store %arg5[%c0_6, %c0_7], %8 {strides = array<i32>} : memref<112x128xbf16, #tpu.memory_space<vmem>>, vector<112x128xbf16>,
    return
  }
  func.func @transform_0(%arg0: i32, %arg1: i32) -> (i32, i32) {
    %c0_i32 = arith.constant 0 : i32
    %c0_i32_0 = arith.constant 0 : i32
    return %arg0, %c0_i32 : i32, i32
  }
  func.func @transform_1(%arg0: i32, %arg1: i32) -> (i32, i32) {
    %c0_i32 = arith.constant 0 : i32
    %c0_i32_0 = arith.constant 0 : i32
    return %c0_i32, %arg1 : i32, i32
  }
  func.func @transform_2(%arg0: i32, %arg1: i32) -> (i32, i32) {
    %c0_i32 = arith.constant 0 : i32
    %c0_i32_0 = arith.constant 0 : i32
    return %c0_i32, %arg1 : i32, i32
  }
  func.func @transform_3(%arg0: i32, %arg1: i32) -> (i32, i32) {
    %c0_i32 = arith.constant 0 : i32
    return %arg0, %arg1 : i32, i32
  }
}

module attributes {stable_mosaic.version = 11 : i64} {
  func.func @_conv4_head_kernel(%arg0: memref<16x2304xbf16, #tpu.memory_space<vmem>>, %arg1: memref<2304x512xbf16, #tpu.memory_space<vmem>>, %arg2: memref<1x512xf32, #tpu.memory_space<vmem>>, %arg3: memref<512x128xbf16, #tpu.memory_space<vmem>>, %arg4: memref<1x128xf32, #tpu.memory_space<vmem>>, %arg5: memref<128x10xbf16, #tpu.memory_space<vmem>>, %arg6: memref<1x10xf32, #tpu.memory_space<vmem>>, %arg7: memref<2x10xf32, #tpu.memory_space<vmem>>) attributes {dimension_semantics = [], scalar_prefetch = 0 : i64, scratch_operands = 0 : i64, tpu.core_type = #tpu.core_type<tc>} {
    %c0 = arith.constant 0 : index
    %c0_0 = arith.constant 0 : index
    %0 = vector.load %arg0[%c0, %c0_0] : memref<16x2304xbf16, #tpu.memory_space<vmem>>, vector<16x2304xbf16>
    %c0_1 = arith.constant 0 : index
    %c0_2 = arith.constant 0 : index
    %1 = vector.load %arg1[%c0_1, %c0_2] : memref<2304x512xbf16, #tpu.memory_space<vmem>>, vector<2304x512xbf16>
    %cst = arith.constant dense<0.000000e+00> : vector<16x512xf32>
    %2 = tpu.matmul %0, %1, %cst {dimension_numbers = #tpu.dot_dimension_numbers<[1], [0], [0], [1], [0, 0, 1, 1], [], []>} : vector<16x2304xbf16>, vector<2304x512xbf16>, vector<16x512xf32> -> vector<16x512xf32>
    %c0_3 = arith.constant 0 : index
    %c0_4 = arith.constant 0 : index
    %3 = vector.load %arg2[%c0_3, %c0_4] : memref<1x512xf32, #tpu.memory_space<vmem>>, vector<1x512xf32>
    %4 = vector.broadcast %3 : vector<1x512xf32> to vector<16x512xf32>
    %5 = arith.addf %2, %4 : vector<16x512xf32>
    %cst_5 = arith.constant 0.000000e+00 : f32
    %6 = vector.broadcast %cst_5 : f32 to vector<16x512xf32>
    %7 = arith.maximumf %5, %6 : vector<16x512xf32>
    %8 = vector.extract_strided_slice %7 {offsets = [0, 0], sizes = [2, 512], strides = [1, 1]} : vector<16x512xf32> to vector<2x512xf32>
    %9 = arith.truncf %8 : vector<2x512xf32> to vector<2x512xbf16>
    %c0_6 = arith.constant 0 : index
    %c0_7 = arith.constant 0 : index
    %10 = vector.load %arg3[%c0_6, %c0_7] : memref<512x128xbf16, #tpu.memory_space<vmem>>, vector<512x128xbf16>
    %cst_8 = arith.constant dense<0.000000e+00> : vector<2x128xf32>
    %11 = tpu.matmul %9, %10, %cst_8 {dimension_numbers = #tpu.dot_dimension_numbers<[1], [0], [0], [1], [0, 0, 1, 1], [], []>} : vector<2x512xbf16>, vector<512x128xbf16>, vector<2x128xf32> -> vector<2x128xf32>
    %c0_9 = arith.constant 0 : index
    %c0_10 = arith.constant 0 : index
    %12 = vector.load %arg4[%c0_9, %c0_10] : memref<1x128xf32, #tpu.memory_space<vmem>>, vector<1x128xf32>
    %13 = vector.broadcast %12 : vector<1x128xf32> to vector<2x128xf32>
    %14 = arith.addf %11, %13 : vector<2x128xf32>
    %cst_11 = arith.constant 0.000000e+00 : f32
    %15 = vector.broadcast %cst_11 : f32 to vector<2x128xf32>
    %16 = arith.maximumf %14, %15 : vector<2x128xf32>
    %17 = arith.truncf %16 : vector<2x128xf32> to vector<2x128xbf16>
    %c0_12 = arith.constant 0 : index
    %c0_13 = arith.constant 0 : index
    %18 = vector.load %arg5[%c0_12, %c0_13] : memref<128x10xbf16, #tpu.memory_space<vmem>>, vector<128x10xbf16>
    %cst_14 = arith.constant dense<0.000000e+00> : vector<2x10xf32>
    %19 = tpu.matmul %17, %18, %cst_14 {dimension_numbers = #tpu.dot_dimension_numbers<[1], [0], [0], [1], [0, 0, 1, 1], [], []>} : vector<2x128xbf16>, vector<128x10xbf16>, vector<2x10xf32> -> vector<2x10xf32>
    %c0_15 = arith.constant 0 : index
    %c0_16 = arith.constant 0 : index
    %20 = vector.load %arg6[%c0_15, %c0_16] : memref<1x10xf32, #tpu.memory_space<vmem>>, vector<1x10xf32>
    %21 = vector.broadcast %20 : vector<1x10xf32> to vector<2x10xf32>
    %22 = arith.addf %19, %21 : vector<2x10xf32>
    %cst_17 = arith.constant dense<0xFF800000> : vector<2xf32>
    %23 = vector.multi_reduction <maximumf>, %22, %cst_17 [1] : vector<2x10xf32> to vector<2xf32>
    %24 = vector.shape_cast %23 : vector<2xf32> to vector<2x1xf32>
    %25 = vector.broadcast %24 : vector<2x1xf32> to vector<2x10xf32>
    %26 = arith.subf %22, %25 : vector<2x10xf32>
    %27 = math.exp %26 : vector<2x10xf32>
    %cst_18 = arith.constant dense<0.000000e+00> : vector<2xf32>
    %28 = vector.multi_reduction <add>, %27, %cst_18 [1] : vector<2x10xf32> to vector<2xf32>
    %29 = vector.shape_cast %28 : vector<2xf32> to vector<2x1xf32>
    %30 = math.log %29 : vector<2x1xf32>
    %31 = vector.broadcast %30 : vector<2x1xf32> to vector<2x10xf32>
    %32 = arith.subf %26, %31 : vector<2x10xf32>
    %c0_19 = arith.constant 0 : index
    %c0_20 = arith.constant 0 : index
    %33 = vector.load %arg7[%c0_19, %c0_20] : memref<2x10xf32, #tpu.memory_space<vmem>>, vector<2x10xf32>
    tpu.vector_store %arg7[%c0_19, %c0_20], %32 {strides = array<i32>} : memref<2x10xf32, #tpu.memory_space<vmem>>, vector<2x10xf32>,
    return
  }
}

</mosaic_0001>

<bundles_post_ra>
// kernel: forward.4
= control target key start
LH: loop header
LB: loop body
LE: loop exit
PB: predicated region body
PF: predicated region fallthrough
CT: control target
= control target key end

     0   :  { %s1726_s12 = smov 0   ;;  %s1728_s13 = smov 0   ;;  %s2146_s0 = inlined_call_operand.vmem [shape: bf16[1568,128], index: 0, kind: input, shape index: {}]   ;;  %s2147_s1 = inlined_call_operand.vmem [shape: bf16[128,32], index: 1, kind: input, shape index: {}]   ;;  %s2148_s2 = inlined_call_operand.vmem [shape: f32[1,32], index: 2, kind: input, shape index: {}]   ;;  %s2149_s3 = inlined_call_operand.vmem [shape: bf16[1568,32], index: 3, kind: output, shape index: {}]  }
   0x1   :  { %s1730_s14 = smov 0  }
   0x2 LB: > { %s25_s15 = sadd.s32 1, %s1700_s13  ;;  %p1342_p0 = scmp.ge.s32.totalorder %s1704_s14, 1  ;;  %s1704_s14 = sphi %s1730_s14, %s13_s14   ;;  %s1700_s13 = sphi %s1728_s13, %s2151_s13   ;;  %s1696_s12 = sphi %s1726_s12, %s2150_s12  }
   0x3   : > { %p27_p1 = scmp.ge.s32.totalorder %s25_s15, 2  ;;  %p169_p2 = scmp.lt.s32.totalorder %s1704_s14, 3 }
   0x5   : > { %s2153_s15 = smov (%p27_p1, %s25_s15), 0  ;;  %p170_p3 = pnand %p1342_p0, %p169_p2 }
   0x6   : > { %s203_s24 = smul.u32 (!%p170_p3), 98, %s1696_s12 }
   0x7   : > { %173 = sbr.rel (%p170_p3) target bundleno = 383 (0x17f), region = 32 }
   0x8   : > { %p204_p4 = scmp.lt.s32.totalorder (!%p170_p3), %s203_s24, 195 }
   0xc   : > { %v1631_v0 = vld [vmem:[%s2147_s1 + $0x38] sm:$0xff]  ;;  %v1630_v1 = vld [vmem:[%s2147_s1 + $0x30] sm:$0xff]  ;;  %v1629_v2 = vld [vmem:[%s2147_s1 + $0x28] sm:$0xff]  ;;  %s2155_s24 = smov (!%p204_p4, %s203_s24), 195  ;;  %vm1135_vm0 = vcmask 257024  }
   0xd   : > { %1633 = vmatpush.bf16.msra.mxu2 %v1631_v0  ;;  %1634 = vmatpush.bf16.msra.mxu3 %v1631_v0  ;;  %v1628_v3 = vld [vmem:[%s2147_s1 + $0x20] sm:$0xff]  ;;  %v1627_v4 = vld [vmem:[%s2147_s1 + $0x18] sm:$0xff]  ;;  %v1626_v5 = vld [vmem:[%s2147_s1 + $0x10] sm:$0xff]  ;;  %s1343_s4 = sshll.u32 %s2155_s24, 2 }
   0xe   : > { %685 = vmatpush.bf16.msra.mxu0 %v1631_v0  ;;  %1632 = vmatpush.bf16.msra.mxu1 %v1631_v0  ;;  %v1625_v6 = vld [vmem:[%s2147_s1 + $0x8] sm:$0xff]  ;;  %v1624_v7 = vld [vmem:[%s2147_s1] sm:$0xff]  ;;  %s1779_s9 = scalar_lea.vmem %s2146_s0, %s1343_s4  ;;  %s1829_s17 = scalar_lea.vmem %s2149_s3, %s1343_s4 }
   0xf   : > { %v1599_v8 = vld [vmem:[%s1779_s9 + $0xc0] sm:$0xff]  ;;  %v1612_v9 = vld [vmem:[%s1779_s9 + $0x128] sm:$0xff]  ;;  %v1613_v13 = vld [vmem:[%s1779_s9 + $0x130] sm:$0xff] }
  0x10   : > { %v1575_v10 = vld [vmem:[%s1779_s9] sm:$0xff]  ;;  %v1600_v12 = vld [vmem:[%s1779_s9 + $0xc8] sm:$0xff]  ;;  %v1601_v16 = vld [vmem:[%s1779_s9 + $0xd0] sm:$0xff] }
  0x11   : > { %1636 = vmatpush.bf16.msra.mxu2 %v1630_v1  ;;  %1637 = vmatpush.bf16.msra.mxu3 %v1630_v1  ;;  %v1587_v11 = vld [vmem:[%s1779_s9 + $0x60] sm:$0xff]  ;;  %v1576_v14 = vld [vmem:[%s1779_s9 + $0x8] sm:$0xff]  ;;  %v1614_v17 = vld [vmem:[%s1779_s9 + $0x138] sm:$0xff] }
  0x12   : > { %686 = vmatpush.bf16.msra.mxu0 %v1630_v1  ;;  %1635 = vmatpush.bf16.msra.mxu1 %v1630_v1  ;;  %v1588_v15 = vld [vmem:[%s1779_s9 + $0x68] sm:$0xff]  ;;  %v1577_v18 = vld [vmem:[%s1779_s9 + $0x10] sm:$0xff]  ;;  %v1602_v20 = vld [vmem:[%s1779_s9 + $0xd8] sm:$0xff] }
  0x13   : > { %v1589_v19 = vld [vmem:[%s1779_s9 + $0x70] sm:$0xff]  ;;  %v1615_v21 = vld [vmem:[%s1779_s9 + $0x140] sm:$0xff]  ;;  %v1578_v22 = vld [vmem:[%s1779_s9 + $0x18] sm:$0xff] }
  0x14   : > { %v1590_v23 = vld [vmem:[%s1779_s9 + $0x78] sm:$0xff]  ;;  %v1603_v24 = vld [vmem:[%s1779_s9 + $0xe0] sm:$0xff]  ;;  %v1616_v25 = vld [vmem:[%s1779_s9 + $0x148] sm:$0xff] }
  0x15   : > { %1639 = vmatpush.bf16.msra.mxu2 %v1629_v2  ;;  %1640 = vmatpush.bf16.msra.mxu3 %v1629_v2  ;;  %v1579_v26 = vld [vmem:[%s1779_s9 + $0x20] sm:$0xff]  ;;  %v1604_v28 = vld [vmem:[%s1779_s9 + $0xe8] sm:$0xff]  ;;  %v1617_v29 = vld [vmem:[%s1779_s9 + $0x150] sm:$0xff] }
  0x16   : > { %687 = vmatpush.bf16.msra.mxu0 %v1629_v2  ;;  %1638 = vmatpush.bf16.msra.mxu1 %v1629_v2  ;;  %v1591_v27 = vld [vmem:[%s1779_s9 + $0x80] sm:$0xff]  ;;  %v1580_v30 = vld [vmem:[%s1779_s9 + $0x28] sm:$0xff]  ;;  %v1605_v32 = vld [vmem:[%s1779_s9 + $0xf0] sm:$0xff] }
  0x17   : > { %v1592_v31 = vld [vmem:[%s1779_s9 + $0x88] sm:$0xff]  ;;  %v1618_v33 = vld [vmem:[%s1779_s9 + $0x158] sm:$0xff]  ;;  %v1581_v34 = vld [vmem:[%s1779_s9 + $0x30] sm:$0xff] }
  0x18   : > { %v1593_v35 = vld [vmem:[%s1779_s9 + $0x90] sm:$0xff]  ;;  %v1606_v36 = vld [vmem:[%s1779_s9 + $0xf8] sm:$0xff]  ;;  %v1619_v37 = vld [vmem:[%s1779_s9 + $0x160] sm:$0xff] }
  0x19   : > { %1642 = vmatpush.bf16.msra.mxu2 %v1628_v3  ;;  %1643 = vmatpush.bf16.msra.mxu3 %v1628_v3  ;;  %v1582_v38 = vld [vmem:[%s1779_s9 + $0x38] sm:$0xff]  ;;  %v1607_v40 = vld [vmem:[%s1779_s9 + $0x100] sm:$0xff]  ;;  %v1620_v41 = vld [vmem:[%s1779_s9 + $0x168] sm:$0xff] }
  0x1a   : > { %688 = vmatpush.bf16.msra.mxu0 %v1628_v3  ;;  %1641 = vmatpush.bf16.msra.mxu1 %v1628_v3  ;;  %v1594_v39 = vld [vmem:[%s1779_s9 + $0x98] sm:$0xff]  ;;  %v1818_v42 = vld [vmem:[%s2148_s2] ss:$0 sm:$0xff] }
  0x1b   : > { %v1583_v43 = vld [vmem:[%s1779_s9 + $0x40] sm:$0xff] }
  0x1c   : > { %v1595_v44 = vld [vmem:[%s1779_s9 + $0xa0] sm:$0xff] }
  0x1d   : > { %1645 = vmatpush.bf16.msra.mxu2 %v1627_v4  ;;  %1646 = vmatpush.bf16.msra.mxu3 %v1627_v4 }
  0x1e   : > { %689 = vmatpush.bf16.msra.mxu0 %v1627_v4  ;;  %1644 = vmatpush.bf16.msra.mxu1 %v1627_v4 }
  0x21   : > { %1648 = vmatpush.bf16.msra.mxu2 %v1626_v5  ;;  %1649 = vmatpush.bf16.msra.mxu3 %v1626_v5 }
  0x22   : > { %690 = vmatpush.bf16.msra.mxu0 %v1626_v5  ;;  %1647 = vmatpush.bf16.msra.mxu1 %v1626_v5 }
  0x25   : > { %1651 = vmatpush.bf16.msra.mxu2 %v1625_v6  ;;  %1652 = vmatpush.bf16.msra.mxu3 %v1625_v6 }
  0x26   : > { %691 = vmatpush.bf16.msra.mxu0 %v1625_v6  ;;  %1650 = vmatpush.bf16.msra.mxu1 %v1625_v6 }
  0x29   : > { %1654 = vmatpush.bf16.msra.mxu2 %v1624_v7  ;;  %1655 = vmatpush.bf16.msra.mxu3 %v1624_v7 }
  0x2a   : > { %692 = vmatpush.bf16.msra.mxu0 %v1624_v7  ;;  %1653 = vmatpush.bf16.msra.mxu1 %v1624_v7 }
  0x2c   : > { %813 = vmatmul.bf16.vlgmr.msra.gmra.mxu2 %v1599_v8  ;;  %878 = vmatmul.bf16.vlgmr.msra.gmra.mxu3 %v1612_v9  ;;  %v1608_v8 = vld [vmem:[%s1779_s9 + $0x108] sm:$0xff] }
  0x2d   : > { %693 = vmatmul.bf16.vlgmr.msra.gmra.mxu0 %v1575_v10  ;;  %753 = vmatmul.bf16.vlgmr.msra.gmra.mxu1 %v1587_v11  ;;  %v1621_v10 = vld [vmem:[%s1779_s9 + $0x170] sm:$0xff]  ;;  %v1584_v11 = vld [vmem:[%s1779_s9 + $0x48] sm:$0xff] }
  0x3c   : > { %818 = vmatmul.bf16.gmra.mxu2 %v1600_v12  ;;  %883 = vmatmul.bf16.gmra.mxu3 %v1613_v13  ;;  %v1596_v12 = vld [vmem:[%s1779_s9 + $0xa8] sm:$0xff] }
  0x3d   : > { %698 = vmatmul.bf16.gmra.mxu0 %v1576_v14  ;;  %758 = vmatmul.bf16.gmra.mxu1 %v1588_v15 }
  0x4c   : > { %823 = vmatmul.bf16.gmra.mxu2 %v1601_v16  ;;  %888 = vmatmul.bf16.gmra.mxu3 %v1614_v17 }
  0x4d   : > { %703 = vmatmul.bf16.gmra.mxu0 %v1577_v18  ;;  %763 = vmatmul.bf16.gmra.mxu1 %v1589_v19 }
  0x5c   : > { %828 = vmatmul.bf16.gmra.mxu2 %v1602_v20  ;;  %893 = vmatmul.bf16.gmra.mxu3 %v1615_v21 }
  0x5d   : > { %708 = vmatmul.bf16.gmra.mxu0 %v1578_v22  ;;  %768 = vmatmul.bf16.gmra.mxu1 %v1590_v23 }
  0x6c   : > { %833 = vmatmul.bf16.gmra.mxu2 %v1603_v24  ;;  %898 = vmatmul.bf16.gmra.mxu3 %v1616_v25 }
  0x6d   : > { %713 = vmatmul.bf16.gmra.mxu0 %v1579_v26  ;;  %773 = vmatmul.bf16.gmra.mxu1 %v1591_v27 }
  0x7c   : > { %838 = vmatmul.bf16.gmra.mxu2 %v1604_v28  ;;  %903 = vmatmul.bf16.gmra.mxu3 %v1617_v29 }
  0x7d   : > { %718 = vmatmul.bf16.gmra.mxu0 %v1580_v30  ;;  %778 = vmatmul.bf16.gmra.mxu1 %v1592_v31 }
  0x8c   : > { %843 = vmatmul.bf16.gmra.mxu2 %v1605_v32  ;;  %908 = vmatmul.bf16.gmra.mxu3 %v1618_v33 }
  0x8d   : > { %723 = vmatmul.bf16.gmra.mxu0 %v1581_v34  ;;  %783 = vmatmul.bf16.gmra.mxu1 %v1593_v35 }
  0x9c   : > { %848 = vmatmul.bf16.gmra.mxu2 %v1606_v36  ;;  %913 = vmatmul.bf16.gmra.mxu3 %v1619_v37 }
  0x9d   : > { %728 = vmatmul.bf16.gmra.mxu0 %v1582_v38  ;;  %788 = vmatmul.bf16.gmra.mxu1 %v1594_v39 }
  0xaa   : > { %v694_v45 = vpop.f32.mrf.mxu0  ;;  %v754_v46 = vpop.f32.mrf.mxu1 }
  0xab   : > { %v695_v47 = vadd.f32 %v1818_v42, %v694_v45  ;;  %v755_v48 = vadd.f32 %v1818_v42, %v754_v46  ;;  %v1609_v45 = vld [vmem:[%s1779_s9 + $0x110] sm:$0xff] }
  0xac   : > { %853 = vmatmul.bf16.gmra.mxu2 %v1607_v40  ;;  %918 = vmatmul.bf16.gmra.mxu3 %v1620_v41 }
  0xad   : > { %v939_v49 = vmax.f32 %v695_v47, 0.0  ;;  %v963_v50 = vmax.f32 %v755_v48, 0.0  ;;  %733 = vmatmul.bf16.gmra.mxu0 %v1583_v43  ;;  %793 = vmatmul.bf16.gmra.mxu1 %v1595_v44  ;;  %v1622_v47 = vld [vmem:[%s1779_s9 + $0x178] sm:$0xff]  ;;  %v1585_v48 = vld [vmem:[%s1779_s9 + $0x50] sm:$0xff] }
  0xaf   : > { %v814_v51 = vpop.f32.mrf.mxu2  ;;  %v1037_v52 = vpack.c.bf16 %v939_v49, %v939_v49  ;;  %v1061_v53 = vpack.c.bf16 %v963_v50, %v963_v50  ;;  %v879_v54 = vpop.f32.mrf.mxu3  ;;  %v1597_v49 = vld [vmem:[%s1779_s9 + $0xb0] sm:$0xff] }
  0xb0   : > { %v815_v55 = vadd.f32 %v1818_v42, %v814_v51  ;;  %v880_v56 = vadd.f32 %v1818_v42, %v879_v54 }
  0xb1   : > { %1136 = vst.msk [vmem:[%s1829_s17] sm:$0xf] %vm1135_vm0, %v1037_v52 }
  0xb2   : > { %v987_v57 = vmax.f32 %v815_v55, 0.0  ;;  %1160 = vst.msk [vmem:[%s1829_s17 + $0x60] sm:$0xf] %vm1135_vm0, %v1061_v53  ;;  %v1013_v58 = vmax.f32 %v880_v56, 0.0  ;;  %v696_v59 = vpop.f32.mrf.mxu0  ;;  %v756_v60 = vpop.f32.mrf.mxu1 }
  0xb3   : > { %v697_v61 = vadd.f32 %v1818_v42, %v696_v59  ;;  %v757_v62 = vadd.f32 %v1818_v42, %v756_v60 }
  0xb4   : > { %v1085_v63 = vpack.c.bf16 %v987_v57, %v987_v57  ;;  %v1111_v0 = vpack.c.bf16 %v1013_v58, %v1013_v58 }
  0xb5   : > { %v940_v1 = vmax.f32 %v697_v61, 0.0  ;;  %v964_v2 = vmax.f32 %v757_v62, 0.0 }
  0xb6   : > { %1184 = vst.msk [vmem:[%s1829_s17 + $0xc0] sm:$0xf] %vm1135_vm0, %v1085_v63 }
  0xb7   : > { %v816_v3 = vpop.f32.mrf.mxu2  ;;  %1210 = vst.msk [vmem:[%s1829_s17 + $0x128] sm:$0xf] %vm1135_vm0, %v1111_v0  ;;  %v1038_v4 = vpack.c.bf16 %v940_v1, %v940_v1  ;;  %v1062_v5 = vpack.c.bf16 %v964_v2, %v964_v2  ;;  %v881_v6 = vpop.f32.mrf.mxu3 }
  0xb8   : > { %v817_v7 = vadd.f32 %v1818_v42, %v816_v3  ;;  %v882_v9 = vadd.f32 %v1818_v42, %v881_v6 }
  0xb9   : > { %1137 = vst.msk [vmem:[%s1829_s17 + $0x4] sm:$0xf] %vm1135_vm0, %v1038_v4 }
  0xba   : > { %v988_v13 = vmax.f32 %v817_v7, 0.0  ;;  %1161 = vst.msk [vmem:[%s1829_s17 + $0x64] sm:$0xf] %vm1135_vm0, %v1062_v5  ;;  %v1014_v14 = vmax.f32 %v882_v9, 0.0  ;;  %v699_v15 = vpop.f32.mrf.mxu0  ;;  %v759_v16 = vpop.f32.mrf.mxu1 }
  0xbb   : > { %v700_v17 = vadd.f32 %v1818_v42, %v699_v15  ;;  %v760_v18 = vadd.f32 %v1818_v42, %v759_v16 }
  0xbc   : > { %v1086_v19 = vpack.c.bf16 %v988_v13, %v988_v13  ;;  %858 = vmatmul.bf16.gmra.mxu2 %v1608_v8  ;;  %v1112_v20 = vpack.c.bf16 %v1014_v14, %v1014_v14  ;;  %923 = vmatmul.bf16.gmra.mxu3 %v1621_v10 }
  0xbd   : > { %v941_v21 = vmax.f32 %v700_v17, 0.0  ;;  %v965_v22 = vmax.f32 %v760_v18, 0.0  ;;  %738 = vmatmul.bf16.gmra.mxu0 %v1584_v11  ;;  %798 = vmatmul.bf16.gmra.mxu1 %v1596_v12  ;;  %v1610_v17 = vld [vmem:[%s1779_s9 + $0x118] sm:$0xff] }
  0xbe   : > { %1185 = vst.msk [vmem:[%s1829_s17 + $0xc4] sm:$0xf] %vm1135_vm0, %v1086_v19  ;;  %v1623_v19 = vld [vmem:[%s1779_s9 + $0x180] sm:$0xff] }
  0xbf   : > { %v819_v23 = vpop.f32.mrf.mxu2  ;;  %1211 = vst.msk [vmem:[%s1829_s17 + $0x12c] sm:$0xf] %vm1135_vm0, %v1112_v20  ;;  %v1039_v24 = vpack.c.bf16 %v941_v21, %v941_v21  ;;  %v1063_v25 = vpack.c.bf16 %v965_v22, %v965_v22  ;;  %v884_v26 = vpop.f32.mrf.mxu3  ;;  %v1586_v20 = vld [vmem:[%s1779_s9 + $0x58] sm:$0xff] }
  0xc0   : > { %v820_v27 = vadd.f32 %v1818_v42, %v819_v23  ;;  %v885_v28 = vadd.f32 %v1818_v42, %v884_v26  ;;  %v1598_v21 = vld [vmem:[%s1779_s9 + $0xb8] sm:$0xff] }
  0xc1   : > { %1138 = vst.msk [vmem:[%s1829_s17 + $0x8] sm:$0xf] %vm1135_vm0, %v1039_v24 }
  0xc2   : > { %v989_v29 = vmax.f32 %v820_v27, 0.0  ;;  %1162 = vst.msk [vmem:[%s1829_s17 + $0x68] sm:$0xf] %vm1135_vm0, %v1063_v25  ;;  %v1015_v30 = vmax.f32 %v885_v28, 0.0  ;;  %v701_v31 = vpop.f32.mrf.mxu0  ;;  %v761_v32 = vpop.f32.mrf.mxu1 }
  0xc3   : > { %v702_v33 = vadd.f32 %v1818_v42, %v701_v31  ;;  %v762_v34 = vadd.f32 %v1818_v42, %v761_v32 }
  0xc4   : > { %v1087_v35 = vpack.c.bf16 %v989_v29, %v989_v29  ;;  %v1113_v36 = vpack.c.bf16 %v1015_v30, %v1015_v30 }
  0xc5   : > { %v942_v37 = vmax.f32 %v702_v33, 0.0  ;;  %v966_v38 = vmax.f32 %v762_v34, 0.0 }
  0xc6   : > { %1186 = vst.msk [vmem:[%s1829_s17 + $0xc8] sm:$0xf] %vm1135_vm0, %v1087_v35 }
  0xc7   : > { %v821_v39 = vpop.f32.mrf.mxu2  ;;  %1212 = vst.msk [vmem:[%s1829_s17 + $0x130] sm:$0xf] %vm1135_vm0, %v1113_v36  ;;  %v1040_v40 = vpack.c.bf16 %v942_v37, %v942_v37  ;;  %v1064_v41 = vpack.c.bf16 %v966_v38, %v966_v38  ;;  %v886_v43 = vpop.f32.mrf.mxu3 }
  0xc8   : > { %v822_v44 = vadd.f32 %v1818_v42, %v821_v39  ;;  %v887_v46 = vadd.f32 %v1818_v42, %v886_v43 }
  0xc9   : > { %1139 = vst.msk [vmem:[%s1829_s17 + $0xc] sm:$0xf] %vm1135_vm0, %v1040_v40 }
  0xca   : > { %v990_v50 = vmax.f32 %v822_v44, 0.0  ;;  %1163 = vst.msk [vmem:[%s1829_s17 + $0x6c] sm:$0xf] %vm1135_vm0, %v1064_v41  ;;  %v1016_v51 = vmax.f32 %v887_v46, 0.0  ;;  %v704_v52 = vpop.f32.mrf.mxu0  ;;  %v764_v53 = vpop.f32.mrf.mxu1 }
  0xcb   : > { %v705_v54 = vadd.f32 %v1818_v42, %v704_v52  ;;  %v765_v55 = vadd.f32 %v1818_v42, %v764_v53 }
  0xcc   : > { %v1088_v56 = vpack.c.bf16 %v990_v50, %v990_v50  ;;  %863 = vmatmul.bf16.gmra.mxu2 %v1609_v45  ;;  %v1114_v57 = vpack.c.bf16 %v1016_v51, %v1016_v51  ;;  %928 = vmatmul.bf16.gmra.mxu3 %v1622_v47 }
  0xcd   : > { %v943_v58 = vmax.f32 %v705_v54, 0.0  ;;  %v967_v59 = vmax.f32 %v765_v55, 0.0  ;;  %743 = vmatmul.bf16.gmra.mxu0 %v1585_v48  ;;  %803 = vmatmul.bf16.gmra.mxu1 %v1597_v49  ;;  %v1611_v54 = vld [vmem:[%s1779_s9 + $0x120] sm:$0xff] }
  0xce   : > { %1187 = vst.msk [vmem:[%s1829_s17 + $0xcc] sm:$0xf] %vm1135_vm0, %v1088_v56 }
  0xcf   : > { %v824_v60 = vpop.f32.mrf.mxu2  ;;  %1213 = vst.msk [vmem:[%s1829_s17 + $0x134] sm:$0xf] %vm1135_vm0, %v1114_v57  ;;  %v1041_v61 = vpack.c.bf16 %v943_v58, %v943_v58  ;;  %v1065_v62 = vpack.c.bf16 %v967_v59, %v967_v59  ;;  %v889_v63 = vpop.f32.mrf.mxu3 }
  0xd0   : > { %v825_v0 = vadd.f32 %v1818_v42, %v824_v60  ;;  %v890_v1 = vadd.f32 %v1818_v42, %v889_v63 }
  0xd1   : > { %1140 = vst.msk [vmem:[%s1829_s17 + $0x10] sm:$0xf] %vm1135_vm0, %v1041_v61 }
  0xd2   : > { %v991_v2 = vmax.f32 %v825_v0, 0.0  ;;  %1164 = vst.msk [vmem:[%s1829_s17 + $0x70] sm:$0xf] %vm1135_vm0, %v1065_v62  ;;  %v1017_v3 = vmax.f32 %v890_v1, 0.0  ;;  %v706_v4 = vpop.f32.mrf.mxu0  ;;  %v766_v5 = vpop.f32.mrf.mxu1 }
  0xd3   : > { %v707_v6 = vadd.f32 %v1818_v42, %v706_v4  ;;  %v767_v7 = vadd.f32 %v1818_v42, %v766_v5 }
  0xd4   : > { %v1089_v8 = vpack.c.bf16 %v991_v2, %v991_v2  ;;  %v1115_v9 = vpack.c.bf16 %v1017_v3, %v1017_v3 }
  0xd5   : > { %v944_v10 = vmax.f32 %v707_v6, 0.0  ;;  %v968_v11 = vmax.f32 %v767_v7, 0.0 }
  0xd6   : > { %1188 = vst.msk [vmem:[%s1829_s17 + $0xd0] sm:$0xf] %vm1135_vm0, %v1089_v8 }
  0xd7   : > { %v826_v12 = vpop.f32.mrf.mxu2  ;;  %1214 = vst.msk [vmem:[%s1829_s17 + $0x138] sm:$0xf] %vm1135_vm0, %v1115_v9  ;;  %v1042_v13 = vpack.c.bf16 %v944_v10, %v944_v10  ;;  %v1066_v14 = vpack.c.bf16 %v968_v11, %v968_v11  ;;  %v891_v15 = vpop.f32.mrf.mxu3 }
  0xd8   : > { %v827_v16 = vadd.f32 %v1818_v42, %v826_v12  ;;  %v892_v18 = vadd.f32 %v1818_v42, %v891_v15 }
  0xd9   : > { %1141 = vst.msk [vmem:[%s1829_s17 + $0x14] sm:$0xf] %vm1135_vm0, %v1042_v13 }
  0xda   : > { %v992_v22 = vmax.f32 %v827_v16, 0.0  ;;  %1165 = vst.msk [vmem:[%s1829_s17 + $0x74] sm:$0xf] %vm1135_vm0, %v1066_v14  ;;  %v1018_v23 = vmax.f32 %v892_v18, 0.0  ;;  %v709_v24 = vpop.f32.mrf.mxu0  ;;  %v769_v25 = vpop.f32.mrf.mxu1 }
  0xdb   : > { %v710_v26 = vadd.f32 %v1818_v42, %v709_v24  ;;  %v770_v27 = vadd.f32 %v1818_v42, %v769_v25 }
  0xdc   : > { %v1090_v28 = vpack.c.bf16 %v992_v22, %v992_v22  ;;  %868 = vmatmul.bf16.gmra.mxu2 %v1610_v17  ;;  %v1116_v29 = vpack.c.bf16 %v1018_v23, %v1018_v23  ;;  %933 = vmatmul.bf16.gmra.mxu3 %v1623_v19 }
  0xdd   : > { %v945_v30 = vmax.f32 %v710_v26, 0.0  ;;  %v969_v31 = vmax.f32 %v770_v27, 0.0  ;;  %748 = vmatmul.bf16.gmra.mxu0 %v1586_v20  ;;  %808 = vmatmul.bf16.gmra.mxu1 %v1598_v21 }
  0xde   : > { %1189 = vst.msk [vmem:[%s1829_s17 + $0xd4] sm:$0xf] %vm1135_vm0, %v1090_v28 }
  0xdf   : > { %v829_v32 = vpop.f32.mrf.mxu2  ;;  %1215 = vst.msk [vmem:[%s1829_s17 + $0x13c] sm:$0xf] %vm1135_vm0, %v1116_v29  ;;  %v1043_v33 = vpack.c.bf16 %v945_v30, %v945_v30  ;;  %v1067_v34 = vpack.c.bf16 %v969_v31, %v969_v31  ;;  %v894_v35 = vpop.f32.mrf.mxu3 }
  0xe0   : > { %v830_v36 = vadd.f32 %v1818_v42, %v829_v32  ;;  %v895_v37 = vadd.f32 %v1818_v42, %v894_v35 }
  0xe1   : > { %1142 = vst.msk [vmem:[%s1829_s17 + $0x18] sm:$0xf] %vm1135_vm0, %v1043_v33 }
  0xe2   : > { %v993_v38 = vmax.f32 %v830_v36, 0.0  ;;  %1166 = vst.msk [vmem:[%s1829_s17 + $0x78] sm:$0xf] %vm1135_vm0, %v1067_v34  ;;  %v1019_v39 = vmax.f32 %v895_v37, 0.0  ;;  %v711_v40 = vpop.f32.mrf.mxu0  ;;  %v771_v41 = vpop.f32.mrf.mxu1 }
  0xe3   : > { %v712_v43 = vadd.f32 %v1818_v42, %v711_v40  ;;  %v772_v44 = vadd.f32 %v1818_v42, %v771_v41 }
  0xe4   : > { %v1091_v45 = vpack.c.bf16 %v993_v38, %v993_v38  ;;  %v1117_v46 = vpack.c.bf16 %v1019_v39, %v1019_v39 }
  0xe5   : > { %v946_v47 = vmax.f32 %v712_v43, 0.0  ;;  %v970_v48 = vmax.f32 %v772_v44, 0.0 }
  0xe6   : > { %1190 = vst.msk [vmem:[%s1829_s17 + $0xd8] sm:$0xf] %vm1135_vm0, %v1091_v45 }
  0xe7   : > { %v831_v49 = vpop.f32.mrf.mxu2  ;;  %1216 = vst.msk [vmem:[%s1829_s17 + $0x140] sm:$0xf] %vm1135_vm0, %v1117_v46  ;;  %v1044_v50 = vpack.c.bf16 %v946_v47, %v946_v47  ;;  %v1068_v51 = vpack.c.bf16 %v970_v48, %v970_v48  ;;  %v896_v52 = vpop.f32.mrf.mxu3 }
  0xe8   : > { %v832_v53 = vadd.f32 %v1818_v42, %v831_v49  ;;  %v897_v55 = vadd.f32 %v1818_v42, %v896_v52 }
  0xe9   : > { %1143 = vst.msk [vmem:[%s1829_s17 + $0x1c] sm:$0xf] %vm1135_vm0, %v1044_v50 }
  0xea   : > { %v994_v56 = vmax.f32 %v832_v53, 0.0  ;;  %1167 = vst.msk [vmem:[%s1829_s17 + $0x7c] sm:$0xf] %vm1135_vm0, %v1068_v51  ;;  %v1020_v57 = vmax.f32 %v897_v55, 0.0  ;;  %v714_v58 = vpop.f32.mrf.mxu0  ;;  %v774_v59 = vpop.f32.mrf.mxu1 }
  0xeb   : > { %v715_v60 = vadd.f32 %v1818_v42, %v714_v58  ;;  %v775_v61 = vadd.f32 %v1818_v42, %v774_v59 }
  0xec   : > { %v1092_v62 = vpack.c.bf16 %v994_v56, %v994_v56  ;;  %873 = vmatmul.bf16.gmra.mxu2 %v1611_v54  ;;  %v1118_v63 = vpack.c.bf16 %v1020_v57, %v1020_v57 }
  0xed   : > { %v947_v0 = vmax.f32 %v715_v60, 0.0  ;;  %v971_v1 = vmax.f32 %v775_v61, 0.0 }
  0xee   : > { %1191 = vst.msk [vmem:[%s1829_s17 + $0xdc] sm:$0xf] %vm1135_vm0, %v1092_v62 }
  0xef   : > { %v834_v2 = vpop.f32.mrf.mxu2  ;;  %1217 = vst.msk [vmem:[%s1829_s17 + $0x144] sm:$0xf] %vm1135_vm0, %v1118_v63  ;;  %v1045_v3 = vpack.c.bf16 %v947_v0, %v947_v0  ;;  %v1069_v4 = vpack.c.bf16 %v971_v1, %v971_v1  ;;  %v899_v5 = vpop.f32.mrf.mxu3 }
  0xf0   : > { %v835_v6 = vadd.f32 %v1818_v42, %v834_v2  ;;  %v900_v7 = vadd.f32 %v1818_v42, %v899_v5 }
  0xf1   : > { %1144 = vst.msk [vmem:[%s1829_s17 + $0x20] sm:$0xf] %vm1135_vm0, %v1045_v3 }
  0xf2   : > { %v995_v8 = vmax.f32 %v835_v6, 0.0  ;;  %1168 = vst.msk [vmem:[%s1829_s17 + $0x80] sm:$0xf] %vm1135_vm0, %v1069_v4  ;;  %v1021_v9 = vmax.f32 %v900_v7, 0.0  ;;  %v716_v10 = vpop.f32.mrf.mxu0  ;;  %v776_v11 = vpop.f32.mrf.mxu1 }
  0xf3   : > { %v717_v12 = vadd.f32 %v1818_v42, %v716_v10  ;;  %v777_v13 = vadd.f32 %v1818_v42, %v776_v11 }
  0xf4   : > { %v1093_v14 = vpack.c.bf16 %v995_v8, %v995_v8  ;;  %v1119_v15 = vpack.c.bf16 %v1021_v9, %v1021_v9 }
  0xf5   : > { %v948_v16 = vmax.f32 %v717_v12, 0.0  ;;  %v972_v17 = vmax.f32 %v777_v13, 0.0 }
  0xf6   : > { %1192 = vst.msk [vmem:[%s1829_s17 + $0xe0] sm:$0xf] %vm1135_vm0, %v1093_v14 }
  0xf7   : > { %v836_v18 = vpop.f32.mrf.mxu2  ;;  %1218 = vst.msk [vmem:[%s1829_s17 + $0x148] sm:$0xf] %vm1135_vm0, %v1119_v15  ;;  %v1046_v19 = vpack.c.bf16 %v948_v16, %v948_v16  ;;  %v1070_v20 = vpack.c.bf16 %v972_v17, %v972_v17  ;;  %v901_v21 = vpop.f32.mrf.mxu3 }
  0xf8   : > { %v837_v22 = vadd.f32 %v1818_v42, %v836_v18  ;;  %v902_v23 = vadd.f32 %v1818_v42, %v901_v21 }
  0xf9   : > { %1145 = vst.msk [vmem:[%s1829_s17 + $0x24] sm:$0xf] %vm1135_vm0, %v1046_v19 }
  0xfa   : > { %v996_v24 = vmax.f32 %v837_v22, 0.0  ;;  %1169 = vst.msk [vmem:[%s1829_s17 + $0x84] sm:$0xf] %vm1135_vm0, %v1070_v20  ;;  %v1022_v25 = vmax.f32 %v902_v23, 0.0  ;;  %v719_v26 = vpop.f32.mrf.mxu0  ;;  %v779_v27 = vpop.f32.mrf.mxu1 }
  0xfb   : > { %v720_v28 = vadd.f32 %v1818_v42, %v719_v26  ;;  %v780_v29 = vadd.f32 %v1818_v42, %v779_v27 }
  0xfc   : > { %v1094_v30 = vpack.c.bf16 %v996_v24, %v996_v24  ;;  %v1120_v31 = vpack.c.bf16 %v1022_v25, %v1022_v25 }
  0xfd   : > { %v949_v32 = vmax.f32 %v720_v28, 0.0  ;;  %v973_v33 = vmax.f32 %v780_v29, 0.0 }
  0xfe   : > { %1193 = vst.msk [vmem:[%s1829_s17 + $0xe4] sm:$0xf] %vm1135_vm0, %v1094_v30 }
  0xff   : > { %v839_v34 = vpop.f32.mrf.mxu2  ;;  %1219 = vst.msk [vmem:[%s1829_s17 + $0x14c] sm:$0xf] %vm1135_vm0, %v1120_v31  ;;  %v1047_v35 = vpack.c.bf16 %v949_v32, %v949_v32  ;;  %v1071_v36 = vpack.c.bf16 %v973_v33, %v973_v33  ;;  %v904_v37 = vpop.f32.mrf.mxu3 }
 0x100   : > { %v840_v38 = vadd.f32 %v1818_v42, %v839_v34  ;;  %v905_v39 = vadd.f32 %v1818_v42, %v904_v37 }
 0x101   : > { %1146 = vst.msk [vmem:[%s1829_s17 + $0x28] sm:$0xf] %vm1135_vm0, %v1047_v35 }
 0x102   : > { %v997_v40 = vmax.f32 %v840_v38, 0.0  ;;  %1170 = vst.msk [vmem:[%s1829_s17 + $0x88] sm:$0xf] %vm1135_vm0, %v1071_v36  ;;  %v1023_v41 = vmax.f32 %v905_v39, 0.0  ;;  %v721_v43 = vpop.f32.mrf.mxu0  ;;  %v781_v44 = vpop.f32.mrf.mxu1 }
 0x103   : > { %v722_v45 = vadd.f32 %v1818_v42, %v721_v43  ;;  %v782_v46 = vadd.f32 %v1818_v42, %v781_v44 }
 0x104   : > { %v1095_v47 = vpack.c.bf16 %v997_v40, %v997_v40  ;;  %v1121_v48 = vpack.c.bf16 %v1023_v41, %v1023_v41 }
 0x105   : > { %v950_v49 = vmax.f32 %v722_v45, 0.0  ;;  %v974_v50 = vmax.f32 %v782_v46, 0.0 }
 0x106   : > { %1194 = vst.msk [vmem:[%s1829_s17 + $0xe8] sm:$0xf] %vm1135_vm0, %v1095_v47 }
 0x107   : > { %v841_v51 = vpop.f32.mrf.mxu2  ;;  %1220 = vst.msk [vmem:[%s1829_s17 + $0x150] sm:$0xf] %vm1135_vm0, %v1121_v48  ;;  %v1048_v52 = vpack.c.bf16 %v950_v49, %v950_v49  ;;  %v1072_v53 = vpack.c.bf16 %v974_v50, %v974_v50  ;;  %v906_v54 = vpop.f32.mrf.mxu3 }
 0x108   : > { %v842_v55 = vadd.f32 %v1818_v42, %v841_v51  ;;  %v907_v56 = vadd.f32 %v1818_v42, %v906_v54 }
 0x109   : > { %1147 = vst.msk [vmem:[%s1829_s17 + $0x2c] sm:$0xf] %vm1135_vm0, %v1048_v52 }
 0x10a   : > { %v998_v57 = vmax.f32 %v842_v55, 0.0  ;;  %1171 = vst.msk [vmem:[%s1829_s17 + $0x8c] sm:$0xf] %vm1135_vm0, %v1072_v53  ;;  %v1024_v58 = vmax.f32 %v907_v56, 0.0  ;;  %v724_v59 = vpop.f32.mrf.mxu0  ;;  %v784_v60 = vpop.f32.mrf.mxu1 }
 0x10b   : > { %v725_v61 = vadd.f32 %v1818_v42, %v724_v59  ;;  %v785_v62 = vadd.f32 %v1818_v42, %v784_v60 }
 0x10c   : > { %v1096_v63 = vpack.c.bf16 %v998_v57, %v998_v57  ;;  %v1122_v0 = vpack.c.bf16 %v1024_v58, %v1024_v58 }
 0x10d   : > { %v951_v1 = vmax.f32 %v725_v61, 0.0  ;;  %v975_v2 = vmax.f32 %v785_v62, 0.0 }
 0x10e   : > { %1195 = vst.msk [vmem:[%s1829_s17 + $0xec] sm:$0xf] %vm1135_vm0, %v1096_v63 }
 0x10f   : > { %v844_v3 = vpop.f32.mrf.mxu2  ;;  %1221 = vst.msk [vmem:[%s1829_s17 + $0x154] sm:$0xf] %vm1135_vm0, %v1122_v0  ;;  %v1049_v4 = vpack.c.bf16 %v951_v1, %v951_v1  ;;  %v1073_v5 = vpack.c.bf16 %v975_v2, %v975_v2  ;;  %v909_v6 = vpop.f32.mrf.mxu3 }
 0x110   : > { %v845_v7 = vadd.f32 %v1818_v42, %v844_v3  ;;  %v910_v8 = vadd.f32 %v1818_v42, %v909_v6 }
 0x111   : > { %1148 = vst.msk [vmem:[%s1829_s17 + $0x30] sm:$0xf] %vm1135_vm0, %v1049_v4 }
 0x112   : > { %v999_v9 = vmax.f32 %v845_v7, 0.0  ;;  %1172 = vst.msk [vmem:[%s1829_s17 + $0x90] sm:$0xf] %vm1135_vm0, %v1073_v5  ;;  %v1025_v10 = vmax.f32 %v910_v8, 0.0  ;;  %v726_v11 = vpop.f32.mrf.mxu0  ;;  %v786_v12 = vpop.f32.mrf.mxu1 }
 0x113   : > { %v727_v13 = vadd.f32 %v1818_v42, %v726_v11  ;;  %v787_v14 = vadd.f32 %v1818_v42, %v786_v12 }
 0x114   : > { %v1097_v15 = vpack.c.bf16 %v999_v9, %v999_v9  ;;  %v1123_v16 = vpack.c.bf16 %v1025_v10, %v1025_v10 }
 0x115   : > { %v952_v17 = vmax.f32 %v727_v13, 0.0  ;;  %v976_v18 = vmax.f32 %v787_v14, 0.0 }
 0x116   : > { %1196 = vst.msk [vmem:[%s1829_s17 + $0xf0] sm:$0xf] %vm1135_vm0, %v1097_v15 }
 0x117   : > { %v846_v19 = vpop.f32.mrf.mxu2  ;;  %1222 = vst.msk [vmem:[%s1829_s17 + $0x158] sm:$0xf] %vm1135_vm0, %v1123_v16  ;;  %v1050_v20 = vpack.c.bf16 %v952_v17, %v952_v17  ;;  %v1074_v21 = vpack.c.bf16 %v976_v18, %v976_v18  ;;  %v911_v22 = vpop.f32.mrf.mxu3 }
 0x118   : > { %v847_v23 = vadd.f32 %v1818_v42, %v846_v19  ;;  %v912_v24 = vadd.f32 %v1818_v42, %v911_v22 }
 0x119   : > { %1149 = vst.msk [vmem:[%s1829_s17 + $0x34] sm:$0xf] %vm1135_vm0, %v1050_v20 }
 0x11a   : > { %v1000_v25 = vmax.f32 %v847_v23, 0.0  ;;  %1173 = vst.msk [vmem:[%s1829_s17 + $0x94] sm:$0xf] %vm1135_vm0, %v1074_v21  ;;  %v1026_v26 = vmax.f32 %v912_v24, 0.0  ;;  %v729_v27 = vpop.f32.mrf.mxu0  ;;  %v789_v28 = vpop.f32.mrf.mxu1 }
 0x11b   : > { %v730_v29 = vadd.f32 %v1818_v42, %v729_v27  ;;  %v790_v30 = vadd.f32 %v1818_v42, %v789_v28 }
 0x11c   : > { %v1098_v31 = vpack.c.bf16 %v1000_v25, %v1000_v25  ;;  %v1124_v32 = vpack.c.bf16 %v1026_v26, %v1026_v26 }
 0x11d   : > { %v953_v33 = vmax.f32 %v730_v29, 0.0  ;;  %v977_v34 = vmax.f32 %v790_v30, 0.0 }
 0x11e   : > { %1197 = vst.msk [vmem:[%s1829_s17 + $0xf4] sm:$0xf] %vm1135_vm0, %v1098_v31 }
 0x11f   : > { %v849_v35 = vpop.f32.mrf.mxu2  ;;  %1223 = vst.msk [vmem:[%s1829_s17 + $0x15c] sm:$0xf] %vm1135_vm0, %v1124_v32  ;;  %v1051_v36 = vpack.c.bf16 %v953_v33, %v953_v33  ;;  %v1075_v37 = vpack.c.bf16 %v977_v34, %v977_v34  ;;  %v914_v38 = vpop.f32.mrf.mxu3 }
 0x120   : > { %v850_v39 = vadd.f32 %v1818_v42, %v849_v35  ;;  %v915_v40 = vadd.f32 %v1818_v42, %v914_v38 }
 0x121   : > { %1150 = vst.msk [vmem:[%s1829_s17 + $0x38] sm:$0xf] %vm1135_vm0, %v1051_v36 }
 0x122   : > { %v1001_v41 = vmax.f32 %v850_v39, 0.0  ;;  %1174 = vst.msk [vmem:[%s1829_s17 + $0x98] sm:$0xf] %vm1135_vm0, %v1075_v37  ;;  %v1027_v43 = vmax.f32 %v915_v40, 0.0  ;;  %v731_v44 = vpop.f32.mrf.mxu0  ;;  %v791_v45 = vpop.f32.mrf.mxu1 }
 0x123   : > { %v732_v46 = vadd.f32 %v1818_v42, %v731_v44  ;;  %v792_v47 = vadd.f32 %v1818_v42, %v791_v45 }
 0x124   : > { %v1099_v48 = vpack.c.bf16 %v1001_v41, %v1001_v41  ;;  %v1125_v49 = vpack.c.bf16 %v1027_v43, %v1027_v43 }
 0x125   : > { %v954_v50 = vmax.f32 %v732_v46, 0.0  ;;  %v978_v51 = vmax.f32 %v792_v47, 0.0 }
 0x126   : > { %1198 = vst.msk [vmem:[%s1829_s17 + $0xf8] sm:$0xf] %vm1135_vm0, %v1099_v48 }
 0x127   : > { %v851_v52 = vpop.f32.mrf.mxu2  ;;  %1224 = vst.msk [vmem:[%s1829_s17 + $0x160] sm:$0xf] %vm1135_vm0, %v1125_v49  ;;  %v1052_v53 = vpack.c.bf16 %v954_v50, %v954_v50  ;;  %v1076_v54 = vpack.c.bf16 %v978_v51, %v978_v51  ;;  %v916_v55 = vpop.f32.mrf.mxu3 }
 0x128   : > { %v852_v56 = vadd.f32 %v1818_v42, %v851_v52  ;;  %v917_v57 = vadd.f32 %v1818_v42, %v916_v55 }
 0x129   : > { %1151 = vst.msk [vmem:[%s1829_s17 + $0x3c] sm:$0xf] %vm1135_vm0, %v1052_v53 }
 0x12a   : > { %v1002_v58 = vmax.f32 %v852_v56, 0.0  ;;  %1175 = vst.msk [vmem:[%s1829_s17 + $0x9c] sm:$0xf] %vm1135_vm0, %v1076_v54  ;;  %v1028_v59 = vmax.f32 %v917_v57, 0.0  ;;  %v734_v60 = vpop.f32.mrf.mxu0  ;;  %v794_v61 = vpop.f32.mrf.mxu1 }
 0x12b   : > { %v735_v62 = vadd.f32 %v1818_v42, %v734_v60  ;;  %v795_v63 = vadd.f32 %v1818_v42, %v794_v61 }
 0x12c   : > { %v1100_v0 = vpack.c.bf16 %v1002_v58, %v1002_v58  ;;  %v1126_v1 = vpack.c.bf16 %v1028_v59, %v1028_v59 }
 0x12d   : > { %v955_v2 = vmax.f32 %v735_v62, 0.0  ;;  %v979_v3 = vmax.f32 %v795_v63, 0.0 }
 0x12e   : > { %1199 = vst.msk [vmem:[%s1829_s17 + $0xfc] sm:$0xf] %vm1135_vm0, %v1100_v0 }
 0x12f   : > { %v854_v4 = vpop.f32.mrf.mxu2  ;;  %1225 = vst.msk [vmem:[%s1829_s17 + $0x164] sm:$0xf] %vm1135_vm0, %v1126_v1  ;;  %v1053_v5 = vpack.c.bf16 %v955_v2, %v955_v2  ;;  %v1077_v6 = vpack.c.bf16 %v979_v3, %v979_v3  ;;  %v919_v7 = vpop.f32.mrf.mxu3 }
 0x130   : > { %v855_v8 = vadd.f32 %v1818_v42, %v854_v4  ;;  %v920_v9 = vadd.f32 %v1818_v42, %v919_v7 }
 0x131   : > { %1152 = vst.msk [vmem:[%s1829_s17 + $0x40] sm:$0xf] %vm1135_vm0, %v1053_v5 }
 0x132   : > { %v1003_v10 = vmax.f32 %v855_v8, 0.0  ;;  %1176 = vst.msk [vmem:[%s1829_s17 + $0xa0] sm:$0xf] %vm1135_vm0, %v1077_v6  ;;  %v1029_v11 = vmax.f32 %v920_v9, 0.0  ;;  %v736_v12 = vpop.f32.mrf.mxu0  ;;  %v796_v13 = vpop.f32.mrf.mxu1 }
 0x133   : > { %v737_v14 = vadd.f32 %v1818_v42, %v736_v12  ;;  %v797_v15 = vadd.f32 %v1818_v42, %v796_v13 }
 0x134   : > { %v1101_v16 = vpack.c.bf16 %v1003_v10, %v1003_v10  ;;  %v1127_v17 = vpack.c.bf16 %v1029_v11, %v1029_v11 }
 0x135   : > { %v956_v18 = vmax.f32 %v737_v14, 0.0  ;;  %v980_v19 = vmax.f32 %v797_v15, 0.0 }
 0x136   : > { %1200 = vst.msk [vmem:[%s1829_s17 + $0x100] sm:$0xf] %vm1135_vm0, %v1101_v16 }
 0x137   : > { %v856_v20 = vpop.f32.mrf.mxu2  ;;  %1226 = vst.msk [vmem:[%s1829_s17 + $0x168] sm:$0xf] %vm1135_vm0, %v1127_v17  ;;  %v1054_v21 = vpack.c.bf16 %v956_v18, %v956_v18  ;;  %v1078_v22 = vpack.c.bf16 %v980_v19, %v980_v19  ;;  %v921_v23 = vpop.f32.mrf.mxu3 }
 0x138   : > { %v857_v24 = vadd.f32 %v1818_v42, %v856_v20  ;;  %v922_v25 = vadd.f32 %v1818_v42, %v921_v23 }
 0x139   : > { %1153 = vst.msk [vmem:[%s1829_s17 + $0x44] sm:$0xf] %vm1135_vm0, %v1054_v21 }
 0x13a   : > { %v1004_v26 = vmax.f32 %v857_v24, 0.0  ;;  %1177 = vst.msk [vmem:[%s1829_s17 + $0xa4] sm:$0xf] %vm1135_vm0, %v1078_v22  ;;  %v1030_v27 = vmax.f32 %v922_v25, 0.0  ;;  %v739_v28 = vpop.f32.mrf.mxu0  ;;  %v799_v29 = vpop.f32.mrf.mxu1 }
 0x13b   : > { %v740_v30 = vadd.f32 %v1818_v42, %v739_v28  ;;  %v800_v31 = vadd.f32 %v1818_v42, %v799_v29 }
 0x13c   : > { %v1102_v32 = vpack.c.bf16 %v1004_v26, %v1004_v26  ;;  %v1128_v33 = vpack.c.bf16 %v1030_v27, %v1030_v27 }
 0x13d   : > { %v957_v34 = vmax.f32 %v740_v30, 0.0  ;;  %v981_v35 = vmax.f32 %v800_v31, 0.0 }
 0x13e   : > { %1201 = vst.msk [vmem:[%s1829_s17 + $0x104] sm:$0xf] %vm1135_vm0, %v1102_v32 }
 0x13f   : > { %v859_v36 = vpop.f32.mrf.mxu2  ;;  %1227 = vst.msk [vmem:[%s1829_s17 + $0x16c] sm:$0xf] %vm1135_vm0, %v1128_v33  ;;  %v1055_v37 = vpack.c.bf16 %v957_v34, %v957_v34  ;;  %v1079_v38 = vpack.c.bf16 %v981_v35, %v981_v35  ;;  %v924_v39 = vpop.f32.mrf.mxu3 }
 0x140   : > { %v860_v40 = vadd.f32 %v1818_v42, %v859_v36  ;;  %v925_v41 = vadd.f32 %v1818_v42, %v924_v39 }
 0x141   : > { %1154 = vst.msk [vmem:[%s1829_s17 + $0x48] sm:$0xf] %vm1135_vm0, %v1055_v37 }
 0x142   : > { %v1005_v43 = vmax.f32 %v860_v40, 0.0  ;;  %1178 = vst.msk [vmem:[%s1829_s17 + $0xa8] sm:$0xf] %vm1135_vm0, %v1079_v38  ;;  %v1031_v44 = vmax.f32 %v925_v41, 0.0  ;;  %v741_v45 = vpop.f32.mrf.mxu0  ;;  %v801_v46 = vpop.f32.mrf.mxu1 }
 0x143   : > { %v742_v47 = vadd.f32 %v1818_v42, %v741_v45  ;;  %v802_v48 = vadd.f32 %v1818_v42, %v801_v46 }
 0x144   : > { %v1103_v49 = vpack.c.bf16 %v1005_v43, %v1005_v43  ;;  %v1129_v50 = vpack.c.bf16 %v1031_v44, %v1031_v44 }
 0x145   : > { %v958_v51 = vmax.f32 %v742_v47, 0.0  ;;  %v982_v52 = vmax.f32 %v802_v48, 0.0 }
 0x146   : > { %1202 = vst.msk [vmem:[%s1829_s17 + $0x108] sm:$0xf] %vm1135_vm0, %v1103_v49 }
 0x147   : > { %v861_v53 = vpop.f32.mrf.mxu2  ;;  %1228 = vst.msk [vmem:[%s1829_s17 + $0x170] sm:$0xf] %vm1135_vm0, %v1129_v50  ;;  %v1056_v54 = vpack.c.bf16 %v958_v51, %v958_v51  ;;  %v1080_v55 = vpack.c.bf16 %v982_v52, %v982_v52  ;;  %v926_v56 = vpop.f32.mrf.mxu3 }
 0x148   : > { %v862_v57 = vadd.f32 %v1818_v42, %v861_v53  ;;  %v927_v58 = vadd.f32 %v1818_v42, %v926_v56 }
 0x149   : > { %1155 = vst.msk [vmem:[%s1829_s17 + $0x4c] sm:$0xf] %vm1135_vm0, %v1056_v54 }
 0x14a   : > { %v1006_v59 = vmax.f32 %v862_v57, 0.0  ;;  %1179 = vst.msk [vmem:[%s1829_s17 + $0xac] sm:$0xf] %vm1135_vm0, %v1080_v55  ;;  %v1032_v60 = vmax.f32 %v927_v58, 0.0  ;;  %v744_v61 = vpop.f32.mrf.mxu0  ;;  %v804_v62 = vpop.f32.mrf.mxu1 }
 0x14b   : > { %v745_v63 = vadd.f32 %v1818_v42, %v744_v61  ;;  %v805_v0 = vadd.f32 %v1818_v42, %v804_v62 }
 0x14c   : > { %v1104_v1 = vpack.c.bf16 %v1006_v59, %v1006_v59  ;;  %v1130_v2 = vpack.c.bf16 %v1032_v60, %v1032_v60 }
 0x14d   : > { %v959_v3 = vmax.f32 %v745_v63, 0.0  ;;  %v983_v4 = vmax.f32 %v805_v0, 0.0 }
 0x14e   : > { %1203 = vst.msk [vmem:[%s1829_s17 + $0x10c] sm:$0xf] %vm1135_vm0, %v1104_v1  ;;  %v1681_v1 = vld [vmem:[%s2148_s2] ss:$0 sm:$0xff] }
 0x14f   : > { %v864_v5 = vpop.f32.mrf.mxu2  ;;  %1229 = vst.msk [vmem:[%s1829_s17 + $0x174] sm:$0xf] %vm1135_vm0, %v1130_v2  ;;  %v1057_v6 = vpack.c.bf16 %v959_v3, %v959_v3  ;;  %v1081_v7 = vpack.c.bf16 %v983_v4, %v983_v4  ;;  %v929_v8 = vpop.f32.mrf.mxu3 }
 0x150   : > { %v865_v9 = vadd.f32 %v1818_v42, %v864_v5  ;;  %v930_v10 = vadd.f32 %v1818_v42, %v929_v8 }
 0x151   : > { %1156 = vst.msk [vmem:[%s1829_s17 + $0x50] sm:$0xf] %vm1135_vm0, %v1057_v6 }
 0x152   : > { %v1007_v11 = vmax.f32 %v865_v9, 0.0  ;;  %1180 = vst.msk [vmem:[%s1829_s17 + $0xb0] sm:$0xf] %vm1135_vm0, %v1081_v7  ;;  %v1033_v12 = vmax.f32 %v930_v10, 0.0  ;;  %v746_v13 = vpop.f32.mrf.mxu0  ;;  %v806_v14 = vpop.f32.mrf.mxu1 }
 0x153   : > { %v747_v15 = vadd.f32 %v1818_v42, %v746_v13  ;;  %v807_v16 = vadd.f32 %v1818_v42, %v806_v14 }
 0x154   : > { %v1105_v17 = vpack.c.bf16 %v1007_v11, %v1007_v11  ;;  %v1131_v18 = vpack.c.bf16 %v1033_v12, %v1033_v12 }
 0x155   : > { %v960_v19 = vmax.f32 %v747_v15, 0.0  ;;  %v984_v20 = vmax.f32 %v807_v16, 0.0 }
 0x156   : > { %1204 = vst.msk [vmem:[%s1829_s17 + $0x110] sm:$0xf] %vm1135_vm0, %v1105_v17 }
 0x157   : > { %v866_v21 = vpop.f32.mrf.mxu2  ;;  %1230 = vst.msk [vmem:[%s1829_s17 + $0x178] sm:$0xf] %vm1135_vm0, %v1131_v18  ;;  %v1058_v22 = vpack.c.bf16 %v960_v19, %v960_v19  ;;  %v1082_v23 = vpack.c.bf16 %v984_v20, %v984_v20  ;;  %v931_v24 = vpop.f32.mrf.mxu3 }
 0x158   : > { %v867_v25 = vadd.f32 %v1818_v42, %v866_v21  ;;  %v932_v26 = vadd.f32 %v1818_v42, %v931_v24 }
 0x159   : > { %1157 = vst.msk [vmem:[%s1829_s17 + $0x54] sm:$0xf] %vm1135_vm0, %v1058_v22 }
 0x15a   : > { %v1008_v27 = vmax.f32 %v867_v25, 0.0  ;;  %1181 = vst.msk [vmem:[%s1829_s17 + $0xb4] sm:$0xf] %vm1135_vm0, %v1082_v23  ;;  %v1034_v28 = vmax.f32 %v932_v26, 0.0  ;;  %v749_v29 = vpop.f32.mrf.mxu0  ;;  %v809_v30 = vpop.f32.mrf.mxu1 }
 0x15b   : > { %v750_v31 = vadd.f32 %v1818_v42, %v749_v29  ;;  %v810_v32 = vadd.f32 %v1818_v42, %v809_v30 }
 0x15c   : > { %v1106_v33 = vpack.c.bf16 %v1008_v27, %v1008_v27  ;;  %v1132_v34 = vpack.c.bf16 %v1034_v28, %v1034_v28 }
 0x15d   : > { %v961_v35 = vmax.f32 %v750_v31, 0.0  ;;  %v985_v36 = vmax.f32 %v810_v32, 0.0 }
 0x15e   : > { %1205 = vst.msk [vmem:[%s1829_s17 + $0x114] sm:$0xf] %vm1135_vm0, %v1106_v33 }
 0x15f   : > { %v869_v37 = vpop.f32.mrf.mxu2  ;;  %1231 = vst.msk [vmem:[%s1829_s17 + $0x17c] sm:$0xf] %vm1135_vm0, %v1132_v34  ;;  %v1059_v38 = vpack.c.bf16 %v961_v35, %v961_v35  ;;  %v1083_v39 = vpack.c.bf16 %v985_v36, %v985_v36  ;;  %v934_v40 = vpop.f32.mrf.mxu3 }
 0x160   : > { %v870_v41 = vadd.f32 %v1818_v42, %v869_v37  ;;  %v935_v43 = vadd.f32 %v1818_v42, %v934_v40 }
 0x161   : > { %1158 = vst.msk [vmem:[%s1829_s17 + $0x58] sm:$0xf] %vm1135_vm0, %v1059_v38 }
 0x162   : > { %v1009_v44 = vmax.f32 %v870_v41, 0.0  ;;  %1182 = vst.msk [vmem:[%s1829_s17 + $0xb8] sm:$0xf] %vm1135_vm0, %v1083_v39  ;;  %v1035_v45 = vmax.f32 %v935_v43, 0.0  ;;  %v751_v46 = vpop.f32.mrf.mxu0  ;;  %v811_v47 = vpop.f32.mrf.mxu1 }
 0x163   : > { %v752_v48 = vadd.f32 %v1818_v42, %v751_v46  ;;  %v812_v49 = vadd.f32 %v1818_v42, %v811_v47 }
 0x164   : > { %v1107_v50 = vpack.c.bf16 %v1009_v44, %v1009_v44  ;;  %v1133_v51 = vpack.c.bf16 %v1035_v45, %v1035_v45 }
 0x165   : > { %v962_v52 = vmax.f32 %v752_v48, 0.0  ;;  %v986_v53 = vmax.f32 %v812_v49, 0.0 }
 0x166   : > { %1206 = vst.msk [vmem:[%s1829_s17 + $0x118] sm:$0xf] %vm1135_vm0, %v1107_v50 }
 0x167   : > { %v871_v54 = vpop.f32.mrf.mxu2  ;;  %1232 = vst.msk [vmem:[%s1829_s17 + $0x180] sm:$0xf] %vm1135_vm0, %v1133_v51  ;;  %v1060_v55 = vpack.c.bf16 %v962_v52, %v962_v52  ;;  %v1084_v56 = vpack.c.bf16 %v986_v53, %v986_v53  ;;  %v936_v57 = vpop.f32.mrf.mxu3 }
 0x168   : > { %v872_v58 = vadd.f32 %v1818_v42, %v871_v54  ;;  %v937_v59 = vadd.f32 %v1818_v42, %v936_v57 }
 0x169   : > { %1159 = vst.msk [vmem:[%s1829_s17 + $0x5c] sm:$0xf] %vm1135_vm0, %v1060_v55 }
 0x16a   : > { %v1010_v60 = vmax.f32 %v872_v58, 0.0  ;;  %1183 = vst.msk [vmem:[%s1829_s17 + $0xbc] sm:$0xf] %vm1135_vm0, %v1084_v56  ;;  %v1036_v61 = vmax.f32 %v937_v59, 0.0 }
 0x16c   : > { %v1108_v62 = vpack.c.bf16 %v1010_v60, %v1010_v60  ;;  %v1134_v63 = vpack.c.bf16 %v1036_v61, %v1036_v61 }
 0x16e   : > { %1207 = vst.msk [vmem:[%s1829_s17 + $0x11c] sm:$0xf] %vm1135_vm0, %v1108_v62 }
 0x16f   : > { %v874_v0 = vpop.f32.mrf.mxu2  ;;  %1233 = vst.msk [vmem:[%s1829_s17 + $0x184] sm:$0xf] %vm1135_vm0, %v1134_v63 }
 0x170   : > { %v875_v2 = vadd.f32 %v1681_v1, %v874_v0 }
 0x172   : > { %v1011_v42 = vmax.f32 %v875_v2, 0.0 }
 0x174   : > { %v1109_v3 = vpack.c.bf16 %v1011_v42, %v1011_v42 }
 0x176   : > { %1208 = vst.msk [vmem:[%s1829_s17 + $0x120] sm:$0xf] %vm1135_vm0, %v1109_v3 }
 0x177   : > { %v876_v4 = vpop.f32.mrf.mxu2 }
 0x178   : > { %v877_v5 = vadd.f32 %v1681_v1, %v876_v4 }
 0x17a   : > { %v1012_v6 = vmax.f32 %v877_v5, 0.0 }
 0x17c   : > { %v1110_v7 = vpack.c.bf16 %v1012_v6, %v1012_v6 }
 0x17e   : > { %1209 = vst.msk [vmem:[%s1829_s17 + $0x124] sm:$0xf] %vm1135_vm0, %v1110_v7 }
 0x17f PF: > { %s13_s14 = sadd.s32 1, %s1704_s14   ;;  %s2150_s12 = smov %s1700_s13 }
 0x180   : > { %p10_p5 = scmp.ge.s32.totalorder %s13_s14, 4   ;;  %s2151_s13 = smov %s2153_s15 }
 0x182   :  { %12 = sbr.rel (!%p10_p5) target bundleno = 2 (0x2), region = 68 }

// kernel: forward.5
= control target key start
LH: loop header
LB: loop body
LE: loop exit
PB: predicated region body
PF: predicated region fallthrough
CT: control target
= control target key end

     0   :  { %s1583_s12 = smov 0   ;;  %s1585_s13 = smov 0   ;;  %s1895_s0 = inlined_call_operand.vmem [shape: bf16[416,384], index: 0, kind: input, shape index: {}]   ;;  %s1896_s1 = inlined_call_operand.vmem [shape: bf16[384,128], index: 1, kind: input, shape index: {}]   ;;  %s1897_s2 = inlined_call_operand.vmem [shape: f32[1,128], index: 2, kind: input, shape index: {}]   ;;  %s1898_s3 = inlined_call_operand.vmem [shape: bf16[416,128], index: 3, kind: output, shape index: {}]  }
   0x1   :  { %s1587_s14 = smov 0  }
   0x2 LB: > { %s25_s15 = sadd.s32 1, %s1557_s13  ;;  %p1092_p0 = scmp.ge.s32.totalorder %s1561_s14, 1  ;;  %s1561_s14 = sphi %s1587_s14, %s13_s14   ;;  %s1557_s13 = sphi %s1585_s13, %s1900_s13   ;;  %s1553_s12 = sphi %s1583_s12, %s1899_s12  }
   0x3   : > { %p27_p1 = scmp.ge.s32.totalorder %s25_s15, 2  ;;  %p170_p2 = scmp.lt.s32.totalorder %s1561_s14, 3 }
   0x5   : > { %s1902_s15 = smov (%p27_p1, %s25_s15), 0  ;;  %p171_p3 = pnand %p1092_p0, %p170_p2 }
   0x6   : > { %s205_s30 = smul.u32 (!%p171_p3), 26, %s1553_s12 }
   0x7   : > { %174 = sbr.rel (%p171_p3) target bundleno = 337 (0x151), region = 32 }
   0x8   : > { %p206_p4 = scmp.lt.s32.totalorder (!%p171_p3), %s205_s30, 51 }
   0xc   : > { %v1395_v0 = vld [vmem:[%s1896_s1 + $0x38] sm:$0xff]  ;;  %v1394_v3 = vld [vmem:[%s1896_s1 + $0x30] sm:$0xff]  ;;  %v1393_v6 = vld [vmem:[%s1896_s1 + $0x28] sm:$0xff]  ;;  %s1904_s30 = smov (!%p206_p4, %s205_s30), 51 }
   0xd   : > { %v1609_v1 = vld [vmem:[%s1896_s1 + $0x78] sm:$0xff]  ;;  %684 = vmatpush.bf16.msra.mxu0 %v1395_v0  ;;  %1489 = vmatpush.bf16.msra.mxu3 %v1395_v0  ;;  %v1624_v4 = vld [vmem:[%s1896_s1 + $0x70] sm:$0xff]  ;;  %v1401_v7 = vld [vmem:[%s1896_s1 + $0x68] sm:$0xff]  ;;  %s1513_s25 = smul.u32 12, %s1904_s30  ;;  %s1094_s24 = sshll.u32 %s1904_s30, 2 }
   0xe   : > { %v1614_v2 = vld [vmem:[%s1896_s1 + $0xb8] sm:$0xff]  ;;  %758 = vmatpush.bf16.msra.mxu1 %v1609_v1  ;;  %v1629_v5 = vld [vmem:[%s1896_s1 + $0xb0] sm:$0xff]  ;;  %v1643_v8 = vld [vmem:[%s1896_s1 + $0xa8] sm:$0xff]  ;;  %s1821_s27 = scalar_lea.vmem %s1898_s3, %s1094_s24 }
   0xf   : > { %832 = vmatpush.bf16.msra.mxu2 %v1614_v2  ;;  %v1392_v9 = vld [vmem:[%s1896_s1 + $0x20] sm:$0xff]  ;;  %v1391_v12 = vld [vmem:[%s1896_s1 + $0x18] sm:$0xff]  ;;  %v1390_v15 = vld [vmem:[%s1896_s1 + $0x10] sm:$0xff]  ;;  %s1693_s8 = scalar_lea.vmem %s1895_s0, %s1513_s25 }
  0x10   : > { %v1652_v10 = vld [vmem:[%s1896_s1 + $0x60] sm:$0xff]  ;;  %v1399_v13 = vld [vmem:[%s1896_s1 + $0x58] sm:$0xff]  ;;  %v1398_v16 = vld [vmem:[%s1896_s1 + $0x50] sm:$0xff] }
  0x11   : > { %685 = vmatpush.bf16.msra.mxu0 %v1394_v3  ;;  %1490 = vmatpush.bf16.msra.mxu3 %v1394_v3  ;;  %v1657_v11 = vld [vmem:[%s1896_s1 + $0xa0] sm:$0xff]  ;;  %v1672_v14 = vld [vmem:[%s1896_s1 + $0x98] sm:$0xff]  ;;  %v1685_v17 = vld [vmem:[%s1896_s1 + $0x90] sm:$0xff] }
  0x12   : > { %759 = vmatpush.bf16.msra.mxu1 %v1624_v4  ;;  %v1389_v18 = vld [vmem:[%s1896_s1 + $0x8] sm:$0xff]  ;;  %v1388_v21 = vld [vmem:[%s1896_s1] sm:$0xff]  ;;  %v1217_v26 = vld [vmem:[%s1693_s8 + $0xf0] sm:$0xf] }
  0x13   : > { %833 = vmatpush.bf16.msra.mxu2 %v1629_v5  ;;  %v1397_v19 = vld [vmem:[%s1896_s1 + $0x48] sm:$0xff]  ;;  %v1396_v22 = vld [vmem:[%s1896_s1 + $0x40] sm:$0xff]  ;;  %v1380_v27 = vld [vmem:[%s1693_s8 + $0xf8] sm:$0xf0] }
  0x14   : > { %v1702_v20 = vld [vmem:[%s1896_s1 + $0x88] sm:$0xff]  ;;  %v1713_v23 = vld [vmem:[%s1896_s1 + $0x80] sm:$0xff]  ;;  %v1099_v29 = vld [vmem:[%s1693_s8 + $0xc] sm:$0xf0]  ;;  %v1218_v33 = vor.u32 %v1380_v27, %v1217_v26 }
  0x15   : > { %686 = vmatpush.bf16.msra.mxu0 %v1393_v6  ;;  %1491 = vmatpush.bf16.msra.mxu3 %v1393_v6  ;;  %v1097_v24 = vld [vmem:[%s1693_s8] sm:$0xf]  ;;  %v1350_v25 = vld [vmem:[%s1693_s8 + $0x8] sm:$0xf0]  ;;  %v1349_v28 = vld [vmem:[%s1693_s8 + $0x4] sm:$0xf] }
  0x16   : > { %760 = vmatpush.bf16.msra.mxu1 %v1401_v7  ;;  %v1105_v30 = vld [vmem:[%s1693_s8 + $0x8] sm:$0xf]  ;;  %v1351_v31 = vld [vmem:[%s1693_s8 + $0x10] sm:$0xf0]  ;;  %v1098_v32 = vor.u32 %v1350_v25, %v1097_v24  ;;  %v1102_v34 = vor.u32 %v1349_v28, %v1099_v29  ;;  %v1109_v36 = vld [vmem:[%s1693_s8 + $0x18] sm:$0xf] }
  0x17   : > { %834 = vmatpush.bf16.msra.mxu2 %v1643_v8  ;;  %v1106_v35 = vor.u32 %v1351_v31, %v1105_v30  ;;  %v1353_v37 = vld [vmem:[%s1693_s8 + $0x20] sm:$0xf0]  ;;  %v1229_v38 = vld [vmem:[%s1693_s8 + $0x108] sm:$0xf]  ;;  %v1383_v39 = vld [vmem:[%s1693_s8 + $0x110] sm:$0xf0] }
  0x18   : > { %v1352_v40 = vld [vmem:[%s1693_s8 + $0x1c] sm:$0xf]  ;;  %v1111_v41 = vld [vmem:[%s1693_s8 + $0x24] sm:$0xf0]  ;;  %v1117_v42 = vld [vmem:[%s1693_s8 + $0x20] sm:$0xf]  ;;  %v1110_v44 = vor.u32 %v1353_v37, %v1109_v36  ;;  %v1230_v45 = vor.u32 %v1383_v39, %v1229_v38 }
  0x19   : > { %687 = vmatpush.bf16.msra.mxu0 %v1392_v9  ;;  %1492 = vmatpush.bf16.msra.mxu3 %v1392_v9  ;;  %v1354_v43 = vld [vmem:[%s1693_s8 + $0x28] sm:$0xf0]  ;;  %v1114_v46 = vor.u32 %v1352_v40, %v1111_v41  ;;  %v1121_v48 = vld [vmem:[%s1693_s8 + $0x30] sm:$0xf]  ;;  %v1356_v49 = vld [vmem:[%s1693_s8 + $0x38] sm:$0xf0] }
  0x1a   : > { %761 = vmatpush.bf16.msra.mxu1 %v1652_v10  ;;  %v1118_v47 = vor.u32 %v1354_v43, %v1117_v42  ;;  %v1241_v50 = vld [vmem:[%s1693_s8 + $0x120] sm:$0xf]  ;;  %v1386_v51 = vld [vmem:[%s1693_s8 + $0x128] sm:$0xf0]  ;;  %v1355_v52 = vld [vmem:[%s1693_s8 + $0x34] sm:$0xf]  ;;  %v1122_v56 = vor.u32 %v1356_v49, %v1121_v48 }
  0x1b   : > { %835 = vmatpush.bf16.msra.mxu2 %v1657_v11  ;;  %v1123_v53 = vld [vmem:[%s1693_s8 + $0x3c] sm:$0xf0]  ;;  %v1129_v54 = vld [vmem:[%s1693_s8 + $0x38] sm:$0xf]  ;;  %v1357_v55 = vld [vmem:[%s1693_s8 + $0x40] sm:$0xf0]  ;;  %v1242_v57 = vor.u32 %v1386_v51, %v1241_v50 }
  0x1c   : > { %v1126_v58 = vor.u32 %v1355_v52, %v1123_v53  ;;  %v1130_v59 = vor.u32 %v1357_v55, %v1129_v54  ;;  %v1133_v60 = vld [vmem:[%s1693_s8 + $0x48] sm:$0xf]  ;;  %v1359_v61 = vld [vmem:[%s1693_s8 + $0x50] sm:$0xf0]  ;;  %v1358_v62 = vld [vmem:[%s1693_s8 + $0x4c] sm:$0xf] }
  0x1d   : > { %688 = vmatpush.bf16.msra.mxu0 %v1391_v12  ;;  %1493 = vmatpush.bf16.msra.mxu3 %v1391_v12  ;;  %v1379_v63 = vld [vmem:[%s1693_s8 + $0xf4] sm:$0xf]  ;;  %v1219_v0 = vld [vmem:[%s1693_s8 + $0xfc] sm:$0xf0]  ;;  %v1360_v3 = vld [vmem:[%s1693_s8 + $0x58] sm:$0xf0] }
  0x1e   : > { %762 = vmatpush.bf16.msra.mxu1 %v1399_v13  ;;  %v1362_v9 = vld [vmem:[%s1693_s8 + $0x68] sm:$0xf0]  ;;  %v1231_v12 = vld [vmem:[%s1693_s8 + $0x114] sm:$0xf0]  ;;  %v1385_v24 = vld [vmem:[%s1693_s8 + $0x124] sm:$0xf] }
  0x1f   : > { %836 = vmatpush.bf16.msra.mxu2 %v1672_v14  ;;  %v1243_v25 = vld [vmem:[%s1693_s8 + $0x12c] sm:$0xf0]  ;;  %v1165_v26 = vld [vmem:[%s1693_s8 + $0x80] sm:$0xf]  ;;  %v1366_v27 = vld [vmem:[%s1693_s8 + $0x88] sm:$0xf0] }
  0x20   : > { %v1246_v29 = vor.u32 %v1385_v24, %v1243_v25  ;;  %v1166_v31 = vor.u32 %v1366_v27, %v1165_v26  ;;  %v1381_v36 = vld [vmem:[%s1693_s8 + $0x100] sm:$0xf0]  ;;  %v1171_v37 = vld [vmem:[%s1693_s8 + $0x9c] sm:$0xf0]  ;;  %v1177_v38 = vld [vmem:[%s1693_s8 + $0x98] sm:$0xf] }
  0x21   : > { %689 = vmatpush.bf16.msra.mxu0 %v1390_v15  ;;  %1494 = vmatpush.bf16.msra.mxu3 %v1390_v15  ;;  %v1363_v15 = vld [vmem:[%s1693_s8 + $0x70] sm:$0xf0]  ;;  %v1369_v39 = vld [vmem:[%s1693_s8 + $0xa0] sm:$0xf0]  ;;  %v1384_v48 = vld [vmem:[%s1693_s8 + $0x118] sm:$0xf0] }
  0x22   : > { %763 = vmatpush.bf16.msra.mxu1 %v1398_v16  ;;  %v1178_v43 = vor.u32 %v1369_v39, %v1177_v38  ;;  %v1183_v49 = vld [vmem:[%s1693_s8 + $0xb4] sm:$0xf0]  ;;  %v1189_v50 = vld [vmem:[%s1693_s8 + $0xb0] sm:$0xf]  ;;  %v1372_v51 = vld [vmem:[%s1693_s8 + $0xb8] sm:$0xf0] }
  0x23   : > { %837 = vmatpush.bf16.msra.mxu2 %v1685_v17  ;;  %v1190_v55 = vor.u32 %v1372_v51, %v1189_v50 }
  0x25   : > { %690 = vmatpush.bf16.msra.mxu0 %v1389_v18  ;;  %1495 = vmatpush.bf16.msra.mxu3 %v1389_v18 }
  0x26   : > { %764 = vmatpush.bf16.msra.mxu1 %v1397_v19 }
  0x27   : > { %838 = vmatpush.bf16.msra.mxu2 %v1702_v20 }
  0x29   : > { %691 = vmatpush.bf16.msra.mxu0 %v1388_v21  ;;  %1496 = vmatpush.bf16.msra.mxu3 %v1388_v21  ;;  %v1365_v21 = vld [vmem:[%s1693_s8 + $0x80] sm:$0xf0] }
  0x2a   : > { %765 = vmatpush.bf16.msra.mxu1 %v1396_v22 }
  0x2b   : > { %839 = vmatpush.bf16.msra.mxu2 %v1713_v23 }
  0x2c   : > { %692 = vmatmul.bf16.vlgmr.msra.gmra.mxu0 %v1098_v32  ;;  %742 = vmatmul.bf16.vlgmr.msra.gmra.mxu3 %v1218_v33  ;;  %v1169_v32 = vld [vmem:[%s1693_s8 + $0x90] sm:$0xf]  ;;  %v1368_v33 = vld [vmem:[%s1693_s8 + $0x98] sm:$0xf0] }
  0x2d   : > { %1497 = vmatpush.bf16.msrb.mxu3 %v1609_v1  ;;  %766 = vmatmul.bf16.vlgmr.msra.gmra.mxu1 %v1102_v34  ;;  %v1135_v1 = vld [vmem:[%s1693_s8 + $0x54] sm:$0xf0]  ;;  %v1367_v34 = vld [vmem:[%s1693_s8 + $0x94] sm:$0xf]  ;;  %v1170_v40 = vor.u32 %v1368_v33, %v1169_v32 }
  0x2e   : > { %840 = vmatmul.bf16.vlgmr.msra.gmra.mxu2 %v1106_v35  ;;  %v1138_v6 = vor.u32 %v1358_v62, %v1135_v1  ;;  %v1225_v35 = vld [vmem:[%s1693_s8 + $0xf8] sm:$0xf]  ;;  %v1174_v42 = vor.u32 %v1367_v34, %v1171_v37  ;;  %v1201_v62 = vld [vmem:[%s1693_s8 + $0xc8] sm:$0xf] }
  0x2f   : > { %v1226_v41 = vor.u32 %v1381_v36, %v1225_v35 }
  0x31   : > { %1498 = vmatpush.bf16.msrb.mxu3 %v1624_v4  ;;  %v1134_v4 = vor.u32 %v1359_v61, %v1133_v60  ;;  %v1387_v60 = vld [vmem:[%s1693_s8 + $0x130] sm:$0xf0]  ;;  %v1195_v61 = vld [vmem:[%s1693_s8 + $0xcc] sm:$0xf0] }
  0x35   : > { %1499 = vmatpush.bf16.msrb.mxu3 %v1401_v7 }
  0x39   : > { %1500 = vmatpush.bf16.msrb.mxu3 %v1652_v10  ;;  %v1361_v10 = vld [vmem:[%s1693_s8 + $0x64] sm:$0xf] }
  0x3c   : > { %697 = vmatmul.bf16.gmra.mxu0 %v1110_v44  ;;  %747 = vmatmul.bf16.gmra.mxu3 %v1230_v45  ;;  %v1181_v44 = vld [vmem:[%s1693_s8 + $0xa8] sm:$0xf]  ;;  %v1371_v45 = vld [vmem:[%s1693_s8 + $0xb0] sm:$0xf0] }
  0x3d   : > { %1501 = vmatpush.bf16.msrb.mxu3 %v1399_v13  ;;  %771 = vmatmul.bf16.gmra.mxu1 %v1114_v46  ;;  %v1147_v13 = vld [vmem:[%s1693_s8 + $0x6c] sm:$0xf0]  ;;  %v1370_v46 = vld [vmem:[%s1693_s8 + $0xac] sm:$0xf]  ;;  %v1182_v52 = vor.u32 %v1371_v45, %v1181_v44 }
  0x3e   : > { %845 = vmatmul.bf16.gmra.mxu2 %v1118_v47  ;;  %v1150_v18 = vor.u32 %v1361_v10, %v1147_v13  ;;  %v1237_v47 = vld [vmem:[%s1693_s8 + $0x110] sm:$0xf]  ;;  %v1186_v54 = vor.u32 %v1370_v46, %v1183_v49 }
  0x3f   : > { %v1238_v53 = vor.u32 %v1384_v48, %v1237_v47 }
  0x41   : > { %1502 = vmatpush.bf16.msrb.mxu3 %v1398_v16 }
  0x45   : > { %1503 = vmatpush.bf16.msrb.mxu3 %v1397_v19 }
  0x49   : > { %1504 = vmatpush.bf16.msrb.mxu3 %v1396_v22  ;;  %v1364_v22 = vld [vmem:[%s1693_s8 + $0x7c] sm:$0xf] }
  0x4c   : > { %702 = vmatmul.bf16.gmra.mxu0 %v1122_v56  ;;  %752 = vmatmul.bf16.gmra.mxu3 %v1242_v57  ;;  %v1193_v56 = vld [vmem:[%s1693_s8 + $0xc0] sm:$0xf]  ;;  %v1374_v57 = vld [vmem:[%s1693_s8 + $0xc8] sm:$0xf0] }
  0x4d   : > { %1505 = vmatpush.bf16.msra.mxu3 %v1614_v2  ;;  %776 = vmatmul.bf16.gmra.mxu1 %v1126_v58  ;;  %v1141_v2 = vld [vmem:[%s1693_s8 + $0x50] sm:$0xf]  ;;  %v1373_v58 = vld [vmem:[%s1693_s8 + $0xc4] sm:$0xf] }
  0x4e   : > { %850 = vmatmul.bf16.gmra.mxu2 %v1130_v59  ;;  %v1142_v7 = vor.u32 %v1360_v3, %v1141_v2  ;;  %v1249_v59 = vld [vmem:[%s1693_s8 + $0x128] sm:$0xf]  ;;  %v1198_v3 = vor.u32 %v1373_v58, %v1195_v61 }
  0x4f   : > { %v1250_v1 = vor.u32 %v1387_v60, %v1249_v59 }
  0x51   : > { %1506 = vmatpush.bf16.msra.mxu3 %v1629_v5  ;;  %v1222_v5 = vor.u32 %v1379_v63, %v1219_v0  ;;  %v1375_v63 = vld [vmem:[%s1693_s8 + $0xd0] sm:$0xf0]  ;;  %v1194_v0 = vor.u32 %v1374_v57, %v1193_v56 }
  0x55   : > { %1507 = vmatpush.bf16.msra.mxu3 %v1643_v8  ;;  %v1145_v8 = vld [vmem:[%s1693_s8 + $0x60] sm:$0xf] }
  0x56   : > { %v1146_v16 = vor.u32 %v1362_v9, %v1145_v8 }
  0x59   : > { %1508 = vmatpush.bf16.msra.mxu3 %v1657_v11  ;;  %v1382_v11 = vld [vmem:[%s1693_s8 + $0x10c] sm:$0xf] }
  0x5c   : > { %707 = vmatmul.bf16.gmra.mxu0 %v1134_v4  ;;  %816 = vmatmul.bf16.vlgmr.msrb.gmra.mxu3 %v1222_v5  ;;  %v1202_v4 = vor.u32 %v1375_v63, %v1201_v62 }
  0x5d   : > { %1509 = vmatpush.bf16.msra.mxu3 %v1672_v14  ;;  %781 = vmatmul.bf16.gmra.mxu1 %v1138_v6  ;;  %v1153_v14 = vld [vmem:[%s1693_s8 + $0x68] sm:$0xf]  ;;  %v1803_v6 = vld [vmem:[%s1897_s2] ss:$0 sm:$0xff] }
  0x5e   : > { %855 = vmatmul.bf16.gmra.mxu2 %v1142_v7  ;;  %v1154_v19 = vor.u32 %v1363_v15, %v1153_v14  ;;  %v1205_v14 = vld [vmem:[%s1693_s8 + $0xd8] sm:$0xf]  ;;  %v1377_v15 = vld [vmem:[%s1693_s8 + $0xe0] sm:$0xf0] }
  0x5f   : > { %v1206_v25 = vor.u32 %v1377_v15, %v1205_v14 }
  0x61   : > { %1510 = vmatpush.bf16.msra.mxu3 %v1685_v17  ;;  %v1234_v17 = vor.u32 %v1382_v11, %v1231_v12 }
  0x65   : > { %1511 = vmatpush.bf16.msra.mxu3 %v1702_v20  ;;  %v1157_v20 = vld [vmem:[%s1693_s8 + $0x78] sm:$0xf] }
  0x66   : > { %v1158_v28 = vor.u32 %v1365_v21, %v1157_v20 }
  0x69   : > { %1512 = vmatpush.bf16.msra.mxu3 %v1713_v23  ;;  %v1159_v23 = vld [vmem:[%s1693_s8 + $0x84] sm:$0xf0] }
  0x6a   : > { %v1162_v30 = vor.u32 %v1364_v22, %v1159_v23 }
  0x6c   : > { %712 = vmatmul.bf16.gmra.mxu0 %v1146_v16  ;;  %821 = vmatmul.bf16.gmra.mxu3 %v1234_v17  ;;  %v1376_v16 = vld [vmem:[%s1693_s8 + $0xdc] sm:$0xf]  ;;  %v1207_v17 = vld [vmem:[%s1693_s8 + $0xe4] sm:$0xf0] }
  0x6d   : > { %786 = vmatmul.bf16.gmra.mxu1 %v1150_v18  ;;  %v1213_v18 = vld [vmem:[%s1693_s8 + $0xe0] sm:$0xf]  ;;  %v1210_v27 = vor.u32 %v1376_v16, %v1207_v17 }
  0x6e   : > { %860 = vmatmul.bf16.gmra.mxu2 %v1154_v19  ;;  %v1378_v19 = vld [vmem:[%s1693_s8 + $0xe8] sm:$0xf0] }
  0x7c   : > { %717 = vmatmul.bf16.gmra.mxu0 %v1158_v28  ;;  %826 = vmatmul.bf16.gmra.mxu3 %v1246_v29  ;;  %v1214_v28 = vor.u32 %v1378_v19, %v1213_v18 }
  0x7d   : > { %791 = vmatmul.bf16.gmra.mxu1 %v1162_v30 }
  0x7e   : > { %865 = vmatmul.bf16.gmra.mxu2 %v1166_v31 }
  0x8c   : > { %722 = vmatmul.bf16.gmra.mxu0 %v1170_v40  ;;  %890 = vmatmul.bf16.vlgmr.msra.gmra.mxu3 %v1226_v41 }
  0x8d   : > { %796 = vmatmul.bf16.gmra.mxu1 %v1174_v42 }
  0x8e   : > { %870 = vmatmul.bf16.gmra.mxu2 %v1178_v43 }
  0x9c   : > { %727 = vmatmul.bf16.gmra.mxu0 %v1182_v52  ;;  %895 = vmatmul.bf16.gmra.mxu3 %v1238_v53 }
  0x9d   : > { %801 = vmatmul.bf16.gmra.mxu1 %v1186_v54 }
  0x9e   : > { %875 = vmatmul.bf16.gmra.mxu2 %v1190_v55 }
  0xa9   : > { %v693_v2 = vpop.f32.mrf.mxu0 }
  0xaa   : > { %v767_v5 = vpop.f32.mrf.mxu1  ;;  %v694_v7 = vadd.f32 %v1803_v6, %v693_v2 }
  0xac   : > { %732 = vmatmul.bf16.gmra.mxu0 %v1194_v0  ;;  %900 = vmatmul.bf16.gmra.mxu3 %v1250_v1  ;;  %v768_v12 = vadd.f32 %v767_v5, %v694_v7 }
  0xad   : > { %806 = vmatmul.bf16.gmra.mxu1 %v1198_v3 }
  0xae   : > { %880 = vmatmul.bf16.gmra.mxu2 %v1202_v4 }
  0xaf   : > { %v1806_v8 = vpop.f32.mrf.mxu3 }
  0xb1   : > { %v841_v9 = vpop.f32.mrf.mxu2  ;;  %v695_v10 = vpop.f32.mrf.mxu0 }
  0xb2   : > { %v769_v11 = vpop.f32.mrf.mxu1  ;;  %v696_v13 = vadd.f32 %v1803_v6, %v695_v10  ;;  %v842_v20 = vadd.f32 %v841_v9, %v768_v12 }
  0xb4   : > { %v770_v21 = vadd.f32 %v769_v11, %v696_v13  ;;  %v906_v30 = vmax.f32 %v842_v20, 0.0 }
  0xb7   : > { %v1815_v22 = vpop.f32.mrf.mxu3 }
  0xb9   : > { %v843_v24 = vpop.f32.mrf.mxu2  ;;  %v698_v26 = vpop.f32.mrf.mxu0 }
  0xba   : > { %v844_v23 = vadd.f32 %v843_v24, %v770_v21  ;;  %v772_v29 = vpop.f32.mrf.mxu1  ;;  %v699_v33 = vadd.f32 %v1803_v6, %v698_v26 }
  0xbc   : > { %v907_v31 = vmax.f32 %v844_v23, 0.0  ;;  %737 = vmatmul.bf16.gmra.mxu0 %v1206_v25  ;;  %v773_v38 = vadd.f32 %v772_v29, %v699_v33 }
  0xbd   : > { %811 = vmatmul.bf16.gmra.mxu1 %v1210_v27 }
  0xbe   : > { %v1415_v32 = vpack.c.bf16 %v907_v31, %v906_v30  ;;  %885 = vmatmul.bf16.gmra.mxu2 %v1214_v28 }
  0xbf   : > { %v1825_v34 = vpop.f32.mrf.mxu3 }
  0xc0   : > { %1416 = vst [vmem:[%s1821_s27] sm:$0xff] %v1415_v32  }
  0xc1   : > { %v846_v35 = vpop.f32.mrf.mxu2  ;;  %v700_v36 = vpop.f32.mrf.mxu0 }
  0xc2   : > { %v774_v37 = vpop.f32.mrf.mxu1  ;;  %v701_v39 = vadd.f32 %v1803_v6, %v700_v36  ;;  %v847_v40 = vadd.f32 %v846_v35, %v773_v38 }
  0xc4   : > { %v775_v41 = vadd.f32 %v774_v37, %v701_v39  ;;  %v908_v47 = vmax.f32 %v847_v40, 0.0 }
  0xc7   : > { %v1828_v42 = vpop.f32.mrf.mxu3 }
  0xc9   : > { %v848_v43 = vpop.f32.mrf.mxu2  ;;  %v703_v45 = vpop.f32.mrf.mxu0 }
  0xca   : > { %v849_v44 = vadd.f32 %v848_v43, %v775_v41  ;;  %v777_v46 = vpop.f32.mrf.mxu1  ;;  %v704_v50 = vadd.f32 %v1803_v6, %v703_v45 }
  0xcc   : > { %v909_v48 = vmax.f32 %v849_v44, 0.0  ;;  %v778_v55 = vadd.f32 %v777_v46, %v704_v50 }
  0xce   : > { %v1420_v49 = vpack.c.bf16 %v909_v48, %v908_v47 }
  0xcf   : > { %v1832_v51 = vpop.f32.mrf.mxu3 }
  0xd0   : > { %1477 = vst [vmem:[%s1821_s27 + $0x8] sm:$0xff] %v1420_v49  }
  0xd1   : > { %v851_v52 = vpop.f32.mrf.mxu2  ;;  %v705_v53 = vpop.f32.mrf.mxu0 }
  0xd2   : > { %v779_v54 = vpop.f32.mrf.mxu1  ;;  %v706_v56 = vadd.f32 %v1803_v6, %v705_v53  ;;  %v852_v57 = vadd.f32 %v851_v52, %v778_v55 }
  0xd4   : > { %v780_v58 = vadd.f32 %v779_v54, %v706_v56  ;;  %v910_v0 = vmax.f32 %v852_v57, 0.0 }
  0xd7   : > { %v1835_v59 = vpop.f32.mrf.mxu3 }
  0xd9   : > { %v853_v60 = vpop.f32.mrf.mxu2  ;;  %v708_v62 = vpop.f32.mrf.mxu0 }
  0xda   : > { %v854_v61 = vadd.f32 %v853_v60, %v780_v58  ;;  %v782_v63 = vpop.f32.mrf.mxu1  ;;  %v709_v3 = vadd.f32 %v1803_v6, %v708_v62 }
  0xdc   : > { %v911_v1 = vmax.f32 %v854_v61, 0.0  ;;  %v783_v10 = vadd.f32 %v782_v63, %v709_v3 }
  0xde   : > { %v1425_v2 = vpack.c.bf16 %v911_v1, %v910_v0  ;;  %v744_v1 = vadd.f32 %v1803_v6, %v1806_v8 }
  0xdf   : > { %v817_v4 = vpop.f32.mrf.mxu3 }
  0xe0   : > { %1478 = vst [vmem:[%s1821_s27 + $0x10] sm:$0xff] %v1425_v2  }
  0xe1   : > { %v856_v5 = vpop.f32.mrf.mxu2  ;;  %v710_v7 = vpop.f32.mrf.mxu0 }
  0xe2   : > { %v784_v9 = vpop.f32.mrf.mxu1  ;;  %v711_v11 = vadd.f32 %v1803_v6, %v710_v7  ;;  %v857_v12 = vadd.f32 %v856_v5, %v783_v10  ;;  %v746_v7 = vadd.f32 %v1803_v6, %v1815_v22 }
  0xe4   : > { %v785_v13 = vadd.f32 %v784_v9, %v711_v11  ;;  %v912_v19 = vmax.f32 %v857_v12, 0.0  ;;  %v818_v9 = vadd.f32 %v817_v4, %v744_v1 }
  0xe7   : > { %v819_v14 = vpop.f32.mrf.mxu3 }
  0xe8   : > { %v820_v10 = vadd.f32 %v819_v14, %v746_v7 }
  0xe9   : > { %v858_v15 = vpop.f32.mrf.mxu2  ;;  %v713_v17 = vpop.f32.mrf.mxu0 }
  0xea   : > { %v859_v16 = vadd.f32 %v858_v15, %v785_v13  ;;  %v787_v18 = vpop.f32.mrf.mxu1  ;;  %v714_v24 = vadd.f32 %v1803_v6, %v713_v17 }
  0xec   : > { %v913_v20 = vmax.f32 %v859_v16, 0.0  ;;  %v788_v28 = vadd.f32 %v787_v18, %v714_v24 }
  0xee   : > { %v1430_v21 = vpack.c.bf16 %v913_v20, %v912_v19 }
  0xef   : > { %v1842_v25 = vpop.f32.mrf.mxu3 }
  0xf0   : > { %1479 = vst [vmem:[%s1821_s27 + $0x18] sm:$0xff] %v1430_v21  }
  0xf1   : > { %v861_v23 = vpop.f32.mrf.mxu2  ;;  %v715_v26 = vpop.f32.mrf.mxu0 }
  0xf2   : > { %v789_v27 = vpop.f32.mrf.mxu1  ;;  %v716_v29 = vadd.f32 %v1803_v6, %v715_v26  ;;  %v862_v30 = vadd.f32 %v861_v23, %v788_v28 }
  0xf4   : > { %v790_v31 = vadd.f32 %v789_v27, %v716_v29  ;;  %v914_v38 = vmax.f32 %v862_v30, 0.0  ;;  %v749_v29 = vadd.f32 %v1803_v6, %v1825_v34 }
  0xf7   : > { %v1845_v32 = vpop.f32.mrf.mxu3 }
  0xf9   : > { %v863_v33 = vpop.f32.mrf.mxu2  ;;  %v718_v36 = vpop.f32.mrf.mxu0 }
  0xfa   : > { %v864_v35 = vadd.f32 %v863_v33, %v790_v31  ;;  %v792_v37 = vpop.f32.mrf.mxu1  ;;  %v719_v41 = vadd.f32 %v1803_v6, %v718_v36  ;;  %v823_v36 = vadd.f32 %v1842_v25, %v749_v29 }
  0xfc   : > { %v915_v39 = vmax.f32 %v864_v35, 0.0  ;;  %v793_v47 = vadd.f32 %v792_v37, %v719_v41  ;;  %v751_v35 = vadd.f32 %v1803_v6, %v1828_v42 }
  0xfe   : > { %v1435_v40 = vpack.c.bf16 %v915_v39, %v914_v38  ;;  %v825_v37 = vadd.f32 %v1845_v32, %v751_v35 }
  0xff   : > { %v1849_v43 = vpop.f32.mrf.mxu3 }
 0x100   : > { %1480 = vst [vmem:[%s1821_s27 + $0x20] sm:$0xff] %v1435_v40  }
 0x101   : > { %v866_v44 = vpop.f32.mrf.mxu2  ;;  %v720_v45 = vpop.f32.mrf.mxu0 }
 0x102   : > { %v794_v46 = vpop.f32.mrf.mxu1  ;;  %v721_v48 = vadd.f32 %v1803_v6, %v720_v45  ;;  %v867_v49 = vadd.f32 %v866_v44, %v793_v47 }
 0x104   : > { %v795_v50 = vadd.f32 %v794_v46, %v721_v48  ;;  %v916_v57 = vmax.f32 %v867_v49, 0.0 }
 0x107   : > { %v1852_v52 = vpop.f32.mrf.mxu3 }
 0x109   : > { %v868_v53 = vpop.f32.mrf.mxu2  ;;  %v723_v55 = vpop.f32.mrf.mxu0 }
 0x10a   : > { %v869_v54 = vadd.f32 %v868_v53, %v795_v50  ;;  %v797_v56 = vpop.f32.mrf.mxu1  ;;  %v724_v61 = vadd.f32 %v1803_v6, %v723_v55 }
 0x10c   : > { %v917_v58 = vmax.f32 %v869_v54, 0.0  ;;  %v798_v3 = vadd.f32 %v797_v56, %v724_v61 }
 0x10e   : > { %v1440_v60 = vpack.c.bf16 %v917_v58, %v916_v57  ;;  %v754_v57 = vadd.f32 %v1803_v6, %v1832_v51 }
 0x10f   : > { %v891_v62 = vpop.f32.mrf.mxu3 }
 0x110   : > { %1481 = vst [vmem:[%s1821_s27 + $0x28] sm:$0xff] %v1440_v60   ;;  %v892_v11 = vadd.f32 %v891_v62, %v818_v9  ;;  %v756_v62 = vadd.f32 %v1803_v6, %v1835_v59 }
 0x111   : > { %v871_v63 = vpop.f32.mrf.mxu2  ;;  %v725_v0 = vpop.f32.mrf.mxu0 }
 0x112   : > { %v799_v2 = vpop.f32.mrf.mxu1  ;;  %v726_v5 = vadd.f32 %v1803_v6, %v725_v0  ;;  %v872_v12 = vadd.f32 %v871_v63, %v798_v3  ;;  %v926_v8 = vmax.f32 %v892_v11, 0.0  ;;  %v828_v63 = vadd.f32 %v1849_v43, %v754_v57 }
 0x113   : > { %v830_v0 = vadd.f32 %v1852_v52, %v756_v62 }
 0x114   : > { %v800_v13 = vadd.f32 %v799_v2, %v726_v5  ;;  %v918_v24 = vmax.f32 %v872_v12, 0.0 }
 0x117   : > { %v893_v15 = vpop.f32.mrf.mxu3 }
 0x118   : > { %v894_v17 = vadd.f32 %v893_v15, %v820_v10 }
 0x119   : > { %v873_v16 = vpop.f32.mrf.mxu2  ;;  %v728_v19 = vpop.f32.mrf.mxu0 }
 0x11a   : > { %v874_v18 = vadd.f32 %v873_v16, %v800_v13  ;;  %v927_v20 = vmax.f32 %v894_v17, 0.0  ;;  %v802_v21 = vpop.f32.mrf.mxu1  ;;  %v729_v22 = vadd.f32 %v1803_v6, %v728_v19 }
 0x11c   : > { %v919_v23 = vmax.f32 %v874_v18, 0.0  ;;  %v1465_v26 = vpack.c.bf16 %v927_v20, %v926_v8  ;;  %v803_v31 = vadd.f32 %v802_v21, %v729_v22 }
 0x11e   : > { %v1445_v27 = vpack.c.bf16 %v919_v23, %v918_v24  ;;  %1486 = vst [vmem:[%s1821_s27 + $0x50] sm:$0xff] %v1465_v26  }
 0x11f   : > { %v896_v4 = vpop.f32.mrf.mxu3 }
 0x120   : > { %1482 = vst [vmem:[%s1821_s27 + $0x30] sm:$0xff] %v1445_v27   ;;  %v897_v38 = vadd.f32 %v896_v4, %v823_v36 }
 0x121   : > { %v876_v14 = vpop.f32.mrf.mxu2  ;;  %v730_v28 = vpop.f32.mrf.mxu0 }
 0x122   : > { %v804_v30 = vpop.f32.mrf.mxu1  ;;  %v731_v33 = vadd.f32 %v1803_v6, %v730_v28  ;;  %v877_v39 = vadd.f32 %v876_v14, %v803_v31  ;;  %v928_v47 = vmax.f32 %v897_v38, 0.0 }
 0x124   : > { %v805_v40 = vadd.f32 %v804_v30, %v731_v33  ;;  %v920_v50 = vmax.f32 %v877_v39, 0.0 }
 0x127   : > { %v898_v41 = vpop.f32.mrf.mxu3 }
 0x128   : > { %v899_v45 = vadd.f32 %v898_v41, %v825_v37 }
 0x129   : > { %v878_v44 = vpop.f32.mrf.mxu2  ;;  %v733_v46 = vpop.f32.mrf.mxu0 }
 0x12a   : > { %v879_v34 = vadd.f32 %v878_v44, %v805_v40  ;;  %v929_v48 = vmax.f32 %v899_v45, 0.0  ;;  %v807_v49 = vpop.f32.mrf.mxu1  ;;  %v734_v25 = vadd.f32 %v1803_v6, %v733_v46 }
 0x12c   : > { %v921_v53 = vmax.f32 %v879_v34, 0.0  ;;  %v1470_v42 = vpack.c.bf16 %v929_v48, %v928_v47  ;;  %v808_v60 = vadd.f32 %v807_v49, %v734_v25 }
 0x12e   : > { %v1450_v54 = vpack.c.bf16 %v921_v53, %v920_v50  ;;  %1487 = vst [vmem:[%s1821_s27 + $0x58] sm:$0xff] %v1470_v42  }
 0x12f   : > { %v901_v32 = vpop.f32.mrf.mxu3 }
 0x130   : > { %1483 = vst [vmem:[%s1821_s27 + $0x38] sm:$0xff] %v1450_v54   ;;  %v902_v1 = vadd.f32 %v901_v32, %v828_v63 }
 0x131   : > { %v881_v55 = vpop.f32.mrf.mxu2  ;;  %v735_v56 = vpop.f32.mrf.mxu0 }
 0x132   : > { %v809_v58 = vpop.f32.mrf.mxu1  ;;  %v736_v61 = vadd.f32 %v1803_v6, %v735_v56  ;;  %v882_v2 = vadd.f32 %v881_v55, %v808_v60  ;;  %v930_v11 = vmax.f32 %v902_v1, 0.0 }
 0x134   : > { %v810_v3 = vadd.f32 %v809_v58, %v736_v61  ;;  %v922_v13 = vmax.f32 %v882_v2, 0.0 }
 0x137   : > { %v903_v5 = vpop.f32.mrf.mxu3 }
 0x138   : > { %v904_v9 = vadd.f32 %v903_v5, %v830_v0 }
 0x139   : > { %v883_v7 = vpop.f32.mrf.mxu2  ;;  %v738_v10 = vpop.f32.mrf.mxu0 }
 0x13a   : > { %v884_v51 = vadd.f32 %v883_v7, %v810_v3  ;;  %v931_v12 = vmax.f32 %v904_v9, 0.0  ;;  %v812_v59 = vpop.f32.mrf.mxu1  ;;  %v739_v43 = vadd.f32 %v1803_v6, %v738_v10 }
 0x13c   : > { %v923_v15 = vmax.f32 %v884_v51, 0.0  ;;  %v1475_v16 = vpack.c.bf16 %v931_v12, %v930_v11  ;;  %v813_v19 = vadd.f32 %v812_v59, %v739_v43 }
 0x13e   : > { %v1455_v17 = vpack.c.bf16 %v923_v15, %v922_v13  ;;  %1488 = vst [vmem:[%s1821_s27 + $0x60] sm:$0xff] %v1475_v16  }
 0x140   : > { %1484 = vst [vmem:[%s1821_s27 + $0x40] sm:$0xff] %v1455_v17  }
 0x141   : > { %v886_v52 = vpop.f32.mrf.mxu2  ;;  %v740_v18 = vpop.f32.mrf.mxu0 }
 0x142   : > { %v741_v8 = vadd.f32 %v1803_v6, %v740_v18  ;;  %v814_v20 = vpop.f32.mrf.mxu1  ;;  %v887_v21 = vadd.f32 %v886_v52, %v813_v19 }
 0x144   : > { %v815_v24 = vadd.f32 %v814_v20, %v741_v8  ;;  %v924_v27 = vmax.f32 %v887_v21, 0.0 }
 0x149   : > { %v888_v23 = vpop.f32.mrf.mxu2 }
 0x14a   : > { %v889_v26 = vadd.f32 %v888_v23, %v815_v24 }
 0x14c   : > { %v925_v22 = vmax.f32 %v889_v26, 0.0 }
 0x14e   : > { %v1460_v4 = vpack.c.bf16 %v925_v22, %v924_v27 }
 0x150   : > { %1485 = vst [vmem:[%s1821_s27 + $0x48] sm:$0xff] %v1460_v4  }
 0x151 PF: > { %s13_s14 = sadd.s32 1, %s1561_s14   ;;  %s1899_s12 = smov %s1557_s13 }
 0x152   : > { %p10_p5 = scmp.ge.s32.totalorder %s13_s14, 4   ;;  %s1900_s13 = smov %s1902_s15 }
 0x154   :  { %12 = sbr.rel (!%p10_p5) target bundleno = 2 (0x2), region = 68 }

// kernel: forward.6
= control target key start
LH: loop header
LB: loop body
LE: loop exit
PB: predicated region body
PF: predicated region fallthrough
CT: control target
= control target key end

     0   :  { %s3294_s12 = smov 0   ;;  %s3296_s13 = smov 0   ;;  %s4238_s0 = inlined_call_operand.vmem [shape: bf16[112,1152], index: 0, kind: input, shape index: {}]   ;;  %s4239_s1 = inlined_call_operand.vmem [shape: bf16[1152,256], index: 1, kind: input, shape index: {}]   ;;  %s4240_s2 = inlined_call_operand.vmem [shape: f32[1,256], index: 2, kind: input, shape index: {}]   ;;  %s4241_s3 = inlined_call_operand.vmem [shape: bf16[112,256], index: 3, kind: output, shape index: {}]  }
   0x1   :  { %s3298_s14 = smov 0   ;;  %s3300_s15 = smov 0  }
   0x2   :  { %s3302_s16 = smov 0  }
   0x3 LB: > { %s22_s17 = sadd.s32 1, %s3268_s15  ;;  %s2440_s18 = sadd.s32 4294967295, %s3272_s16   ;;  %s3272_s16 = sphi %s3302_s16, %s13_s16   ;;  %s3268_s15 = sphi %s3300_s15, %s4246_s15   ;;  %s3264_s14 = sphi %s3298_s14, %s4245_s14   ;;  %s3260_s13 = sphi %s3296_s13, %s4244_s13   ;;  %s3256_s12 = sphi %s3294_s12, %s4243_s12  }
   0x4   : > { %p23_p0 = scmp.ge.s32.totalorder %s22_s17, 2  ;;  %p65_p1 = scmp.ne.s32.totalorder %s3260_s13, %s3256_s12 }
   0x5   : > { %p66_p2 = scmp.eq.s32.totalorder %s3272_s16, 0  ;;  %p123_p4 = scmp.eq.s32.totalorder %s2440_s18, 1 }
   0x6   : > { %s4248_s17 = smov (%p23_p0, %s22_s17), 0  ;;  %s58_s20 = sadd.s32 1, %s3260_s13 }
   0x7   : > { %p67_p3 = por %p66_p2, %p65_p1  ;;  %s55_s19 = ssub.s32 %s3268_s15, %s4248_s17 }
   0x8   : > { %p56_p5 = scmp.eq.s32.totalorder %s55_s19, 0  ;;  %p3329_p6 = por %p123_p4, %p65_p1 }
   0x9   : > { %p2444_p7 = scmp.ge.s32.totalorder %s3272_s16, 2 }
   0xa   : > { %s3334_s22 = scalar_select %p56_p5, %s3260_s13, %s58_s20  }
   0xb   : > { %155 = sbr.rel (%p2444_p7) target bundleno = 165 (0xa5), region = 20 }
  0x10   : > { %158 = sbr.rel (!%p67_p3) target bundleno = 165 (0xa5), region = 24  ;;  %s160_s23 = sand.u32 (%p67_p3), 1, %s3260_s13  }
  0x11   : > { %s2445_s24 = sshll.u32 (%p67_p3), %s3268_s15, 2  ;;  %s3190_s25 = smul.u32 (%p67_p3), 576, %s160_s23 }
  0x12   : > { %s3342_s28 = scalar_lea.vmem (%p67_p3), %s4239_s1, %s2445_s24 }
  0x13   : > { %v181_v0 = vld [vmem:[%s3342_s28] sm:$0xf] (%p67_p3)  ;;  %v183_v1 = vld [vmem:[%s3342_s28 + $0x8] sm:$0xf] (%p67_p3)  ;;  %v185_v2 = vld [vmem:[%s3342_s28 + $0x10] sm:$0xf] (%p67_p3) }
  0x14   : > { %s3347_s29 = scalar_lea.vmem (%p67_p3), [#allocation2], %s3190_s25  ;;  %v187_v3 = vld [vmem:[%s3342_s28 + $0x18] sm:$0xf] (%p67_p3)  ;;  %v189_v4 = vld [vmem:[%s3342_s28 + $0x20] sm:$0xf] (%p67_p3) }
  0x15   : > { %182 = vst [vmem:[%s3347_s29] sm:$0xf] %v181_v0  ;;  %v191_v5 = vld [vmem:[%s3342_s28 + $0x28] sm:$0xf]  ;;  %v193_v6 = vld [vmem:[%s3342_s28 + $0x30] sm:$0xf] }
  0x16   : > { %184 = vst [vmem:[%s3347_s29 + $0x4] sm:$0xf] %v183_v1  ;;  %v195_v7 = vld [vmem:[%s3342_s28 + $0x38] sm:$0xf]  ;;  %v197_v8 = vld [vmem:[%s3342_s28 + $0x40] sm:$0xf] }
  0x17   : > { %186 = vst [vmem:[%s3347_s29 + $0x8] sm:$0xf] %v185_v2  ;;  %v199_v9 = vld [vmem:[%s3342_s28 + $0x48] sm:$0xf]  ;;  %v201_v10 = vld [vmem:[%s3342_s28 + $0x50] sm:$0xf] }
  0x18   : > { %188 = vst [vmem:[%s3347_s29 + $0xc] sm:$0xf] %v187_v3  ;;  %v203_v11 = vld [vmem:[%s3342_s28 + $0x58] sm:$0xf]  ;;  %v205_v12 = vld [vmem:[%s3342_s28 + $0x60] sm:$0xf] }
  0x19   : > { %190 = vst [vmem:[%s3347_s29 + $0x10] sm:$0xf] %v189_v4  ;;  %v207_v13 = vld [vmem:[%s3342_s28 + $0x68] sm:$0xf]  ;;  %v209_v14 = vld [vmem:[%s3342_s28 + $0x70] sm:$0xf] }
  0x1a   : > { %192 = vst [vmem:[%s3347_s29 + $0x14] sm:$0xf] %v191_v5  ;;  %v211_v15 = vld [vmem:[%s3342_s28 + $0x78] sm:$0xf]  ;;  %v213_v16 = vld [vmem:[%s3342_s28 + $0x80] sm:$0xf] }
  0x1b   : > { %194 = vst [vmem:[%s3347_s29 + $0x18] sm:$0xf] %v193_v6  ;;  %v215_v17 = vld [vmem:[%s3342_s28 + $0x88] sm:$0xf]  ;;  %v217_v18 = vld [vmem:[%s3342_s28 + $0x90] sm:$0xf] }
  0x1c   : > { %196 = vst [vmem:[%s3347_s29 + $0x1c] sm:$0xf] %v195_v7  ;;  %v219_v19 = vld [vmem:[%s3342_s28 + $0x98] sm:$0xf]  ;;  %v221_v20 = vld [vmem:[%s3342_s28 + $0xa0] sm:$0xf] }
  0x1d   : > { %198 = vst [vmem:[%s3347_s29 + $0x20] sm:$0xf] %v197_v8  ;;  %v223_v21 = vld [vmem:[%s3342_s28 + $0xa8] sm:$0xf]  ;;  %v225_v22 = vld [vmem:[%s3342_s28 + $0xb0] sm:$0xf] }
  0x1e   : > { %200 = vst [vmem:[%s3347_s29 + $0x24] sm:$0xf] %v199_v9  ;;  %v227_v23 = vld [vmem:[%s3342_s28 + $0xb8] sm:$0xf]  ;;  %v229_v24 = vld [vmem:[%s3342_s28 + $0xc0] sm:$0xf] }
  0x1f   : > { %202 = vst [vmem:[%s3347_s29 + $0x28] sm:$0xf] %v201_v10  ;;  %v231_v25 = vld [vmem:[%s3342_s28 + $0xc8] sm:$0xf]  ;;  %v233_v26 = vld [vmem:[%s3342_s28 + $0xd0] sm:$0xf] }
  0x20   : > { %204 = vst [vmem:[%s3347_s29 + $0x2c] sm:$0xf] %v203_v11  ;;  %v235_v27 = vld [vmem:[%s3342_s28 + $0xd8] sm:$0xf]  ;;  %v237_v28 = vld [vmem:[%s3342_s28 + $0xe0] sm:$0xf] }
  0x21   : > { %206 = vst [vmem:[%s3347_s29 + $0x30] sm:$0xf] %v205_v12  ;;  %v239_v29 = vld [vmem:[%s3342_s28 + $0xe8] sm:$0xf]  ;;  %v241_v30 = vld [vmem:[%s3342_s28 + $0xf0] sm:$0xf] }
  0x22   : > { %208 = vst [vmem:[%s3347_s29 + $0x34] sm:$0xf] %v207_v13  ;;  %v243_v31 = vld [vmem:[%s3342_s28 + $0xf8] sm:$0xf]  ;;  %v245_v32 = vld [vmem:[%s3342_s28 + $0x100] sm:$0xf] }
  0x23   : > { %210 = vst [vmem:[%s3347_s29 + $0x38] sm:$0xf] %v209_v14  ;;  %v247_v33 = vld [vmem:[%s3342_s28 + $0x108] sm:$0xf]  ;;  %v249_v34 = vld [vmem:[%s3342_s28 + $0x110] sm:$0xf] }
  0x24   : > { %212 = vst [vmem:[%s3347_s29 + $0x3c] sm:$0xf] %v211_v15  ;;  %v251_v35 = vld [vmem:[%s3342_s28 + $0x118] sm:$0xf]  ;;  %v253_v36 = vld [vmem:[%s3342_s28 + $0x120] sm:$0xf] }
  0x25   : > { %214 = vst [vmem:[%s3347_s29 + $0x40] sm:$0xf] %v213_v16  ;;  %v255_v37 = vld [vmem:[%s3342_s28 + $0x128] sm:$0xf]  ;;  %v257_v38 = vld [vmem:[%s3342_s28 + $0x130] sm:$0xf] }
  0x26   : > { %216 = vst [vmem:[%s3347_s29 + $0x44] sm:$0xf] %v215_v17  ;;  %v259_v39 = vld [vmem:[%s3342_s28 + $0x138] sm:$0xf]  ;;  %v261_v40 = vld [vmem:[%s3342_s28 + $0x140] sm:$0xf] }
  0x27   : > { %218 = vst [vmem:[%s3347_s29 + $0x48] sm:$0xf] %v217_v18  ;;  %v263_v41 = vld [vmem:[%s3342_s28 + $0x148] sm:$0xf]  ;;  %v265_v42 = vld [vmem:[%s3342_s28 + $0x150] sm:$0xf] }
  0x28   : > { %220 = vst [vmem:[%s3347_s29 + $0x4c] sm:$0xf] %v219_v19  ;;  %v267_v43 = vld [vmem:[%s3342_s28 + $0x158] sm:$0xf]  ;;  %v269_v44 = vld [vmem:[%s3342_s28 + $0x160] sm:$0xf] }
  0x29   : > { %222 = vst [vmem:[%s3347_s29 + $0x50] sm:$0xf] %v221_v20  ;;  %v271_v45 = vld [vmem:[%s3342_s28 + $0x168] sm:$0xf]  ;;  %v273_v46 = vld [vmem:[%s3342_s28 + $0x170] sm:$0xf] }
  0x2a   : > { %224 = vst [vmem:[%s3347_s29 + $0x54] sm:$0xf] %v223_v21  ;;  %v275_v47 = vld [vmem:[%s3342_s28 + $0x178] sm:$0xf]  ;;  %v277_v48 = vld [vmem:[%s3342_s28 + $0x180] sm:$0xf] }
  0x2b   : > { %226 = vst [vmem:[%s3347_s29 + $0x58] sm:$0xf] %v225_v22  ;;  %v279_v49 = vld [vmem:[%s3342_s28 + $0x188] sm:$0xf]  ;;  %v281_v50 = vld [vmem:[%s3342_s28 + $0x190] sm:$0xf] }
  0x2c   : > { %228 = vst [vmem:[%s3347_s29 + $0x5c] sm:$0xf] %v227_v23  ;;  %v283_v51 = vld [vmem:[%s3342_s28 + $0x198] sm:$0xf]  ;;  %v285_v52 = vld [vmem:[%s3342_s28 + $0x1a0] sm:$0xf] }
  0x2d   : > { %230 = vst [vmem:[%s3347_s29 + $0x60] sm:$0xf] %v229_v24  ;;  %v287_v53 = vld [vmem:[%s3342_s28 + $0x1a8] sm:$0xf]  ;;  %v289_v54 = vld [vmem:[%s3342_s28 + $0x1b0] sm:$0xf] }
  0x2e   : > { %232 = vst [vmem:[%s3347_s29 + $0x64] sm:$0xf] %v231_v25  ;;  %v291_v55 = vld [vmem:[%s3342_s28 + $0x1b8] sm:$0xf]  ;;  %v293_v56 = vld [vmem:[%s3342_s28 + $0x1c0] sm:$0xf] }
  0x2f   : > { %234 = vst [vmem:[%s3347_s29 + $0x68] sm:$0xf] %v233_v26  ;;  %v295_v57 = vld [vmem:[%s3342_s28 + $0x1c8] sm:$0xf]  ;;  %v297_v58 = vld [vmem:[%s3342_s28 + $0x1d0] sm:$0xf] }
  0x30   : > { %236 = vst [vmem:[%s3347_s29 + $0x6c] sm:$0xf] %v235_v27  ;;  %v299_v59 = vld [vmem:[%s3342_s28 + $0x1d8] sm:$0xf]  ;;  %v301_v60 = vld [vmem:[%s3342_s28 + $0x1e0] sm:$0xf] }
  0x31   : > { %238 = vst [vmem:[%s3347_s29 + $0x70] sm:$0xf] %v237_v28  ;;  %v303_v61 = vld [vmem:[%s3342_s28 + $0x1e8] sm:$0xf]  ;;  %v305_v62 = vld [vmem:[%s3342_s28 + $0x1f0] sm:$0xf] }
  0x32   : > { %240 = vst [vmem:[%s3347_s29 + $0x74] sm:$0xf] %v239_v29  ;;  %v307_v63 = vld [vmem:[%s3342_s28 + $0x1f8] sm:$0xf]  ;;  %v309_v0 = vld [vmem:[%s3342_s28 + $0x200] sm:$0xf] }
  0x33   : > { %242 = vst [vmem:[%s3347_s29 + $0x78] sm:$0xf] %v241_v30  ;;  %v311_v1 = vld [vmem:[%s3342_s28 + $0x208] sm:$0xf]  ;;  %v313_v2 = vld [vmem:[%s3342_s28 + $0x210] sm:$0xf] }
  0x34   : > { %244 = vst [vmem:[%s3347_s29 + $0x7c] sm:$0xf] %v243_v31  ;;  %v315_v3 = vld [vmem:[%s3342_s28 + $0x218] sm:$0xf]  ;;  %v317_v4 = vld [vmem:[%s3342_s28 + $0x220] sm:$0xf] }
  0x35   : > { %246 = vst [vmem:[%s3347_s29 + $0x80] sm:$0xf] %v245_v32  ;;  %v319_v5 = vld [vmem:[%s3342_s28 + $0x228] sm:$0xf]  ;;  %v321_v6 = vld [vmem:[%s3342_s28 + $0x230] sm:$0xf] }
  0x36   : > { %248 = vst [vmem:[%s3347_s29 + $0x84] sm:$0xf] %v247_v33  ;;  %v323_v7 = vld [vmem:[%s3342_s28 + $0x238] sm:$0xf]  ;;  %v325_v8 = vld [vmem:[%s3342_s28 + $0x240] sm:$0xf] }
  0x37   : > { %250 = vst [vmem:[%s3347_s29 + $0x88] sm:$0xf] %v249_v34  ;;  %v327_v9 = vld [vmem:[%s3342_s28 + $0x248] sm:$0xf]  ;;  %v329_v10 = vld [vmem:[%s3342_s28 + $0x250] sm:$0xf] }
  0x38   : > { %252 = vst [vmem:[%s3347_s29 + $0x8c] sm:$0xf] %v251_v35  ;;  %v331_v11 = vld [vmem:[%s3342_s28 + $0x258] sm:$0xf]  ;;  %v333_v12 = vld [vmem:[%s3342_s28 + $0x260] sm:$0xf] }
  0x39   : > { %254 = vst [vmem:[%s3347_s29 + $0x90] sm:$0xf] %v253_v36  ;;  %v335_v13 = vld [vmem:[%s3342_s28 + $0x268] sm:$0xf]  ;;  %v337_v14 = vld [vmem:[%s3342_s28 + $0x270] sm:$0xf] }
  0x3a   : > { %256 = vst [vmem:[%s3347_s29 + $0x94] sm:$0xf] %v255_v37  ;;  %v339_v15 = vld [vmem:[%s3342_s28 + $0x278] sm:$0xf]  ;;  %v341_v16 = vld [vmem:[%s3342_s28 + $0x280] sm:$0xf] }
  0x3b   : > { %258 = vst [vmem:[%s3347_s29 + $0x98] sm:$0xf] %v257_v38  ;;  %v343_v17 = vld [vmem:[%s3342_s28 + $0x288] sm:$0xf]  ;;  %v345_v18 = vld [vmem:[%s3342_s28 + $0x290] sm:$0xf] }
  0x3c   : > { %260 = vst [vmem:[%s3347_s29 + $0x9c] sm:$0xf] %v259_v39  ;;  %v347_v19 = vld [vmem:[%s3342_s28 + $0x298] sm:$0xf]  ;;  %v349_v20 = vld [vmem:[%s3342_s28 + $0x2a0] sm:$0xf] }
  0x3d   : > { %262 = vst [vmem:[%s3347_s29 + $0xa0] sm:$0xf] %v261_v40  ;;  %v351_v21 = vld [vmem:[%s3342_s28 + $0x2a8] sm:$0xf]  ;;  %v353_v22 = vld [vmem:[%s3342_s28 + $0x2b0] sm:$0xf] }
  0x3e   : > { %264 = vst [vmem:[%s3347_s29 + $0xa4] sm:$0xf] %v263_v41  ;;  %v355_v23 = vld [vmem:[%s3342_s28 + $0x2b8] sm:$0xf]  ;;  %v357_v24 = vld [vmem:[%s3342_s28 + $0x2c0] sm:$0xf] }
  0x3f   : > { %266 = vst [vmem:[%s3347_s29 + $0xa8] sm:$0xf] %v265_v42  ;;  %v359_v25 = vld [vmem:[%s3342_s28 + $0x2c8] sm:$0xf]  ;;  %v361_v26 = vld [vmem:[%s3342_s28 + $0x2d0] sm:$0xf] }
  0x40   : > { %268 = vst [vmem:[%s3347_s29 + $0xac] sm:$0xf] %v267_v43  ;;  %v363_v27 = vld [vmem:[%s3342_s28 + $0x2d8] sm:$0xf]  ;;  %v365_v28 = vld [vmem:[%s3342_s28 + $0x2e0] sm:$0xf] }
  0x41   : > { %270 = vst [vmem:[%s3347_s29 + $0xb0] sm:$0xf] %v269_v44  ;;  %v367_v29 = vld [vmem:[%s3342_s28 + $0x2e8] sm:$0xf]  ;;  %v369_v30 = vld [vmem:[%s3342_s28 + $0x2f0] sm:$0xf] }
  0x42   : > { %272 = vst [vmem:[%s3347_s29 + $0xb4] sm:$0xf] %v271_v45  ;;  %v371_v31 = vld [vmem:[%s3342_s28 + $0x2f8] sm:$0xf]  ;;  %v373_v32 = vld [vmem:[%s3342_s28 + $0x300] sm:$0xf] }
  0x43   : > { %274 = vst [vmem:[%s3347_s29 + $0xb8] sm:$0xf] %v273_v46  ;;  %v375_v33 = vld [vmem:[%s3342_s28 + $0x308] sm:$0xf]  ;;  %v377_v34 = vld [vmem:[%s3342_s28 + $0x310] sm:$0xf] }
  0x44   : > { %276 = vst [vmem:[%s3347_s29 + $0xbc] sm:$0xf] %v275_v47  ;;  %v379_v35 = vld [vmem:[%s3342_s28 + $0x318] sm:$0xf]  ;;  %v381_v36 = vld [vmem:[%s3342_s28 + $0x320] sm:$0xf] }
  0x45   : > { %278 = vst [vmem:[%s3347_s29 + $0xc0] sm:$0xf] %v277_v48  ;;  %v383_v37 = vld [vmem:[%s3342_s28 + $0x328] sm:$0xf]  ;;  %v385_v38 = vld [vmem:[%s3342_s28 + $0x330] sm:$0xf] }
  0x46   : > { %280 = vst [vmem:[%s3347_s29 + $0xc4] sm:$0xf] %v279_v49  ;;  %v387_v39 = vld [vmem:[%s3342_s28 + $0x338] sm:$0xf]  ;;  %v389_v40 = vld [vmem:[%s3342_s28 + $0x340] sm:$0xf] }
  0x47   : > { %282 = vst [vmem:[%s3347_s29 + $0xc8] sm:$0xf] %v281_v50  ;;  %v391_v41 = vld [vmem:[%s3342_s28 + $0x348] sm:$0xf]  ;;  %v393_v42 = vld [vmem:[%s3342_s28 + $0x350] sm:$0xf] }
  0x48   : > { %284 = vst [vmem:[%s3347_s29 + $0xcc] sm:$0xf] %v283_v51  ;;  %v395_v43 = vld [vmem:[%s3342_s28 + $0x358] sm:$0xf]  ;;  %v397_v44 = vld [vmem:[%s3342_s28 + $0x360] sm:$0xf] }
  0x49   : > { %286 = vst [vmem:[%s3347_s29 + $0xd0] sm:$0xf] %v285_v52  ;;  %v399_v45 = vld [vmem:[%s3342_s28 + $0x368] sm:$0xf]  ;;  %v401_v46 = vld [vmem:[%s3342_s28 + $0x370] sm:$0xf] }
  0x4a   : > { %288 = vst [vmem:[%s3347_s29 + $0xd4] sm:$0xf] %v287_v53  ;;  %v403_v47 = vld [vmem:[%s3342_s28 + $0x378] sm:$0xf]  ;;  %v405_v48 = vld [vmem:[%s3342_s28 + $0x380] sm:$0xf] }
  0x4b   : > { %290 = vst [vmem:[%s3347_s29 + $0xd8] sm:$0xf] %v289_v54  ;;  %v407_v49 = vld [vmem:[%s3342_s28 + $0x388] sm:$0xf]  ;;  %v409_v50 = vld [vmem:[%s3342_s28 + $0x390] sm:$0xf] }
  0x4c   : > { %292 = vst [vmem:[%s3347_s29 + $0xdc] sm:$0xf] %v291_v55  ;;  %v411_v51 = vld [vmem:[%s3342_s28 + $0x398] sm:$0xf]  ;;  %v413_v52 = vld [vmem:[%s3342_s28 + $0x3a0] sm:$0xf] }
  0x4d   : > { %294 = vst [vmem:[%s3347_s29 + $0xe0] sm:$0xf] %v293_v56  ;;  %v415_v53 = vld [vmem:[%s3342_s28 + $0x3a8] sm:$0xf]  ;;  %v417_v54 = vld [vmem:[%s3342_s28 + $0x3b0] sm:$0xf] }
  0x4e   : > { %296 = vst [vmem:[%s3347_s29 + $0xe4] sm:$0xf] %v295_v57  ;;  %v419_v55 = vld [vmem:[%s3342_s28 + $0x3b8] sm:$0xf]  ;;  %v421_v56 = vld [vmem:[%s3342_s28 + $0x3c0] sm:$0xf] }
  0x4f   : > { %298 = vst [vmem:[%s3347_s29 + $0xe8] sm:$0xf] %v297_v58  ;;  %v423_v57 = vld [vmem:[%s3342_s28 + $0x3c8] sm:$0xf]  ;;  %v425_v58 = vld [vmem:[%s3342_s28 + $0x3d0] sm:$0xf] }
  0x50   : > { %300 = vst [vmem:[%s3347_s29 + $0xec] sm:$0xf] %v299_v59  ;;  %v427_v59 = vld [vmem:[%s3342_s28 + $0x3d8] sm:$0xf] }
  0x51   : > { %302 = vst [vmem:[%s3347_s29 + $0xf0] sm:$0xf] %v301_v60  ;;  %v429_v60 = vld [vmem:[%s3342_s28 + $0x3e0] sm:$0xf] }
  0x52   : > { %304 = vst [vmem:[%s3347_s29 + $0xf4] sm:$0xf] %v303_v61  ;;  %v431_v61 = vld [vmem:[%s3342_s28 + $0x3e8] sm:$0xf] }
  0x53   : > { %306 = vst [vmem:[%s3347_s29 + $0xf8] sm:$0xf] %v305_v62  ;;  %v433_v62 = vld [vmem:[%s3342_s28 + $0x3f0] sm:$0xf] }
  0x54   : > { %308 = vst [vmem:[%s3347_s29 + $0xfc] sm:$0xf] %v307_v63  ;;  %v435_v63 = vld [vmem:[%s3342_s28 + $0x3f8] sm:$0xf] }
  0x55   : > { %310 = vst [vmem:[%s3347_s29 + $0x100] sm:$0xf] %v309_v0  ;;  %v437_v0 = vld [vmem:[%s3342_s28 + $0x400] sm:$0xf] }
  0x56   : > { %312 = vst [vmem:[%s3347_s29 + $0x104] sm:$0xf] %v311_v1  ;;  %v439_v1 = vld [vmem:[%s3342_s28 + $0x408] sm:$0xf] }
  0x57   : > { %314 = vst [vmem:[%s3347_s29 + $0x108] sm:$0xf] %v313_v2  ;;  %v441_v2 = vld [vmem:[%s3342_s28 + $0x410] sm:$0xf] }
  0x58   : > { %316 = vst [vmem:[%s3347_s29 + $0x10c] sm:$0xf] %v315_v3  ;;  %v443_v3 = vld [vmem:[%s3342_s28 + $0x418] sm:$0xf] }
  0x59   : > { %318 = vst [vmem:[%s3347_s29 + $0x110] sm:$0xf] %v317_v4  ;;  %v445_v4 = vld [vmem:[%s3342_s28 + $0x420] sm:$0xf] }
  0x5a   : > { %320 = vst [vmem:[%s3347_s29 + $0x114] sm:$0xf] %v319_v5  ;;  %v447_v5 = vld [vmem:[%s3342_s28 + $0x428] sm:$0xf] }
  0x5b   : > { %322 = vst [vmem:[%s3347_s29 + $0x118] sm:$0xf] %v321_v6  ;;  %v449_v6 = vld [vmem:[%s3342_s28 + $0x430] sm:$0xf] }
  0x5c   : > { %324 = vst [vmem:[%s3347_s29 + $0x11c] sm:$0xf] %v323_v7  ;;  %v451_v7 = vld [vmem:[%s3342_s28 + $0x438] sm:$0xf] }
  0x5d   : > { %326 = vst [vmem:[%s3347_s29 + $0x120] sm:$0xf] %v325_v8  ;;  %v453_v8 = vld [vmem:[%s3342_s28 + $0x440] sm:$0xf] }
  0x5e   : > { %328 = vst [vmem:[%s3347_s29 + $0x124] sm:$0xf] %v327_v9  ;;  %v455_v9 = vld [vmem:[%s3342_s28 + $0x448] sm:$0xf] }
  0x5f   : > { %330 = vst [vmem:[%s3347_s29 + $0x128] sm:$0xf] %v329_v10  ;;  %v457_v10 = vld [vmem:[%s3342_s28 + $0x450] sm:$0xf] }
  0x60   : > { %332 = vst [vmem:[%s3347_s29 + $0x12c] sm:$0xf] %v331_v11  ;;  %v459_v11 = vld [vmem:[%s3342_s28 + $0x458] sm:$0xf] }
  0x61   : > { %334 = vst [vmem:[%s3347_s29 + $0x130] sm:$0xf] %v333_v12  ;;  %v461_v12 = vld [vmem:[%s3342_s28 + $0x460] sm:$0xf] }
  0x62   : > { %336 = vst [vmem:[%s3347_s29 + $0x134] sm:$0xf] %v335_v13  ;;  %v463_v13 = vld [vmem:[%s3342_s28 + $0x468] sm:$0xf] }
  0x63   : > { %338 = vst [vmem:[%s3347_s29 + $0x138] sm:$0xf] %v337_v14  ;;  %v465_v14 = vld [vmem:[%s3342_s28 + $0x470] sm:$0xf] }
  0x64   : > { %340 = vst [vmem:[%s3347_s29 + $0x13c] sm:$0xf] %v339_v15  ;;  %v467_v15 = vld [vmem:[%s3342_s28 + $0x478] sm:$0xf] }
  0x65   : > { %342 = vst [vmem:[%s3347_s29 + $0x140] sm:$0xf] %v341_v16 }
  0x66   : > { %344 = vst [vmem:[%s3347_s29 + $0x144] sm:$0xf] %v343_v17 }
  0x67   : > { %346 = vst [vmem:[%s3347_s29 + $0x148] sm:$0xf] %v345_v18 }
  0x68   : > { %348 = vst [vmem:[%s3347_s29 + $0x14c] sm:$0xf] %v347_v19 }
  0x69   : > { %350 = vst [vmem:[%s3347_s29 + $0x150] sm:$0xf] %v349_v20 }
  0x6a   : > { %352 = vst [vmem:[%s3347_s29 + $0x154] sm:$0xf] %v351_v21 }
  0x6b   : > { %354 = vst [vmem:[%s3347_s29 + $0x158] sm:$0xf] %v353_v22 }
  0x6c   : > { %356 = vst [vmem:[%s3347_s29 + $0x15c] sm:$0xf] %v355_v23 }
  0x6d   : > { %358 = vst [vmem:[%s3347_s29 + $0x160] sm:$0xf] %v357_v24 }
  0x6e   : > { %360 = vst [vmem:[%s3347_s29 + $0x164] sm:$0xf] %v359_v25 }
  0x6f   : > { %362 = vst [vmem:[%s3347_s29 + $0x168] sm:$0xf] %v361_v26 }
  0x70   : > { %364 = vst [vmem:[%s3347_s29 + $0x16c] sm:$0xf] %v363_v27 }
  0x71   : > { %366 = vst [vmem:[%s3347_s29 + $0x170] sm:$0xf] %v365_v28 }
  0x72   : > { %368 = vst [vmem:[%s3347_s29 + $0x174] sm:$0xf] %v367_v29 }
  0x73   : > { %370 = vst [vmem:[%s3347_s29 + $0x178] sm:$0xf] %v369_v30 }
  0x74   : > { %372 = vst [vmem:[%s3347_s29 + $0x17c] sm:$0xf] %v371_v31 }
  0x75   : > { %374 = vst [vmem:[%s3347_s29 + $0x180] sm:$0xf] %v373_v32 }
  0x76   : > { %376 = vst [vmem:[%s3347_s29 + $0x184] sm:$0xf] %v375_v33 }
  0x77   : > { %378 = vst [vmem:[%s3347_s29 + $0x188] sm:$0xf] %v377_v34 }
  0x78   : > { %380 = vst [vmem:[%s3347_s29 + $0x18c] sm:$0xf] %v379_v35 }
  0x79   : > { %382 = vst [vmem:[%s3347_s29 + $0x190] sm:$0xf] %v381_v36 }
  0x7a   : > { %384 = vst [vmem:[%s3347_s29 + $0x194] sm:$0xf] %v383_v37 }
  0x7b   : > { %386 = vst [vmem:[%s3347_s29 + $0x198] sm:$0xf] %v385_v38 }
  0x7c   : > { %388 = vst [vmem:[%s3347_s29 + $0x19c] sm:$0xf] %v387_v39 }
  0x7d   : > { %390 = vst [vmem:[%s3347_s29 + $0x1a0] sm:$0xf] %v389_v40 }
  0x7e   : > { %392 = vst [vmem:[%s3347_s29 + $0x1a4] sm:$0xf] %v391_v41 }
  0x7f   : > { %394 = vst [vmem:[%s3347_s29 + $0x1a8] sm:$0xf] %v393_v42 }
  0x80   : > { %396 = vst [vmem:[%s3347_s29 + $0x1ac] sm:$0xf] %v395_v43 }
  0x81   : > { %398 = vst [vmem:[%s3347_s29 + $0x1b0] sm:$0xf] %v397_v44 }
  0x82   : > { %400 = vst [vmem:[%s3347_s29 + $0x1b4] sm:$0xf] %v399_v45 }
  0x83   : > { %402 = vst [vmem:[%s3347_s29 + $0x1b8] sm:$0xf] %v401_v46 }
  0x84   : > { %404 = vst [vmem:[%s3347_s29 + $0x1bc] sm:$0xf] %v403_v47 }
  0x85   : > { %406 = vst [vmem:[%s3347_s29 + $0x1c0] sm:$0xf] %v405_v48 }
  0x86   : > { %408 = vst [vmem:[%s3347_s29 + $0x1c4] sm:$0xf] %v407_v49 }
  0x87   : > { %410 = vst [vmem:[%s3347_s29 + $0x1c8] sm:$0xf] %v409_v50 }
  0x88   : > { %412 = vst [vmem:[%s3347_s29 + $0x1cc] sm:$0xf] %v411_v51 }
  0x89   : > { %414 = vst [vmem:[%s3347_s29 + $0x1d0] sm:$0xf] %v413_v52 }
  0x8a   : > { %416 = vst [vmem:[%s3347_s29 + $0x1d4] sm:$0xf] %v415_v53 }
  0x8b   : > { %418 = vst [vmem:[%s3347_s29 + $0x1d8] sm:$0xf] %v417_v54 }
  0x8c   : > { %420 = vst [vmem:[%s3347_s29 + $0x1dc] sm:$0xf] %v419_v55 }
  0x8d   : > { %422 = vst [vmem:[%s3347_s29 + $0x1e0] sm:$0xf] %v421_v56 }
  0x8e   : > { %424 = vst [vmem:[%s3347_s29 + $0x1e4] sm:$0xf] %v423_v57 }
  0x8f   : > { %426 = vst [vmem:[%s3347_s29 + $0x1e8] sm:$0xf] %v425_v58 }
  0x90   : > { %428 = vst [vmem:[%s3347_s29 + $0x1ec] sm:$0xf] %v427_v59 }
  0x91   : > { %430 = vst [vmem:[%s3347_s29 + $0x1f0] sm:$0xf] %v429_v60 }
  0x92   : > { %432 = vst [vmem:[%s3347_s29 + $0x1f4] sm:$0xf] %v431_v61 }
  0x93   : > { %434 = vst [vmem:[%s3347_s29 + $0x1f8] sm:$0xf] %v433_v62 }
  0x94   : > { %436 = vst [vmem:[%s3347_s29 + $0x1fc] sm:$0xf] %v435_v63 }
  0x95   : > { %438 = vst [vmem:[%s3347_s29 + $0x200] sm:$0xf] %v437_v0 }
  0x96   : > { %440 = vst [vmem:[%s3347_s29 + $0x204] sm:$0xf] %v439_v1 }
  0x97   : > { %442 = vst [vmem:[%s3347_s29 + $0x208] sm:$0xf] %v441_v2 }
  0x98   : > { %444 = vst [vmem:[%s3347_s29 + $0x20c] sm:$0xf] %v443_v3 }
  0x99   : > { %446 = vst [vmem:[%s3347_s29 + $0x210] sm:$0xf] %v445_v4 }
  0x9a   : > { %448 = vst [vmem:[%s3347_s29 + $0x214] sm:$0xf] %v447_v5 }
  0x9b   : > { %450 = vst [vmem:[%s3347_s29 + $0x218] sm:$0xf] %v449_v6 }
  0x9c   : > { %452 = vst [vmem:[%s3347_s29 + $0x21c] sm:$0xf] %v451_v7 }
  0x9d   : > { %454 = vst [vmem:[%s3347_s29 + $0x220] sm:$0xf] %v453_v8 }
  0x9e   : > { %456 = vst [vmem:[%s3347_s29 + $0x224] sm:$0xf] %v455_v9 }
  0x9f   : > { %458 = vst [vmem:[%s3347_s29 + $0x228] sm:$0xf] %v457_v10 }
  0xa0   : > { %460 = vst [vmem:[%s3347_s29 + $0x22c] sm:$0xf] %v459_v11 }
  0xa1   : > { %462 = vst [vmem:[%s3347_s29 + $0x230] sm:$0xf] %v461_v12 }
  0xa2   : > { %464 = vst [vmem:[%s3347_s29 + $0x234] sm:$0xf] %v463_v13 }
  0xa3   : > { %466 = vst [vmem:[%s3347_s29 + $0x238] sm:$0xf] %v465_v14 }
  0xa4   : > { %468 = vst [vmem:[%s3347_s29 + $0x23c] sm:$0xf] %v467_v15 }
  0xa5 PF: > { %p2446_p8 = scmp.ge.s32.totalorder %s3272_s16, 1  ;;  %p785_p9 = scmp.lt.s32.totalorder %s3272_s16, 3 }
  0xa7   : > { %p786_p10 = pnand %p2446_p8, %p785_p9 }
  0xa8   : > { %s792_s30 = sand.u32 (!%p786_p10), 1, %s3256_s12   ;;  %p830_p11 = scmp.lt.s32.totalorder (!%p786_p10), %s3264_s14, 1 }
  0xa9   : > { %789 = sbr.rel (%p786_p10) target bundleno = 606 (0x25e), region = 69 }
  0xaa   : > { %s3191_s4 = smul.u32 (!%p786_p10), 576, %s792_s30 }
  0xac   : > { %s3639_s5 = scalar_lea.vmem (!%p786_p10), [#allocation2], %s3191_s4 }
  0xae   : > { %v3060_v16 = vld [vmem:[%s3639_s5 + $0x38] sm:$0xff]  ;;  %v3059_v17 = vld [vmem:[%s3639_s5 + $0x30] sm:$0xff]  ;;  %v3058_v18 = vld [vmem:[%s3639_s5 + $0x28] sm:$0xff]  ;;  %s3649_s6 = scalar_select %p830_p11, %s3264_s14, 1 }
  0xaf   : > { %3166 = vmatpush.bf16.msra.mxu1 %v3060_v16  ;;  %3167 = vmatpush.bf16.msra.mxu2 %v3060_v16  ;;  %v3057_v19 = vld [vmem:[%s3639_s5 + $0x20] sm:$0xff]  ;;  %v3056_v20 = vld [vmem:[%s3639_s5 + $0x18] sm:$0xff]  ;;  %v3055_v21 = vld [vmem:[%s3639_s5 + $0x10] sm:$0xff]  ;;  %s2987_s12 = sshll.u32 (%p3329_p6), %s3264_s14, 2 }
  0xb0   : > { %3168 = vmatpush.bf16.msra.mxu3 %v3060_v16  ;;  %1806 = vmatpush.bf16.msra.mxu0 %v3060_v16  ;;  %v3054_v22 = vld [vmem:[%s3639_s5 + $0x8] sm:$0xff]  ;;  %s832_s9 = scalar_lea.vmem %s4240_s2, %s3649_s6  ;;  %v2521_v23 = vld [vmem:[%s4238_s0 + $0x90] sm:$0xf]  ;;  %v3012_v24 = vld [vmem:[%s4238_s0 + $0xb0] sm:$0xf0]  ;;  %s3192_s6 = smul.u32 56, %s792_s30 }
  0xb1   : > { %v3053_v25 = vld [vmem:[%s3639_s5] sm:$0xff]  ;;  %v3084_v28 = vld [vmem:[%s3639_s5 + $0xf8] sm:$0xff]  ;;  %v2665_v32 = vld [vmem:[%s4238_s0 + $0x1b0] sm:$0xf]  ;;  %v2522_v34 = vor.u32 %v3012_v24, %v2521_v23 }
  0xb2   : > { %v2593_v26 = vld [vmem:[%s4238_s0 + $0x120] sm:$0xf]  ;;  %v3030_v27 = vld [vmem:[%s4238_s0 + $0x140] sm:$0xf0]  ;;  %v3076_v31 = vld [vmem:[%s3639_s5 + $0xb8] sm:$0xff] }
  0xb3   : > { %3169 = vmatpush.bf16.msra.mxu1 %v3059_v17  ;;  %3170 = vmatpush.bf16.msra.mxu2 %v3059_v17  ;;  %v2449_v29 = vld [vmem:[%s4238_s0] sm:$0xf]  ;;  %v2994_v30 = vld [vmem:[%s4238_s0 + $0x20] sm:$0xf0]  ;;  %v3048_v33 = vld [vmem:[%s4238_s0 + $0x1d0] sm:$0xf0]  ;;  %v2594_v35 = vor.u32 %v3030_v27, %v2593_v26 }
  0xb4   : > { %3171 = vmatpush.bf16.msra.mxu3 %v3059_v17  ;;  %1807 = vmatpush.bf16.msra.mxu0 %v3059_v17  ;;  %v3068_v36 = vld [vmem:[%s3639_s5 + $0x78] sm:$0xff]  ;;  %v2450_v37 = vor.u32 %v2994_v30, %v2449_v29  ;;  %v2666_v39 = vor.u32 %v3048_v33, %v2665_v32  ;;  %v3083_v40 = vld [vmem:[%s3639_s5 + $0xf0] sm:$0xff]  ;;  %v3082_v44 = vld [vmem:[%s3639_s5 + $0xe8] sm:$0xff] }
  0xb5   : > { %v3092_v38 = vld [vmem:[%s3639_s5 + $0x138] sm:$0xff]  ;;  %v3075_v41 = vld [vmem:[%s3639_s5 + $0xb0] sm:$0xff]  ;;  %v3074_v45 = vld [vmem:[%s3639_s5 + $0xa8] sm:$0xff] }
  0xb6   : > { %v3067_v42 = vld [vmem:[%s3639_s5 + $0x70] sm:$0xff]  ;;  %v3066_v46 = vld [vmem:[%s3639_s5 + $0x68] sm:$0xff]  ;;  %v3081_v48 = vld [vmem:[%s3639_s5 + $0xe0] sm:$0xff] }
  0xb7   : > { %3172 = vmatpush.bf16.msra.mxu1 %v3058_v18  ;;  %3173 = vmatpush.bf16.msra.mxu2 %v3058_v18  ;;  %v3091_v43 = vld [vmem:[%s3639_s5 + $0x130] sm:$0xff]  ;;  %v3090_v47 = vld [vmem:[%s3639_s5 + $0x128] sm:$0xff]  ;;  %v3073_v49 = vld [vmem:[%s3639_s5 + $0xa0] sm:$0xff] }
  0xb8   : > { %3174 = vmatpush.bf16.msra.mxu3 %v3058_v18  ;;  %1808 = vmatpush.bf16.msra.mxu0 %v3058_v18  ;;  %v3065_v50 = vld [vmem:[%s3639_s5 + $0x60] sm:$0xff]  ;;  %v2557_v51 = vld [vmem:[%s4238_s0 + $0xd8] sm:$0xf]  ;;  %v3021_v52 = vld [vmem:[%s4238_s0 + $0xf8] sm:$0xf0] }
  0xb9   : > { %v2629_v53 = vld [vmem:[%s4238_s0 + $0x168] sm:$0xf]  ;;  %v3039_v54 = vld [vmem:[%s4238_s0 + $0x188] sm:$0xf0]  ;;  %v3089_v55 = vld [vmem:[%s3639_s5 + $0x120] sm:$0xff]  ;;  %v2558_v60 = vor.u32 %v3021_v52, %v2557_v51 }
  0xba   : > { %v2485_v56 = vld [vmem:[%s4238_s0 + $0x48] sm:$0xf]  ;;  %v3003_v57 = vld [vmem:[%s4238_s0 + $0x68] sm:$0xf0]  ;;  %v3080_v58 = vld [vmem:[%s3639_s5 + $0xd8] sm:$0xff]  ;;  %v2630_v61 = vor.u32 %v3039_v54, %v2629_v53 }
  0xbb   : > { %3175 = vmatpush.bf16.msra.mxu1 %v3057_v19  ;;  %3176 = vmatpush.bf16.msra.mxu2 %v3057_v19  ;;  %v3072_v59 = vld [vmem:[%s3639_s5 + $0x98] sm:$0xff]  ;;  %v2486_v63 = vor.u32 %v3003_v57, %v2485_v56  ;;  %v3079_v1 = vld [vmem:[%s3639_s5 + $0xd0] sm:$0xff]  ;;  %v3078_v5 = vld [vmem:[%s3639_s5 + $0xc8] sm:$0xff] }
  0xbc   : > { %3177 = vmatpush.bf16.msra.mxu3 %v3057_v19  ;;  %1809 = vmatpush.bf16.msra.mxu0 %v3057_v19  ;;  %v3064_v62 = vld [vmem:[%s3639_s5 + $0x58] sm:$0xff]  ;;  %v3071_v2 = vld [vmem:[%s3639_s5 + $0x90] sm:$0xff]  ;;  %v3070_v6 = vld [vmem:[%s3639_s5 + $0x88] sm:$0xff] }
  0xbd   : > { %v3088_v0 = vld [vmem:[%s3639_s5 + $0x118] sm:$0xff]  ;;  %v3063_v3 = vld [vmem:[%s3639_s5 + $0x50] sm:$0xff]  ;;  %v3062_v7 = vld [vmem:[%s3639_s5 + $0x48] sm:$0xff] }
  0xbe   : > { %v3087_v4 = vld [vmem:[%s3639_s5 + $0x110] sm:$0xff]  ;;  %v3077_v8 = vld [vmem:[%s3639_s5 + $0xc0] sm:$0xff]  ;;  %v3086_v9 = vld [vmem:[%s3639_s5 + $0x108] sm:$0xff] }
  0xbf   : > { %3178 = vmatpush.bf16.msra.mxu1 %v3056_v20  ;;  %3179 = vmatpush.bf16.msra.mxu2 %v3056_v20  ;;  %v3069_v10 = vld [vmem:[%s3639_s5 + $0x80] sm:$0xff]  ;;  %v2991_v12 = vld [vmem:[%s4238_s0 + $0xc] sm:$0xf]  ;;  %v2459_v13 = vld [vmem:[%s4238_s0 + $0x2c] sm:$0xf0] }
  0xc0   : > { %3180 = vmatpush.bf16.msra.mxu3 %v3056_v20  ;;  %1810 = vmatpush.bf16.msra.mxu0 %v3056_v20  ;;  %v3061_v11 = vld [vmem:[%s3639_s5 + $0x40] sm:$0xff]  ;;  %v3108_v15 = vld [vmem:[%s3639_s5 + $0x1b8] sm:$0xff]  ;;  %v2451_v17 = vld [vmem:[%s4238_s0 + $0x24] sm:$0xf0]  ;;  %v2462_v20 = vor.u32 %v2991_v12, %v2459_v13 }
  0xc1   : > { %v2990_v14 = vld [vmem:[%s4238_s0 + $0x4] sm:$0xf]  ;;  %v3116_v16 = vld [vmem:[%s3639_s5 + $0x1f8] sm:$0xff]  ;;  %v2457_v18 = vld [vmem:[%s4238_s0 + $0x8] sm:$0xf] }
  0xc2   : > { %v2995_v19 = vld [vmem:[%s4238_s0 + $0x28] sm:$0xf0]  ;;  %v2996_v23 = vld [vmem:[%s4238_s0 + $0x30] sm:$0xf0]  ;;  %v3100_v24 = vld [vmem:[%s3639_s5 + $0x178] sm:$0xff]  ;;  %v2454_v26 = vor.u32 %v2990_v14, %v2451_v17 }
  0xc3   : > { %3181 = vmatpush.bf16.msra.mxu1 %v3055_v21  ;;  %3182 = vmatpush.bf16.msra.mxu2 %v3055_v21  ;;  %v2458_v27 = vor.u32 %v2995_v19, %v2457_v18  ;;  %v3107_v29 = vld [vmem:[%s3639_s5 + $0x1b0] sm:$0xff]  ;;  %v3106_v33 = vld [vmem:[%s3639_s5 + $0x1a8] sm:$0xff]  ;;  %v3097_v51 = vld [vmem:[%s3639_s5 + $0x160] sm:$0xff] }
  0xc4   : > { %3183 = vmatpush.bf16.msra.mxu3 %v3055_v21  ;;  %1811 = vmatpush.bf16.msra.mxu0 %v3055_v21  ;;  %v3085_v21 = vld [vmem:[%s3639_s5 + $0x100] sm:$0xff]  ;;  %v3115_v30 = vld [vmem:[%s3639_s5 + $0x1f0] sm:$0xff]  ;;  %v3104_v53 = vld [vmem:[%s3639_s5 + $0x198] sm:$0xff] }
  0xc5   : > { %v3123_v32 = vld [vmem:[%s3639_s5 + $0x230] sm:$0xff]  ;;  %v3121_v52 = vld [vmem:[%s3639_s5 + $0x220] sm:$0xff]  ;;  %v3112_v54 = vld [vmem:[%s3639_s5 + $0x1d8] sm:$0xff] }
  0xc6   : > { %v3009_v56 = vld [vmem:[%s4238_s0 + $0x9c] sm:$0xf]  ;;  %v2531_v57 = vld [vmem:[%s4238_s0 + $0xbc] sm:$0xf0]  ;;  %v3022_v13 = vld [vmem:[%s4238_s0 + $0x100] sm:$0xf0] }
  0xc7   : > { %3184 = vmatpush.bf16.msra.mxu1 %v3054_v22  ;;  %3185 = vmatpush.bf16.msra.mxu2 %v3054_v22  ;;  %v2565_v12 = vld [vmem:[%s4238_s0 + $0xe0] sm:$0xf] }
  0xc8   : > { %3186 = vmatpush.bf16.msra.mxu3 %v3054_v22  ;;  %1812 = vmatpush.bf16.msra.mxu0 %v3054_v22  ;;  %v2465_v22 = vld [vmem:[%s4238_s0 + $0x10] sm:$0xf]  ;;  %v2566_v18 = vor.u32 %v3022_v13, %v2565_v12  ;;  %v2992_v12 = vld [vmem:[%s4238_s0 + $0x14] sm:$0xf]  ;;  %v2467_v13 = vld [vmem:[%s4238_s0 + $0x34] sm:$0xf0] }
  0xcb   : > { %3187 = vmatpush.bf16.msra.mxu1 %v3053_v25  ;;  %3188 = vmatpush.bf16.msra.mxu2 %v3053_v25 }
  0xcc   : > { %3189 = vmatpush.bf16.msra.mxu3 %v3053_v25  ;;  %1813 = vmatpush.bf16.msra.mxu0 %v3053_v25  ;;  %v3124_v25 = vld [vmem:[%s3639_s5 + $0x238] sm:$0xff] }
  0xce   : > { %1824 = vmatmul.bf16.vlgmr.msra.gmra.mxu1 %v2522_v34  ;;  %1834 = vmatmul.bf16.vlgmr.msra.gmra.mxu2 %v2594_v35  ;;  %v3114_v34 = vld [vmem:[%s3639_s5 + $0x1e8] sm:$0xff] }
  0xcf   : > { %1894 = vmatpush.bf16.msrb.mxu2 %v3076_v31  ;;  %1850 = vmatpush.bf16.msrb.mxu1 %v3068_v36  ;;  %v3099_v31 = vld [vmem:[%s3639_s5 + $0x170] sm:$0xff]  ;;  %v3098_v35 = vld [vmem:[%s3639_s5 + $0x168] sm:$0xff] }
  0xd0   : > { %1938 = vmatpush.bf16.msrb.mxu3 %v3084_v28  ;;  %1814 = vmatmul.bf16.vlgmr.msra.gmra.mxu0 %v2450_v37  ;;  %v2466_v28 = vor.u32 %v2996_v23, %v2465_v22  ;;  %v3122_v36 = vld [vmem:[%s3639_s5 + $0x228] sm:$0xff]  ;;  %v3105_v37 = vld [vmem:[%s3639_s5 + $0x1a0] sm:$0xff] }
  0xd1   : > { %1982 = vmatpush.bf16.msrb.mxu0 %v3092_v38  ;;  %1844 = vmatmul.bf16.vlgmr.msra.gmra.mxu3 %v2666_v39  ;;  %v3113_v38 = vld [vmem:[%s3639_s5 + $0x1e0] sm:$0xff]  ;;  %v3000_v39 = vld [vmem:[%s4238_s0 + $0x54] sm:$0xf]  ;;  %v3110_v22 = vld [vmem:[%s3639_s5 + $0x1c8] sm:$0xff] }
  0xd2   : > { %v3094_v23 = vld [vmem:[%s3639_s5 + $0x148] sm:$0xff] }
  0xd3   : > { %1895 = vmatpush.bf16.msrb.mxu2 %v3075_v41  ;;  %1851 = vmatpush.bf16.msrb.mxu1 %v3067_v42  ;;  %v2999_v41 = vld [vmem:[%s4238_s0 + $0x4c] sm:$0xf]  ;;  %v2487_v42 = vld [vmem:[%s4238_s0 + $0x6c] sm:$0xf0] }
  0xd4   : > { %1939 = vmatpush.bf16.msrb.mxu3 %v3083_v40  ;;  %v2495_v40 = vld [vmem:[%s4238_s0 + $0x74] sm:$0xf0] }
  0xd5   : > { %1983 = vmatpush.bf16.msrb.mxu0 %v3091_v43  ;;  %v2493_v43 = vld [vmem:[%s4238_s0 + $0x50] sm:$0xf] }
  0xd7   : > { %1896 = vmatpush.bf16.msrb.mxu2 %v3074_v45  ;;  %1852 = vmatpush.bf16.msrb.mxu1 %v3066_v46  ;;  %v2498_v45 = vor.u32 %v3000_v39, %v2495_v40  ;;  %v2501_v46 = vld [vmem:[%s4238_s0 + $0x58] sm:$0xf]  ;;  %v3093_v39 = vld [vmem:[%s3639_s5 + $0x140] sm:$0xff]  ;;  %v3036_v40 = vld [vmem:[%s4238_s0 + $0x174] sm:$0xf] }
  0xd8   : > { %1940 = vmatpush.bf16.msrb.mxu3 %v3082_v44  ;;  %v3004_v44 = vld [vmem:[%s4238_s0 + $0x70] sm:$0xf0] }
  0xd9   : > { %1984 = vmatpush.bf16.msrb.mxu0 %v3090_v47  ;;  %v3005_v47 = vld [vmem:[%s4238_s0 + $0x78] sm:$0xf0] }
  0xdb   : > { %1897 = vmatpush.bf16.msrb.mxu2 %v3073_v49  ;;  %1853 = vmatpush.bf16.msrb.mxu1 %v3065_v50  ;;  %v2494_v49 = vor.u32 %v3004_v44, %v2493_v43  ;;  %v2502_v50 = vor.u32 %v3005_v47, %v2501_v46  ;;  %v2631_v43 = vld [vmem:[%s4238_s0 + $0x18c] sm:$0xf0]  ;;  %v2645_v47 = vld [vmem:[%s4238_s0 + $0x178] sm:$0xf] }
  0xdc   : > { %1941 = vmatpush.bf16.msrb.mxu3 %v3081_v48  ;;  %v2490_v48 = vor.u32 %v2999_v41, %v2487_v42  ;;  %v2639_v41 = vld [vmem:[%s4238_s0 + $0x194] sm:$0xf0]  ;;  %v3035_v42 = vld [vmem:[%s4238_s0 + $0x16c] sm:$0xf]  ;;  %v2637_v44 = vld [vmem:[%s4238_s0 + $0x170] sm:$0xf] }
  0xdd   : > { %1985 = vmatpush.bf16.msrb.mxu0 %v3089_v55  ;;  %v3096_v55 = vld [vmem:[%s3639_s5 + $0x158] sm:$0xff]  ;;  %v2642_v46 = vor.u32 %v3036_v40, %v2639_v41  ;;  %v3007_v40 = vld [vmem:[%s4238_s0 + $0x88] sm:$0xf0] }
  0xde   : > { %1829 = vmatmul.bf16.gmra.mxu1 %v2558_v60  ;;  %1839 = vmatmul.bf16.gmra.mxu2 %v2630_v61  ;;  %v2529_v60 = vld [vmem:[%s4238_s0 + $0x98] sm:$0xf]  ;;  %v3013_v61 = vld [vmem:[%s4238_s0 + $0xb8] sm:$0xf0] }
  0xdf   : > { %1898 = vmatpush.bf16.msrb.mxu2 %v3072_v59  ;;  %1854 = vmatpush.bf16.msrb.mxu1 %v3064_v62  ;;  %v2523_v59 = vld [vmem:[%s4238_s0 + $0xb4] sm:$0xf0]  ;;  %v2534_v62 = vor.u32 %v3009_v56, %v2531_v57 }
  0xe0   : > { %1942 = vmatpush.bf16.msrb.mxu3 %v3080_v58  ;;  %1819 = vmatmul.bf16.gmra.mxu0 %v2486_v63  ;;  %v3008_v58 = vld [vmem:[%s4238_s0 + $0x94] sm:$0xf]  ;;  %v2537_v63 = vld [vmem:[%s4238_s0 + $0xa0] sm:$0xf]  ;;  %v2667_v56 = vld [vmem:[%s4238_s0 + $0x1d4] sm:$0xf0] }
  0xe1   : > { %1986 = vmatpush.bf16.msrb.mxu0 %v3088_v0  ;;  %v3014_v0 = vld [vmem:[%s4238_s0 + $0xc0] sm:$0xf0]  ;;  %v2673_v57 = vld [vmem:[%s4238_s0 + $0x1b8] sm:$0xf] }
  0xe3   : > { %1899 = vmatpush.bf16.msrb.mxu2 %v3071_v2  ;;  %1855 = vmatpush.bf16.msrb.mxu1 %v3063_v3  ;;  %v2530_v2 = vor.u32 %v3013_v61, %v2529_v60  ;;  %v2538_v3 = vor.u32 %v3014_v0, %v2537_v63  ;;  %v2681_v60 = vld [vmem:[%s4238_s0 + $0x1c0] sm:$0xf]  ;;  %v3050_v61 = vld [vmem:[%s4238_s0 + $0x1e0] sm:$0xf0] }
  0xe4   : > { %1943 = vmatpush.bf16.msrb.mxu3 %v3079_v1  ;;  %v2526_v1 = vor.u32 %v3008_v58, %v2523_v59  ;;  %v3049_v58 = vld [vmem:[%s4238_s0 + $0x1d8] sm:$0xf0] }
  0xe5   : > { %1987 = vmatpush.bf16.msrb.mxu0 %v3087_v4  ;;  %v3120_v4 = vld [vmem:[%s3639_s5 + $0x218] sm:$0xff]  ;;  %v2674_v63 = vor.u32 %v3049_v58, %v2673_v57  ;;  %v3011_v58 = vld [vmem:[%s4238_s0 + $0xac] sm:$0xf] }
  0xe7   : > { %1900 = vmatpush.bf16.msrb.mxu2 %v3070_v6  ;;  %1856 = vmatpush.bf16.msrb.mxu1 %v3062_v7  ;;  %v3111_v6 = vld [vmem:[%s3639_s5 + $0x1d0] sm:$0xff] }
  0xe8   : > { %1944 = vmatpush.bf16.msrb.mxu3 %v3078_v5  ;;  %v3103_v5 = vld [vmem:[%s3639_s5 + $0x190] sm:$0xff] }
  0xe9   : > { %1988 = vmatpush.bf16.msrb.mxu0 %v3086_v9  ;;  %v3095_v7 = vld [vmem:[%s3639_s5 + $0x150] sm:$0xff]  ;;  %v2567_v9 = vld [vmem:[%s4238_s0 + $0x104] sm:$0xf0] }
  0xeb   : > { %1901 = vmatpush.bf16.msrb.mxu2 %v3069_v10  ;;  %1857 = vmatpush.bf16.msrb.mxu1 %v3061_v11  ;;  %v3017_v10 = vld [vmem:[%s4238_s0 + $0xdc] sm:$0xf]  ;;  %v2559_v11 = vld [vmem:[%s4238_s0 + $0xfc] sm:$0xf0] }
  0xec   : > { %1945 = vmatpush.bf16.msrb.mxu3 %v3077_v8  ;;  %v3018_v8 = vld [vmem:[%s4238_s0 + $0xe4] sm:$0xf]  ;;  %v2562_v17 = vor.u32 %v3017_v10, %v2559_v11  ;;  %v2993_v10 = vld [vmem:[%s4238_s0 + $0x1c] sm:$0xf]  ;;  %v2475_v11 = vld [vmem:[%s4238_s0 + $0x3c] sm:$0xf0] }
  0xed   : > { %1989 = vmatpush.bf16.msrb.mxu0 %v3085_v21  ;;  %v2570_v14 = vor.u32 %v3018_v8, %v2567_v9  ;;  %v3102_v21 = vld [vmem:[%s3639_s5 + $0x188] sm:$0xff] }
  0xee   : > { %1858 = vmatmul.bf16.vlgmr.msrb.gmra.mxu1 %v2454_v26  ;;  %1902 = vmatmul.bf16.vlgmr.msrb.gmra.mxu2 %v2458_v27  ;;  %v3026_v26 = vld [vmem:[%s4238_s0 + $0x124] sm:$0xf]  ;;  %v2595_v27 = vld [vmem:[%s4238_s0 + $0x144] sm:$0xf0] }
  0xef   : > { %2070 = vmatpush.bf16.msra.mxu2 %v3108_v15  ;;  %1946 = vmatmul.bf16.vlgmr.msrb.gmra.mxu3 %v2462_v20  ;;  %v2573_v15 = vld [vmem:[%s4238_s0 + $0xe8] sm:$0xf]  ;;  %v3119_v20 = vld [vmem:[%s3639_s5 + $0x210] sm:$0xff] }
  0xf0   : > { %2114 = vmatpush.bf16.msra.mxu3 %v3116_v16  ;;  %2026 = vmatpush.bf16.msra.mxu1 %v3100_v24  ;;  %v3023_v16 = vld [vmem:[%s4238_s0 + $0x108] sm:$0xf0] }
  0xf1   : > { %2158 = vmatpush.bf16.msra.mxu0 %v3124_v25  ;;  %v2574_v19 = vor.u32 %v3023_v16, %v2573_v15  ;;  %v3027_v24 = vld [vmem:[%s4238_s0 + $0x12c] sm:$0xf]  ;;  %v2603_v25 = vld [vmem:[%s4238_s0 + $0x14c] sm:$0xf0]  ;;  %v2997_v15 = vld [vmem:[%s4238_s0 + $0x38] sm:$0xf0]  ;;  %v2478_v16 = vor.u32 %v2993_v10, %v2475_v11 }
  0xf2   : > { %1990 = vmatmul.bf16.vlgmr.msrb.gmra.mxu0 %v2466_v28  ;;  %v2601_v28 = vld [vmem:[%s4238_s0 + $0x128] sm:$0xf] }
  0xf3   : > { %2071 = vmatpush.bf16.msra.mxu2 %v3107_v29  ;;  %v3031_v29 = vld [vmem:[%s4238_s0 + $0x148] sm:$0xf0] }
  0xf4   : > { %2115 = vmatpush.bf16.msra.mxu3 %v3115_v30  ;;  %2027 = vmatpush.bf16.msra.mxu1 %v3099_v31  ;;  %v2606_v30 = vor.u32 %v3027_v24, %v2603_v25  ;;  %v2609_v31 = vld [vmem:[%s4238_s0 + $0x130] sm:$0xf] }
  0xf5   : > { %2159 = vmatpush.bf16.msra.mxu0 %v3123_v32  ;;  %v3032_v32 = vld [vmem:[%s4238_s0 + $0x150] sm:$0xf0] }
  0xf7   : > { %2072 = vmatpush.bf16.msra.mxu2 %v3106_v33  ;;  %v2598_v33 = vor.u32 %v3026_v26, %v2595_v27 }
  0xf8   : > { %2116 = vmatpush.bf16.msra.mxu3 %v3114_v34  ;;  %2028 = vmatpush.bf16.msra.mxu1 %v3098_v35  ;;  %v2602_v34 = vor.u32 %v3031_v29, %v2601_v28  ;;  %v2610_v35 = vor.u32 %v3032_v32, %v2609_v31  ;;  %v3002_v32 = vld [vmem:[%s4238_s0 + $0x64] sm:$0xf] }
  0xf9   : > { %2160 = vmatpush.bf16.msra.mxu0 %v3122_v36  ;;  %v3118_v36 = vld [vmem:[%s3639_s5 + $0x208] sm:$0xff] }
  0xfb   : > { %2073 = vmatpush.bf16.msra.mxu2 %v3105_v37  ;;  %v3101_v37 = vld [vmem:[%s3639_s5 + $0x180] sm:$0xff] }
  0xfc   : > { %2117 = vmatpush.bf16.msra.mxu3 %v3113_v38  ;;  %2029 = vmatpush.bf16.msra.mxu1 %v3097_v51  ;;  %v3109_v38 = vld [vmem:[%s3639_s5 + $0x1c0] sm:$0xff] }
  0xfd   : > { %2161 = vmatpush.bf16.msra.mxu0 %v3121_v52  ;;  %v3117_v51 = vld [vmem:[%s3639_s5 + $0x200] sm:$0xff]  ;;  %s2255_s5 = scalar_lea.vmem (%p3329_p6), %s4241_s3, %s2987_s12 }
  0xfe   : > { %1863 = vmatmul.bf16.gmra.mxu1 %v2490_v48  ;;  %1907 = vmatmul.bf16.gmra.mxu2 %v2494_v49  ;;  %v3041_v48 = vld [vmem:[%s4238_s0 + $0x198] sm:$0xf0]  ;;  %v2634_v49 = vor.u32 %v3035_v42, %v2631_v43 }
  0xff   : > { %1951 = vmatmul.bf16.gmra.mxu3 %v2498_v45  ;;  %2074 = vmatpush.bf16.msra.mxu2 %v3104_v53  ;;  %v3040_v45 = vld [vmem:[%s4238_s0 + $0x190] sm:$0xf0]  ;;  %v2646_v52 = vor.u32 %v3041_v48, %v2645_v47  ;;  %v3045_v53 = vld [vmem:[%s4238_s0 + $0x1bc] sm:$0xf] }
 0x100   : > { %2118 = vmatpush.bf16.msra.mxu3 %v3112_v54  ;;  %2030 = vmatpush.bf16.msra.mxu1 %v3096_v55  ;;  %v2675_v54 = vld [vmem:[%s4238_s0 + $0x1dc] sm:$0xf0]  ;;  %v3044_v55 = vld [vmem:[%s4238_s0 + $0x1b4] sm:$0xf] }
 0x101   : > { %2162 = vmatpush.bf16.msra.mxu0 %v3120_v4  ;;  %v2678_v59 = vor.u32 %v3045_v53, %v2675_v54 }
 0x102   : > { %1995 = vmatmul.bf16.gmra.mxu0 %v2502_v50  ;;  %v2638_v50 = vor.u32 %v3040_v45, %v2637_v44 }
 0x103   : > { %2075 = vmatpush.bf16.msra.mxu2 %v3103_v5 }
 0x104   : > { %2119 = vmatpush.bf16.msra.mxu3 %v3111_v6  ;;  %2031 = vmatpush.bf16.msra.mxu1 %v3095_v7 }
 0x105   : > { %2163 = vmatpush.bf16.msra.mxu0 %v3119_v20 }
 0x107   : > { %2076 = vmatpush.bf16.msra.mxu2 %v3102_v21  ;;  %v2470_v21 = vor.u32 %v2992_v12, %v2467_v13 }
 0x108   : > { %2120 = vmatpush.bf16.msra.mxu3 %v3110_v22  ;;  %2032 = vmatpush.bf16.msra.mxu1 %v3094_v23 }
 0x109   : > { %2164 = vmatpush.bf16.msra.mxu0 %v3118_v36  ;;  %v2509_v36 = vld [vmem:[%s4238_s0 + $0x60] sm:$0xf] }
 0x10b   : > { %2077 = vmatpush.bf16.msra.mxu2 %v3101_v37  ;;  %v3006_v37 = vld [vmem:[%s4238_s0 + $0x80] sm:$0xf0] }
 0x10c   : > { %2121 = vmatpush.bf16.msra.mxu3 %v3109_v38  ;;  %2033 = vmatpush.bf16.msra.mxu1 %v3093_v39  ;;  %v2517_v39 = vld [vmem:[%s4238_s0 + $0x68] sm:$0xf]  ;;  %v2510_v45 = vor.u32 %v3006_v37, %v2509_v36  ;;  %v2583_v36 = vld [vmem:[%s4238_s0 + $0x114] sm:$0xf0]  ;;  %v3019_v37 = vld [vmem:[%s4238_s0 + $0xec] sm:$0xf] }
 0x10d   : > { %2165 = vmatpush.bf16.msra.mxu0 %v3117_v51  ;;  %v2518_v47 = vor.u32 %v3007_v40, %v2517_v39  ;;  %v2575_v39 = vld [vmem:[%s4238_s0 + $0x10c] sm:$0xf0] }
 0x10e   : > { %1868 = vmatmul.bf16.gmra.mxu1 %v2526_v1  ;;  %1912 = vmatmul.bf16.gmra.mxu2 %v2530_v2  ;;  %v2682_v1 = vor.u32 %v3050_v61, %v2681_v60  ;;  %v3010_v60 = vld [vmem:[%s4238_s0 + $0xa4] sm:$0xf]  ;;  %v2581_v40 = vld [vmem:[%s4238_s0 + $0xf0] sm:$0xf] }
 0x10f   : > { %1956 = vmatmul.bf16.gmra.mxu3 %v2534_v62  ;;  %v2670_v62 = vor.u32 %v3044_v55, %v2667_v56 }
 0x112   : > { %2000 = vmatmul.bf16.gmra.mxu0 %v2538_v3  ;;  %v3938_v3 = vld [vmem:[%s832_s9] ss:$0 sm:$0xff]  ;;  %s4183_s9 = scalar_lea.vmem [#allocation3], %s3192_s6 }
 0x11e   : > { %1873 = vmatmul.bf16.gmra.mxu1 %v2562_v17  ;;  %1917 = vmatmul.bf16.gmra.mxu2 %v2566_v18  ;;  %v2481_v17 = vld [vmem:[%s4238_s0 + $0x20] sm:$0xf]  ;;  %v2998_v18 = vld [vmem:[%s4238_s0 + $0x40] sm:$0xf0] }
 0x11f   : > { %1961 = vmatmul.bf16.gmra.mxu3 %v2570_v14  ;;  %v2473_v14 = vld [vmem:[%s4238_s0 + $0x18] sm:$0xf]  ;;  %v2482_v24 = vor.u32 %v2998_v18, %v2481_v17 }
 0x120   : > { %v2474_v22 = vor.u32 %v2997_v15, %v2473_v14 }
 0x122   : > { %2005 = vmatmul.bf16.gmra.mxu0 %v2574_v19 }
 0x12e   : > { %1878 = vmatmul.bf16.gmra.mxu1 %v2598_v33  ;;  %1922 = vmatmul.bf16.gmra.mxu2 %v2602_v34  ;;  %v2511_v33 = vld [vmem:[%s4238_s0 + $0x84] sm:$0xf0]  ;;  %v3001_v34 = vld [vmem:[%s4238_s0 + $0x5c] sm:$0xf] }
 0x12f   : > { %1966 = vmatmul.bf16.gmra.mxu3 %v2606_v30  ;;  %v2514_v38 = vor.u32 %v3002_v32, %v2511_v33 }
 0x132   : > { %2010 = vmatmul.bf16.gmra.mxu0 %v2610_v35  ;;  %v2503_v35 = vld [vmem:[%s4238_s0 + $0x7c] sm:$0xf0] }
 0x133   : > { %v2506_v44 = vor.u32 %v3001_v34, %v2503_v35  ;;  %v3020_v35 = vld [vmem:[%s4238_s0 + $0xf4] sm:$0xf] }
 0x13e   : > { %1883 = vmatmul.bf16.gmra.mxu1 %v2634_v49  ;;  %1927 = vmatmul.bf16.gmra.mxu2 %v2638_v50 }
 0x13f   : > { %1971 = vmatmul.bf16.gmra.mxu3 %v2642_v46 }
 0x142   : > { %2015 = vmatmul.bf16.gmra.mxu0 %v2646_v52 }
 0x14b   : > { %v3931_v0 = vpop.f32.mrf.mxu1 }
 0x14d   : > { %v1815_v2 = vpop.f32.mrf.mxu0 }
 0x14e   : > { %1888 = vmatmul.bf16.gmra.mxu1 %v2670_v62  ;;  %1932 = vmatmul.bf16.gmra.mxu2 %v2674_v63  ;;  %v1816_v42 = vadd.f32 %v3938_v3, %v1815_v2  ;;  %v2539_v63 = vld [vmem:[%s4238_s0 + $0xc4] sm:$0xf0]  ;;  %v3015_v2 = vld [vmem:[%s4238_s0 + $0xc8] sm:$0xf0] }
 0x14f   : > { %1976 = vmatmul.bf16.gmra.mxu3 %v2678_v59  ;;  %v2547_v59 = vld [vmem:[%s4238_s0 + $0xcc] sm:$0xf0]  ;;  %v2542_v13 = vor.u32 %v3010_v60, %v2539_v63 }
 0x151   : > { %v1835_v4 = vpop.f32.mrf.mxu2 }
 0x152   : > { %2020 = vmatmul.bf16.gmra.mxu0 %v2682_v1  ;;  %v3941_v5 = vadd.f32 %v3938_v3, %v1835_v4  ;;  %v2545_v1 = vld [vmem:[%s4238_s0 + $0xa8] sm:$0xf]  ;;  %v2550_v4 = vor.u32 %v3011_v58, %v2547_v59 }
 0x153   : > { %v3943_v6 = vpop.f32.mrf.mxu1  ;;  %v2546_v14 = vor.u32 %v3015_v2, %v2545_v1  ;;  %v3029_v2 = vld [vmem:[%s4238_s0 + $0x13c] sm:$0xf] }
 0x154   : > { %v1845_v7 = vpop.f32.mrf.mxu3  ;;  %v1828_v59 = vadd.f32 %v3938_v3, %v3943_v6 }
 0x155   : > { %v1817_v8 = vpop.f32.mrf.mxu0  ;;  %v3946_v9 = vadd.f32 %v3938_v3, %v1845_v7  ;;  %v2553_v7 = vld [vmem:[%s4238_s0 + $0xb0] sm:$0xf] }
 0x156   : > { %v1818_v52 = vadd.f32 %v3938_v3, %v1817_v8  ;;  %v3016_v8 = vld [vmem:[%s4238_s0 + $0xd0] sm:$0xf0] }
 0x159   : > { %v1837_v19 = vpop.f32.mrf.mxu2 }
 0x15a   : > { %v3973_v20 = vadd.f32 %v3938_v3, %v1837_v19 }
 0x15b   : > { %v3975_v23 = vpop.f32.mrf.mxu1 }
 0x15c   : > { %v1847_v25 = vpop.f32.mrf.mxu3 }
 0x15d   : > { %v1820_v26 = vpop.f32.mrf.mxu0  ;;  %v3978_v27 = vadd.f32 %v3938_v3, %v1847_v25 }
 0x15e   : > { %2034 = vmatmul.bf16.vlgmr.msra.gmra.mxu1 %v2470_v21  ;;  %2078 = vmatmul.bf16.vlgmr.msra.gmra.mxu2 %v2474_v22  ;;  %v1821_v11 = vadd.f32 %v3938_v3, %v1820_v26 }
 0x15f   : > { %2122 = vmatmul.bf16.vlgmr.msra.gmra.mxu3 %v2478_v16  ;;  %v2554_v16 = vor.u32 %v3016_v8, %v2553_v7  ;;  %v3028_v7 = vld [vmem:[%s4238_s0 + $0x134] sm:$0xf] }
 0x161   : > { %v1840_v28 = vpop.f32.mrf.mxu2 }
 0x162   : > { %2166 = vmatmul.bf16.vlgmr.msra.gmra.mxu0 %v2482_v24  ;;  %v3981_v29 = vadd.f32 %v3938_v3, %v1840_v28 }
 0x163   : > { %v3983_v30 = vpop.f32.mrf.mxu1 }
 0x165   : > { %v1822_v31 = vpop.f32.mrf.mxu0 }
 0x166   : > { %v1823_v25 = vadd.f32 %v3938_v3, %v1822_v31 }
 0x169   : > { %v1842_v41 = vpop.f32.mrf.mxu2 }
 0x16a   : > { %v4011_v43 = vadd.f32 %v3938_v3, %v1842_v41  ;;  %v3024_v41 = vld [vmem:[%s4238_s0 + $0x110] sm:$0xf0] }
 0x16b   : > { %v1859_v46 = vpop.f32.mrf.mxu1 }
 0x16c   : > { %v1860_v48 = vadd.f32 %v1859_v46, %v1816_v42  ;;  %v2586_v42 = vor.u32 %v3020_v35, %v2583_v36  ;;  %v1833_v36 = vadd.f32 %v3938_v3, %v3983_v30  ;;  %v2647_v30 = vld [vmem:[%s4238_s0 + $0x19c] sm:$0xf0] }
 0x16e   : > { %2039 = vmatmul.bf16.gmra.mxu1 %v2506_v44  ;;  %2083 = vmatmul.bf16.gmra.mxu2 %v2510_v45  ;;  %v2589_v44 = vld [vmem:[%s4238_s0 + $0xf8] sm:$0xf]  ;;  %v3025_v45 = vld [vmem:[%s4238_s0 + $0x118] sm:$0xf0] }
 0x16f   : > { %2127 = vmatmul.bf16.gmra.mxu3 %v2514_v38  ;;  %v1991_v49 = vpop.f32.mrf.mxu0 }
 0x171   : > { %v1903_v51 = vpop.f32.mrf.mxu2 }
 0x172   : > { %v1947_v50 = vpop.f32.mrf.mxu3  ;;  %2171 = vmatmul.bf16.gmra.mxu0 %v2518_v47  ;;  %v1904_v53 = vadd.f32 %v1903_v51, %v1860_v48  ;;  %v1826_v47 = vadd.f32 %v3938_v3, %v3931_v0 }
 0x173   : > { %v1861_v54 = vpop.f32.mrf.mxu1 }
 0x174   : > { %v1948_v55 = vadd.f32 %v1947_v50, %v1904_v53  ;;  %v1862_v56 = vadd.f32 %v1861_v54, %v1818_v52  ;;  %v2582_v50 = vor.u32 %v3024_v41, %v2581_v40  ;;  %v2590_v52 = vor.u32 %v3025_v45, %v2589_v44  ;;  %v3038_v41 = vld [vmem:[%s4238_s0 + $0x184] sm:$0xf]  ;;  %v3037_v44 = vld [vmem:[%s4238_s0 + $0x17c] sm:$0xf] }
 0x176   : > { %v4023_v61 = vadd.f32 %v1991_v49, %v1948_v55  ;;  %v2578_v49 = vor.u32 %v3019_v37, %v2575_v39 }
 0x177   : > { %v1993_v57 = vpop.f32.mrf.mxu0 }
 0x179   : > { %v1905_v10 = vpop.f32.mrf.mxu2 }
 0x17a   : > { %v1949_v62 = vpop.f32.mrf.mxu3  ;;  %v1906_v12 = vadd.f32 %v1905_v10, %v1862_v56  ;;  %v2611_v10 = vld [vmem:[%s4238_s0 + $0x154] sm:$0xf0] }
 0x17b   : > { %v1864_v15 = vpop.f32.mrf.mxu1 }
 0x17c   : > { %v1950_v17 = vadd.f32 %v1949_v62, %v1906_v12  ;;  %v1865_v18 = vadd.f32 %v1864_v15, %v1821_v11  ;;  %v2617_v11 = vld [vmem:[%s4238_s0 + $0x138] sm:$0xf]  ;;  %v3033_v12 = vld [vmem:[%s4238_s0 + $0x158] sm:$0xf0]  ;;  %v3034_v15 = vld [vmem:[%s4238_s0 + $0x160] sm:$0xf0] }
 0x17e   : > { %2044 = vmatmul.bf16.gmra.mxu1 %v2542_v13  ;;  %2088 = vmatmul.bf16.gmra.mxu2 %v2546_v14  ;;  %v4041_v21 = vadd.f32 %v1993_v57, %v1950_v17  ;;  %v2625_v14 = vld [vmem:[%s4238_s0 + $0x140] sm:$0xf]  ;;  %v1831_v17 = vadd.f32 %v3938_v3, %v3975_v23 }
 0x17f   : > { %2132 = vmatmul.bf16.gmra.mxu3 %v2550_v4  ;;  %v1996_v19 = vpop.f32.mrf.mxu0  ;;  %v2619_v4 = vld [vmem:[%s4238_s0 + $0x15c] sm:$0xf0] }
 0x180   : > { %v2622_v13 = vor.u32 %v3029_v2, %v2619_v4 }
 0x181   : > { %v1908_v24 = vpop.f32.mrf.mxu2 }
 0x182   : > { %v1952_v22 = vpop.f32.mrf.mxu3  ;;  %2176 = vmatmul.bf16.gmra.mxu0 %v2554_v16  ;;  %v1909_v28 = vadd.f32 %v1908_v24, %v1865_v18 }
 0x183   : > { %v1866_v26 = vpop.f32.mrf.mxu1 }
 0x184   : > { %v1953_v32 = vadd.f32 %v1952_v22, %v1909_v28  ;;  %v1867_v33 = vadd.f32 %v1866_v26, %v1823_v25  ;;  %v2618_v22 = vor.u32 %v3033_v12, %v2617_v11  ;;  %v2626_v25 = vor.u32 %v3034_v15, %v2625_v14  ;;  %v3046_v11 = vld [vmem:[%s4238_s0 + $0x1c4] sm:$0xf]  ;;  %v2689_v14 = vld [vmem:[%s4238_s0 + $0x1c8] sm:$0xf]  ;;  %v3051_v15 = vld [vmem:[%s4238_s0 + $0x1e8] sm:$0xf0] }
 0x186   : > { %v4053_v38 = vadd.f32 %v1996_v19, %v1953_v32  ;;  %v2614_v19 = vor.u32 %v3028_v7, %v2611_v10  ;;  %v3047_v10 = vld [vmem:[%s4238_s0 + $0x1cc] sm:$0xf] }
 0x187   : > { %v1998_v34 = vpop.f32.mrf.mxu0 }
 0x189   : > { %v1910_v46 = vpop.f32.mrf.mxu2 }
 0x18a   : > { %v1954_v31 = vpop.f32.mrf.mxu3  ;;  %v1911_v48 = vadd.f32 %v1910_v46, %v1867_v33  ;;  %v2653_v46 = vld [vmem:[%s4238_s0 + $0x180] sm:$0xf] }
 0x18b   : > { %v1869_v51 = vpop.f32.mrf.mxu1 }
 0x18c   : > { %v1955_v53 = vadd.f32 %v1954_v31, %v1911_v48  ;;  %v1870_v54 = vadd.f32 %v1869_v51, %v1826_v47  ;;  %v3042_v47 = vld [vmem:[%s4238_s0 + $0x1a0] sm:$0xf0] }
 0x18e   : > { %2049 = vmatmul.bf16.gmra.mxu1 %v2578_v49  ;;  %2093 = vmatmul.bf16.gmra.mxu2 %v2582_v50  ;;  %v4072_v56 = vadd.f32 %v1998_v34, %v1955_v53  ;;  %v2661_v49 = vld [vmem:[%s4238_s0 + $0x188] sm:$0xf]  ;;  %v3043_v50 = vld [vmem:[%s4238_s0 + $0x1a8] sm:$0xf0]  ;;  %v2650_v53 = vor.u32 %v3037_v44, %v2647_v30 }
 0x18f   : > { %2137 = vmatmul.bf16.gmra.mxu3 %v2586_v42  ;;  %v2001_v55 = vpop.f32.mrf.mxu0  ;;  %v2655_v42 = vld [vmem:[%s4238_s0 + $0x1a4] sm:$0xf0] }
 0x190   : > { %v2658_v48 = vor.u32 %v3038_v41, %v2655_v42 }
 0x191   : > { %v1913_v58 = vpop.f32.mrf.mxu2 }
 0x192   : > { %v1957_v57 = vpop.f32.mrf.mxu3  ;;  %2181 = vmatmul.bf16.gmra.mxu0 %v2590_v52  ;;  %v1914_v0 = vadd.f32 %v1913_v58, %v1870_v54  ;;  %v2654_v54 = vor.u32 %v3042_v47, %v2653_v46 }
 0x193   : > { %v1871_v60 = vpop.f32.mrf.mxu1 }
 0x194   : > { %v1958_v62 = vadd.f32 %v1957_v57, %v1914_v0  ;;  %v1872_v63 = vadd.f32 %v1871_v60, %v1828_v59  ;;  %v2662_v57 = vor.u32 %v3043_v50, %v2661_v49 }
 0x196   : > { %v4085_v8 = vadd.f32 %v2001_v55, %v1958_v62 }
 0x197   : > { %v2003_v1 = vpop.f32.mrf.mxu0 }
 0x199   : > { %v1915_v16 = vpop.f32.mrf.mxu2 }
 0x19a   : > { %v1959_v6 = vpop.f32.mrf.mxu3  ;;  %v1916_v18 = vadd.f32 %v1915_v16, %v1872_v63 }
 0x19b   : > { %v1874_v24 = vpop.f32.mrf.mxu1 }
 0x19c   : > { %v1960_v28 = vadd.f32 %v1959_v6, %v1916_v18  ;;  %v1875_v26 = vadd.f32 %v1874_v24, %v1831_v17  ;;  %v2697_v17 = vld [vmem:[%s4238_s0 + $0x1d0] sm:$0xf]  ;;  %v3052_v18 = vld [vmem:[%s4238_s0 + $0x1f0] sm:$0xf0] }
 0x19e   : > { %2054 = vmatmul.bf16.gmra.mxu1 %v2614_v19  ;;  %2098 = vmatmul.bf16.gmra.mxu2 %v2618_v22  ;;  %v4104_v33 = vadd.f32 %v2003_v1, %v1960_v28 }
 0x19f   : > { %2142 = vmatmul.bf16.gmra.mxu3 %v2622_v13  ;;  %v2006_v32 = vpop.f32.mrf.mxu0 }
 0x1a1   : > { %v1918_v35 = vpop.f32.mrf.mxu2 }
 0x1a2   : > { %v1962_v34 = vpop.f32.mrf.mxu3  ;;  %2186 = vmatmul.bf16.gmra.mxu0 %v2626_v25  ;;  %v1919_v23 = vadd.f32 %v1918_v35, %v1875_v26  ;;  %v2690_v25 = vor.u32 %v3051_v15, %v2689_v14  ;;  %v2698_v26 = vor.u32 %v3052_v18, %v2697_v17 }
 0x1a3   : > { %v1876_v37 = vpop.f32.mrf.mxu1 }
 0x1a4   : > { %v1963_v31 = vadd.f32 %v1962_v34, %v1919_v23  ;;  %v1877_v39 = vadd.f32 %v1876_v37, %v1833_v36 }
 0x1a6   : > { %v4117_v45 = vadd.f32 %v2006_v32, %v1963_v31 }
 0x1a7   : > { %v2008_v40 = vpop.f32.mrf.mxu0 }
 0x1a9   : > { %v1920_v51 = vpop.f32.mrf.mxu2 }
 0x1aa   : > { %v1964_v3 = vpop.f32.mrf.mxu3  ;;  %v1921_v52 = vadd.f32 %v1920_v51, %v1877_v39 }
 0x1ab   : > { %v1879_v55 = vpop.f32.mrf.mxu1 }
 0x1ac   : > { %v1965_v58 = vadd.f32 %v1964_v3, %v1921_v52  ;;  %v1880_v59 = vadd.f32 %v1879_v55, %v3941_v5  ;;  %v2691_v5 = vld [vmem:[%s4238_s0 + $0x1ec] sm:$0xf0] }
 0x1ad   : > { %v2694_v16 = vor.u32 %v3047_v10, %v2691_v5 }
 0x1ae   : > { %2059 = vmatmul.bf16.gmra.mxu1 %v2650_v53  ;;  %2103 = vmatmul.bf16.gmra.mxu2 %v2654_v54  ;;  %v4135_v60 = vadd.f32 %v2008_v40, %v1965_v58 }
 0x1af   : > { %2147 = vmatmul.bf16.gmra.mxu3 %v2658_v48  ;;  %v2011_v0 = vpop.f32.mrf.mxu0 }
 0x1b1   : > { %v1923_v63 = vpop.f32.mrf.mxu2 }
 0x1b2   : > { %v1967_v62 = vpop.f32.mrf.mxu3  ;;  %2191 = vmatmul.bf16.gmra.mxu0 %v2662_v57  ;;  %v1924_v1 = vadd.f32 %v1923_v63, %v1880_v59 }
 0x1b3   : > { %v1881_v2 = vpop.f32.mrf.mxu1 }
 0x1b4   : > { %v1968_v4 = vadd.f32 %v1967_v62, %v1924_v1  ;;  %v1882_v7 = vadd.f32 %v1881_v2, %v3973_v20  ;;  %v2683_v20 = vld [vmem:[%s4238_s0 + $0x1e4] sm:$0xf0] }
 0x1b5   : > { %v2686_v24 = vor.u32 %v3046_v11, %v2683_v20 }
 0x1b6   : > { %v4147_v12 = vadd.f32 %v2011_v0, %v1968_v4 }
 0x1b7   : > { %v2013_v6 = vpop.f32.mrf.mxu0 }
 0x1b9   : > { %v1925_v19 = vpop.f32.mrf.mxu2 }
 0x1ba   : > { %v1969_v13 = vpop.f32.mrf.mxu3  ;;  %v1926_v22 = vadd.f32 %v1925_v19, %v1882_v7 }
 0x1bb   : > { %v1884_v28 = vpop.f32.mrf.mxu1 }
 0x1bc   : > { %v1970_v32 = vadd.f32 %v1969_v13, %v1926_v22  ;;  %v1885_v34 = vadd.f32 %v1884_v28, %v3981_v29 }
 0x1be   : > { %2064 = vmatmul.bf16.gmra.mxu1 %v2686_v24  ;;  %2108 = vmatmul.bf16.gmra.mxu2 %v2690_v25  ;;  %v4165_v36 = vadd.f32 %v2013_v6, %v1970_v32 }
 0x1bf   : > { %2152 = vmatmul.bf16.gmra.mxu3 %v2694_v16  ;;  %v2016_v35 = vpop.f32.mrf.mxu0 }
 0x1c1   : > { %v1928_v37 = vpop.f32.mrf.mxu2 }
 0x1c2   : > { %v1972_v23 = vpop.f32.mrf.mxu3  ;;  %2196 = vmatmul.bf16.gmra.mxu0 %v2698_v26  ;;  %v1929_v31 = vadd.f32 %v1928_v37, %v1885_v34 }
 0x1c3   : > { %v1886_v39 = vpop.f32.mrf.mxu1 }
 0x1c4   : > { %v1973_v40 = vadd.f32 %v1972_v23, %v1929_v31  ;;  %v1887_v41 = vadd.f32 %v1886_v39, %v4011_v43 }
 0x1c6   : > { %v4168_v44 = vadd.f32 %v2016_v35, %v1973_v40 }
 0x1c7   : > { %v2018_v42 = vpop.f32.mrf.mxu0 }
 0x1c9   : > { %v1930_v30 = vpop.f32.mrf.mxu2 }
 0x1ca   : > { %v1974_v3 = vpop.f32.mrf.mxu3  ;;  %v1931_v29 = vadd.f32 %v1930_v30, %v1887_v41 }
 0x1cb   : > { %v1889_v46 = vpop.f32.mrf.mxu1 }
 0x1cc   : > { %v1975_v47 = vadd.f32 %v1974_v3, %v1931_v29  ;;  %v1890_v48 = vadd.f32 %v1889_v46, %v3946_v9 }
 0x1ce   : > { %v4171_v50 = vadd.f32 %v2018_v42, %v1975_v47 }
 0x1cf   : > { %v2021_v49 = vpop.f32.mrf.mxu0 }
 0x1d1   : > { %v1933_v52 = vpop.f32.mrf.mxu2 }
 0x1d2   : > { %v1977_v51 = vpop.f32.mrf.mxu3  ;;  %v1934_v53 = vadd.f32 %v1933_v52, %v1890_v48 }
 0x1d3   : > { %v1891_v54 = vpop.f32.mrf.mxu1 }
 0x1d4   : > { %v1978_v55 = vadd.f32 %v1977_v51, %v1934_v53  ;;  %v1892_v43 = vadd.f32 %v1891_v54, %v3978_v27 }
 0x1d6   : > { %v4174_v58 = vadd.f32 %v2021_v49, %v1978_v55 }
 0x1d7   : > { %v2023_v57 = vpop.f32.mrf.mxu0 }
 0x1d9   : > { %v1935_v0 = vpop.f32.mrf.mxu2 }
 0x1da   : > { %v1979_v59 = vpop.f32.mrf.mxu3  ;;  %v1936_v62 = vadd.f32 %v1935_v0, %v1892_v43 }
 0x1db   : > { %v2035_v63 = vpop.f32.mrf.mxu1 }
 0x1dc   : > { %v1980_v1 = vadd.f32 %v1979_v59, %v1936_v62  ;;  %v2036_v6 = vadd.f32 %v2035_v63, %v4023_v61 }
 0x1de   : > { %v4176_v9 = vadd.f32 %v2023_v57, %v1980_v1 }
 0x1df   : > { %v2167_v2 = vpop.f32.mrf.mxu0 }
 0x1e1   : > { %v2079_v7 = vpop.f32.mrf.mxu2 }
 0x1e2   : > { %v2123_v4 = vpop.f32.mrf.mxu3  ;;  %v2080_v5 = vadd.f32 %v2079_v7, %v2036_v6 }
 0x1e3   : > { %v2037_v10 = vpop.f32.mrf.mxu1 }
 0x1e4   : > { %v2124_v13 = vadd.f32 %v2123_v4, %v2080_v5  ;;  %v2038_v20 = vadd.f32 %v2037_v10, %v4041_v21 }
 0x1e6   : > { %v2168_v17 = vadd.f32 %v2167_v2, %v2124_v13 }
 0x1e7   : > { %v2169_v11 = vpop.f32.mrf.mxu0 }
 0x1e8   : > { %v2202_v25 = vmax.f32 %v2168_v17, 0.0 }
 0x1e9   : > { %v2081_v14 = vpop.f32.mrf.mxu2 }
 0x1ea   : > { %v2125_v27 = vpop.f32.mrf.mxu3  ;;  %v2082_v15 = vadd.f32 %v2081_v14, %v2038_v20 }
 0x1eb   : > { %v2040_v16 = vpop.f32.mrf.mxu1 }
 0x1ec   : > { %v2126_v18 = vadd.f32 %v2125_v27, %v2082_v15  ;;  %v2041_v32 = vadd.f32 %v2040_v16, %v4053_v38 }
 0x1ee   : > { %v2170_v22 = vadd.f32 %v2169_v11, %v2126_v18 }
 0x1ef   : > { %v2172_v19 = vpop.f32.mrf.mxu0 }
 0x1f0   : > { %v2203_v28 = vmax.f32 %v2170_v22, 0.0 }
 0x1f1   : > { %v2084_v61 = vpop.f32.mrf.mxu2 }
 0x1f2   : > { %v2128_v24 = vpop.f32.mrf.mxu3  ;;  %v3128_v26 = vpack.c.bf16 %v2203_v28, %v2202_v25  ;;  %v2085_v21 = vadd.f32 %v2084_v61, %v2041_v32 }
 0x1f3   : > { %v2042_v34 = vpop.f32.mrf.mxu1 }
 0x1f4   : > { %3129 = vst [vmem:[%s4183_s9] sm:$0xff] %v3128_v26   ;;  %v2129_v37 = vadd.f32 %v2128_v24, %v2085_v21  ;;  %v2043_v31 = vadd.f32 %v2042_v34, %v4072_v56 }
 0x1f6   : > { %v2173_v42 = vadd.f32 %v2172_v19, %v2129_v37 }
 0x1f7   : > { %v2174_v35 = vpop.f32.mrf.mxu0 }
 0x1f8   : > { %v2204_v46 = vmax.f32 %v2173_v42, 0.0 }
 0x1f9   : > { %v2086_v39 = vpop.f32.mrf.mxu2 }
 0x1fa   : > { %v2130_v23 = vpop.f32.mrf.mxu3  ;;  %v2087_v40 = vadd.f32 %v2086_v39, %v2043_v31 }
 0x1fb   : > { %v2045_v41 = vpop.f32.mrf.mxu1 }
 0x1fc   : > { %v2131_v3 = vadd.f32 %v2130_v23, %v2087_v40  ;;  %v2046_v51 = vadd.f32 %v2045_v41, %v4085_v8 }
 0x1fe   : > { %v2175_v29 = vadd.f32 %v2174_v35, %v2131_v3 }
 0x1ff   : > { %v2177_v30 = vpop.f32.mrf.mxu0 }
 0x200   : > { %v2205_v47 = vmax.f32 %v2175_v29, 0.0 }
 0x201   : > { %v2089_v48 = vpop.f32.mrf.mxu2 }
 0x202   : > { %v2133_v38 = vpop.f32.mrf.mxu3  ;;  %v3133_v49 = vpack.c.bf16 %v2205_v47, %v2204_v46  ;;  %v2090_v53 = vadd.f32 %v2089_v48, %v2046_v51 }
 0x203   : > { %v2047_v52 = vpop.f32.mrf.mxu1 }
 0x204   : > { %3160 = vst [vmem:[%s4183_s9 + $0x8] sm:$0xff] %v3133_v49   ;;  %v2134_v56 = vadd.f32 %v2133_v38, %v2090_v53  ;;  %v2048_v43 = vadd.f32 %v2047_v52, %v4104_v33 }
 0x206   : > { %v2178_v62 = vadd.f32 %v2177_v30, %v2134_v56 }
 0x207   : > { %v2179_v54 = vpop.f32.mrf.mxu0 }
 0x208   : > { %v2206_v7 = vmax.f32 %v2178_v62, 0.0 }
 0x209   : > { %v2091_v57 = vpop.f32.mrf.mxu2 }
 0x20a   : > { %v2135_v55 = vpop.f32.mrf.mxu3  ;;  %v2092_v59 = vadd.f32 %v2091_v57, %v2048_v43 }
 0x20b   : > { %v2050_v0 = vpop.f32.mrf.mxu1 }
 0x20c   : > { %v2136_v63 = vadd.f32 %v2135_v55, %v2092_v59  ;;  %v2051_v5 = vadd.f32 %v2050_v0, %v4117_v45 }
 0x20e   : > { %v2180_v2 = vadd.f32 %v2179_v54, %v2136_v63 }
 0x20f   : > { %v2182_v1 = vpop.f32.mrf.mxu0 }
 0x210   : > { %v2207_v6 = vmax.f32 %v2180_v2, 0.0 }
 0x211   : > { %v2094_v8 = vpop.f32.mrf.mxu2 }
 0x212   : > { %v2138_v4 = vpop.f32.mrf.mxu3  ;;  %v3138_v10 = vpack.c.bf16 %v2207_v6, %v2206_v7  ;;  %v2095_v27 = vadd.f32 %v2094_v8, %v2051_v5 }
 0x213   : > { %v2052_v11 = vpop.f32.mrf.mxu1 }
 0x214   : > { %3161 = vst [vmem:[%s4183_s9 + $0x10] sm:$0xff] %v3138_v10   ;;  %v2139_v33 = vadd.f32 %v2138_v4, %v2095_v27  ;;  %v2053_v14 = vadd.f32 %v2052_v11, %v4135_v60 }
 0x216   : > { %v2183_v18 = vadd.f32 %v2182_v1, %v2139_v33 }
 0x217   : > { %v2184_v13 = vpop.f32.mrf.mxu0 }
 0x218   : > { %v2208_v28 = vmax.f32 %v2183_v18, 0.0  ;;  %v2276_v18 = vld [vmem:[%s4183_s9 + $0x8] sm:$0xf] (%p3329_p6) }
 0x219   : > { %v2096_v15 = vpop.f32.mrf.mxu2  ;;  %2277 = vst [vmem:[%s2255_s5 + $0x10] sm:$0xf] (%p3329_p6), %v2276_v18 }
 0x21a   : > { %v2140_v20 = vpop.f32.mrf.mxu3  ;;  %v2097_v16 = vadd.f32 %v2096_v15, %v2053_v14 }
 0x21b   : > { %v2055_v17 = vpop.f32.mrf.mxu1 }
 0x21c   : > { %v2141_v19 = vadd.f32 %v2140_v20, %v2097_v16  ;;  %v2056_v32 = vadd.f32 %v2055_v17, %v4147_v12 }
 0x21e   : > { %v2185_v24 = vadd.f32 %v2184_v13, %v2141_v19  ;;  %v2278_v19 = vld [vmem:[%s4183_s9 + $0xc] sm:$0xf] (%p3329_p6) }
 0x21f   : > { %v2187_v22 = vpop.f32.mrf.mxu0  ;;  %2279 = vst [vmem:[%s2255_s5 + $0x18] sm:$0xf] (%p3329_p6), %v2278_v19 }
 0x220   : > { %v2209_v61 = vmax.f32 %v2185_v24, 0.0  ;;  %v2282_v24 = vld [vmem:[%s4183_s9 + $0x14] sm:$0xf] (%p3329_p6) }
 0x221   : > { %v2099_v45 = vpop.f32.mrf.mxu2  ;;  %2283 = vst [vmem:[%s2255_s5 + $0x28] sm:$0xf] (%p3329_p6), %v2282_v24 }
 0x222   : > { %v2143_v25 = vpop.f32.mrf.mxu3  ;;  %v3143_v26 = vpack.c.bf16 %v2209_v61, %v2208_v28  ;;  %v2100_v21 = vadd.f32 %v2099_v45, %v2056_v32 }
 0x223   : > { %v2057_v34 = vpop.f32.mrf.mxu1 }
 0x224   : > { %3162 = vst [vmem:[%s4183_s9 + $0x18] sm:$0xff] %v3143_v26   ;;  %v2144_v60 = vadd.f32 %v2143_v25, %v2100_v21  ;;  %v2058_v37 = vadd.f32 %v2057_v34, %v4165_v36 }
 0x226   : > { %v2188_v41 = vadd.f32 %v2187_v22, %v2144_v60  ;;  %v2280_v22 = vld [vmem:[%s4183_s9 + $0x10] sm:$0xf] (%p3329_p6) }
 0x227   : > { %v2189_v35 = vpop.f32.mrf.mxu0  ;;  %2281 = vst [vmem:[%s2255_s5 + $0x20] sm:$0xf] (%p3329_p6), %v2280_v22 }
 0x228   : > { %v2210_v38 = vmax.f32 %v2188_v41, 0.0 }
 0x229   : > { %v2101_v31 = vpop.f32.mrf.mxu2 }
 0x22a   : > { %v2145_v23 = vpop.f32.mrf.mxu3  ;;  %v2102_v39 = vadd.f32 %v2101_v31, %v2058_v37 }
 0x22b   : > { %v2060_v40 = vpop.f32.mrf.mxu1  ;;  %v2284_v25 = vld [vmem:[%s4183_s9 + $0x18] sm:$0xf] (%p3329_p6)  ;;  %v2286_v28 = vld [vmem:[%s4183_s9 + $0x1c] sm:$0xf] (%p3329_p6) }
 0x22c   : > { %v2146_v42 = vadd.f32 %v2145_v23, %v2102_v39  ;;  %v2061_v48 = vadd.f32 %v2060_v40, %v4168_v44  ;;  %2285 = vst [vmem:[%s2255_s5 + $0x30] sm:$0xf] (%p3329_p6), %v2284_v25 }
 0x22d   : > { %2287 = vst [vmem:[%s2255_s5 + $0x38] sm:$0xf] (%p3329_p6), %v2286_v28 }
 0x22e   : > { %v2190_v3 = vadd.f32 %v2189_v35, %v2146_v42 }
 0x22f   : > { %v2192_v30 = vpop.f32.mrf.mxu0 }
 0x230   : > { %v2211_v46 = vmax.f32 %v2190_v3, 0.0 }
 0x231   : > { %v2104_v12 = vpop.f32.mrf.mxu2 }
 0x232   : > { %v2148_v29 = vpop.f32.mrf.mxu3  ;;  %v3148_v47 = vpack.c.bf16 %v2211_v46, %v2210_v38  ;;  %v2105_v51 = vadd.f32 %v2104_v12, %v2061_v48 }
 0x233   : > { %v2062_v49 = vpop.f32.mrf.mxu1 }
 0x234   : > { %3163 = vst [vmem:[%s4183_s9 + $0x20] sm:$0xff] %v3148_v47   ;;  %v2149_v53 = vadd.f32 %v2148_v29, %v2105_v51  ;;  %v2063_v36 = vadd.f32 %v2062_v49, %v4171_v50 }
 0x236   : > { %v2193_v57 = vadd.f32 %v2192_v30, %v2149_v53 }
 0x237   : > { %v2194_v54 = vpop.f32.mrf.mxu0 }
 0x238   : > { %v2212_v62 = vmax.f32 %v2193_v57, 0.0 }
 0x239   : > { %v2106_v55 = vpop.f32.mrf.mxu2 }
 0x23a   : > { %v2150_v52 = vpop.f32.mrf.mxu3  ;;  %v2107_v56 = vadd.f32 %v2106_v55, %v2063_v36 }
 0x23b   : > { %v2065_v43 = vpop.f32.mrf.mxu1  ;;  %v2288_v61 = vld [vmem:[%s4183_s9 + $0x20] sm:$0xf] (%p3329_p6)  ;;  %v2290_v45 = vld [vmem:[%s4183_s9 + $0x24] sm:$0xf] (%p3329_p6) }
 0x23c   : > { %v2151_v59 = vadd.f32 %v2150_v52, %v2107_v56  ;;  %v2066_v4 = vadd.f32 %v2065_v43, %v4174_v58  ;;  %v2272_v58 = vld [vmem:[%s4183_s9] sm:$0xf] (%p3329_p6)  ;;  %2289 = vst [vmem:[%s2255_s5 + $0x40] sm:$0xf] (%p3329_p6), %v2288_v61 }
 0x23d   : > { %2273 = vst [vmem:[%s2255_s5] sm:$0xf] (%p3329_p6), %v2272_v58 }
 0x23e   : > { %v2195_v0 = vadd.f32 %v2194_v54, %v2151_v59  ;;  %2291 = vst [vmem:[%s2255_s5 + $0x48] sm:$0xf] (%p3329_p6), %v2290_v45 }
 0x23f   : > { %v2197_v7 = vpop.f32.mrf.mxu0 }
 0x240   : > { %v2213_v63 = vmax.f32 %v2195_v0, 0.0 }
 0x241   : > { %v2109_v2 = vpop.f32.mrf.mxu2 }
 0x242   : > { %v2153_v1 = vpop.f32.mrf.mxu3  ;;  %v3153_v44 = vpack.c.bf16 %v2213_v63, %v2212_v62  ;;  %v2110_v6 = vadd.f32 %v2109_v2, %v2066_v4 }
 0x243   : > { %v2067_v8 = vpop.f32.mrf.mxu1 }
 0x244   : > { %3164 = vst [vmem:[%s4183_s9 + $0x28] sm:$0xff] %v3153_v44   ;;  %v2154_v50 = vadd.f32 %v2153_v1, %v2110_v6  ;;  %v2068_v10 = vadd.f32 %v2067_v8, %v4176_v9  ;;  %v2274_v9 = vld [vmem:[%s4183_s9 + $0x4] sm:$0xf] (%p3329_p6) }
 0x245   : > { %2275 = vst [vmem:[%s2255_s5 + $0x8] sm:$0xf] (%p3329_p6), %v2274_v9 }
 0x246   : > { %v2198_v13 = vadd.f32 %v2197_v7, %v2154_v50 }
 0x247   : > { %v2199_v33 = vpop.f32.mrf.mxu0 }
 0x248   : > { %v2214_v15 = vmax.f32 %v2198_v13, 0.0 }
 0x249   : > { %v2111_v5 = vpop.f32.mrf.mxu2 }
 0x24a   : > { %v2112_v11 = vadd.f32 %v2111_v5, %v2068_v10  ;;  %v2155_v27 = vpop.f32.mrf.mxu3 }
 0x24b   : > { %v2292_v26 = vld [vmem:[%s4183_s9 + $0x28] sm:$0xf] (%p3329_p6)  ;;  %v2294_v32 = vld [vmem:[%s4183_s9 + $0x2c] sm:$0xf] (%p3329_p6) }
 0x24c   : > { %v2156_v20 = vadd.f32 %v2155_v27, %v2112_v11  ;;  %2293 = vst [vmem:[%s2255_s5 + $0x50] sm:$0xf] (%p3329_p6), %v2292_v26 }
 0x24d   : > { %2295 = vst [vmem:[%s2255_s5 + $0x58] sm:$0xf] (%p3329_p6), %v2294_v32 }
 0x24e   : > { %v2200_v14 = vadd.f32 %v2199_v33, %v2156_v20 }
 0x250   : > { %v2215_v16 = vmax.f32 %v2200_v14, 0.0  ;;  %2250 = sbr.rel (!%p3329_p6) target bundleno = 606 (0x25e), region = 77 }
 0x252   : > { %v3158_v17 = vpack.c.bf16 %v2215_v16, %v2214_v15 }
 0x254   : > { %3165 = vst [vmem:[%s4183_s9 + $0x30] sm:$0xff] %v3158_v17  }
 0x25b   : > { %v2296_v34 = vld [vmem:[%s4183_s9 + $0x30] sm:$0xf]  ;;  %v2298_v21 = vld [vmem:[%s4183_s9 + $0x34] sm:$0xf] }
 0x25c   : > { %2297 = vst [vmem:[%s2255_s5 + $0x60] sm:$0xf] %v2296_v34 }
 0x25d   : > { %2299 = vst [vmem:[%s2255_s5 + $0x68] sm:$0xf] %v2298_v21 }
 0x25e PF: > { %s13_s16 = sadd.s32 1, %s3272_s16   ;;  %s4243_s12 = smov %s3260_s13 }
 0x25f   : > { %p10_p12 = scmp.ge.s32.totalorder %s13_s16, 4   ;;  %s4244_s13 = smov %s3334_s22 }
 0x260   : > { %s4245_s14 = smov %s3268_s15  ;;  %s4246_s15 = smov %s4248_s17 }
 0x261   :  { %12 = sbr.rel (!%p10_p12) target bundleno = 3 (0x3), region = 155 }

// kernel: forward.7
= control target key start
LH: loop header
LB: loop body
LE: loop exit
PB: predicated region body
PF: predicated region fallthrough
CT: control target
= control target key end

     0   :  { %s12093_s0 = inlined_call_operand.vmem [shape: bf16[16,2304], index: 0, kind: input, shape index: {}]   ;;  %s12094_s1 = inlined_call_operand.vmem [shape: bf16[2304,512], index: 1, kind: input, shape index: {}]   ;;  %s12095_s2 = inlined_call_operand.vmem [shape: f32[1,512], index: 2, kind: input, shape index: {}]   ;;  %s12096_s3 = inlined_call_operand.vmem [shape: bf16[512,128], index: 3, kind: input, shape index: {}]   ;;  %s12097_s4 = inlined_call_operand.vmem [shape: f32[1,128], index: 4, kind: input, shape index: {}]   ;;  %s12098_s5 = inlined_call_operand.vmem [shape: bf16[128,10], index: 5, kind: input, shape index: {}]   ;;  %s12099_s6 = inlined_call_operand.vmem [shape: f32[1,10], index: 6, kind: input, shape index: {}]   ;;  %s12100_s7 = inlined_call_operand.hbm [shape: f32[2,10], index: 7, kind: output, shape index: {}]  }
   0x1   :  { %v5156_v0 = vld [vmem:[%s12094_s1 + $0xe0] sm:$0xf]  ;;  %v7554_v1 = vld [vmem:[%s12094_s1 + $0xec] sm:$0xf0] }
   0x2   :  { %v5284_v2 = vld [vmem:[%s12094_s1 + $0x1e0] sm:$0xf]  ;;  %v5157_v3 = vor.u32 %v7554_v1, %v5156_v0  ;;  %v7586_v4 = vld [vmem:[%s12094_s1 + $0x1ec] sm:$0xf0] }
   0x3   :  { %v5412_v5 = vld [vmem:[%s12094_s1 + $0x2e0] sm:$0xf]  ;;  %v7618_v6 = vld [vmem:[%s12094_s1 + $0x2ec] sm:$0xf0]  ;;  %v5285_v7 = vor.u32 %v7586_v4, %v5284_v2 }
   0x4   :  { %v5413_v8 = vor.u32 %v7618_v6, %v5412_v5  ;;  %v5540_v9 = vld [vmem:[%s12094_s1 + $0x3e0] sm:$0xf]  ;;  %v7650_v10 = vld [vmem:[%s12094_s1 + $0x3ec] sm:$0xf0]  ;;  %3601 = vmatpush.bf16.msra.mxu0 %v5157_v3 }
   0x5   :  { %v5140_v11 = vld [vmem:[%s12094_s1 + $0xc0] sm:$0xf]  ;;  %v5541_v12 = vor.u32 %v7650_v10, %v5540_v9  ;;  %v7550_v13 = vld [vmem:[%s12094_s1 + $0xcc] sm:$0xf0]  ;;  %3614 = vmatpush.bf16.msra.mxu1 %v5285_v7 }
   0x6   :  { %v5268_v14 = vld [vmem:[%s12094_s1 + $0x1c0] sm:$0xf]  ;;  %v7582_v15 = vld [vmem:[%s12094_s1 + $0x1cc] sm:$0xf0]  ;;  %3627 = vmatpush.bf16.msra.mxu2 %v5413_v8  ;;  %v5141_v16 = vor.u32 %v7550_v13, %v5140_v11 }
   0x7   :  { %v5269_v17 = vor.u32 %v7582_v15, %v5268_v14  ;;  %v5396_v18 = vld [vmem:[%s12094_s1 + $0x2c0] sm:$0xf]  ;;  %v7614_v19 = vld [vmem:[%s12094_s1 + $0x2cc] sm:$0xf0]  ;;  %3640 = vmatpush.bf16.msra.mxu3 %v5541_v12 }
   0x8   :  { %v5524_v20 = vld [vmem:[%s12094_s1 + $0x3c0] sm:$0xf]  ;;  %v5397_v21 = vor.u32 %v7614_v19, %v5396_v18  ;;  %v7646_v22 = vld [vmem:[%s12094_s1 + $0x3cc] sm:$0xf0]  ;;  %3602 = vmatpush.bf16.msra.mxu0 %v5141_v16 }
   0x9   :  { %v5124_v23 = vld [vmem:[%s12094_s1 + $0xa0] sm:$0xf]  ;;  %v7546_v24 = vld [vmem:[%s12094_s1 + $0xac] sm:$0xf0]  ;;  %v5525_v25 = vor.u32 %v7646_v22, %v5524_v20  ;;  %3615 = vmatpush.bf16.msra.mxu1 %v5269_v17 }
   0xa   :  { %v5252_v26 = vld [vmem:[%s12094_s1 + $0x1a0] sm:$0xf]  ;;  %v7578_v27 = vld [vmem:[%s12094_s1 + $0x1ac] sm:$0xf0]  ;;  %v5125_v29 = vor.u32 %v7546_v24, %v5124_v23  ;;  %3628 = vmatpush.bf16.msra.mxu2 %v5397_v21 }
   0xb   :  { %v5380_v28 = vld [vmem:[%s12094_s1 + $0x2a0] sm:$0xf]  ;;  %v7610_v30 = vld [vmem:[%s12094_s1 + $0x2ac] sm:$0xf0]  ;;  %v5253_v33 = vor.u32 %v7578_v27, %v5252_v26  ;;  %3641 = vmatpush.bf16.msra.mxu3 %v5525_v25 }
   0xc   :  { %v5508_v31 = vld [vmem:[%s12094_s1 + $0x3a0] sm:$0xf]  ;;  %v7642_v32 = vld [vmem:[%s12094_s1 + $0x3ac] sm:$0xf0]  ;;  %v5381_v34 = vor.u32 %v7610_v30, %v5380_v28  ;;  %3603 = vmatpush.bf16.msra.mxu0 %v5125_v29 }
   0xd   :  { %v5108_v35 = vld [vmem:[%s12094_s1 + $0x80] sm:$0xf]  ;;  %v7542_v36 = vld [vmem:[%s12094_s1 + $0x8c] sm:$0xf0]  ;;  %v5509_v38 = vor.u32 %v7642_v32, %v5508_v31  ;;  %3616 = vmatpush.bf16.msra.mxu1 %v5253_v33 }
   0xe   :  { %v5236_v37 = vld [vmem:[%s12094_s1 + $0x180] sm:$0xf]  ;;  %v7574_v39 = vld [vmem:[%s12094_s1 + $0x18c] sm:$0xf0]  ;;  %v5109_v44 = vor.u32 %v7542_v36, %v5108_v35  ;;  %3629 = vmatpush.bf16.msra.mxu2 %v5381_v34 }
   0xf   :  { %v5364_v40 = vld [vmem:[%s12094_s1 + $0x280] sm:$0xf]  ;;  %v7606_v41 = vld [vmem:[%s12094_s1 + $0x28c] sm:$0xf0]  ;;  %v5237_v45 = vor.u32 %v7574_v39, %v5236_v37  ;;  %3642 = vmatpush.bf16.msra.mxu3 %v5509_v38 }
  0x10   :  { %v5492_v42 = vld [vmem:[%s12094_s1 + $0x380] sm:$0xf]  ;;  %v7638_v43 = vld [vmem:[%s12094_s1 + $0x38c] sm:$0xf0]  ;;  %v5365_v46 = vor.u32 %v7606_v41, %v5364_v40  ;;  %3604 = vmatpush.bf16.msra.mxu0 %v5109_v44 }
  0x11   :  { %v5092_v47 = vld [vmem:[%s12094_s1 + $0x60] sm:$0xf]  ;;  %v7538_v48 = vld [vmem:[%s12094_s1 + $0x6c] sm:$0xf0]  ;;  %v5493_v50 = vor.u32 %v7638_v43, %v5492_v42  ;;  %3617 = vmatpush.bf16.msra.mxu1 %v5237_v45 }
  0x12   :  { %v5220_v49 = vld [vmem:[%s12094_s1 + $0x160] sm:$0xf]  ;;  %v7570_v51 = vld [vmem:[%s12094_s1 + $0x16c] sm:$0xf0]  ;;  %v5093_v56 = vor.u32 %v7538_v48, %v5092_v47  ;;  %3630 = vmatpush.bf16.msra.mxu2 %v5365_v46 }
  0x13   :  { %v5348_v52 = vld [vmem:[%s12094_s1 + $0x260] sm:$0xf]  ;;  %v7602_v53 = vld [vmem:[%s12094_s1 + $0x26c] sm:$0xf0]  ;;  %v5221_v57 = vor.u32 %v7570_v51, %v5220_v49  ;;  %3643 = vmatpush.bf16.msra.mxu3 %v5493_v50 }
  0x14   :  { %v5476_v54 = vld [vmem:[%s12094_s1 + $0x360] sm:$0xf]  ;;  %v7634_v55 = vld [vmem:[%s12094_s1 + $0x36c] sm:$0xf0]  ;;  %v5349_v58 = vor.u32 %v7602_v53, %v5348_v52  ;;  %3605 = vmatpush.bf16.msra.mxu0 %v5093_v56 }
  0x15   :  { %v5076_v59 = vld [vmem:[%s12094_s1 + $0x40] sm:$0xf]  ;;  %v7534_v60 = vld [vmem:[%s12094_s1 + $0x4c] sm:$0xf0]  ;;  %v5477_v62 = vor.u32 %v7634_v55, %v5476_v54  ;;  %3618 = vmatpush.bf16.msra.mxu1 %v5221_v57 }
  0x16   :  { %v5204_v61 = vld [vmem:[%s12094_s1 + $0x140] sm:$0xf]  ;;  %v7566_v63 = vld [vmem:[%s12094_s1 + $0x14c] sm:$0xf0]  ;;  %v5077_v4 = vor.u32 %v7534_v60, %v5076_v59  ;;  %3631 = vmatpush.bf16.msra.mxu2 %v5349_v58 }
  0x17   :  { %v5332_v0 = vld [vmem:[%s12094_s1 + $0x240] sm:$0xf]  ;;  %v7598_v1 = vld [vmem:[%s12094_s1 + $0x24c] sm:$0xf0]  ;;  %v5205_v5 = vor.u32 %v7566_v63, %v5204_v61  ;;  %3644 = vmatpush.bf16.msra.mxu3 %v5477_v62 }
  0x18   :  { %v5460_v2 = vld [vmem:[%s12094_s1 + $0x340] sm:$0xf]  ;;  %v7630_v3 = vld [vmem:[%s12094_s1 + $0x34c] sm:$0xf0]  ;;  %v5333_v6 = vor.u32 %v7598_v1, %v5332_v0  ;;  %3606 = vmatpush.bf16.msra.mxu0 %v5077_v4 }
  0x19   :  { %v5060_v7 = vld [vmem:[%s12094_s1 + $0x20] sm:$0xf]  ;;  %v7530_v8 = vld [vmem:[%s12094_s1 + $0x2c] sm:$0xf0]  ;;  %v5461_v10 = vor.u32 %v7630_v3, %v5460_v2  ;;  %3619 = vmatpush.bf16.msra.mxu1 %v5205_v5  ;;  %v4980_v5 = vld [vmem:[%s12093_s0 + $0x8] sm:$0xf] }
  0x1a   :  { %v5188_v9 = vld [vmem:[%s12094_s1 + $0x120] sm:$0xf]  ;;  %v7562_v11 = vld [vmem:[%s12094_s1 + $0x12c] sm:$0xf0]  ;;  %v5061_v16 = vor.u32 %v7530_v8, %v5060_v7  ;;  %3632 = vmatpush.bf16.msra.mxu2 %v5333_v6 }
  0x1b   :  { %v5316_v12 = vld [vmem:[%s12094_s1 + $0x220] sm:$0xf]  ;;  %v7594_v13 = vld [vmem:[%s12094_s1 + $0x22c] sm:$0xf0]  ;;  %v5189_v19 = vor.u32 %v7562_v11, %v5188_v9  ;;  %3645 = vmatpush.bf16.msra.mxu3 %v5461_v10  ;;  %v7515_v11 = vld [vmem:[%s12093_s0 + $0x44] sm:$0xf0] }
  0x1c   :  { %v5444_v14 = vld [vmem:[%s12094_s1 + $0x320] sm:$0xf]  ;;  %v7626_v15 = vld [vmem:[%s12094_s1 + $0x32c] sm:$0xf0]  ;;  %v5317_v20 = vor.u32 %v7594_v13, %v5316_v12  ;;  %3607 = vmatpush.bf16.msra.mxu0 %v5061_v16  ;;  %v7507_v12 = vld [vmem:[%s12093_s0 + $0xc] sm:$0xf] }
  0x1d   :  { %v5044_v17 = vld [vmem:[%s12094_s1] sm:$0xf]  ;;  %v7526_v18 = vld [vmem:[%s12094_s1 + $0xc] sm:$0xf0]  ;;  %v5445_v24 = vor.u32 %v7626_v15, %v5444_v14  ;;  %3620 = vmatpush.bf16.msra.mxu1 %v5189_v19 }
  0x1e   :  { %v5172_v21 = vld [vmem:[%s12094_s1 + $0x100] sm:$0xf]  ;;  %v7558_v22 = vld [vmem:[%s12094_s1 + $0x10c] sm:$0xf0]  ;;  %v5045_v31 = vor.u32 %v7526_v18, %v5044_v17  ;;  %3633 = vmatpush.bf16.msra.mxu2 %v5317_v20  ;;  %v4982_v17 = vld [vmem:[%s12093_s0 + $0x50] sm:$0xf0] }
  0x1f   :  { %v5300_v23 = vld [vmem:[%s12094_s1 + $0x200] sm:$0xf]  ;;  %v7590_v25 = vld [vmem:[%s12094_s1 + $0x20c] sm:$0xf0]  ;;  %v5173_v35 = vor.u32 %v7558_v22, %v5172_v21  ;;  %3646 = vmatpush.bf16.msra.mxu3 %v5445_v24  ;;  %v8528_v20 = vor.u32 %v7507_v12, %v4982_v17 }
  0x20   :  { %v5428_v26 = vld [vmem:[%s12094_s1 + $0x300] sm:$0xf]  ;;  %v7622_v27 = vld [vmem:[%s12094_s1 + $0x30c] sm:$0xf0]  ;;  %v5301_v36 = vor.u32 %v7590_v25, %v5300_v23  ;;  %3608 = vmatpush.bf16.msra.mxu0 %v5045_v31 }
  0x21   :  { %v5668_v28 = vld [vmem:[%s12094_s1 + $0x4e0] sm:$0xf]  ;;  %v7682_v29 = vld [vmem:[%s12094_s1 + $0x4ec] sm:$0xf0]  ;;  %v5429_v39 = vor.u32 %v7622_v27, %v5428_v26  ;;  %3621 = vmatpush.bf16.msra.mxu1 %v5173_v35  ;;  %v7506_v27 = vld [vmem:[%s12093_s0 + $0x4] sm:$0xf] }
  0x22   :  { %v5796_v30 = vld [vmem:[%s12094_s1 + $0x5e0] sm:$0xf]  ;;  %v7714_v32 = vld [vmem:[%s12094_s1 + $0x5ec] sm:$0xf0]  ;;  %v5669_v40 = vor.u32 %v7682_v29, %v5668_v28  ;;  %3634 = vmatpush.bf16.msra.mxu2 %v5301_v36  ;;  %v4974_v28 = vld [vmem:[%s12093_s0 + $0x48] sm:$0xf0] }
  0x23   :  { %v5924_v33 = vld [vmem:[%s12094_s1 + $0x6e0] sm:$0xf]  ;;  %v7746_v34 = vld [vmem:[%s12094_s1 + $0x6ec] sm:$0xf0]  ;;  %v5797_v41 = vor.u32 %v7714_v32, %v5796_v30  ;;  %3647 = vmatpush.bf16.msra.mxu3 %v5429_v39 }
  0x24   :  { %v6052_v37 = vld [vmem:[%s12094_s1 + $0x7e0] sm:$0xf]  ;;  %v7778_v38 = vld [vmem:[%s12094_s1 + $0x7ec] sm:$0xf0]  ;;  %v5925_v42 = vor.u32 %v7746_v34, %v5924_v33  ;;  %3653 = vmatpush.bf16.msrb.mxu0 %v5669_v40  ;;  %v8555_v33 = vor.u32 %v7506_v27, %v4974_v28 }
  0x25   :  { %v5652_v43 = vld [vmem:[%s12094_s1 + $0x4c0] sm:$0xf]  ;;  %v7678_v44 = vld [vmem:[%s12094_s1 + $0x4cc] sm:$0xf0]  ;;  %v6053_v46 = vor.u32 %v7778_v38, %v6052_v37  ;;  %3666 = vmatpush.bf16.msrb.mxu1 %v5797_v41 }
  0x26   :  { %v5780_v45 = vld [vmem:[%s12094_s1 + $0x5c0] sm:$0xf]  ;;  %v7710_v47 = vld [vmem:[%s12094_s1 + $0x5cc] sm:$0xf0]  ;;  %v5653_v52 = vor.u32 %v7678_v44, %v5652_v43  ;;  %3679 = vmatpush.bf16.msrb.mxu2 %v5925_v42  ;;  %3648 = vmatmul.bf16.vlgmr.msra.gmra.mxu3 %v8528_v20 }
  0x27   :  { %v5908_v48 = vld [vmem:[%s12094_s1 + $0x6c0] sm:$0xf]  ;;  %v7742_v49 = vld [vmem:[%s12094_s1 + $0x6cc] sm:$0xf0]  ;;  %v5781_v54 = vor.u32 %v7710_v47, %v5780_v45  ;;  %3692 = vmatpush.bf16.msrb.mxu3 %v6053_v46  ;;  %3622 = vmatmul.bf16.vlgmr.msra.gmra.mxu1 %v8555_v33 }
  0x28   :  { %v6036_v50 = vld [vmem:[%s12094_s1 + $0x7c0] sm:$0xf]  ;;  %v7774_v51 = vld [vmem:[%s12094_s1 + $0x7cc] sm:$0xf0]  ;;  %v5909_v55 = vor.u32 %v7742_v49, %v5908_v48  ;;  %3654 = vmatpush.bf16.msrb.mxu0 %v5653_v52 }
  0x29   :  { %v5636_v53 = vld [vmem:[%s12094_s1 + $0x4a0] sm:$0xf]  ;;  %v7674_v56 = vld [vmem:[%s12094_s1 + $0x4ac] sm:$0xf0]  ;;  %v6037_v59 = vor.u32 %v7774_v51, %v6036_v50  ;;  %3667 = vmatpush.bf16.msrb.mxu1 %v5781_v54 }
  0x2a   :  { %v5764_v57 = vld [vmem:[%s12094_s1 + $0x5a0] sm:$0xf]  ;;  %v7706_v58 = vld [vmem:[%s12094_s1 + $0x5ac] sm:$0xf0]  ;;  %v5637_v2 = vor.u32 %v7674_v56, %v5636_v53  ;;  %3680 = vmatpush.bf16.msrb.mxu2 %v5909_v55 }
  0x2b   :  { %v5892_v60 = vld [vmem:[%s12094_s1 + $0x6a0] sm:$0xf]  ;;  %v7738_v61 = vld [vmem:[%s12094_s1 + $0x6ac] sm:$0xf0]  ;;  %v5765_v7 = vor.u32 %v7706_v58, %v5764_v57  ;;  %3693 = vmatpush.bf16.msrb.mxu3 %v6037_v59 }
  0x2c   :  { %v6020_v62 = vld [vmem:[%s12094_s1 + $0x7a0] sm:$0xf]  ;;  %v7770_v63 = vld [vmem:[%s12094_s1 + $0x7ac] sm:$0xf0]  ;;  %v5893_v8 = vor.u32 %v7738_v61, %v5892_v60  ;;  %3655 = vmatpush.bf16.msrb.mxu0 %v5637_v2 }
  0x2d   :  { %v5620_v0 = vld [vmem:[%s12094_s1 + $0x480] sm:$0xf]  ;;  %v7670_v1 = vld [vmem:[%s12094_s1 + $0x48c] sm:$0xf0]  ;;  %v6021_v13 = vor.u32 %v7770_v63, %v6020_v62  ;;  %3668 = vmatpush.bf16.msrb.mxu1 %v5765_v7 }
  0x2e   :  { %v5748_v3 = vld [vmem:[%s12094_s1 + $0x580] sm:$0xf]  ;;  %v7702_v4 = vld [vmem:[%s12094_s1 + $0x58c] sm:$0xf0]  ;;  %v5621_v21 = vor.u32 %v7670_v1, %v5620_v0  ;;  %3681 = vmatpush.bf16.msrb.mxu2 %v5893_v8 }
  0x2f   :  { %v7516_v6 = vld [vmem:[%s12093_s0 + $0x4c] sm:$0xf0]  ;;  %v4972_v10 = vld [vmem:[%s12093_s0] sm:$0xf]  ;;  %v5749_v24 = vor.u32 %v7702_v4, %v5748_v3  ;;  %3694 = vmatpush.bf16.msrb.mxu3 %v6021_v13 }
  0x30   :  { %v8499_v9 = vor.u32 %v7516_v6, %v4980_v5  ;;  %v5876_v14 = vld [vmem:[%s12094_s1 + $0x680] sm:$0xf]  ;;  %v7734_v15 = vld [vmem:[%s12094_s1 + $0x68c] sm:$0xf0]  ;;  %v8516_v16 = vor.u32 %v7515_v11, %v4972_v10  ;;  %3656 = vmatpush.bf16.msrb.mxu0 %v5621_v21 }
  0x31   :  { %v6004_v18 = vld [vmem:[%s12094_s1 + $0x780] sm:$0xf]  ;;  %v7766_v19 = vld [vmem:[%s12094_s1 + $0x78c] sm:$0xf0]  ;;  %v5877_v25 = vor.u32 %v7734_v15, %v5876_v14  ;;  %3669 = vmatpush.bf16.msrb.mxu1 %v5749_v24  ;;  %v4996_v24 = vld [vmem:[%s12093_s0 + $0x18] sm:$0xf] }
  0x32   :  { %3635 = vmatmul.bf16.vlgmr.msra.gmra.mxu2 %v8499_v9  ;;  %v5604_v22 = vld [vmem:[%s12094_s1 + $0x460] sm:$0xf]  ;;  %v7666_v23 = vld [vmem:[%s12094_s1 + $0x46c] sm:$0xf0]  ;;  %v6005_v29 = vor.u32 %v7766_v19, %v6004_v18  ;;  %3609 = vmatmul.bf16.vlgmr.msra.gmra.mxu0 %v8516_v16 }
  0x33   :  { %v5732_v26 = vld [vmem:[%s12094_s1 + $0x560] sm:$0xf]  ;;  %v7698_v30 = vld [vmem:[%s12094_s1 + $0x56c] sm:$0xf0]  ;;  %v5605_v36 = vor.u32 %v7666_v23, %v5604_v22  ;;  %3682 = vmatpush.bf16.msrb.mxu2 %v5877_v25 }
  0x34   :  { %v5860_v31 = vld [vmem:[%s12094_s1 + $0x660] sm:$0xf]  ;;  %v7730_v32 = vld [vmem:[%s12094_s1 + $0x66c] sm:$0xf0]  ;;  %v5733_v37 = vor.u32 %v7698_v30, %v5732_v26  ;;  %3695 = vmatpush.bf16.msrb.mxu3 %v6005_v29  ;;  %v7517_v29 = vld [vmem:[%s12093_s0 + $0x54] sm:$0xf0] }
  0x35   :  { %v5988_v34 = vld [vmem:[%s12094_s1 + $0x760] sm:$0xf]  ;;  %v7762_v35 = vld [vmem:[%s12094_s1 + $0x76c] sm:$0xf0]  ;;  %v5861_v38 = vor.u32 %v7730_v32, %v5860_v31  ;;  %3657 = vmatpush.bf16.msrb.mxu0 %v5605_v36  ;;  %v7509_v30 = vld [vmem:[%s12093_s0 + $0x1c] sm:$0xf] }
  0x36   :  { %v5588_v39 = vld [vmem:[%s12094_s1 + $0x440] sm:$0xf]  ;;  %v7662_v40 = vld [vmem:[%s12094_s1 + $0x44c] sm:$0xf0]  ;;  %v5989_v42 = vor.u32 %v7762_v35, %v5988_v34  ;;  %3670 = vmatpush.bf16.msrb.mxu1 %v5733_v37  ;;  %v4998_v31 = vld [vmem:[%s12093_s0 + $0x60] sm:$0xf0] }
  0x37   :  { %v5716_v41 = vld [vmem:[%s12094_s1 + $0x540] sm:$0xf]  ;;  %v7694_v43 = vld [vmem:[%s12094_s1 + $0x54c] sm:$0xf0]  ;;  %v5589_v48 = vor.u32 %v7662_v40, %v5588_v39  ;;  %3683 = vmatpush.bf16.msrb.mxu2 %v5861_v38  ;;  %v7508_v36 = vld [vmem:[%s12093_s0 + $0x14] sm:$0xf] }
  0x38   :  { %v5844_v44 = vld [vmem:[%s12094_s1 + $0x640] sm:$0xf]  ;;  %v7726_v45 = vld [vmem:[%s12094_s1 + $0x64c] sm:$0xf0]  ;;  %v5717_v49 = vor.u32 %v7694_v43, %v5716_v41  ;;  %3696 = vmatpush.bf16.msrb.mxu3 %v5989_v42  ;;  %v4990_v37 = vld [vmem:[%s12093_s0 + $0x58] sm:$0xf0] }
  0x39   :  { %v5972_v46 = vld [vmem:[%s12094_s1 + $0x740] sm:$0xf]  ;;  %v7758_v47 = vld [vmem:[%s12094_s1 + $0x74c] sm:$0xf0]  ;;  %v5845_v50 = vor.u32 %v7726_v45, %v5844_v44  ;;  %3658 = vmatpush.bf16.msrb.mxu0 %v5589_v48  ;;  %v8715_v48 = vor.u32 %v7508_v36, %v4990_v37 }
  0x3a   :  { %v5572_v51 = vld [vmem:[%s12094_s1 + $0x420] sm:$0xf]  ;;  %v7658_v52 = vld [vmem:[%s12094_s1 + $0x42c] sm:$0xf0]  ;;  %v5973_v54 = vor.u32 %v7758_v47, %v5972_v46  ;;  %3671 = vmatpush.bf16.msrb.mxu1 %v5717_v49  ;;  %v8713_v46 = vor.u32 %v7509_v30, %v4998_v31 }
  0x3b   :  { %v5700_v53 = vld [vmem:[%s12094_s1 + $0x520] sm:$0xf]  ;;  %v7690_v55 = vld [vmem:[%s12094_s1 + $0x52c] sm:$0xf0]  ;;  %v5573_v61 = vor.u32 %v7658_v52, %v5572_v51  ;;  %3684 = vmatpush.bf16.msrb.mxu2 %v5845_v50 }
  0x3c   :  { %v5828_v56 = vld [vmem:[%s12094_s1 + $0x620] sm:$0xf]  ;;  %v7722_v57 = vld [vmem:[%s12094_s1 + $0x62c] sm:$0xf0]  ;;  %v5701_v1 = vor.u32 %v7690_v55, %v5700_v53  ;;  %3697 = vmatpush.bf16.msrb.mxu3 %v5973_v54 }
  0x3d   :  { %v5956_v58 = vld [vmem:[%s12094_s1 + $0x720] sm:$0xf]  ;;  %v7754_v59 = vld [vmem:[%s12094_s1 + $0x72c] sm:$0xf0]  ;;  %v5829_v2 = vor.u32 %v7722_v57, %v5828_v56  ;;  %3659 = vmatpush.bf16.msrb.mxu0 %v5573_v61 }
  0x3e   :  { %v5556_v60 = vld [vmem:[%s12094_s1 + $0x400] sm:$0xf]  ;;  %v7654_v62 = vld [vmem:[%s12094_s1 + $0x40c] sm:$0xf0]  ;;  %v5957_v6 = vor.u32 %v7754_v59, %v5956_v58  ;;  %3672 = vmatpush.bf16.msrb.mxu1 %v5701_v1 }
  0x3f   :  { %v5684_v63 = vld [vmem:[%s12094_s1 + $0x500] sm:$0xf]  ;;  %v7686_v0 = vld [vmem:[%s12094_s1 + $0x50c] sm:$0xf0]  ;;  %v5557_v14 = vor.u32 %v7654_v62, %v5556_v60  ;;  %3685 = vmatpush.bf16.msrb.mxu2 %v5829_v2 }
  0x40   :  { %v5812_v3 = vld [vmem:[%s12094_s1 + $0x600] sm:$0xf]  ;;  %v7718_v4 = vld [vmem:[%s12094_s1 + $0x60c] sm:$0xf0]  ;;  %v5685_v19 = vor.u32 %v7686_v0, %v5684_v63  ;;  %3698 = vmatpush.bf16.msrb.mxu3 %v5957_v6 }
  0x41   :  { %v5940_v5 = vld [vmem:[%s12094_s1 + $0x700] sm:$0xf]  ;;  %v7750_v7 = vld [vmem:[%s12094_s1 + $0x70c] sm:$0xf0]  ;;  %v5813_v21 = vor.u32 %v7718_v4, %v5812_v3  ;;  %3660 = vmatpush.bf16.msrb.mxu0 %v5557_v14 }
  0x42   :  { %v6180_v8 = vld [vmem:[%s12094_s1 + $0x8e0] sm:$0xf]  ;;  %v7810_v10 = vld [vmem:[%s12094_s1 + $0x8ec] sm:$0xf0]  ;;  %v5941_v27 = vor.u32 %v7750_v7, %v5940_v5  ;;  %3673 = vmatpush.bf16.msrb.mxu1 %v5685_v19 }
  0x43   :  { %v6308_v11 = vld [vmem:[%s12094_s1 + $0x9e0] sm:$0xf]  ;;  %v7842_v12 = vld [vmem:[%s12094_s1 + $0x9ec] sm:$0xf0]  ;;  %v6181_v28 = vor.u32 %v7810_v10, %v6180_v8  ;;  %3686 = vmatpush.bf16.msrb.mxu2 %v5813_v21 }
  0x44   :  { %v6436_v13 = vld [vmem:[%s12094_s1 + $0xae0] sm:$0xf]  ;;  %v7874_v15 = vld [vmem:[%s12094_s1 + $0xaec] sm:$0xf0]  ;;  %v6309_v32 = vor.u32 %v7842_v12, %v6308_v11  ;;  %3699 = vmatpush.bf16.msrb.mxu3 %v5941_v27 }
  0x45   :  { %v6564_v17 = vld [vmem:[%s12094_s1 + $0xbe0] sm:$0xf]  ;;  %v7906_v18 = vld [vmem:[%s12094_s1 + $0xbec] sm:$0xf0]  ;;  %v6437_v34 = vor.u32 %v7874_v15, %v6436_v13  ;;  %3705 = vmatpush.bf16.msra.mxu0 %v6181_v28  ;;  %3674 = vmatmul.bf16.vlgmr.msrb.gmra.mxu1 %v8715_v48 }
  0x46   :  { %v6164_v22 = vld [vmem:[%s12094_s1 + $0x8c0] sm:$0xf]  ;;  %v7806_v23 = vld [vmem:[%s12094_s1 + $0x8cc] sm:$0xf0]  ;;  %v6565_v38 = vor.u32 %v7906_v18, %v6564_v17  ;;  %3718 = vmatpush.bf16.msra.mxu1 %v6309_v32 }
  0x47   :  { %v7518_v25 = vld [vmem:[%s12093_s0 + $0x5c] sm:$0xf0]  ;;  %v4988_v26 = vld [vmem:[%s12093_s0 + $0x10] sm:$0xf]  ;;  %v6165_v47 = vor.u32 %v7806_v23, %v6164_v22  ;;  %3731 = vmatpush.bf16.msra.mxu2 %v6437_v34  ;;  %3700 = vmatmul.bf16.vlgmr.msrb.gmra.mxu3 %v8713_v46 }
  0x48   :  { %v6292_v35 = vld [vmem:[%s12094_s1 + $0x9c0] sm:$0xf]  ;;  %v7838_v39 = vld [vmem:[%s12094_s1 + $0x9cc] sm:$0xf0]  ;;  %v8703_v42 = vor.u32 %v7518_v25, %v4996_v24  ;;  %v8711_v45 = vor.u32 %v7517_v29, %v4988_v26  ;;  %3744 = vmatpush.bf16.msra.mxu3 %v6565_v38 }
  0x49   :  { %v6420_v40 = vld [vmem:[%s12094_s1 + $0xac0] sm:$0xf]  ;;  %v7870_v41 = vld [vmem:[%s12094_s1 + $0xacc] sm:$0xf0]  ;;  %v6293_v49 = vor.u32 %v7838_v39, %v6292_v35  ;;  %3706 = vmatpush.bf16.msra.mxu0 %v6165_v47 }
  0x4a   :  { %v6548_v43 = vld [vmem:[%s12094_s1 + $0xbc0] sm:$0xf]  ;;  %v7902_v44 = vld [vmem:[%s12094_s1 + $0xbcc] sm:$0xf0]  ;;  %v6421_v50 = vor.u32 %v7870_v41, %v6420_v40  ;;  %3687 = vmatmul.bf16.vlgmr.msrb.gmra.mxu2 %v8703_v42  ;;  %3661 = vmatmul.bf16.vlgmr.msrb.gmra.mxu0 %v8711_v45 }
  0x4b   :  { %v6148_v51 = vld [vmem:[%s12094_s1 + $0x8a0] sm:$0xf]  ;;  %v7802_v52 = vld [vmem:[%s12094_s1 + $0x8ac] sm:$0xf0]  ;;  %v6549_v54 = vor.u32 %v7902_v44, %v6548_v43  ;;  %3719 = vmatpush.bf16.msra.mxu1 %v6293_v49 }
  0x4c   :  { %v6276_v53 = vld [vmem:[%s12094_s1 + $0x9a0] sm:$0xf]  ;;  %v7834_v55 = vld [vmem:[%s12094_s1 + $0x9ac] sm:$0xf0]  ;;  %v6149_v60 = vor.u32 %v7802_v52, %v6148_v51  ;;  %3732 = vmatpush.bf16.msra.mxu2 %v6421_v50 }
  0x4d   :  { %v6404_v56 = vld [vmem:[%s12094_s1 + $0xaa0] sm:$0xf]  ;;  %v7866_v57 = vld [vmem:[%s12094_s1 + $0xaac] sm:$0xf0]  ;;  %v6277_v61 = vor.u32 %v7834_v55, %v6276_v53  ;;  %3745 = vmatpush.bf16.msra.mxu3 %v6549_v54 }
  0x4e   :  { %v6532_v58 = vld [vmem:[%s12094_s1 + $0xba0] sm:$0xf]  ;;  %v7898_v59 = vld [vmem:[%s12094_s1 + $0xbac] sm:$0xf0]  ;;  %v6405_v62 = vor.u32 %v7866_v57, %v6404_v56  ;;  %3707 = vmatpush.bf16.msra.mxu0 %v6149_v60 }
  0x4f   :  { %v6132_v63 = vld [vmem:[%s12094_s1 + $0x880] sm:$0xf]  ;;  %v7798_v0 = vld [vmem:[%s12094_s1 + $0x88c] sm:$0xf0]  ;;  %v6533_v2 = vor.u32 %v7898_v59, %v6532_v58  ;;  %3720 = vmatpush.bf16.msra.mxu1 %v6277_v61 }
  0x50   :  { %v6260_v1 = vld [vmem:[%s12094_s1 + $0x980] sm:$0xf]  ;;  %v7830_v3 = vld [vmem:[%s12094_s1 + $0x98c] sm:$0xf0]  ;;  %v6133_v8 = vor.u32 %v7798_v0, %v6132_v63  ;;  %3733 = vmatpush.bf16.msra.mxu2 %v6405_v62 }
  0x51   :  { %v6388_v4 = vld [vmem:[%s12094_s1 + $0xa80] sm:$0xf]  ;;  %v7862_v5 = vld [vmem:[%s12094_s1 + $0xa8c] sm:$0xf0]  ;;  %v6261_v10 = vor.u32 %v7830_v3, %v6260_v1  ;;  %3746 = vmatpush.bf16.msra.mxu3 %v6533_v2 }
  0x52   :  { %v6516_v6 = vld [vmem:[%s12094_s1 + $0xb80] sm:$0xf]  ;;  %v7894_v7 = vld [vmem:[%s12094_s1 + $0xb8c] sm:$0xf0]  ;;  %v6389_v11 = vor.u32 %v7862_v5, %v6388_v4  ;;  %3708 = vmatpush.bf16.msra.mxu0 %v6133_v8 }
  0x53   :  { %v6116_v12 = vld [vmem:[%s12094_s1 + $0x860] sm:$0xf]  ;;  %v7794_v13 = vld [vmem:[%s12094_s1 + $0x86c] sm:$0xf0]  ;;  %v6517_v15 = vor.u32 %v7894_v7, %v6516_v6  ;;  %3721 = vmatpush.bf16.msra.mxu1 %v6261_v10 }
  0x54   :  { %v6244_v14 = vld [vmem:[%s12094_s1 + $0x960] sm:$0xf]  ;;  %v7826_v17 = vld [vmem:[%s12094_s1 + $0x96c] sm:$0xf0]  ;;  %v6117_v23 = vor.u32 %v7794_v13, %v6116_v12  ;;  %3734 = vmatpush.bf16.msra.mxu2 %v6389_v11  ;;  %v7519_v11 = vld [vmem:[%s12093_s0 + $0x64] sm:$0xf0] }
  0x55   :  { %v6372_v18 = vld [vmem:[%s12094_s1 + $0xa60] sm:$0xf]  ;;  %v7858_v19 = vld [vmem:[%s12094_s1 + $0xa6c] sm:$0xf0]  ;;  %v6245_v24 = vor.u32 %v7826_v17, %v6244_v14  ;;  %3747 = vmatpush.bf16.msra.mxu3 %v6517_v15  ;;  %v5012_v14 = vld [vmem:[%s12093_s0 + $0x28] sm:$0xf] }
  0x56   :  { %v6500_v21 = vld [vmem:[%s12094_s1 + $0xb60] sm:$0xf]  ;;  %v7890_v22 = vld [vmem:[%s12094_s1 + $0xb6c] sm:$0xf0]  ;;  %v6373_v25 = vor.u32 %v7858_v19, %v6372_v18  ;;  %3709 = vmatpush.bf16.msra.mxu0 %v6117_v23  ;;  %v7510_v17 = vld [vmem:[%s12093_s0 + $0x24] sm:$0xf] }
  0x57   :  { %v6100_v26 = vld [vmem:[%s12094_s1 + $0x840] sm:$0xf]  ;;  %v7790_v27 = vld [vmem:[%s12094_s1 + $0x84c] sm:$0xf0]  ;;  %v6501_v29 = vor.u32 %v7890_v22, %v6500_v21  ;;  %3722 = vmatpush.bf16.msra.mxu1 %v6245_v24  ;;  %v5006_v21 = vld [vmem:[%s12093_s0 + $0x68] sm:$0xf0] }
  0x58   :  { %v6228_v28 = vld [vmem:[%s12094_s1 + $0x940] sm:$0xf]  ;;  %v7822_v30 = vld [vmem:[%s12094_s1 + $0x94c] sm:$0xf0]  ;;  %v6101_v36 = vor.u32 %v7790_v27, %v6100_v26  ;;  %3735 = vmatpush.bf16.msra.mxu2 %v6373_v25  ;;  %v7511_v22 = vld [vmem:[%s12093_s0 + $0x2c] sm:$0xf] }
  0x59   :  { %v6356_v31 = vld [vmem:[%s12094_s1 + $0xa40] sm:$0xf]  ;;  %v7854_v32 = vld [vmem:[%s12094_s1 + $0xa4c] sm:$0xf0]  ;;  %v6229_v38 = vor.u32 %v7822_v30, %v6228_v28  ;;  %3748 = vmatpush.bf16.msra.mxu3 %v6501_v29  ;;  %v5014_v23 = vld [vmem:[%s12093_s0 + $0x70] sm:$0xf0] }
  0x5a   :  { %v6484_v34 = vld [vmem:[%s12094_s1 + $0xb40] sm:$0xf]  ;;  %v7886_v35 = vld [vmem:[%s12094_s1 + $0xb4c] sm:$0xf0]  ;;  %v6357_v39 = vor.u32 %v7854_v32, %v6356_v31  ;;  %3710 = vmatpush.bf16.msra.mxu0 %v6101_v36  ;;  %v8935_v36 = vor.u32 %v7510_v17, %v5006_v21 }
  0x5b   :  { %v6084_v37 = vld [vmem:[%s12094_s1 + $0x820] sm:$0xf]  ;;  %v7786_v40 = vld [vmem:[%s12094_s1 + $0x82c] sm:$0xf0]  ;;  %v6485_v44 = vor.u32 %v7886_v35, %v6484_v34  ;;  %3723 = vmatpush.bf16.msra.mxu1 %v6229_v38 }
  0x5c   :  { %v6212_v41 = vld [vmem:[%s12094_s1 + $0x920] sm:$0xf]  ;;  %v7818_v43 = vld [vmem:[%s12094_s1 + $0x92c] sm:$0xf0]  ;;  %v6085_v54 = vor.u32 %v7786_v40, %v6084_v37  ;;  %3736 = vmatpush.bf16.msra.mxu2 %v6357_v39  ;;  %v8943_v39 = vor.u32 %v7511_v22, %v5014_v23 }
  0x5d   :  { %v6340_v47 = vld [vmem:[%s12094_s1 + $0xa20] sm:$0xf]  ;;  %v7850_v49 = vld [vmem:[%s12094_s1 + $0xa2c] sm:$0xf0]  ;;  %v6213_v59 = vor.u32 %v7818_v43, %v6212_v41  ;;  %3749 = vmatpush.bf16.msra.mxu3 %v6485_v44 }
  0x5e   :  { %v6468_v50 = vld [vmem:[%s12094_s1 + $0xb20] sm:$0xf]  ;;  %v7882_v51 = vld [vmem:[%s12094_s1 + $0xb2c] sm:$0xf0]  ;;  %v6341_v60 = vor.u32 %v7850_v49, %v6340_v47  ;;  %3711 = vmatpush.bf16.msra.mxu0 %v6085_v54 }
  0x5f   :  { %v6068_v52 = vld [vmem:[%s12094_s1 + $0x800] sm:$0xf]  ;;  %v7782_v53 = vld [vmem:[%s12094_s1 + $0x80c] sm:$0xf0]  ;;  %v6469_v0 = vor.u32 %v7882_v51, %v6468_v50  ;;  %3724 = vmatpush.bf16.msra.mxu1 %v6213_v59 }
  0x60   :  { %v6196_v55 = vld [vmem:[%s12094_s1 + $0x900] sm:$0xf]  ;;  %v7814_v56 = vld [vmem:[%s12094_s1 + $0x90c] sm:$0xf0]  ;;  %v6069_v7 = vor.u32 %v7782_v53, %v6068_v52  ;;  %3737 = vmatpush.bf16.msra.mxu2 %v6341_v60 }
  0x61   :  { %v6324_v57 = vld [vmem:[%s12094_s1 + $0xa00] sm:$0xf]  ;;  %v7846_v58 = vld [vmem:[%s12094_s1 + $0xa0c] sm:$0xf0]  ;;  %v6197_v12 = vor.u32 %v7814_v56, %v6196_v55  ;;  %3750 = vmatpush.bf16.msra.mxu3 %v6469_v0 }
  0x62   :  { %v6452_v61 = vld [vmem:[%s12094_s1 + $0xb00] sm:$0xf]  ;;  %v7878_v62 = vld [vmem:[%s12094_s1 + $0xb0c] sm:$0xf0]  ;;  %v6325_v13 = vor.u32 %v7846_v58, %v6324_v57  ;;  %3712 = vmatpush.bf16.msra.mxu0 %v6069_v7 }
  0x63   :  { %v6692_v63 = vld [vmem:[%s12094_s1 + $0xce0] sm:$0xf]  ;;  %v7938_v1 = vld [vmem:[%s12094_s1 + $0xcec] sm:$0xf0]  ;;  %v6453_v18 = vor.u32 %v7878_v62, %v6452_v61  ;;  %3725 = vmatpush.bf16.msra.mxu1 %v6197_v12 }
  0x64   :  { %v6820_v2 = vld [vmem:[%s12094_s1 + $0xde0] sm:$0xf]  ;;  %v7970_v3 = vld [vmem:[%s12094_s1 + $0xdec] sm:$0xf0]  ;;  %v6693_v19 = vor.u32 %v7938_v1, %v6692_v63  ;;  %3738 = vmatpush.bf16.msra.mxu2 %v6325_v13 }
  0x65   :  { %v6948_v4 = vld [vmem:[%s12094_s1 + $0xee0] sm:$0xf]  ;;  %v8002_v5 = vld [vmem:[%s12094_s1 + $0xeec] sm:$0xf0]  ;;  %v6821_v24 = vor.u32 %v7970_v3, %v6820_v2  ;;  %3751 = vmatpush.bf16.msra.mxu3 %v6453_v18 }
  0x66   :  { %v7076_v6 = vld [vmem:[%s12094_s1 + $0xfe0] sm:$0xf]  ;;  %v8034_v8 = vld [vmem:[%s12094_s1 + $0xfec] sm:$0xf0]  ;;  %v6949_v25 = vor.u32 %v8002_v5, %v6948_v4  ;;  %3757 = vmatpush.bf16.msrb.mxu0 %v6693_v19  ;;  %3726 = vmatmul.bf16.vlgmr.msra.gmra.mxu1 %v8935_v36 }
  0x67   :  { %v5004_v10 = vld [vmem:[%s12093_s0 + $0x20] sm:$0xf]  ;;  %v7520_v15 = vld [vmem:[%s12093_s0 + $0x6c] sm:$0xf0]  ;;  %v7077_v29 = vor.u32 %v8034_v8, %v7076_v6  ;;  %3770 = vmatpush.bf16.msrb.mxu1 %v6821_v24 }
  0x68   :  { %v6676_v26 = vld [vmem:[%s12094_s1 + $0xcc0] sm:$0xf]  ;;  %v7934_v27 = vld [vmem:[%s12094_s1 + $0xccc] sm:$0xf0]  ;;  %v8922_v30 = vor.u32 %v7519_v11, %v5004_v10  ;;  %v8933_v35 = vor.u32 %v7520_v15, %v5012_v14  ;;  %3783 = vmatpush.bf16.msrb.mxu2 %v6949_v25  ;;  %3752 = vmatmul.bf16.vlgmr.msra.gmra.mxu3 %v8943_v39 }
  0x69   :  { %v6804_v28 = vld [vmem:[%s12094_s1 + $0xdc0] sm:$0xf]  ;;  %v7966_v31 = vld [vmem:[%s12094_s1 + $0xdcc] sm:$0xf0]  ;;  %v6677_v40 = vor.u32 %v7934_v27, %v6676_v26  ;;  %3796 = vmatpush.bf16.msrb.mxu3 %v7077_v29 }
  0x6a   :  { %v6932_v32 = vld [vmem:[%s12094_s1 + $0xec0] sm:$0xf]  ;;  %v7998_v34 = vld [vmem:[%s12094_s1 + $0xecc] sm:$0xf0]  ;;  %v6805_v41 = vor.u32 %v7966_v31, %v6804_v28  ;;  %3713 = vmatmul.bf16.vlgmr.msra.gmra.mxu0 %v8922_v30  ;;  %3739 = vmatmul.bf16.vlgmr.msra.gmra.mxu2 %v8933_v35 }
  0x6b   :  { %v7060_v37 = vld [vmem:[%s12094_s1 + $0xfc0] sm:$0xf]  ;;  %v8030_v38 = vld [vmem:[%s12094_s1 + $0xfcc] sm:$0xf0]  ;;  %v6933_v43 = vor.u32 %v7998_v34, %v6932_v32  ;;  %3758 = vmatpush.bf16.msrb.mxu0 %v6677_v40 }
  0x6c   :  { %v6660_v44 = vld [vmem:[%s12094_s1 + $0xca0] sm:$0xf]  ;;  %v7930_v47 = vld [vmem:[%s12094_s1 + $0xcac] sm:$0xf0]  ;;  %v7061_v50 = vor.u32 %v8030_v38, %v7060_v37  ;;  %3771 = vmatpush.bf16.msrb.mxu1 %v6805_v41 }
  0x6d   :  { %v6788_v49 = vld [vmem:[%s12094_s1 + $0xda0] sm:$0xf]  ;;  %v7962_v51 = vld [vmem:[%s12094_s1 + $0xdac] sm:$0xf0]  ;;  %v6661_v56 = vor.u32 %v7930_v47, %v6660_v44  ;;  %3784 = vmatpush.bf16.msrb.mxu2 %v6933_v43 }
  0x6e   :  { %v6916_v52 = vld [vmem:[%s12094_s1 + $0xea0] sm:$0xf]  ;;  %v7994_v53 = vld [vmem:[%s12094_s1 + $0xeac] sm:$0xf0]  ;;  %v6789_v57 = vor.u32 %v7962_v51, %v6788_v49  ;;  %3797 = vmatpush.bf16.msrb.mxu3 %v7061_v50 }
  0x6f   :  { %v7044_v54 = vld [vmem:[%s12094_s1 + $0xfa0] sm:$0xf]  ;;  %v8026_v55 = vld [vmem:[%s12094_s1 + $0xfac] sm:$0xf0]  ;;  %v6917_v58 = vor.u32 %v7994_v53, %v6916_v52  ;;  %3759 = vmatpush.bf16.msrb.mxu0 %v6661_v56 }
  0x70   :  { %v6644_v59 = vld [vmem:[%s12094_s1 + $0xc80] sm:$0xf]  ;;  %v7926_v60 = vld [vmem:[%s12094_s1 + $0xc8c] sm:$0xf0]  ;;  %v7045_v62 = vor.u32 %v8026_v55, %v7044_v54  ;;  %3772 = vmatpush.bf16.msrb.mxu1 %v6789_v57 }
  0x71   :  { %v6772_v61 = vld [vmem:[%s12094_s1 + $0xd80] sm:$0xf]  ;;  %v7958_v63 = vld [vmem:[%s12094_s1 + $0xd8c] sm:$0xf0]  ;;  %v6645_v4 = vor.u32 %v7926_v60, %v6644_v59  ;;  %3785 = vmatpush.bf16.msrb.mxu2 %v6917_v58 }
  0x72   :  { %v6900_v0 = vld [vmem:[%s12094_s1 + $0xe80] sm:$0xf]  ;;  %v7990_v1 = vld [vmem:[%s12094_s1 + $0xe8c] sm:$0xf0]  ;;  %v6773_v5 = vor.u32 %v7958_v63, %v6772_v61  ;;  %3798 = vmatpush.bf16.msrb.mxu3 %v7045_v62 }
  0x73   :  { %v7028_v2 = vld [vmem:[%s12094_s1 + $0xf80] sm:$0xf]  ;;  %v8022_v3 = vld [vmem:[%s12094_s1 + $0xf8c] sm:$0xf0]  ;;  %v6901_v6 = vor.u32 %v7990_v1, %v6900_v0  ;;  %3760 = vmatpush.bf16.msrb.mxu0 %v6645_v4 }
  0x74   :  { %v6628_v7 = vld [vmem:[%s12094_s1 + $0xc60] sm:$0xf]  ;;  %v7922_v8 = vld [vmem:[%s12094_s1 + $0xc6c] sm:$0xf0]  ;;  %v7029_v11 = vor.u32 %v8022_v3, %v7028_v2  ;;  %3773 = vmatpush.bf16.msrb.mxu1 %v6773_v5 }
  0x75   :  { %v6756_v10 = vld [vmem:[%s12094_s1 + $0xd60] sm:$0xf]  ;;  %v7954_v12 = vld [vmem:[%s12094_s1 + $0xd6c] sm:$0xf0]  ;;  %v6629_v18 = vor.u32 %v7922_v8, %v6628_v7  ;;  %3786 = vmatpush.bf16.msrb.mxu2 %v6901_v6 }
  0x76   :  { %v6884_v13 = vld [vmem:[%s12094_s1 + $0xe60] sm:$0xf]  ;;  %v7986_v14 = vld [vmem:[%s12094_s1 + $0xe6c] sm:$0xf0]  ;;  %v6757_v19 = vor.u32 %v7954_v12, %v6756_v10  ;;  %3799 = vmatpush.bf16.msrb.mxu3 %v7029_v11 }
  0x77   :  { %v7012_v15 = vld [vmem:[%s12094_s1 + $0xf60] sm:$0xf]  ;;  %v8018_v17 = vld [vmem:[%s12094_s1 + $0xf6c] sm:$0xf0]  ;;  %v6885_v21 = vor.u32 %v7986_v14, %v6884_v13  ;;  %3761 = vmatpush.bf16.msrb.mxu0 %v6629_v18 }
  0x78   :  { %v6612_v22 = vld [vmem:[%s12094_s1 + $0xc40] sm:$0xf]  ;;  %v7918_v23 = vld [vmem:[%s12094_s1 + $0xc4c] sm:$0xf0]  ;;  %v7013_v25 = vor.u32 %v8018_v17, %v7012_v15  ;;  %3774 = vmatpush.bf16.msrb.mxu1 %v6757_v19 }
  0x79   :  { %v6740_v24 = vld [vmem:[%s12094_s1 + $0xd40] sm:$0xf]  ;;  %v7950_v26 = vld [vmem:[%s12094_s1 + $0xd4c] sm:$0xf0]  ;;  %v6613_v32 = vor.u32 %v7918_v23, %v6612_v22  ;;  %3787 = vmatpush.bf16.msrb.mxu2 %v6885_v21 }
  0x7a   :  { %v6868_v27 = vld [vmem:[%s12094_s1 + $0xe40] sm:$0xf]  ;;  %v7982_v28 = vld [vmem:[%s12094_s1 + $0xe4c] sm:$0xf0]  ;;  %v6741_v38 = vor.u32 %v7950_v26, %v6740_v24  ;;  %3800 = vmatpush.bf16.msrb.mxu3 %v7013_v25 }
  0x7b   :  { %v6996_v29 = vld [vmem:[%s12094_s1 + $0xf40] sm:$0xf]  ;;  %v8014_v31 = vld [vmem:[%s12094_s1 + $0xf4c] sm:$0xf0]  ;;  %v6869_v40 = vor.u32 %v7982_v28, %v6868_v27 }
  0x7c   :  { %v6596_v34 = vld [vmem:[%s12094_s1 + $0xc20] sm:$0xf]  ;;  %v7914_v37 = vld [vmem:[%s12094_s1 + $0xc2c] sm:$0xf0]  ;;  %v6997_v47 = vor.u32 %v8014_v31, %v6996_v29 }
  0x7d   :  { %v6724_v41 = vld [vmem:[%s12094_s1 + $0xd20] sm:$0xf]  ;;  %v7946_v43 = vld [vmem:[%s12094_s1 + $0xd2c] sm:$0xf0] }
  0x7e   :  { %v6852_v44 = vld [vmem:[%s12094_s1 + $0xe20] sm:$0xf]  ;;  %v7978_v49 = vld [vmem:[%s12094_s1 + $0xe2c] sm:$0xf0] }
  0x7f   :  { %v6980_v50 = vld [vmem:[%s12094_s1 + $0xf20] sm:$0xf]  ;;  %v8010_v51 = vld [vmem:[%s12094_s1 + $0xf2c] sm:$0xf0] }
  0x80   :  { %v6580_v52 = vld [vmem:[%s12094_s1 + $0xc00] sm:$0xf]  ;;  %v7910_v53 = vld [vmem:[%s12094_s1 + $0xc0c] sm:$0xf0] }
  0x81   :  { %12 = vsyncpa [#allocation3], 0  ;;  %3762 = vmatpush.bf16.msrb.mxu0 %v6613_v32  ;;  %v6597_v54 = vor.u32 %v7914_v37, %v6596_v34  ;;  %v6708_v55 = vld [vmem:[%s12094_s1 + $0xd00] sm:$0xf]  ;;  %v7942_v56 = vld [vmem:[%s12094_s1 + $0xd0c] sm:$0xf0]  ;;  %3775 = vmatpush.bf16.msrb.mxu1 %v6741_v38  ;;  %v6725_v59 = vor.u32 %v7946_v43, %v6724_v41  ;;  %v6853_v60 = vor.u32 %v7978_v49, %v6852_v44 }
  0x82   :  { %v6836_v57 = vld [vmem:[%s12094_s1 + $0xe00] sm:$0xf]  ;;  %v7974_v58 = vld [vmem:[%s12094_s1 + $0xe0c] sm:$0xf0]  ;;  %3788 = vmatpush.bf16.msrb.mxu2 %v6869_v40  ;;  %3801 = vmatpush.bf16.msrb.mxu3 %v6997_v47  ;;  %v6981_v0 = vor.u32 %v8010_v51, %v6980_v50  ;;  %v7552_v4 = vld [vmem:[%s12094_s1 + $0xe4] sm:$0xf]  ;;  %v6581_v7 = vor.u32 %v7910_v53, %v6580_v52  ;;  %v6709_v12 = vor.u32 %v7942_v56, %v6708_v55 }
  0x83   :  { %v6964_v61 = vld [vmem:[%s12094_s1 + $0xf00] sm:$0xf]  ;;  %v8006_v62 = vld [vmem:[%s12094_s1 + $0xf0c] sm:$0xf0]  ;;  %v5158_v5 = vld [vmem:[%s12094_s1 + $0xf0] sm:$0xf0]  ;;  %v6837_v13 = vor.u32 %v7974_v58, %v6836_v57 }
  0x84   :  { %v7204_v63 = vld [vmem:[%s12094_s1 + $0x10e0] sm:$0xf]  ;;  %v8066_v1 = vld [vmem:[%s12094_s1 + $0x10ec] sm:$0xf0]  ;;  %v7584_v6 = vld [vmem:[%s12094_s1 + $0x1e4] sm:$0xf]  ;;  %v6965_v18 = vor.u32 %v8006_v62, %v6964_v61  ;;  %v5161_v25 = vor.u32 %v7552_v4, %v5158_v5 }
  0x85   :  { %v7332_v2 = vld [vmem:[%s12094_s1 + $0x11e0] sm:$0xf]  ;;  %v8098_v3 = vld [vmem:[%s12094_s1 + $0x11ec] sm:$0xf0]  ;;  %3763 = vmatpush.bf16.msrb.mxu0 %v6597_v54  ;;  %v5286_v8 = vld [vmem:[%s12094_s1 + $0x1f0] sm:$0xf0]  ;;  %3776 = vmatpush.bf16.msrb.mxu1 %v6725_v59  ;;  %v7205_v19 = vor.u32 %v8066_v1, %v7204_v63 }
  0x86   :  { %v5020_v10 = vld [vmem:[%s12093_s0 + $0x30] sm:$0xf]  ;;  %v7521_v11 = vld [vmem:[%s12093_s0 + $0x74] sm:$0xf0]  ;;  %3789 = vmatpush.bf16.msrb.mxu2 %v6853_v60  ;;  %v7522_v15 = vld [vmem:[%s12093_s0 + $0x7c] sm:$0xf0]  ;;  %3802 = vmatpush.bf16.msrb.mxu3 %v6981_v0  ;;  %v7333_v24 = vor.u32 %v8098_v3, %v7332_v2  ;;  %v5289_v29 = vor.u32 %v7584_v6, %v5286_v8 }
  0x87   :  { %v5028_v14 = vld [vmem:[%s12093_s0 + $0x38] sm:$0xf]  ;;  %v7512_v17 = vld [vmem:[%s12093_s0 + $0x34] sm:$0xf]  ;;  %v5022_v21 = vld [vmem:[%s12093_s0 + $0x78] sm:$0xf0]  ;;  %v9150_v31 = vor.u32 %v7521_v11, %v5020_v10 }
  0x88   :  { %v7513_v22 = vld [vmem:[%s12093_s0 + $0x3c] sm:$0xf]  ;;  %v5030_v23 = vld [vmem:[%s12093_s0 + $0x80] sm:$0xf0]  ;;  %v7188_v26 = vld [vmem:[%s12094_s1 + $0x10c0] sm:$0xf]  ;;  %v9161_v38 = vor.u32 %v7522_v15, %v5028_v14  ;;  %v9163_v40 = vor.u32 %v7512_v17, %v5022_v21 }
  0x89   :  { %v8062_v27 = vld [vmem:[%s12094_s1 + $0x10cc] sm:$0xf0]  ;;  %v7316_v28 = vld [vmem:[%s12094_s1 + $0x11c0] sm:$0xf]  ;;  %3764 = vmatpush.bf16.msrb.mxu0 %v6581_v7  ;;  %v7548_v34 = vld [vmem:[%s12094_s1 + $0xc4] sm:$0xf]  ;;  %3777 = vmatpush.bf16.msrb.mxu1 %v6709_v12  ;;  %v9171_v44 = vor.u32 %v7513_v22, %v5030_v23 }
  0x8a   :  { %v8094_v32 = vld [vmem:[%s12094_s1 + $0x11cc] sm:$0xf0]  ;;  %v5142_v37 = vld [vmem:[%s12094_s1 + $0xd0] sm:$0xf0]  ;;  %3790 = vmatpush.bf16.msrb.mxu2 %v6837_v13  ;;  %v7580_v41 = vld [vmem:[%s12094_s1 + $0x1c4] sm:$0xf]  ;;  %3803 = vmatpush.bf16.msrb.mxu3 %v6965_v18  ;;  %v7189_v47 = vor.u32 %v8062_v27, %v7188_v26 }
  0x8b   :  { %v5270_v43 = vld [vmem:[%s12094_s1 + $0x1d0] sm:$0xf0]  ;;  %v7317_v49 = vor.u32 %v8094_v32, %v7316_v28  ;;  %v5145_v50 = vor.u32 %v7548_v34, %v5142_v37  ;;  %v7172_v51 = vld [vmem:[%s12094_s1 + $0x10a0] sm:$0xf]  ;;  %v8058_v52 = vld [vmem:[%s12094_s1 + $0x10ac] sm:$0xf0] }
  0x8c   :  { %v7300_v53 = vld [vmem:[%s12094_s1 + $0x11a0] sm:$0xf]  ;;  %3765 = vmatmul.bf16.vlgmr.msrb.gmra.mxu0 %v9150_v31  ;;  %v5273_v54 = vor.u32 %v7580_v41, %v5270_v43  ;;  %v8090_v55 = vld [vmem:[%s12094_s1 + $0x11ac] sm:$0xf0]  ;;  %v7544_v56 = vld [vmem:[%s12094_s1 + $0xa4] sm:$0xf]  ;;  %3778 = vmatmul.bf16.vlgmr.msrb.gmra.mxu1 %v9163_v40  ;;  %v7173_v60 = vor.u32 %v8058_v52, %v7172_v51 }
  0x8d   :  { %3809 = vmatpush.bf16.msra.mxu0 %v7205_v19  ;;  %3822 = vmatpush.bf16.msra.mxu1 %v7333_v24  ;;  %v5126_v57 = vld [vmem:[%s12094_s1 + $0xb0] sm:$0xf0]  ;;  %v7576_v58 = vld [vmem:[%s12094_s1 + $0x1a4] sm:$0xf]  ;;  %v7301_v61 = vor.u32 %v8090_v55, %v7300_v53  ;;  %v7156_v63 = vld [vmem:[%s12094_s1 + $0x1080] sm:$0xf] }
  0x8e   :  { %3835 = vmatpush.bf16.msra.mxu2 %v5161_v25  ;;  %3848 = vmatpush.bf16.msra.mxu3 %v5289_v29  ;;  %v5254_v59 = vld [vmem:[%s12094_s1 + $0x1b0] sm:$0xf0]  ;;  %v5129_v62 = vor.u32 %v7544_v56, %v5126_v57  ;;  %v8054_v0 = vld [vmem:[%s12094_s1 + $0x108c] sm:$0xf0]  ;;  %v7284_v1 = vld [vmem:[%s12094_s1 + $0x1180] sm:$0xf] }
  0x8f   :  { %3791 = vmatmul.bf16.vlgmr.msrb.gmra.mxu2 %v9161_v38  ;;  %3804 = vmatmul.bf16.vlgmr.msrb.gmra.mxu3 %v9171_v44  ;;  %v5257_v2 = vor.u32 %v7576_v58, %v5254_v59  ;;  %v8086_v3 = vld [vmem:[%s12094_s1 + $0x118c] sm:$0xf0]  ;;  %v7540_v4 = vld [vmem:[%s12094_s1 + $0x84] sm:$0xf]  ;;  %v5110_v5 = vld [vmem:[%s12094_s1 + $0x90] sm:$0xf0]  ;;  %v7157_v8 = vor.u32 %v8054_v0, %v7156_v63 }
  0x90   :  { %v7572_v6 = vld [vmem:[%s12094_s1 + $0x184] sm:$0xf]  ;;  %v5238_v7 = vld [vmem:[%s12094_s1 + $0x190] sm:$0xf0]  ;;  %v7285_v10 = vor.u32 %v8086_v3, %v7284_v1  ;;  %v5113_v11 = vor.u32 %v7540_v4, %v5110_v5  ;;  %v7140_v12 = vld [vmem:[%s12094_s1 + $0x1060] sm:$0xf] }
  0x91   :  { %3810 = vmatpush.bf16.msra.mxu0 %v7189_v47  ;;  %3823 = vmatpush.bf16.msra.mxu1 %v7317_v49  ;;  %v8050_v13 = vld [vmem:[%s12094_s1 + $0x106c] sm:$0xf0]  ;;  %v7268_v14 = vld [vmem:[%s12094_s1 + $0x1160] sm:$0xf]  ;;  %v5241_v15 = vor.u32 %v7572_v6, %v5238_v7  ;;  %v7536_v18 = vld [vmem:[%s12094_s1 + $0x64] sm:$0xf] }
  0x92   :  { %3836 = vmatpush.bf16.msra.mxu2 %v5145_v50  ;;  %3849 = vmatpush.bf16.msra.mxu3 %v5273_v54  ;;  %v8082_v17 = vld [vmem:[%s12094_s1 + $0x116c] sm:$0xf0]  ;;  %v5094_v19 = vld [vmem:[%s12094_s1 + $0x70] sm:$0xf0]  ;;  %v7568_v21 = vld [vmem:[%s12094_s1 + $0x164] sm:$0xf]  ;;  %v7141_v23 = vor.u32 %v8050_v13, %v7140_v12 }
  0x93   :  { %v5222_v22 = vld [vmem:[%s12094_s1 + $0x170] sm:$0xf0]  ;;  %v7269_v24 = vor.u32 %v8082_v17, %v7268_v14  ;;  %v5097_v25 = vor.u32 %v7536_v18, %v5094_v19  ;;  %v7124_v26 = vld [vmem:[%s12094_s1 + $0x1040] sm:$0xf]  ;;  %v8046_v27 = vld [vmem:[%s12094_s1 + $0x104c] sm:$0xf0] }
  0x94   :  { %v7252_v28 = vld [vmem:[%s12094_s1 + $0x1140] sm:$0xf]  ;;  %v5225_v29 = vor.u32 %v7568_v21, %v5222_v22  ;;  %v8078_v32 = vld [vmem:[%s12094_s1 + $0x114c] sm:$0xf0]  ;;  %v7532_v34 = vld [vmem:[%s12094_s1 + $0x44] sm:$0xf]  ;;  %v7125_v47 = vor.u32 %v8046_v27, %v7124_v26 }
  0x95   :  { %3811 = vmatpush.bf16.msra.mxu0 %v7173_v60  ;;  %3824 = vmatpush.bf16.msra.mxu1 %v7301_v61  ;;  %v5078_v37 = vld [vmem:[%s12094_s1 + $0x50] sm:$0xf0]  ;;  %v7564_v41 = vld [vmem:[%s12094_s1 + $0x144] sm:$0xf]  ;;  %v7253_v49 = vor.u32 %v8078_v32, %v7252_v28  ;;  %v7108_v51 = vld [vmem:[%s12094_s1 + $0x1020] sm:$0xf] }
  0x96   :  { %3837 = vmatpush.bf16.msra.mxu2 %v5129_v62  ;;  %3850 = vmatpush.bf16.msra.mxu3 %v5257_v2  ;;  %v5206_v43 = vld [vmem:[%s12094_s1 + $0x150] sm:$0xf0]  ;;  %v5081_v50 = vor.u32 %v7532_v34, %v5078_v37  ;;  %v8042_v52 = vld [vmem:[%s12094_s1 + $0x102c] sm:$0xf0]  ;;  %v7236_v53 = vld [vmem:[%s12094_s1 + $0x1120] sm:$0xf] }
  0x97   :  { %v5209_v54 = vor.u32 %v7564_v41, %v5206_v43  ;;  %v8074_v55 = vld [vmem:[%s12094_s1 + $0x112c] sm:$0xf0]  ;;  %v7528_v56 = vld [vmem:[%s12094_s1 + $0x24] sm:$0xf]  ;;  %v5062_v57 = vld [vmem:[%s12094_s1 + $0x30] sm:$0xf0]  ;;  %v7109_v60 = vor.u32 %v8042_v52, %v7108_v51 }
  0x98   :  { %v7560_v58 = vld [vmem:[%s12094_s1 + $0x124] sm:$0xf]  ;;  %v5190_v59 = vld [vmem:[%s12094_s1 + $0x130] sm:$0xf0]  ;;  %v7092_v61 = vld [vmem:[%s12094_s1 + $0x1000] sm:$0xf]  ;;  %v7237_v0 = vor.u32 %v8074_v55, %v7236_v53  ;;  %v5065_v1 = vor.u32 %v7528_v56, %v5062_v57 }
  0x99   :  { %3812 = vmatpush.bf16.msra.mxu0 %v7157_v8  ;;  %3825 = vmatpush.bf16.msra.mxu1 %v7285_v10  ;;  %v8038_v62 = vld [vmem:[%s12094_s1 + $0x100c] sm:$0xf0]  ;;  %v7220_v63 = vld [vmem:[%s12094_s1 + $0x1100] sm:$0xf]  ;;  %v7524_v3 = vld [vmem:[%s12094_s1 + $0x4] sm:$0xf]  ;;  %v5193_v5 = vor.u32 %v7560_v58, %v5190_v59 }
  0x9a   :  { %3838 = vmatpush.bf16.msra.mxu2 %v5113_v11  ;;  %3851 = vmatpush.bf16.msra.mxu3 %v5241_v15  ;;  %v8070_v2 = vld [vmem:[%s12094_s1 + $0x110c] sm:$0xf0]  ;;  %v5046_v4 = vld [vmem:[%s12094_s1 + $0x10] sm:$0xf0]  ;;  %v7556_v6 = vld [vmem:[%s12094_s1 + $0x104] sm:$0xf]  ;;  %v7093_v13 = vor.u32 %v8038_v62, %v7092_v61 }
  0x9b   :  { %v5174_v7 = vld [vmem:[%s12094_s1 + $0x110] sm:$0xf0]  ;;  %v7616_v8 = vld [vmem:[%s12094_s1 + $0x2e4] sm:$0xf]  ;;  %v7221_v18 = vor.u32 %v8070_v2, %v7220_v63  ;;  %v5049_v19 = vor.u32 %v7524_v3, %v5046_v4  ;;  %v5036_v22 = vld [vmem:[%s12093_s0 + $0x40] sm:$0xf] }
  0x9c   :  { %v5414_v10 = vld [vmem:[%s12094_s1 + $0x2f0] sm:$0xf0]  ;;  %v7648_v11 = vld [vmem:[%s12094_s1 + $0x3e4] sm:$0xf]  ;;  %v5038_v27 = vld [vmem:[%s12093_s0 + $0x88] sm:$0xf0] }
  0x9d   :  { %3813 = vmatpush.bf16.msra.mxu0 %v7141_v23  ;;  %3826 = vmatpush.bf16.msra.mxu1 %v7269_v24  ;;  %v5542_v12 = vld [vmem:[%s12094_s1 + $0x3f0] sm:$0xf0]  ;;  %v7680_v14 = vld [vmem:[%s12094_s1 + $0x4e4] sm:$0xf]  ;;  %v7523_v23 = vld [vmem:[%s12093_s0 + $0x84] sm:$0xf0]  ;;  %v5177_v24 = vor.u32 %v7556_v6, %v5174_v7 }
  0x9e   :  { %3839 = vmatpush.bf16.msra.mxu2 %v5097_v25  ;;  %3852 = vmatpush.bf16.msra.mxu3 %v5225_v29  ;;  %v5670_v15 = vld [vmem:[%s12094_s1 + $0x4f0] sm:$0xf0]  ;;  %v7712_v17 = vld [vmem:[%s12094_s1 + $0x5e4] sm:$0xf]  ;;  %v5417_v25 = vor.u32 %v7616_v8, %v5414_v10  ;;  %v5545_v28 = vor.u32 %v7648_v11, %v5542_v12  ;;  %v9366_v43 = vor.u32 %v7523_v23, %v5036_v22  ;;  %v621_v23 = vld [vmem:[%s12095_s2] sm:$0xf] }
  0x9f   :  { %v5798_v21 = vld [vmem:[%s12094_s1 + $0x5f0] sm:$0xf0]  ;;  %v7514_v26 = vld [vmem:[%s12093_s0 + $0x44] sm:$0xf]  ;;  %v5673_v29 = vor.u32 %v7680_v14, %v5670_v15  ;;  %vm4940_vm0 = vcmask 74752   ;;  %s4961_s21 = sshll.u32 %s12100_s7, 4  ;;  %s4962_s21 = int_to_ptr.hbm [resolvable:$true] %s4961_s21 }
  0xa0   :  { %v7612_v32 = vld [vmem:[%s12094_s1 + $0x2c4] sm:$0xf]  ;;  %v5398_v34 = vld [vmem:[%s12094_s1 + $0x2d0] sm:$0xf0]  ;;  %v5801_v41 = vor.u32 %v7712_v17, %v5798_v21  ;;  %v9377_v51 = vor.u32 %v7514_v26, %v5038_v27 }
  0xa1   :  { %3814 = vmatpush.bf16.msra.mxu0 %v7125_v47  ;;  %3827 = vmatpush.bf16.msra.mxu1 %v7253_v49  ;;  %v7644_v37 = vld [vmem:[%s12094_s1 + $0x3c4] sm:$0xf]  ;;  %v5526_v47 = vld [vmem:[%s12094_s1 + $0x3d0] sm:$0xf0] }
  0xa2   :  { %3840 = vmatpush.bf16.msra.mxu2 %v5081_v50  ;;  %3853 = vmatpush.bf16.msra.mxu3 %v5209_v54  ;;  %v7676_v49 = vld [vmem:[%s12094_s1 + $0x4c4] sm:$0xf]  ;;  %v5654_v50 = vld [vmem:[%s12094_s1 + $0x4d0] sm:$0xf0]  ;;  %v5401_v54 = vor.u32 %v7612_v32, %v5398_v34  ;;  %v5529_v55 = vor.u32 %v7644_v37, %v5526_v47  ;;  %v623_v34 = vperm.slane %v621_v23, 0 }
  0xa3   :  { %v7708_v52 = vld [vmem:[%s12094_s1 + $0x5c4] sm:$0xf]  ;;  %v5782_v53 = vld [vmem:[%s12094_s1 + $0x5d0] sm:$0xf0]  ;;  %v5657_v56 = vor.u32 %v7676_v49, %v5654_v50 }
  0xa4   :  { %v7608_v57 = vld [vmem:[%s12094_s1 + $0x2a4] sm:$0xf]  ;;  %v5382_v58 = vld [vmem:[%s12094_s1 + $0x2b0] sm:$0xf0] }
  0xa5   :  { %3815 = vmatpush.bf16.msra.mxu0 %v7109_v60  ;;  %3828 = vmatpush.bf16.msra.mxu1 %v7237_v0  ;;  %v7640_v59 = vld [vmem:[%s12094_s1 + $0x3a4] sm:$0xf]  ;;  %v5785_v60 = vor.u32 %v7708_v52, %v5782_v53  ;;  %v5510_v61 = vld [vmem:[%s12094_s1 + $0x3b0] sm:$0xf0]  ;;  %v5385_v2 = vor.u32 %v7608_v57, %v5382_v58 }
  0xa6   :  { %3841 = vmatpush.bf16.msra.mxu2 %v5065_v1  ;;  %3854 = vmatpush.bf16.msra.mxu3 %v5193_v5  ;;  %v7672_v62 = vld [vmem:[%s12094_s1 + $0x4a4] sm:$0xf]  ;;  %v5638_v63 = vld [vmem:[%s12094_s1 + $0x4b0] sm:$0xf0]  ;;  %v5513_v3 = vor.u32 %v7640_v59, %v5510_v61 }
  0xa7   :  { %v7704_v0 = vld [vmem:[%s12094_s1 + $0x5a4] sm:$0xf]  ;;  %v5766_v1 = vld [vmem:[%s12094_s1 + $0x5b0] sm:$0xf0]  ;;  %v5641_v4 = vor.u32 %v7672_v62, %v5638_v63 }
  0xa8   :  { %v7604_v5 = vld [vmem:[%s12094_s1 + $0x284] sm:$0xf]  ;;  %v5366_v6 = vld [vmem:[%s12094_s1 + $0x290] sm:$0xf0]  ;;  %v5769_v8 = vor.u32 %v7704_v0, %v5766_v1 }
  0xa9   :  { %3816 = vmatpush.bf16.msra.mxu0 %v7093_v13  ;;  %3829 = vmatpush.bf16.msra.mxu1 %v7221_v18  ;;  %v7636_v7 = vld [vmem:[%s12094_s1 + $0x384] sm:$0xf]  ;;  %v5494_v10 = vld [vmem:[%s12094_s1 + $0x390] sm:$0xf0]  ;;  %v5369_v15 = vor.u32 %v7604_v5, %v5366_v6 }
  0xaa   :  { %3842 = vmatpush.bf16.msra.mxu2 %v5049_v19  ;;  %3855 = vmatpush.bf16.msra.mxu3 %v5177_v24  ;;  %v7668_v11 = vld [vmem:[%s12094_s1 + $0x484] sm:$0xf]  ;;  %v5622_v12 = vld [vmem:[%s12094_s1 + $0x490] sm:$0xf0]  ;;  %v5497_v18 = vor.u32 %v7636_v7, %v5494_v10 }
  0xab   :  { %v7700_v13 = vld [vmem:[%s12094_s1 + $0x584] sm:$0xf]  ;;  %v5750_v14 = vld [vmem:[%s12094_s1 + $0x590] sm:$0xf0]  ;;  %v5625_v19 = vor.u32 %v7668_v11, %v5622_v12 }
  0xac   :  { %3817 = vmatmul.bf16.vlgmr.msra.gmra.mxu0 %v9366_v43  ;;  %3830 = vmatmul.bf16.vlgmr.msra.gmra.mxu1 %v9377_v51  ;;  %v7600_v17 = vld [vmem:[%s12094_s1 + $0x264] sm:$0xf]  ;;  %v5350_v21 = vld [vmem:[%s12094_s1 + $0x270] sm:$0xf0]  ;;  %v5753_v24 = vor.u32 %v7700_v13, %v5750_v14 }
  0xad   :  { %3861 = vmatpush.bf16.msrb.mxu0 %v5417_v25  ;;  %3874 = vmatpush.bf16.msrb.mxu1 %v5545_v28  ;;  %v7632_v22 = vld [vmem:[%s12094_s1 + $0x364] sm:$0xf]  ;;  %v5478_v25 = vld [vmem:[%s12094_s1 + $0x370] sm:$0xf0]  ;;  %v5353_v32 = vor.u32 %v7600_v17, %v5350_v21 }
  0xae   :  { %3887 = vmatpush.bf16.msrb.mxu2 %v5673_v29  ;;  %3900 = vmatpush.bf16.msrb.mxu3 %v5801_v41  ;;  %v7664_v26 = vld [vmem:[%s12094_s1 + $0x464] sm:$0xf]  ;;  %v5606_v27 = vld [vmem:[%s12094_s1 + $0x470] sm:$0xf0]  ;;  %v5481_v37 = vor.u32 %v7632_v22, %v5478_v25 }
  0xaf   :  { %3843 = vmatmul.bf16.vlgmr.msra.gmra.mxu2 %v8516_v16  ;;  %3856 = vmatmul.bf16.vlgmr.msra.gmra.mxu3 %v8555_v33  ;;  %v7696_v28 = vld [vmem:[%s12094_s1 + $0x564] sm:$0xf]  ;;  %v5734_v29 = vld [vmem:[%s12094_s1 + $0x570] sm:$0xf0]  ;;  %v5609_v41 = vor.u32 %v7664_v26, %v5606_v27  ;;  %v3610_v58 = vpop.f32.mrf.mxu0  ;;  %v3649_v27 = vpop.f32.mrf.mxu3 }
  0xb0   :  { %v7596_v47 = vld [vmem:[%s12094_s1 + $0x244] sm:$0xf]  ;;  %v5334_v49 = vld [vmem:[%s12094_s1 + $0x250] sm:$0xf0]  ;;  %v5737_v52 = vor.u32 %v7696_v28, %v5734_v29 }
  0xb1   :  { %3862 = vmatpush.bf16.msrb.mxu0 %v5401_v54  ;;  %3875 = vmatpush.bf16.msrb.mxu1 %v5529_v55  ;;  %v7628_v50 = vld [vmem:[%s12094_s1 + $0x344] sm:$0xf]  ;;  %v5462_v53 = vld [vmem:[%s12094_s1 + $0x350] sm:$0xf0]  ;;  %v5337_v59 = vor.u32 %v7596_v47, %v5334_v49 }
  0xb2   :  { %3888 = vmatpush.bf16.msrb.mxu2 %v5657_v56  ;;  %3901 = vmatpush.bf16.msrb.mxu3 %v5785_v60  ;;  %v7660_v54 = vld [vmem:[%s12094_s1 + $0x444] sm:$0xf]  ;;  %v5590_v55 = vld [vmem:[%s12094_s1 + $0x450] sm:$0xf0]  ;;  %v3611_v60 = vadd.f32 %v3610_v58, %v623_v34  ;;  %v5465_v61 = vor.u32 %v7628_v50, %v5462_v53 }
  0xb3   :  { %v7692_v56 = vld [vmem:[%s12094_s1 + $0x544] sm:$0xf]  ;;  %v5718_v57 = vld [vmem:[%s12094_s1 + $0x550] sm:$0xf0]  ;;  %v5593_v62 = vor.u32 %v7660_v54, %v5590_v55 }
  0xb4   :  { %v7592_v63 = vld [vmem:[%s12094_s1 + $0x224] sm:$0xf]  ;;  %v5318_v0 = vld [vmem:[%s12094_s1 + $0x230] sm:$0xf0] }
  0xb5   :  { %3863 = vmatpush.bf16.msrb.mxu0 %v5385_v2  ;;  %3876 = vmatpush.bf16.msrb.mxu1 %v5513_v3  ;;  %v7624_v1 = vld [vmem:[%s12094_s1 + $0x324] sm:$0xf]  ;;  %v3623_v2 = vpop.f32.mrf.mxu1  ;;  %v5721_v3 = vor.u32 %v7692_v56, %v5718_v57  ;;  %v5574_v6 = vld [vmem:[%s12094_s1 + $0x430] sm:$0xf0]  ;;  %v5321_v12 = vor.u32 %v7592_v63, %v5318_v0 }
  0xb6   :  { %3889 = vmatpush.bf16.msrb.mxu2 %v5641_v4  ;;  %3902 = vmatpush.bf16.msrb.mxu3 %v5769_v8  ;;  %v5446_v4 = vld [vmem:[%s12094_s1 + $0x330] sm:$0xf0]  ;;  %v7656_v5 = vld [vmem:[%s12094_s1 + $0x424] sm:$0xf]  ;;  %v3624_v7 = vadd.f32 %v3623_v2, %v3611_v60  ;;  %v3636_v8 = vpop.f32.mrf.mxu2 }
  0xb7   :  { %v7688_v10 = vld [vmem:[%s12094_s1 + $0x524] sm:$0xf]  ;;  %v5702_v11 = vld [vmem:[%s12094_s1 + $0x530] sm:$0xf0]  ;;  %v5449_v17 = vor.u32 %v7624_v1, %v5446_v4 }
  0xb8   :  { %v7588_v13 = vld [vmem:[%s12094_s1 + $0x204] sm:$0xf]  ;;  %v5302_v14 = vld [vmem:[%s12094_s1 + $0x210] sm:$0xf0]  ;;  %v5705_v23 = vor.u32 %v7688_v10, %v5702_v11 }
  0xb9   :  { %3864 = vmatpush.bf16.msrb.mxu0 %v5369_v15  ;;  %3877 = vmatpush.bf16.msrb.mxu1 %v5497_v18  ;;  %v3637_v15 = vadd.f32 %v3636_v8, %v3624_v7  ;;  %v5577_v18 = vor.u32 %v7656_v5, %v5574_v6  ;;  %v5430_v21 = vld [vmem:[%s12094_s1 + $0x310] sm:$0xf0]  ;;  %v7652_v22 = vld [vmem:[%s12094_s1 + $0x404] sm:$0xf]  ;;  %v3651_v8 = vpop.f32.mrf.mxu3 }
  0xba   :  { %3890 = vmatpush.bf16.msrb.mxu2 %v5625_v19  ;;  %3903 = vmatpush.bf16.msrb.mxu3 %v5753_v24  ;;  %v7620_v19 = vld [vmem:[%s12094_s1 + $0x304] sm:$0xf]  ;;  %v5558_v24 = vld [vmem:[%s12094_s1 + $0x410] sm:$0xf0] }
  0xbb   :  { %v7684_v25 = vld [vmem:[%s12094_s1 + $0x504] sm:$0xf]  ;;  %v5686_v26 = vld [vmem:[%s12094_s1 + $0x510] sm:$0xf0]  ;;  %v9545_v34 = vadd.f32 %v3649_v27, %v3637_v15  ;;  %v5561_v53 = vor.u32 %v7652_v22, %v5558_v24 }
  0xbc   :  { %v7744_v28 = vld [vmem:[%s12094_s1 + $0x6e4] sm:$0xf]  ;;  %v5926_v29 = vld [vmem:[%s12094_s1 + $0x6f0] sm:$0xf0]  ;;  %v5689_v57 = vor.u32 %v7684_v25, %v5686_v26 }
  0xbd   :  { %3865 = vmatpush.bf16.msrb.mxu0 %v5353_v32  ;;  %3878 = vmatpush.bf16.msrb.mxu1 %v5481_v37  ;;  %v7776_v32 = vld [vmem:[%s12094_s1 + $0x7e4] sm:$0xf]  ;;  %v3612_v37 = vpop.f32.mrf.mxu0  ;;  %v6054_v47 = vld [vmem:[%s12094_s1 + $0x7f0] sm:$0xf0]  ;;  %v3625_v56 = vpop.f32.mrf.mxu1  ;;  %v5929_v58 = vor.u32 %v7744_v28, %v5926_v29 }
  0xbe   :  { %3891 = vmatpush.bf16.msrb.mxu2 %v5609_v41  ;;  %3904 = vmatpush.bf16.msrb.mxu3 %v5737_v52  ;;  %v5305_v41 = vor.u32 %v7588_v13, %v5302_v14  ;;  %v7808_v49 = vld [vmem:[%s12094_s1 + $0x8e4] sm:$0xf]  ;;  %v6182_v50 = vld [vmem:[%s12094_s1 + $0x8f0] sm:$0xf0]  ;;  %v5433_v52 = vor.u32 %v7620_v19, %v5430_v21  ;;  %v6057_v60 = vor.u32 %v7776_v32, %v6054_v47 }
  0xbf   :  { %v7840_v54 = vld [vmem:[%s12094_s1 + $0x9e4] sm:$0xf]  ;;  %v6310_v55 = vld [vmem:[%s12094_s1 + $0x9f0] sm:$0xf0] }
  0xc0   :  { %v5910_v63 = vld [vmem:[%s12094_s1 + $0x6d0] sm:$0xf0]  ;;  %v7772_v0 = vld [vmem:[%s12094_s1 + $0x7c4] sm:$0xf]  ;;  %v6313_v1 = vor.u32 %v7840_v54, %v6310_v55 }
  0xc1   :  { %3866 = vmatpush.bf16.msrb.mxu0 %v5337_v59  ;;  %3879 = vmatpush.bf16.msrb.mxu1 %v5465_v61  ;;  %v3638_v59 = vpop.f32.mrf.mxu2  ;;  %v6185_v61 = vor.u32 %v7808_v49, %v6182_v50  ;;  %v6038_v2 = vld [vmem:[%s12094_s1 + $0x7d0] sm:$0xf0]  ;;  %v7836_v5 = vld [vmem:[%s12094_s1 + $0x9c4] sm:$0xf] }
  0xc2   :  { %3892 = vmatpush.bf16.msrb.mxu2 %v5593_v62  ;;  %3905 = vmatpush.bf16.msrb.mxu3 %v5721_v3  ;;  %v7740_v62 = vld [vmem:[%s12094_s1 + $0x6c4] sm:$0xf]  ;;  %v6166_v4 = vld [vmem:[%s12094_s1 + $0x8d0] sm:$0xf0]  ;;  %v6041_v10 = vor.u32 %v7772_v0, %v6038_v2 }
  0xc3   :  { %v7804_v3 = vld [vmem:[%s12094_s1 + $0x8c4] sm:$0xf]  ;;  %v6294_v6 = vld [vmem:[%s12094_s1 + $0x9d0] sm:$0xf0]  ;;  %v5913_v7 = vor.u32 %v7740_v62, %v5910_v63 }
  0xc4   :  { %v6169_v11 = vor.u32 %v7804_v3, %v6166_v4  ;;  %v5894_v13 = vld [vmem:[%s12094_s1 + $0x6b0] sm:$0xf0]  ;;  %v7768_v14 = vld [vmem:[%s12094_s1 + $0x7a4] sm:$0xf]  ;;  %v6297_v15 = vor.u32 %v7836_v5, %v6294_v6 }
  0xc5   :  { %3867 = vmatpush.bf16.msrb.mxu0 %v5321_v12  ;;  %3880 = vmatpush.bf16.msrb.mxu1 %v5449_v17  ;;  %v7736_v12 = vld [vmem:[%s12094_s1 + $0x6a4] sm:$0xf]  ;;  %v6022_v17 = vld [vmem:[%s12094_s1 + $0x7b0] sm:$0xf0]  ;;  %v3675_v59 = vpop.f32.mrf.mxu1 }
  0xc6   :  { %3893 = vmatpush.bf16.msrb.mxu2 %v5577_v18  ;;  %3906 = vmatpush.bf16.msrb.mxu3 %v5705_v23  ;;  %v7800_v18 = vld [vmem:[%s12094_s1 + $0x8a4] sm:$0xf]  ;;  %v6150_v19 = vld [vmem:[%s12094_s1 + $0x8b0] sm:$0xf0]  ;;  %v5897_v23 = vor.u32 %v7736_v12, %v5894_v13  ;;  %v6025_v24 = vor.u32 %v7768_v14, %v6022_v17 }
  0xc7   :  { %v7832_v21 = vld [vmem:[%s12094_s1 + $0x9a4] sm:$0xf]  ;;  %v6278_v22 = vld [vmem:[%s12094_s1 + $0x9b0] sm:$0xf0]  ;;  %v6153_v25 = vor.u32 %v7800_v18, %v6150_v19 }
  0xc8   :  { %v7732_v26 = vld [vmem:[%s12094_s1 + $0x684] sm:$0xf]  ;;  %v5878_v27 = vld [vmem:[%s12094_s1 + $0x690] sm:$0xf0]  ;;  %v6281_v29 = vor.u32 %v7832_v21, %v6278_v22 }
  0xc9   :  { %3868 = vmatpush.bf16.msrb.mxu0 %v5305_v41  ;;  %3881 = vmatpush.bf16.msrb.mxu1 %v5433_v52  ;;  %v7764_v28 = vld [vmem:[%s12094_s1 + $0x784] sm:$0xf]  ;;  %v6006_v32 = vld [vmem:[%s12094_s1 + $0x790] sm:$0xf0]  ;;  %v5881_v50 = vor.u32 %v7732_v26, %v5878_v27  ;;  %v3662_v52 = vpop.f32.mrf.mxu0 }
  0xca   :  { %3894 = vmatpush.bf16.msrb.mxu2 %v5561_v53  ;;  %3907 = vmatpush.bf16.msrb.mxu3 %v5689_v57  ;;  %v7796_v37 = vld [vmem:[%s12094_s1 + $0x884] sm:$0xf]  ;;  %v6134_v41 = vld [vmem:[%s12094_s1 + $0x890] sm:$0xf0]  ;;  %v6009_v53 = vor.u32 %v7764_v28, %v6006_v32 }
  0xcb   :  { %v7828_v47 = vld [vmem:[%s12094_s1 + $0x984] sm:$0xf]  ;;  %v6262_v49 = vld [vmem:[%s12094_s1 + $0x990] sm:$0xf0]  ;;  %v6137_v54 = vor.u32 %v7796_v37, %v6134_v41 }
  0xcc   :  { %3869 = vmatmul.bf16.vlgmr.msrb.gmra.mxu0 %v8499_v9  ;;  %3882 = vmatmul.bf16.vlgmr.msrb.gmra.mxu1 %v8528_v20  ;;  %v7728_v55 = vld [vmem:[%s12094_s1 + $0x664] sm:$0xf]  ;;  %v5862_v56 = vld [vmem:[%s12094_s1 + $0x670] sm:$0xf0] }
  0xcd   :  { %3913 = vmatpush.bf16.msra.mxu0 %v5929_v58  ;;  %3926 = vmatpush.bf16.msra.mxu1 %v6057_v60  ;;  %v7760_v57 = vld [vmem:[%s12094_s1 + $0x764] sm:$0xf]  ;;  %v3663_v58 = vadd.f32 %v3662_v52, %v9545_v34  ;;  %v6265_v60 = vor.u32 %v7828_v47, %v6262_v49  ;;  %v6118_v63 = vld [vmem:[%s12094_s1 + $0x870] sm:$0xf0]  ;;  %v5865_v2 = vor.u32 %v7728_v55, %v5862_v56  ;;  %v3688_v8 = vpop.f32.mrf.mxu2  ;;  %v3677_v28 = vpop.f32.mrf.mxu1 }
  0xce   :  { %3939 = vmatpush.bf16.msra.mxu2 %v6185_v61  ;;  %3952 = vmatpush.bf16.msra.mxu3 %v6313_v1  ;;  %v5990_v61 = vld [vmem:[%s12094_s1 + $0x770] sm:$0xf0]  ;;  %v7792_v62 = vld [vmem:[%s12094_s1 + $0x864] sm:$0xf] }
  0xcf   :  { %3895 = vmatmul.bf16.vlgmr.msrb.gmra.mxu2 %v8711_v45  ;;  %3908 = vmatmul.bf16.vlgmr.msrb.gmra.mxu3 %v8715_v48  ;;  %v7824_v0 = vld [vmem:[%s12094_s1 + $0x964] sm:$0xf]  ;;  %v6246_v34 = vld [vmem:[%s12094_s1 + $0x970] sm:$0xf0]  ;;  %v3676_v1 = vadd.f32 %v3675_v59, %v3663_v58  ;;  %v5993_v3 = vor.u32 %v7760_v57, %v5990_v61  ;;  %v6121_v4 = vor.u32 %v7792_v62, %v6118_v63 }
  0xd0   :  { %v7724_v5 = vld [vmem:[%s12094_s1 + $0x644] sm:$0xf]  ;;  %v5846_v6 = vld [vmem:[%s12094_s1 + $0x650] sm:$0xf0] }
  0xd1   :  { %3914 = vmatpush.bf16.msra.mxu0 %v5913_v7  ;;  %3927 = vmatpush.bf16.msra.mxu1 %v6041_v10  ;;  %v7756_v7 = vld [vmem:[%s12094_s1 + $0x744] sm:$0xf]  ;;  %v6249_v10 = vor.u32 %v7824_v0, %v6246_v34  ;;  %v6102_v13 = vld [vmem:[%s12094_s1 + $0x850] sm:$0xf0]  ;;  %v3689_v14 = vadd.f32 %v3688_v8, %v3676_v1  ;;  %v5849_v19 = vor.u32 %v7724_v5, %v5846_v6  ;;  %v3664_v22 = vpop.f32.mrf.mxu0 }
  0xd2   :  { %3940 = vmatpush.bf16.msra.mxu2 %v6169_v11  ;;  %3953 = vmatpush.bf16.msra.mxu3 %v6297_v15  ;;  %v5974_v11 = vld [vmem:[%s12094_s1 + $0x750] sm:$0xf0]  ;;  %v7788_v12 = vld [vmem:[%s12094_s1 + $0x844] sm:$0xf]  ;;  %v3701_v15 = vpop.f32.mrf.mxu3 }
  0xd3   :  { %v7820_v17 = vld [vmem:[%s12094_s1 + $0x944] sm:$0xf]  ;;  %v6230_v18 = vld [vmem:[%s12094_s1 + $0x950] sm:$0xf0]  ;;  %v9687_v21 = vadd.f32 %v3701_v15, %v3689_v14 }
  0xd4   :  { %v5830_v26 = vld [vmem:[%s12094_s1 + $0x630] sm:$0xf0]  ;;  %v7752_v27 = vld [vmem:[%s12094_s1 + $0x724] sm:$0xf] }
  0xd5   :  { %3915 = vmatpush.bf16.msra.mxu0 %v5897_v23  ;;  %3928 = vmatpush.bf16.msra.mxu1 %v6025_v24  ;;  %v5977_v23 = vor.u32 %v7756_v7, %v5974_v11  ;;  %v6105_v24 = vor.u32 %v7788_v12, %v6102_v13  ;;  %v5958_v32 = vld [vmem:[%s12094_s1 + $0x730] sm:$0xf0]  ;;  %v7784_v37 = vld [vmem:[%s12094_s1 + $0x824] sm:$0xf]  ;;  %v3690_v59 = vpop.f32.mrf.mxu2 }
  0xd6   :  { %3941 = vmatpush.bf16.msra.mxu2 %v6153_v25  ;;  %3954 = vmatpush.bf16.msra.mxu3 %v6281_v29  ;;  %v7720_v25 = vld [vmem:[%s12094_s1 + $0x624] sm:$0xf]  ;;  %v6233_v29 = vor.u32 %v7820_v17, %v6230_v18  ;;  %v6086_v41 = vld [vmem:[%s12094_s1 + $0x830] sm:$0xf0] }
  0xd7   :  { %v7816_v47 = vld [vmem:[%s12094_s1 + $0x924] sm:$0xf]  ;;  %v6214_v49 = vld [vmem:[%s12094_s1 + $0x930] sm:$0xf0]  ;;  %v6089_v55 = vor.u32 %v7784_v37, %v6086_v41 }
  0xd8   :  { %v7716_v52 = vld [vmem:[%s12094_s1 + $0x604] sm:$0xf]  ;;  %v5942_v57 = vld [vmem:[%s12094_s1 + $0x710] sm:$0xf0] }
  0xd9   :  { %3916 = vmatpush.bf16.msra.mxu0 %v5881_v50  ;;  %3929 = vmatpush.bf16.msra.mxu1 %v6009_v53  ;;  %v5833_v50 = vor.u32 %v7720_v25, %v5830_v26  ;;  %v5814_v53 = vld [vmem:[%s12094_s1 + $0x610] sm:$0xf0]  ;;  %v7748_v56 = vld [vmem:[%s12094_s1 + $0x704] sm:$0xf] }
  0xda   :  { %3942 = vmatpush.bf16.msra.mxu2 %v6137_v54  ;;  %3955 = vmatpush.bf16.msra.mxu3 %v6265_v60  ;;  %v5961_v54 = vor.u32 %v7752_v27, %v5958_v32  ;;  %v7780_v58 = vld [vmem:[%s12094_s1 + $0x804] sm:$0xf]  ;;  %v6217_v60 = vor.u32 %v7816_v47, %v6214_v49  ;;  %v6070_v61 = vld [vmem:[%s12094_s1 + $0x810] sm:$0xf0]  ;;  %v3703_v0 = vpop.f32.mrf.mxu3  ;;  %v5945_v7 = vor.u32 %v7748_v56, %v5942_v57 }
  0xdb   :  { %v7812_v62 = vld [vmem:[%s12094_s1 + $0x904] sm:$0xf]  ;;  %v6198_v63 = vld [vmem:[%s12094_s1 + $0x910] sm:$0xf0]  ;;  %v6073_v8 = vor.u32 %v7780_v58, %v6070_v61 }
  0xdc   :  { %v7872_v34 = vld [vmem:[%s12094_s1 + $0xae4] sm:$0xf]  ;;  %v6438_v1 = vld [vmem:[%s12094_s1 + $0xaf0] sm:$0xf0]  ;;  %v6201_v12 = vor.u32 %v7812_v62, %v6198_v63 }
  0xdd   :  { %3917 = vmatpush.bf16.msra.mxu0 %v5865_v2  ;;  %3930 = vmatpush.bf16.msra.mxu1 %v5993_v3  ;;  %v7904_v2 = vld [vmem:[%s12094_s1 + $0xbe4] sm:$0xf]  ;;  %v5817_v3 = vor.u32 %v7716_v52, %v5814_v53  ;;  %v6694_v6 = vld [vmem:[%s12094_s1 + $0xcf0] sm:$0xf0]  ;;  %v6441_v13 = vor.u32 %v7872_v34, %v6438_v1 }
  0xde   :  { %3943 = vmatpush.bf16.msra.mxu2 %v6121_v4  ;;  %3956 = vmatpush.bf16.msra.mxu3 %v6249_v10  ;;  %v6566_v4 = vld [vmem:[%s12094_s1 + $0xbf0] sm:$0xf0]  ;;  %v7936_v5 = vld [vmem:[%s12094_s1 + $0xce4] sm:$0xf] }
  0xdf   :  { %v7968_v10 = vld [vmem:[%s12094_s1 + $0xde4] sm:$0xf]  ;;  %v6822_v11 = vld [vmem:[%s12094_s1 + $0xdf0] sm:$0xf0]  ;;  %v6569_v14 = vor.u32 %v7904_v2, %v6566_v4  ;;  %v6697_v15 = vor.u32 %v7936_v5, %v6694_v6 }
  0xe0   :  { %v7868_v17 = vld [vmem:[%s12094_s1 + $0xac4] sm:$0xf]  ;;  %v6422_v18 = vld [vmem:[%s12094_s1 + $0xad0] sm:$0xf0]  ;;  %v6825_v22 = vor.u32 %v7968_v10, %v6822_v11 }
  0xe1   :  { %3918 = vmatpush.bf16.msra.mxu0 %v5849_v19  ;;  %3931 = vmatpush.bf16.msra.mxu1 %v5977_v23  ;;  %v7900_v19 = vld [vmem:[%s12094_s1 + $0xbc4] sm:$0xf]  ;;  %v6550_v23 = vld [vmem:[%s12094_s1 + $0xbd0] sm:$0xf0]  ;;  %v6425_v28 = vor.u32 %v7868_v17, %v6422_v18 }
  0xe2   :  { %3944 = vmatpush.bf16.msra.mxu2 %v6105_v24  ;;  %3957 = vmatpush.bf16.msra.mxu3 %v6233_v29  ;;  %v7932_v24 = vld [vmem:[%s12094_s1 + $0xcc4] sm:$0xf]  ;;  %v6678_v25 = vld [vmem:[%s12094_s1 + $0xcd0] sm:$0xf0]  ;;  %v6553_v29 = vor.u32 %v7900_v19, %v6550_v23 }
  0xe3   :  { %v7964_v26 = vld [vmem:[%s12094_s1 + $0xdc4] sm:$0xf]  ;;  %v6806_v27 = vld [vmem:[%s12094_s1 + $0xdd0] sm:$0xf0]  ;;  %v6681_v32 = vor.u32 %v7932_v24, %v6678_v25  ;;  %v3727_v6 = vpop.f32.mrf.mxu1 }
  0xe4   :  { %v7864_v37 = vld [vmem:[%s12094_s1 + $0xaa4] sm:$0xf]  ;;  %v6406_v41 = vld [vmem:[%s12094_s1 + $0xab0] sm:$0xf0]  ;;  %v6809_v49 = vor.u32 %v7964_v26, %v6806_v27 }
  0xe5   :  { %3919 = vmatpush.bf16.msra.mxu0 %v5833_v50  ;;  %3932 = vmatpush.bf16.msra.mxu1 %v5961_v54  ;;  %v7896_v47 = vld [vmem:[%s12094_s1 + $0xba4] sm:$0xf]  ;;  %v6534_v50 = vld [vmem:[%s12094_s1 + $0xbb0] sm:$0xf0]  ;;  %v6409_v56 = vor.u32 %v7864_v37, %v6406_v41 }
  0xe6   :  { %3945 = vmatpush.bf16.msra.mxu2 %v6089_v55  ;;  %3958 = vmatpush.bf16.msra.mxu3 %v6217_v60  ;;  %v7928_v52 = vld [vmem:[%s12094_s1 + $0xca4] sm:$0xf]  ;;  %v6662_v53 = vld [vmem:[%s12094_s1 + $0xcb0] sm:$0xf0]  ;;  %v6537_v57 = vor.u32 %v7896_v47, %v6534_v50 }
  0xe7   :  { %v7960_v54 = vld [vmem:[%s12094_s1 + $0xda4] sm:$0xf]  ;;  %v6790_v55 = vld [vmem:[%s12094_s1 + $0xdb0] sm:$0xf0]  ;;  %v6665_v58 = vor.u32 %v7928_v52, %v6662_v53  ;;  %v3714_v1 = vpop.f32.mrf.mxu0 }
  0xe8   :  { %v7860_v59 = vld [vmem:[%s12094_s1 + $0xa84] sm:$0xf]  ;;  %v6390_v60 = vld [vmem:[%s12094_s1 + $0xa90] sm:$0xf0]  ;;  %v6793_v62 = vor.u32 %v7960_v54, %v6790_v55  ;;  %v3715_v4 = vadd.f32 %v3714_v1, %v9687_v21 }
  0xe9   :  { %3920 = vmatpush.bf16.msra.mxu0 %v5817_v3  ;;  %3933 = vmatpush.bf16.msra.mxu1 %v5945_v7  ;;  %v7892_v61 = vld [vmem:[%s12094_s1 + $0xb84] sm:$0xf]  ;;  %v6518_v63 = vld [vmem:[%s12094_s1 + $0xb90] sm:$0xf0]  ;;  %v6393_v5 = vor.u32 %v7860_v59, %v6390_v60 }
  0xea   :  { %3946 = vmatpush.bf16.msra.mxu2 %v6073_v8  ;;  %3959 = vmatpush.bf16.msra.mxu3 %v6201_v12  ;;  %v7924_v0 = vld [vmem:[%s12094_s1 + $0xc84] sm:$0xf]  ;;  %v6646_v34 = vld [vmem:[%s12094_s1 + $0xc90] sm:$0xf0]  ;;  %v6521_v7 = vor.u32 %v7892_v61, %v6518_v63 }
  0xeb   :  { %v7956_v2 = vld [vmem:[%s12094_s1 + $0xd84] sm:$0xf]  ;;  %v6774_v3 = vld [vmem:[%s12094_s1 + $0xd90] sm:$0xf0]  ;;  %v6649_v8 = vor.u32 %v7924_v0, %v6646_v34  ;;  %v3729_v55 = vpop.f32.mrf.mxu1 }
  0xec   :  { %3921 = vmatmul.bf16.vlgmr.msra.gmra.mxu0 %v8703_v42  ;;  %3934 = vmatmul.bf16.vlgmr.msra.gmra.mxu1 %v8713_v46  ;;  %v7856_v10 = vld [vmem:[%s12094_s1 + $0xa64] sm:$0xf]  ;;  %v6374_v11 = vld [vmem:[%s12094_s1 + $0xa70] sm:$0xf0]  ;;  %v6777_v21 = vor.u32 %v7956_v2, %v6774_v3 }
  0xed   :  { %3965 = vmatpush.bf16.msrb.mxu0 %v6441_v13  ;;  %3978 = vmatpush.bf16.msrb.mxu1 %v6569_v14  ;;  %v7888_v12 = vld [vmem:[%s12094_s1 + $0xb64] sm:$0xf]  ;;  %v3728_v13 = vadd.f32 %v3727_v6, %v3715_v4  ;;  %v6502_v14 = vld [vmem:[%s12094_s1 + $0xb70] sm:$0xf0] }
  0xee   :  { %3991 = vmatpush.bf16.msrb.mxu2 %v6697_v15  ;;  %4004 = vmatpush.bf16.msrb.mxu3 %v6825_v22  ;;  %v7920_v15 = vld [vmem:[%s12094_s1 + $0xc64] sm:$0xf]  ;;  %v6630_v17 = vld [vmem:[%s12094_s1 + $0xc70] sm:$0xf0]  ;;  %v6377_v22 = vor.u32 %v7856_v10, %v6374_v11  ;;  %v6505_v23 = vor.u32 %v7888_v12, %v6502_v14 }
  0xef   :  { %3947 = vmatmul.bf16.vlgmr.msra.gmra.mxu2 %v8922_v30  ;;  %3960 = vmatmul.bf16.vlgmr.msra.gmra.mxu3 %v8935_v36  ;;  %v7952_v18 = vld [vmem:[%s12094_s1 + $0xd64] sm:$0xf]  ;;  %v6758_v19 = vld [vmem:[%s12094_s1 + $0xd70] sm:$0xf0]  ;;  %v6633_v24 = vor.u32 %v7920_v15, %v6630_v17  ;;  %v3716_v53 = vpop.f32.mrf.mxu0 }
  0xf0   :  { %v7852_v25 = vld [vmem:[%s12094_s1 + $0xa44] sm:$0xf]  ;;  %v6358_v26 = vld [vmem:[%s12094_s1 + $0xa50] sm:$0xf0] }
  0xf1   :  { %3966 = vmatpush.bf16.msrb.mxu0 %v6425_v28  ;;  %3979 = vmatpush.bf16.msrb.mxu1 %v6553_v29  ;;  %v7884_v27 = vld [vmem:[%s12094_s1 + $0xb44] sm:$0xf]  ;;  %v6761_v28 = vor.u32 %v7952_v18, %v6758_v19  ;;  %v3740_v29 = vpop.f32.mrf.mxu2  ;;  %v6614_v41 = vld [vmem:[%s12094_s1 + $0xc50] sm:$0xf0]  ;;  %v6361_v54 = vor.u32 %v7852_v25, %v6358_v26 }
  0xf2   :  { %3992 = vmatpush.bf16.msrb.mxu2 %v6681_v32  ;;  %4005 = vmatpush.bf16.msrb.mxu3 %v6809_v49  ;;  %v6486_v32 = vld [vmem:[%s12094_s1 + $0xb50] sm:$0xf0]  ;;  %v7916_v37 = vld [vmem:[%s12094_s1 + $0xc44] sm:$0xf]  ;;  %v3741_v47 = vadd.f32 %v3740_v29, %v3728_v13  ;;  %v3753_v49 = vpop.f32.mrf.mxu3 }
  0xf3   :  { %v7948_v50 = vld [vmem:[%s12094_s1 + $0xd44] sm:$0xf]  ;;  %v6742_v52 = vld [vmem:[%s12094_s1 + $0xd50] sm:$0xf0] }
  0xf4   :  { %v7848_v59 = vld [vmem:[%s12094_s1 + $0xa24] sm:$0xf]  ;;  %v6342_v60 = vld [vmem:[%s12094_s1 + $0xa30] sm:$0xf0] }
  0xf5   :  { %3967 = vmatpush.bf16.msrb.mxu0 %v6409_v56  ;;  %3980 = vmatpush.bf16.msrb.mxu1 %v6537_v57  ;;  %v9886_v56 = vadd.f32 %v3753_v49, %v3741_v47  ;;  %v6489_v57 = vor.u32 %v7884_v27, %v6486_v32  ;;  %v7880_v61 = vld [vmem:[%s12094_s1 + $0xb24] sm:$0xf]  ;;  %v6470_v63 = vld [vmem:[%s12094_s1 + $0xb30] sm:$0xf0]  ;;  %v6345_v3 = vor.u32 %v7848_v59, %v6342_v60 }
  0xf6   :  { %3993 = vmatpush.bf16.msrb.mxu2 %v6665_v58  ;;  %4006 = vmatpush.bf16.msrb.mxu3 %v6793_v62  ;;  %v6617_v58 = vor.u32 %v7916_v37, %v6614_v41  ;;  %v6745_v62 = vor.u32 %v7948_v50, %v6742_v52  ;;  %v7912_v0 = vld [vmem:[%s12094_s1 + $0xc24] sm:$0xf]  ;;  %v6598_v34 = vld [vmem:[%s12094_s1 + $0xc30] sm:$0xf0]  ;;  %v6473_v6 = vor.u32 %v7880_v61, %v6470_v63 }
  0xf7   :  { %v7944_v1 = vld [vmem:[%s12094_s1 + $0xd24] sm:$0xf]  ;;  %v6726_v2 = vld [vmem:[%s12094_s1 + $0xd30] sm:$0xf0] }
  0xf8   :  { %v7844_v4 = vld [vmem:[%s12094_s1 + $0xa04] sm:$0xf]  ;;  %v6454_v10 = vld [vmem:[%s12094_s1 + $0xb10] sm:$0xf0]  ;;  %v6729_v12 = vor.u32 %v7944_v1, %v6726_v2 }
  0xf9   :  { %3968 = vmatpush.bf16.msrb.mxu0 %v6393_v5  ;;  %3981 = vmatpush.bf16.msrb.mxu1 %v6521_v7  ;;  %v6326_v5 = vld [vmem:[%s12094_s1 + $0xa10] sm:$0xf0]  ;;  %v6601_v7 = vor.u32 %v7912_v0, %v6598_v34  ;;  %v7908_v11 = vld [vmem:[%s12094_s1 + $0xc04] sm:$0xf]  ;;  %v3742_v15 = vpop.f32.mrf.mxu2 }
  0xfa   :  { %3994 = vmatpush.bf16.msrb.mxu2 %v6649_v8  ;;  %4007 = vmatpush.bf16.msrb.mxu3 %v6777_v21  ;;  %v7876_v8 = vld [vmem:[%s12094_s1 + $0xb04] sm:$0xf]  ;;  %v6582_v21 = vld [vmem:[%s12094_s1 + $0xc10] sm:$0xf0] }
  0xfb   :  { %v7940_v13 = vld [vmem:[%s12094_s1 + $0xd04] sm:$0xf]  ;;  %v6710_v14 = vld [vmem:[%s12094_s1 + $0xd10] sm:$0xf0]  ;;  %v6457_v27 = vor.u32 %v7876_v8, %v6454_v10 }
  0xfc   :  { %v8000_v17 = vld [vmem:[%s12094_s1 + $0xee4] sm:$0xf]  ;;  %v6950_v18 = vld [vmem:[%s12094_s1 + $0xef0] sm:$0xf0]  ;;  %v6713_v37 = vor.u32 %v7940_v13, %v6710_v14 }
  0xfd   :  { %3969 = vmatpush.bf16.msrb.mxu0 %v6377_v22  ;;  %3982 = vmatpush.bf16.msrb.mxu1 %v6505_v23  ;;  %v8032_v19 = vld [vmem:[%s12094_s1 + $0xfe4] sm:$0xf]  ;;  %v3755_v22 = vpop.f32.mrf.mxu3  ;;  %v6329_v23 = vor.u32 %v7844_v4, %v6326_v5  ;;  %v7206_v26 = vld [vmem:[%s12094_s1 + $0x10f0] sm:$0xf0]  ;;  %v6953_v41 = vor.u32 %v8000_v17, %v6950_v18 }
  0xfe   :  { %3995 = vmatpush.bf16.msrb.mxu2 %v6633_v24  ;;  %4008 = vmatpush.bf16.msrb.mxu3 %v6761_v28  ;;  %v7078_v24 = vld [vmem:[%s12094_s1 + $0xff0] sm:$0xf0]  ;;  %v8064_v25 = vld [vmem:[%s12094_s1 + $0x10e4] sm:$0xf]  ;;  %v6585_v28 = vor.u32 %v7908_v11, %v6582_v21 }
  0xff   :  { %v8096_v29 = vld [vmem:[%s12094_s1 + $0x11e4] sm:$0xf]  ;;  %v7334_v32 = vld [vmem:[%s12094_s1 + $0x11f0] sm:$0xf0]  ;;  %v7081_v47 = vor.u32 %v8032_v19, %v7078_v24  ;;  %v7209_v49 = vor.u32 %v8064_v25, %v7206_v26 }
 0x100   :  { %v7996_v50 = vld [vmem:[%s12094_s1 + $0xec4] sm:$0xf]  ;;  %v6934_v52 = vld [vmem:[%s12094_s1 + $0xed0] sm:$0xf0] }
 0x101   :  { %3970 = vmatpush.bf16.msrb.mxu0 %v6361_v54  ;;  %3983 = vmatpush.bf16.msrb.mxu1 %v6489_v57  ;;  %v8028_v53 = vld [vmem:[%s12094_s1 + $0xfc4] sm:$0xf]  ;;  %v7337_v54 = vor.u32 %v8096_v29, %v7334_v32  ;;  %v7062_v55 = vld [vmem:[%s12094_s1 + $0xfd0] sm:$0xf0]  ;;  %v6937_v61 = vor.u32 %v7996_v50, %v6934_v52 }
 0x102   :  { %3996 = vmatpush.bf16.msrb.mxu2 %v6617_v58  ;;  %4009 = vmatpush.bf16.msrb.mxu3 %v6745_v62  ;;  %v8060_v57 = vld [vmem:[%s12094_s1 + $0x10c4] sm:$0xf]  ;;  %v7190_v58 = vld [vmem:[%s12094_s1 + $0x10d0] sm:$0xf0]  ;;  %v7065_v62 = vor.u32 %v8028_v53, %v7062_v55 }
 0x103   :  { %v8092_v59 = vld [vmem:[%s12094_s1 + $0x11c4] sm:$0xf]  ;;  %v7318_v60 = vld [vmem:[%s12094_s1 + $0x11d0] sm:$0xf0]  ;;  %v7193_v63 = vor.u32 %v8060_v57, %v7190_v58 }
 0x104   :  { %v7992_v0 = vld [vmem:[%s12094_s1 + $0xea4] sm:$0xf]  ;;  %v6918_v34 = vld [vmem:[%s12094_s1 + $0xeb0] sm:$0xf0]  ;;  %v7321_v2 = vor.u32 %v8092_v59, %v7318_v60 }
 0x105   :  { %3971 = vmatpush.bf16.msrb.mxu0 %v6345_v3  ;;  %3984 = vmatpush.bf16.msrb.mxu1 %v6473_v6  ;;  %v8024_v1 = vld [vmem:[%s12094_s1 + $0xfa4] sm:$0xf]  ;;  %v7046_v3 = vld [vmem:[%s12094_s1 + $0xfb0] sm:$0xf0]  ;;  %v6921_v8 = vor.u32 %v7992_v0, %v6918_v34 }
 0x106   :  { %3997 = vmatpush.bf16.msrb.mxu2 %v6601_v7  ;;  %4010 = vmatpush.bf16.msrb.mxu3 %v6729_v12  ;;  %v8056_v4 = vld [vmem:[%s12094_s1 + $0x10a4] sm:$0xf]  ;;  %v7174_v5 = vld [vmem:[%s12094_s1 + $0x10b0] sm:$0xf0]  ;;  %v7049_v10 = vor.u32 %v8024_v1, %v7046_v3 }
 0x107   :  { %v8088_v6 = vld [vmem:[%s12094_s1 + $0x11a4] sm:$0xf]  ;;  %v7302_v7 = vld [vmem:[%s12094_s1 + $0x11b0] sm:$0xf0]  ;;  %v7177_v11 = vor.u32 %v8056_v4, %v7174_v5 }
 0x108   :  { %v7988_v12 = vld [vmem:[%s12094_s1 + $0xe84] sm:$0xf]  ;;  %v6902_v21 = vld [vmem:[%s12094_s1 + $0xe90] sm:$0xf0]  ;;  %v7305_v14 = vor.u32 %v8088_v6, %v7302_v7 }
 0x109   :  { %3972 = vmatpush.bf16.msrb.mxu0 %v6329_v23  ;;  %3985 = vmatpush.bf16.msrb.mxu1 %v6457_v27  ;;  %v8020_v13 = vld [vmem:[%s12094_s1 + $0xf84] sm:$0xf]  ;;  %v7030_v15 = vld [vmem:[%s12094_s1 + $0xf90] sm:$0xf0]  ;;  %v3766_v19 = vpop.f32.mrf.mxu0  ;;  %v6905_v25 = vor.u32 %v7988_v12, %v6902_v21  ;;  %v3779_v26 = vpop.f32.mrf.mxu1 }
 0x10a   :  { %3998 = vmatpush.bf16.msrb.mxu2 %v6585_v28  ;;  %4011 = vmatpush.bf16.msrb.mxu3 %v6713_v37  ;;  %v8052_v17 = vld [vmem:[%s12094_s1 + $0x1084] sm:$0xf]  ;;  %v7158_v18 = vld [vmem:[%s12094_s1 + $0x1090] sm:$0xf0]  ;;  %v3767_v24 = vadd.f32 %v3766_v19, %v9886_v56  ;;  %v7033_v27 = vor.u32 %v8020_v13, %v7030_v15 }
 0x10b   :  { %v8084_v22 = vld [vmem:[%s12094_s1 + $0x1184] sm:$0xf]  ;;  %v7286_v23 = vld [vmem:[%s12094_s1 + $0x1190] sm:$0xf0]  ;;  %v7161_v28 = vor.u32 %v8052_v17, %v7158_v18 }
 0x10c   :  { %3973 = vmatmul.bf16.vlgmr.msrb.gmra.mxu0 %v8933_v35  ;;  %3986 = vmatmul.bf16.vlgmr.msrb.gmra.mxu1 %v8943_v39  ;;  %v7984_v29 = vld [vmem:[%s12094_s1 + $0xe64] sm:$0xf]  ;;  %v6886_v32 = vld [vmem:[%s12094_s1 + $0xe70] sm:$0xf0]  ;;  %v7289_v56 = vor.u32 %v8084_v22, %v7286_v23 }
 0x10d   :  { %4017 = vmatpush.bf16.msra.mxu0 %v6953_v41  ;;  %4030 = vmatpush.bf16.msra.mxu1 %v7081_v47  ;;  %v8016_v37 = vld [vmem:[%s12094_s1 + $0xf64] sm:$0xf]  ;;  %v3780_v41 = vadd.f32 %v3779_v26, %v3767_v24  ;;  %v7014_v47 = vld [vmem:[%s12094_s1 + $0xf70] sm:$0xf0] }
 0x10e   :  { %4043 = vmatpush.bf16.msra.mxu2 %v7209_v49  ;;  %4056 = vmatpush.bf16.msra.mxu3 %v7337_v54  ;;  %v8048_v49 = vld [vmem:[%s12094_s1 + $0x1064] sm:$0xf]  ;;  %v7142_v50 = vld [vmem:[%s12094_s1 + $0x1070] sm:$0xf0]  ;;  %v6889_v54 = vor.u32 %v7984_v29, %v6886_v32  ;;  %v7017_v55 = vor.u32 %v8016_v37, %v7014_v47 }
 0x10f   :  { %3999 = vmatmul.bf16.vlgmr.msrb.gmra.mxu2 %v9150_v31  ;;  %4012 = vmatmul.bf16.vlgmr.msrb.gmra.mxu3 %v9163_v40  ;;  %v8080_v52 = vld [vmem:[%s12094_s1 + $0x1164] sm:$0xf]  ;;  %v7270_v53 = vld [vmem:[%s12094_s1 + $0x1170] sm:$0xf0]  ;;  %v7145_v57 = vor.u32 %v8048_v49, %v7142_v50  ;;  %v5164_v50 = vld [vmem:[%s12094_s1 + $0xe8] sm:$0xf] }
 0x110   :  { %v7980_v58 = vld [vmem:[%s12094_s1 + $0xe44] sm:$0xf]  ;;  %v6870_v59 = vld [vmem:[%s12094_s1 + $0xe50] sm:$0xf0] }
 0x111   :  { %4018 = vmatpush.bf16.msra.mxu0 %v6937_v61  ;;  %4031 = vmatpush.bf16.msra.mxu1 %v7065_v62  ;;  %v8012_v60 = vld [vmem:[%s12094_s1 + $0xf44] sm:$0xf]  ;;  %v7273_v61 = vor.u32 %v8080_v52, %v7270_v53  ;;  %v7126_v34 = vld [vmem:[%s12094_s1 + $0x1050] sm:$0xf0]  ;;  %v3768_v5 = vpop.f32.mrf.mxu0  ;;  %v6873_v6 = vor.u32 %v7980_v58, %v6870_v59  ;;  %v3781_v7 = vpop.f32.mrf.mxu1  ;;  %v7555_v52 = vld [vmem:[%s12094_s1 + $0xf4] sm:$0xf0] }
 0x112   :  { %4044 = vmatpush.bf16.msra.mxu2 %v7193_v63  ;;  %4057 = vmatpush.bf16.msra.mxu3 %v7321_v2  ;;  %v3792_v62 = vpop.f32.mrf.mxu2  ;;  %v6998_v63 = vld [vmem:[%s12094_s1 + $0xf50] sm:$0xf0]  ;;  %v8044_v0 = vld [vmem:[%s12094_s1 + $0x1044] sm:$0xf]  ;;  %v3805_v2 = vpop.f32.mrf.mxu3  ;;  %v5292_v53 = vld [vmem:[%s12094_s1 + $0x1e8] sm:$0xf] }
 0x113   :  { %v3793_v1 = vadd.f32 %v3792_v62, %v3780_v41  ;;  %v8076_v3 = vld [vmem:[%s12094_s1 + $0x1144] sm:$0xf]  ;;  %v7254_v4 = vld [vmem:[%s12094_s1 + $0x1150] sm:$0xf0]  ;;  %v5420_v58 = vld [vmem:[%s12094_s1 + $0x2e8] sm:$0xf] }
 0x114   :  { %v7976_v12 = vld [vmem:[%s12094_s1 + $0xe24] sm:$0xf]  ;;  %v6854_v21 = vld [vmem:[%s12094_s1 + $0xe30] sm:$0xf0]  ;;  %v7619_v59 = vld [vmem:[%s12094_s1 + $0x2f4] sm:$0xf0] }
 0x115   :  { %4019 = vmatpush.bf16.msra.mxu0 %v6921_v8  ;;  %4032 = vmatpush.bf16.msra.mxu1 %v7049_v10  ;;  %v10085_v8 = vadd.f32 %v3805_v2, %v3793_v1  ;;  %v7001_v10 = vor.u32 %v8012_v60, %v6998_v63  ;;  %v8008_v13 = vld [vmem:[%s12094_s1 + $0xf24] sm:$0xf]  ;;  %v6982_v15 = vld [vmem:[%s12094_s1 + $0xf30] sm:$0xf0]  ;;  %v6857_v23 = vor.u32 %v7976_v12, %v6854_v21  ;;  %v5548_v62 = vld [vmem:[%s12094_s1 + $0x3e8] sm:$0xf] }
 0x116   :  { %4045 = vmatpush.bf16.msra.mxu2 %v7177_v11  ;;  %4058 = vmatpush.bf16.msra.mxu3 %v7305_v14  ;;  %v7129_v11 = vor.u32 %v8044_v0, %v7126_v34  ;;  %v7257_v14 = vor.u32 %v8076_v3, %v7254_v4  ;;  %v8040_v17 = vld [vmem:[%s12094_s1 + $0x1024] sm:$0xf]  ;;  %v7110_v18 = vld [vmem:[%s12094_s1 + $0x1030] sm:$0xf0]  ;;  %v6985_v26 = vor.u32 %v8008_v13, %v6982_v15  ;;  %v7651_v63 = vld [vmem:[%s12094_s1 + $0x3f4] sm:$0xf0] }
 0x117   :  { %v8072_v19 = vld [vmem:[%s12094_s1 + $0x1124] sm:$0xf]  ;;  %v7238_v22 = vld [vmem:[%s12094_s1 + $0x1130] sm:$0xf0]  ;;  %v5165_v34 = vor.u32 %v7555_v52, %v5164_v50  ;;  %v5421_v2 = vor.u32 %v7619_v59, %v5420_v58  ;;  %v5148_v3 = vld [vmem:[%s12094_s1 + $0xc8] sm:$0xf] }
 0x118   :  { %v7972_v24 = vld [vmem:[%s12094_s1 + $0xe04] sm:$0xf]  ;;  %v6966_v29 = vld [vmem:[%s12094_s1 + $0xf10] sm:$0xf0]  ;;  %v7241_v37 = vor.u32 %v8072_v19, %v7238_v22  ;;  %v7551_v4 = vld [vmem:[%s12094_s1 + $0xd4] sm:$0xf0] }
 0x119   :  { %4020 = vmatpush.bf16.msra.mxu0 %v6905_v25  ;;  %4033 = vmatpush.bf16.msra.mxu1 %v7033_v27  ;;  %v6838_v25 = vld [vmem:[%s12094_s1 + $0xe10] sm:$0xf0]  ;;  %v7113_v27 = vor.u32 %v8040_v17, %v7110_v18  ;;  %v8036_v32 = vld [vmem:[%s12094_s1 + $0x1004] sm:$0xf]  ;;  %v5276_v5 = vld [vmem:[%s12094_s1 + $0x1c8] sm:$0xf]  ;;  %v5149_v13 = vor.u32 %v7551_v4, %v5148_v3 }
 0x11a   :  { %4046 = vmatpush.bf16.msra.mxu2 %v7161_v28  ;;  %4059 = vmatpush.bf16.msra.mxu3 %v7289_v56  ;;  %v8004_v28 = vld [vmem:[%s12094_s1 + $0xf04] sm:$0xf]  ;;  %v7094_v56 = vld [vmem:[%s12094_s1 + $0x1010] sm:$0xf0]  ;;  %v3794_v49 = vpop.f32.mrf.mxu2  ;;  %v7583_v7 = vld [vmem:[%s12094_s1 + $0x1d4] sm:$0xf0] }
 0x11b   :  { %v8068_v41 = vld [vmem:[%s12094_s1 + $0x1104] sm:$0xf]  ;;  %v7222_v47 = vld [vmem:[%s12094_s1 + $0x1110] sm:$0xf0]  ;;  %v6969_v60 = vor.u32 %v8004_v28, %v6966_v29  ;;  %v5532_v12 = vld [vmem:[%s12094_s1 + $0x3c8] sm:$0xf] }
 0x11c   :  { %v7225_v0 = vor.u32 %v8068_v41, %v7222_v47  ;;  %v7647_v21 = vld [vmem:[%s12094_s1 + $0x3d4] sm:$0xf0]  ;;  %v5132_v17 = vld [vmem:[%s12094_s1 + $0xa8] sm:$0xf] }
 0x11d   :  { %4021 = vmatpush.bf16.msra.mxu0 %v6889_v54  ;;  %4034 = vmatpush.bf16.msra.mxu1 %v7017_v55  ;;  %v3807_v54 = vpop.f32.mrf.mxu3  ;;  %v6841_v55 = vor.u32 %v7972_v24, %v6838_v25  ;;  %v7547_v18 = vld [vmem:[%s12094_s1 + $0xb4] sm:$0xf0]  ;;  %v5260_v19 = vld [vmem:[%s12094_s1 + $0x1a8] sm:$0xf]  ;;  %v5533_v22 = vor.u32 %v7647_v21, %v5532_v12 }
 0x11e   :  { %4047 = vmatpush.bf16.msra.mxu2 %v7145_v57  ;;  %4060 = vmatpush.bf16.msra.mxu3 %v7273_v61  ;;  %v7587_v57 = vld [vmem:[%s12094_s1 + $0x1f4] sm:$0xf0]  ;;  %v7097_v61 = vor.u32 %v8036_v32, %v7094_v56  ;;  %v5388_v24 = vld [vmem:[%s12094_s1 + $0x2a8] sm:$0xf]  ;;  %v5133_v28 = vor.u32 %v7547_v18, %v5132_v17 }
 0x11f   :  { %v5293_v1 = vor.u32 %v7587_v57, %v5292_v53  ;;  %v7611_v25 = vld [vmem:[%s12094_s1 + $0x2b4] sm:$0xf0]  ;;  %v5244_v41 = vld [vmem:[%s12094_s1 + $0x188] sm:$0xf] }
 0x120   :  { %v5389_v32 = vor.u32 %v7611_v25, %v5388_v24  ;;  %v7543_v56 = vld [vmem:[%s12094_s1 + $0x94] sm:$0xf0]  ;;  %v5372_v50 = vld [vmem:[%s12094_s1 + $0x288] sm:$0xf] }
 0x121   :  { %4022 = vmatpush.bf16.msra.mxu0 %v6873_v6  ;;  %4035 = vmatpush.bf16.msra.mxu1 %v7001_v10  ;;  %v5549_v6 = vor.u32 %v7651_v63, %v5548_v62  ;;  %v5404_v10 = vld [vmem:[%s12094_s1 + $0x2c8] sm:$0xf]  ;;  %v7575_v49 = vld [vmem:[%s12094_s1 + $0x194] sm:$0xf0] }
 0x122   :  { %4048 = vmatpush.bf16.msra.mxu2 %v7129_v11  ;;  %4061 = vmatpush.bf16.msra.mxu3 %v7257_v14  ;;  %v7615_v11 = vld [vmem:[%s12094_s1 + $0x2d4] sm:$0xf0]  ;;  %v5277_v14 = vor.u32 %v7583_v7, %v5276_v5  ;;  %v5500_v54 = vld [vmem:[%s12094_s1 + $0x388] sm:$0xf] }
 0x123   :  { %v5405_v15 = vor.u32 %v7615_v11, %v5404_v10  ;;  %v7607_v52 = vld [vmem:[%s12094_s1 + $0x294] sm:$0xf0]  ;;  %v5100_v62 = vld [vmem:[%s12094_s1 + $0x68] sm:$0xf] }
 0x124   :  { %v7539_v63 = vld [vmem:[%s12094_s1 + $0x74] sm:$0xf0]  ;;  %v5484_v4 = vld [vmem:[%s12094_s1 + $0x368] sm:$0xf] }
 0x125   :  { %4023 = vmatpush.bf16.msra.mxu0 %v6857_v23  ;;  %4036 = vmatpush.bf16.msra.mxu1 %v6985_v26  ;;  %v7579_v23 = vld [vmem:[%s12094_s1 + $0x1b4] sm:$0xf0]  ;;  %v5516_v26 = vld [vmem:[%s12094_s1 + $0x3a8] sm:$0xf]  ;;  %v5101_v10 = vor.u32 %v7539_v63, %v5100_v62 }
 0x126   :  { %4049 = vmatpush.bf16.msra.mxu2 %v7113_v27  ;;  %4062 = vmatpush.bf16.msra.mxu3 %v7241_v37  ;;  %v7643_v27 = vld [vmem:[%s12094_s1 + $0x3b4] sm:$0xf0]  ;;  %v5261_v29 = vor.u32 %v7579_v23, %v5260_v19  ;;  %v5116_v37 = vld [vmem:[%s12094_s1 + $0x88] sm:$0xf] }
 0x127   :  { %v5517_v47 = vor.u32 %v7643_v27, %v5516_v26  ;;  %v5117_v58 = vor.u32 %v7543_v56, %v5116_v37  ;;  %v7603_v3 = vld [vmem:[%s12094_s1 + $0x274] sm:$0xf0]  ;;  %v5084_v21 = vld [vmem:[%s12094_s1 + $0x48] sm:$0xf] }
 0x128   :  { %v7635_v5 = vld [vmem:[%s12094_s1 + $0x374] sm:$0xf0]  ;;  %v5340_v18 = vld [vmem:[%s12094_s1 + $0x248] sm:$0xf] }
 0x129   :  { %4024 = vmatpush.bf16.msra.mxu0 %v6841_v55  ;;  %4037 = vmatpush.bf16.msra.mxu1 %v6969_v60  ;;  %v3818_v53 = vpop.f32.mrf.mxu0  ;;  %v7639_v55 = vld [vmem:[%s12094_s1 + $0x394] sm:$0xf0]  ;;  %v3831_v59 = vpop.f32.mrf.mxu1  ;;  %v5245_v60 = vor.u32 %v7575_v49, %v5244_v41  ;;  %v5468_v23 = vld [vmem:[%s12094_s1 + $0x348] sm:$0xf] }
 0x12a   :  { %4050 = vmatpush.bf16.msra.mxu2 %v7097_v61  ;;  %4063 = vmatpush.bf16.msra.mxu3 %v7225_v0  ;;  %v3819_v57 = vadd.f32 %v3818_v53, %v10085_v8  ;;  %v5373_v61 = vor.u32 %v7607_v52, %v5372_v50  ;;  %v5228_v0 = vld [vmem:[%s12094_s1 + $0x168] sm:$0xf]  ;;  %v5501_v8 = vor.u32 %v7639_v55, %v5500_v54  ;;  %v7567_v17 = vld [vmem:[%s12094_s1 + $0x154] sm:$0xf0] }
 0x12b   :  { %v7599_v19 = vld [vmem:[%s12094_s1 + $0x254] sm:$0xf0]  ;;  %v5068_v56 = vld [vmem:[%s12094_s1 + $0x28] sm:$0xf] }
 0x12c   :  { %4025 = vmatmul.bf16.vlgmr.msra.gmra.mxu0 %v9161_v38  ;;  %4038 = vmatmul.bf16.vlgmr.msra.gmra.mxu1 %v9171_v44  ;;  %v7631_v24 = vld [vmem:[%s12094_s1 + $0x354] sm:$0xf0]  ;;  %v5341_v37 = vor.u32 %v7599_v19, %v5340_v18  ;;  %v5324_v53 = vld [vmem:[%s12094_s1 + $0x228] sm:$0xf] }
 0x12d   :  { %4069 = vmatpush.bf16.msrb.mxu0 %v5165_v34  ;;  %4082 = vmatpush.bf16.msrb.mxu1 %v5293_v1  ;;  %v10245_v34 = vadd.f32 %v3831_v59, %v3819_v57  ;;  %v7571_v1 = vld [vmem:[%s12094_s1 + $0x174] sm:$0xf0]  ;;  %v5469_v50 = vor.u32 %v7631_v24, %v5468_v23  ;;  %v5452_v55 = vld [vmem:[%s12094_s1 + $0x328] sm:$0xf] }
 0x12e   :  { %4095 = vmatpush.bf16.msrb.mxu2 %v5421_v2  ;;  %4108 = vmatpush.bf16.msrb.mxu3 %v5549_v6  ;;  %v5356_v2 = vld [vmem:[%s12094_s1 + $0x268] sm:$0xf]  ;;  %v8147_v6 = vld [vmem:[%s12095_s2] sm:$0xf]  ;;  %v5229_v11 = vor.u32 %v7571_v1, %v5228_v0  ;;  %v7531_v41 = vld [vmem:[%s12094_s1 + $0x34] sm:$0xf0] }
 0x12f   :  { %4051 = vmatmul.bf16.vlgmr.msra.gmra.mxu2 %v9366_v43  ;;  %4064 = vmatmul.bf16.vlgmr.msra.gmra.mxu3 %v9377_v51  ;;  %v624_v7 = vperm.slane %v8147_v6, 1  ;;  %v5357_v12 = vor.u32 %v7603_v3, %v5356_v2  ;;  %v7563_v52 = vld [vmem:[%s12094_s1 + $0x134] sm:$0xf0]  ;;  %v5052_v59 = vld [vmem:[%s12094_s1 + $0x8] sm:$0xf] }
 0x130   :  { %v7595_v54 = vld [vmem:[%s12094_s1 + $0x234] sm:$0xf0]  ;;  %v5180_v63 = vld [vmem:[%s12094_s1 + $0x108] sm:$0xf] }
 0x131   :  { %4070 = vmatpush.bf16.msrb.mxu0 %v5149_v13  ;;  %4083 = vmatpush.bf16.msrb.mxu1 %v5277_v14  ;;  %v7535_v13 = vld [vmem:[%s12094_s1 + $0x54] sm:$0xf0]  ;;  %v5212_v14 = vld [vmem:[%s12094_s1 + $0x148] sm:$0xf]  ;;  %v3820_v27 = vpop.f32.mrf.mxu0  ;;  %v5325_v62 = vor.u32 %v7595_v54, %v5324_v53 }
 0x132   :  { %4096 = vmatpush.bf16.msrb.mxu2 %v5405_v15  ;;  %4109 = vmatpush.bf16.msrb.mxu3 %v5533_v22  ;;  %v5485_v15 = vor.u32 %v7635_v5, %v5484_v4  ;;  %v3844_v22 = vpop.f32.mrf.mxu2  ;;  %v3857_v26 = vpop.f32.mrf.mxu3  ;;  %v7627_v57 = vld [vmem:[%s12094_s1 + $0x334] sm:$0xf0]  ;;  %v5436_v3 = vld [vmem:[%s12094_s1 + $0x308] sm:$0xf] }
 0x133   :  { %v3845_v25 = vadd.f32 %v3844_v22, %v624_v7  ;;  %v7559_v0 = vld [vmem:[%s12094_s1 + $0x114] sm:$0xf0]  ;;  %v5453_v1 = vor.u32 %v7627_v57, %v5452_v55  ;;  %v5676_v6 = vld [vmem:[%s12094_s1 + $0x4e8] sm:$0xf] }
 0x134   :  { %v7591_v2 = vld [vmem:[%s12094_s1 + $0x214] sm:$0xf0]  ;;  %v6060_v18 = vld [vmem:[%s12094_s1 + $0x7e8] sm:$0xf] }
 0x135   :  { %4071 = vmatpush.bf16.msrb.mxu0 %v5133_v28  ;;  %4084 = vmatpush.bf16.msrb.mxu1 %v5261_v29  ;;  %v5085_v28 = vor.u32 %v7535_v13, %v5084_v21  ;;  %v3833_v29 = vpop.f32.mrf.mxu1  ;;  %v10298_v49 = vadd.f32 %v3857_v26, %v3845_v25  ;;  %v7623_v4 = vld [vmem:[%s12094_s1 + $0x314] sm:$0xf0]  ;;  %v5932_v13 = vld [vmem:[%s12094_s1 + $0x6e8] sm:$0xf] }
 0x136   :  { %4097 = vmatpush.bf16.msrb.mxu2 %v5389_v32  ;;  %4110 = vmatpush.bf16.msrb.mxu3 %v5517_v47  ;;  %v5213_v32 = vor.u32 %v7567_v17, %v5212_v14  ;;  %v5196_v47 = vld [vmem:[%s12094_s1 + $0x128] sm:$0xf]  ;;  %v7683_v7 = vld [vmem:[%s12094_s1 + $0x4f4] sm:$0xf0]  ;;  %v5437_v22 = vor.u32 %v7623_v4, %v5436_v3 }
 0x137   :  { %v7715_v21 = vld [vmem:[%s12094_s1 + $0x5f4] sm:$0xf0]  ;;  %v5677_v23 = vor.u32 %v7683_v7, %v5676_v6  ;;  %v5660_v26 = vld [vmem:[%s12094_s1 + $0x4c8] sm:$0xf] }
 0x138   :  { %v7747_v14 = vld [vmem:[%s12094_s1 + $0x6f4] sm:$0xf0]  ;;  %v5644_v54 = vld [vmem:[%s12094_s1 + $0x4a8] sm:$0xf] }
 0x139   :  { %4072 = vmatpush.bf16.msrb.mxu0 %v5117_v58  ;;  %4085 = vmatpush.bf16.msrb.mxu1 %v5245_v60  ;;  %v5069_v58 = vor.u32 %v7531_v41, %v5068_v56  ;;  %v7527_v60 = vld [vmem:[%s12094_s1 + $0x14] sm:$0xf0]  ;;  %v5933_v25 = vor.u32 %v7747_v14, %v5932_v13  ;;  %v6044_v41 = vld [vmem:[%s12094_s1 + $0x7c8] sm:$0xf] }
 0x13a   :  { %4098 = vmatpush.bf16.msrb.mxu2 %v5373_v61  ;;  %4111 = vmatpush.bf16.msrb.mxu3 %v5501_v8  ;;  %v5197_v61 = vor.u32 %v7563_v52, %v5196_v47  ;;  %v5308_v8 = vld [vmem:[%s12094_s1 + $0x208] sm:$0xf]  ;;  %v3846_v5 = vpop.f32.mrf.mxu2  ;;  %v7779_v19 = vld [vmem:[%s12094_s1 + $0x7f4] sm:$0xf0] }
 0x13b   :  { %v5309_v17 = vor.u32 %v7591_v2, %v5308_v8  ;;  %v7679_v27 = vld [vmem:[%s12094_s1 + $0x4d4] sm:$0xf0]  ;;  %v6061_v29 = vor.u32 %v7779_v19, %v6060_v18  ;;  %v5772_v57 = vld [vmem:[%s12094_s1 + $0x5a8] sm:$0xf] }
 0x13c   :  { %v7743_v56 = vld [vmem:[%s12094_s1 + $0x6d4] sm:$0xf0]  ;;  %v5628_v2 = vld [vmem:[%s12094_s1 + $0x488] sm:$0xf] }
 0x13d   :  { %4073 = vmatpush.bf16.msrb.mxu0 %v5101_v10  ;;  %4086 = vmatpush.bf16.msrb.mxu1 %v5229_v11  ;;  %v5804_v10 = vld [vmem:[%s12094_s1 + $0x5e8] sm:$0xf]  ;;  %v3859_v11 = vpop.f32.mrf.mxu3  ;;  %v7775_v47 = vld [vmem:[%s12094_s1 + $0x7d4] sm:$0xf0] }
 0x13e   :  { %4099 = vmatpush.bf16.msrb.mxu2 %v5357_v12  ;;  %4112 = vmatpush.bf16.msrb.mxu3 %v5485_v15  ;;  %v5053_v12 = vor.u32 %v7527_v60, %v5052_v59  ;;  %v5181_v15 = vor.u32 %v7559_v0, %v5180_v63  ;;  %v5805_v24 = vor.u32 %v7715_v21, %v5804_v10  ;;  %v7675_v55 = vld [vmem:[%s12094_s1 + $0x4b4] sm:$0xf0]  ;;  %v5900_v60 = vld [vmem:[%s12094_s1 + $0x6a8] sm:$0xf] }
 0x13f   :  { %v7707_v59 = vld [vmem:[%s12094_s1 + $0x5b4] sm:$0xf0]  ;;  %v5645_v0 = vor.u32 %v7675_v55, %v5644_v54  ;;  %v5756_v4 = vld [vmem:[%s12094_s1 + $0x588] sm:$0xf] }
 0x140   :  { %v7771_v63 = vld [vmem:[%s12094_s1 + $0x7b4] sm:$0xf0]  ;;  %v5773_v8 = vor.u32 %v7707_v59, %v5772_v57  ;;  %v5884_v7 = vld [vmem:[%s12094_s1 + $0x688] sm:$0xf] }
 0x141   :  { %4074 = vmatpush.bf16.msrb.mxu0 %v5085_v28  ;;  %4087 = vmatpush.bf16.msrb.mxu1 %v5213_v32  ;;  %v5788_v28 = vld [vmem:[%s12094_s1 + $0x5c8] sm:$0xf]  ;;  %v7711_v32 = vld [vmem:[%s12094_s1 + $0x5d4] sm:$0xf0] }
 0x142   :  { %4100 = vmatpush.bf16.msrb.mxu2 %v5341_v37  ;;  %4113 = vmatpush.bf16.msrb.mxu3 %v5469_v50  ;;  %v5916_v37 = vld [vmem:[%s12094_s1 + $0x6c8] sm:$0xf]  ;;  %v5661_v50 = vor.u32 %v7679_v27, %v5660_v26  ;;  %v5789_v52 = vor.u32 %v7711_v32, %v5788_v28  ;;  %v7671_v3 = vld [vmem:[%s12094_s1 + $0x494] sm:$0xf0] }
 0x143   :  { %v5917_v53 = vor.u32 %v7743_v56, %v5916_v37  ;;  %v7703_v6 = vld [vmem:[%s12094_s1 + $0x594] sm:$0xf0]  ;;  %v6012_v11 = vld [vmem:[%s12094_s1 + $0x788] sm:$0xf]  ;;  %v5629_v21 = vor.u32 %v7671_v3, %v5628_v2 }
 0x144   :  { %v7735_v10 = vld [vmem:[%s12094_s1 + $0x694] sm:$0xf0]  ;;  %v5757_v14 = vor.u32 %v7703_v6, %v5756_v4  ;;  %v5740_v19 = vld [vmem:[%s12094_s1 + $0x568] sm:$0xf] }
 0x145   :  { %4075 = vmatpush.bf16.msrb.mxu0 %v5069_v58  ;;  %4088 = vmatpush.bf16.msrb.mxu1 %v5197_v61  ;;  %v6045_v58 = vor.u32 %v7775_v47, %v6044_v41  ;;  %v7739_v61 = vld [vmem:[%s12094_s1 + $0x6b4] sm:$0xf0]  ;;  %v5868_v26 = vld [vmem:[%s12094_s1 + $0x668] sm:$0xf] }
 0x146   :  { %4101 = vmatpush.bf16.msrb.mxu2 %v5325_v62  ;;  %4114 = vmatpush.bf16.msrb.mxu3 %v5453_v1  ;;  %v6028_v62 = vld [vmem:[%s12094_s1 + $0x7a8] sm:$0xf]  ;;  %v5901_v1 = vor.u32 %v7739_v61, %v5900_v60  ;;  %v7667_v18 = vld [vmem:[%s12094_s1 + $0x474] sm:$0xf0] }
 0x147   :  { %v6029_v5 = vor.u32 %v7771_v63, %v6028_v62  ;;  %v7731_v27 = vld [vmem:[%s12094_s1 + $0x674] sm:$0xf0]  ;;  %v5996_v28 = vld [vmem:[%s12094_s1 + $0x768] sm:$0xf] }
 0x148   :  { %v5869_v56 = vor.u32 %v7731_v27, %v5868_v26  ;;  %v5596_v41 = vld [vmem:[%s12094_s1 + $0x448] sm:$0xf]  ;;  %v7663_v47 = vld [vmem:[%s12094_s1 + $0x454] sm:$0xf0] }
 0x149   :  { %4076 = vmatpush.bf16.msrb.mxu0 %v5053_v12  ;;  %4089 = vmatpush.bf16.msrb.mxu1 %v5181_v15  ;;  %v7767_v12 = vld [vmem:[%s12094_s1 + $0x794] sm:$0xf0]  ;;  %v3870_v13 = vpop.f32.mrf.mxu0  ;;  %v5885_v15 = vor.u32 %v7735_v10, %v5884_v7  ;;  %v5852_v55 = vld [vmem:[%s12094_s1 + $0x648] sm:$0xf]  ;;  %v5597_v62 = vor.u32 %v7663_v47, %v5596_v41 }
 0x14a   :  { %4102 = vmatpush.bf16.msrb.mxu2 %v5309_v17  ;;  %4115 = vmatpush.bf16.msrb.mxu3 %v5437_v22  ;;  %v5612_v17 = vld [vmem:[%s12094_s1 + $0x468] sm:$0xf]  ;;  %v3871_v22 = vadd.f32 %v3870_v13, %v10298_v49  ;;  %v7763_v49 = vld [vmem:[%s12094_s1 + $0x774] sm:$0xf0] }
 0x14b   :  { %v5613_v32 = vor.u32 %v7667_v18, %v5612_v17  ;;  %v7695_v54 = vld [vmem:[%s12094_s1 + $0x554] sm:$0xf0]  ;;  %v5980_v60 = vld [vmem:[%s12094_s1 + $0x748] sm:$0xf] }
 0x14c   :  { %4077 = vmatmul.bf16.vlgmr.msrb.gmra.mxu0 %v8516_v16  ;;  %4090 = vmatmul.bf16.vlgmr.msrb.gmra.mxu1 %v8555_v33  ;;  %v7727_v57 = vld [vmem:[%s12094_s1 + $0x654] sm:$0xf0]  ;;  %v5580_v2 = vld [vmem:[%s12094_s1 + $0x428] sm:$0xf] }
 0x14d   :  { %4121 = vmatpush.bf16.msra.mxu0 %v5677_v23  ;;  %4134 = vmatpush.bf16.msra.mxu1 %v5805_v24  ;;  %v3883_v23 = vpop.f32.mrf.mxu1  ;;  %v6013_v24 = vor.u32 %v7767_v12, %v6012_v11  ;;  %v7759_v61 = vld [vmem:[%s12094_s1 + $0x754] sm:$0xf0]  ;;  %v5708_v4 = vld [vmem:[%s12094_s1 + $0x528] sm:$0xf] }
 0x14e   :  { %4147 = vmatpush.bf16.msra.mxu2 %v5933_v25  ;;  %4160 = vmatpush.bf16.msra.mxu3 %v6061_v29  ;;  %v7699_v25 = vld [vmem:[%s12094_s1 + $0x574] sm:$0xf0]  ;;  %v3884_v29 = vadd.f32 %v3883_v23, %v3871_v22  ;;  %v5981_v6 = vor.u32 %v7759_v61, %v5980_v60  ;;  %v5836_v10 = vld [vmem:[%s12094_s1 + $0x628] sm:$0xf] }
 0x14f   :  { %4103 = vmatmul.bf16.vlgmr.msrb.gmra.mxu2 %v8499_v9  ;;  %4116 = vmatmul.bf16.vlgmr.msrb.gmra.mxu3 %v8528_v20  ;;  %v5741_v37 = vor.u32 %v7699_v25, %v5740_v19  ;;  %v7659_v3 = vld [vmem:[%s12094_s1 + $0x434] sm:$0xf0]  ;;  %v5964_v12 = vld [vmem:[%s12094_s1 + $0x728] sm:$0xf] }
 0x150   :  { %v7691_v7 = vld [vmem:[%s12094_s1 + $0x534] sm:$0xf0]  ;;  %v5581_v13 = vor.u32 %v7659_v3, %v5580_v2  ;;  %v5692_v19 = vld [vmem:[%s12094_s1 + $0x508] sm:$0xf] }
 0x151   :  { %4122 = vmatpush.bf16.msra.mxu0 %v5661_v50  ;;  %4135 = vmatpush.bf16.msra.mxu1 %v5789_v52  ;;  %v5724_v50 = vld [vmem:[%s12094_s1 + $0x548] sm:$0xf]  ;;  %v7723_v11 = vld [vmem:[%s12094_s1 + $0x634] sm:$0xf0]  ;;  %v5709_v17 = vor.u32 %v7691_v7, %v5708_v4 }
 0x152   :  { %4148 = vmatpush.bf16.msra.mxu2 %v5917_v53  ;;  %4161 = vmatpush.bf16.msra.mxu3 %v6045_v58  ;;  %v3896_v52 = vpop.f32.mrf.mxu2  ;;  %v5997_v53 = vor.u32 %v7763_v49, %v5996_v28  ;;  %v3909_v59 = vpop.f32.mrf.mxu3  ;;  %v5837_v18 = vor.u32 %v7723_v11, %v5836_v10  ;;  %v7687_v22 = vld [vmem:[%s12094_s1 + $0x514] sm:$0xf0]  ;;  %v5820_v23 = vld [vmem:[%s12094_s1 + $0x608] sm:$0xf] }
 0x153   :  { %v3897_v58 = vadd.f32 %v3896_v52, %v3884_v29  ;;  %v7719_v26 = vld [vmem:[%s12094_s1 + $0x614] sm:$0xf0]  ;;  %v5948_v27 = vld [vmem:[%s12094_s1 + $0x708] sm:$0xf]  ;;  %v5693_v52 = vor.u32 %v7687_v22, %v5692_v19 }
 0x154   :  { %v7751_v28 = vld [vmem:[%s12094_s1 + $0x714] sm:$0xf0]  ;;  %v6188_v29 = vld [vmem:[%s12094_s1 + $0x8e8] sm:$0xf] }
 0x155   :  { %4123 = vmatpush.bf16.msra.mxu0 %v5645_v0  ;;  %4136 = vmatpush.bf16.msra.mxu1 %v5773_v8  ;;  %v10488_v63 = vadd.f32 %v3909_v59, %v3897_v58  ;;  %v3872_v0 = vpop.f32.mrf.mxu0  ;;  %v5725_v8 = vor.u32 %v7695_v54, %v5724_v50  ;;  %v7843_v41 = vld [vmem:[%s12094_s1 + $0x9f4] sm:$0xf0]  ;;  %v6444_v47 = vld [vmem:[%s12094_s1 + $0xae8] sm:$0xf] }
 0x156   :  { %4149 = vmatpush.bf16.msra.mxu2 %v5901_v1  ;;  %4162 = vmatpush.bf16.msra.mxu3 %v6029_v5  ;;  %v5853_v1 = vor.u32 %v7727_v57, %v5852_v55  ;;  %v3885_v5 = vpop.f32.mrf.mxu1  ;;  %v7875_v50 = vld [vmem:[%s12094_s1 + $0xaf4] sm:$0xf0]  ;;  %v6572_v54 = vld [vmem:[%s12094_s1 + $0xbe8] sm:$0xf]  ;;  %v5949_v57 = vor.u32 %v7751_v28, %v5948_v27 }
 0x157   :  { %v7907_v55 = vld [vmem:[%s12094_s1 + $0xbf4] sm:$0xf0]  ;;  %v6445_v60 = vor.u32 %v7875_v50, %v6444_v47  ;;  %v6172_v61 = vld [vmem:[%s12094_s1 + $0x8c8] sm:$0xf] }
 0x158   :  { %v6300_v0 = vld [vmem:[%s12094_s1 + $0x9c8] sm:$0xf]  ;;  %v7871_v3 = vld [vmem:[%s12094_s1 + $0xad4] sm:$0xf0] }
 0x159   :  { %4124 = vmatpush.bf16.msra.mxu0 %v5629_v21  ;;  %4137 = vmatpush.bf16.msra.mxu1 %v5757_v14  ;;  %v7755_v21 = vld [vmem:[%s12094_s1 + $0x734] sm:$0xf0]  ;;  %v5564_v14 = vld [vmem:[%s12094_s1 + $0x408] sm:$0xf] }
 0x15a   :  { %4150 = vmatpush.bf16.msra.mxu2 %v5885_v15  ;;  %4163 = vmatpush.bf16.msra.mxu3 %v6013_v24  ;;  %v7655_v15 = vld [vmem:[%s12094_s1 + $0x414] sm:$0xf0]  ;;  %v3898_v24 = vpop.f32.mrf.mxu2  ;;  %v5965_v25 = vor.u32 %v7755_v21, %v5964_v12  ;;  %v3911_v49 = vpop.f32.mrf.mxu3  ;;  %v6428_v2 = vld [vmem:[%s12094_s1 + $0xac8] sm:$0xf] }
 0x15b   :  { %v6556_v4 = vld [vmem:[%s12094_s1 + $0xbc8] sm:$0xf]  ;;  %v7903_v5 = vld [vmem:[%s12094_s1 + $0xbd4] sm:$0xf0]  ;;  %v6429_v10 = vor.u32 %v7871_v3, %v6428_v2 }
 0x15c   :  { %v6156_v11 = vld [vmem:[%s12094_s1 + $0x8a8] sm:$0xf]  ;;  %v7803_v12 = vld [vmem:[%s12094_s1 + $0x8b4] sm:$0xf0] }
 0x15d   :  { %4125 = vmatpush.bf16.msra.mxu0 %v5613_v32  ;;  %4138 = vmatpush.bf16.msra.mxu1 %v5741_v37  ;;  %v7811_v32 = vld [vmem:[%s12094_s1 + $0x8f4] sm:$0xf0]  ;;  %v6316_v37 = vld [vmem:[%s12094_s1 + $0x9e8] sm:$0xf]  ;;  %v6157_v22 = vor.u32 %v7803_v12, %v6156_v11 }
 0x15e   :  { %4151 = vmatpush.bf16.msra.mxu2 %v5869_v56  ;;  %4164 = vmatpush.bf16.msra.mxu3 %v5997_v53  ;;  %v5565_v56 = vor.u32 %v7655_v15, %v5564_v14  ;;  %v5821_v53 = vor.u32 %v7719_v26, %v5820_v23  ;;  %v6189_v58 = vor.u32 %v7811_v32, %v6188_v29  ;;  %v6284_v21 = vld [vmem:[%s12094_s1 + $0x9a8] sm:$0xf]  ;;  %v7835_v14 = vld [vmem:[%s12094_s1 + $0x9b4] sm:$0xf0] }
 0x15f   :  { %v6317_v59 = vor.u32 %v7843_v41, %v6316_v37  ;;  %v6412_v15 = vld [vmem:[%s12094_s1 + $0xaa8] sm:$0xf]  ;;  %v7899_v19 = vld [vmem:[%s12094_s1 + $0xbb4] sm:$0xf0]  ;;  %v6285_v23 = vor.u32 %v7835_v14, %v6284_v21 }
 0x160   :  { %v7799_v26 = vld [vmem:[%s12094_s1 + $0x894] sm:$0xf0]  ;;  %v6268_v27 = vld [vmem:[%s12094_s1 + $0x988] sm:$0xf] }
 0x161   :  { %4126 = vmatpush.bf16.msra.mxu0 %v5597_v62  ;;  %4139 = vmatpush.bf16.msra.mxu1 %v5725_v8  ;;  %v7807_v62 = vld [vmem:[%s12094_s1 + $0x8d4] sm:$0xf0]  ;;  %v6573_v8 = vor.u32 %v7907_v55, %v6572_v54  ;;  %v6396_v29 = vld [vmem:[%s12094_s1 + $0xa88] sm:$0xf] }
 0x162   :  { %4152 = vmatpush.bf16.msra.mxu2 %v5853_v1  ;;  %4165 = vmatpush.bf16.msra.mxu3 %v5981_v6  ;;  %v7839_v1 = vld [vmem:[%s12094_s1 + $0x9d4] sm:$0xf0]  ;;  %v6173_v6 = vor.u32 %v7807_v62, %v6172_v61  ;;  %v6124_v55 = vld [vmem:[%s12094_s1 + $0x868] sm:$0xf] }
 0x163   :  { %v6301_v7 = vor.u32 %v7839_v1, %v6300_v0  ;;  %v7831_v49 = vld [vmem:[%s12094_s1 + $0x994] sm:$0xf0]  ;;  %v6380_v61 = vld [vmem:[%s12094_s1 + $0xa68] sm:$0xf] }
 0x164   :  { %v7863_v32 = vld [vmem:[%s12094_s1 + $0xa94] sm:$0xf0]  ;;  %v6508_v0 = vld [vmem:[%s12094_s1 + $0xb68] sm:$0xf] }
 0x165   :  { %4127 = vmatpush.bf16.msra.mxu0 %v5581_v13  ;;  %4140 = vmatpush.bf16.msra.mxu1 %v5709_v17  ;;  %v6557_v13 = vor.u32 %v7903_v5, %v6556_v4  ;;  %v7867_v17 = vld [vmem:[%s12094_s1 + $0xab4] sm:$0xf0]  ;;  %v6397_v54 = vor.u32 %v7863_v32, %v6396_v29  ;;  %v6108_v4 = vld [vmem:[%s12094_s1 + $0x848] sm:$0xf] }
 0x166   :  { %4153 = vmatpush.bf16.msra.mxu2 %v5837_v18  ;;  %4166 = vmatpush.bf16.msra.mxu3 %v5965_v25  ;;  %v6540_v18 = vld [vmem:[%s12094_s1 + $0xba8] sm:$0xf]  ;;  %v6413_v24 = vor.u32 %v7867_v17, %v6412_v15  ;;  %v7895_v41 = vld [vmem:[%s12094_s1 + $0xb94] sm:$0xf0] }
 0x167   :  { %v6140_v25 = vld [vmem:[%s12094_s1 + $0x888] sm:$0xf]  ;;  %v6541_v28 = vor.u32 %v7899_v19, %v6540_v18  ;;  %v7859_v62 = vld [vmem:[%s12094_s1 + $0xa74] sm:$0xf0] }
 0x168   :  { %v6141_v50 = vor.u32 %v7799_v26, %v6140_v25  ;;  %v6381_v3 = vor.u32 %v7859_v62, %v6380_v61  ;;  %v7791_v5 = vld [vmem:[%s12094_s1 + $0x854] sm:$0xf0]  ;;  %v6364_v12 = vld [vmem:[%s12094_s1 + $0xa48] sm:$0xf] }
 0x169   :  { %4128 = vmatpush.bf16.msra.mxu0 %v5565_v56  ;;  %4141 = vmatpush.bf16.msra.mxu1 %v5693_v52  ;;  %v3922_v37 = vpop.f32.mrf.mxu0  ;;  %v6524_v56 = vld [vmem:[%s12094_s1 + $0xb88] sm:$0xf]  ;;  %v3935_v52 = vpop.f32.mrf.mxu1  ;;  %v7823_v11 = vld [vmem:[%s12094_s1 + $0x954] sm:$0xf0]  ;;  %v6109_v19 = vor.u32 %v7791_v5, %v6108_v4 }
 0x16a   :  { %4154 = vmatpush.bf16.msra.mxu2 %v5821_v53  ;;  %4167 = vmatpush.bf16.msra.mxu3 %v5949_v57  ;;  %v3923_v47 = vadd.f32 %v3922_v37, %v10488_v63  ;;  %v6269_v53 = vor.u32 %v7831_v49, %v6268_v27  ;;  %v7795_v57 = vld [vmem:[%s12094_s1 + $0x874] sm:$0xf0]  ;;  %v6525_v63 = vor.u32 %v7895_v41, %v6524_v56  ;;  %v6492_v15 = vld [vmem:[%s12094_s1 + $0xb48] sm:$0xf] }
 0x16b   :  { %v6125_v1 = vor.u32 %v7795_v57, %v6124_v55  ;;  %v7855_v21 = vld [vmem:[%s12094_s1 + $0xa54] sm:$0xf0]  ;;  %v6092_v26 = vld [vmem:[%s12094_s1 + $0x828] sm:$0xf] }
 0x16c   :  { %4129 = vmatmul.bf16.vlgmr.msra.gmra.mxu0 %v8711_v45  ;;  %4142 = vmatmul.bf16.vlgmr.msra.gmra.mxu1 %v8715_v48  ;;  %v7887_v17 = vld [vmem:[%s12094_s1 + $0xb54] sm:$0xf0]  ;;  %v6365_v25 = vor.u32 %v7855_v21, %v6364_v12  ;;  %v6348_v32 = vld [vmem:[%s12094_s1 + $0xa28] sm:$0xf] }
 0x16d   :  { %4173 = vmatpush.bf16.msrb.mxu0 %v6189_v58  ;;  %4186 = vmatpush.bf16.msrb.mxu1 %v6317_v59  ;;  %v6252_v58 = vld [vmem:[%s12094_s1 + $0x968] sm:$0xf]  ;;  %v3936_v59 = vadd.f32 %v3935_v52, %v3923_v47  ;;  %v7787_v27 = vld [vmem:[%s12094_s1 + $0x834] sm:$0xf0]  ;;  %v6493_v49 = vor.u32 %v7887_v17, %v6492_v15 }
 0x16e   :  { %4199 = vmatpush.bf16.msrb.mxu2 %v6445_v60  ;;  %4212 = vmatpush.bf16.msrb.mxu3 %v6573_v8  ;;  %v7827_v60 = vld [vmem:[%s12094_s1 + $0x974] sm:$0xf0]  ;;  %v6476_v56 = vld [vmem:[%s12094_s1 + $0xb28] sm:$0xf]  ;;  %v6093_v47 = vor.u32 %v7787_v27, %v6092_v26 }
 0x16f   :  { %4155 = vmatmul.bf16.vlgmr.msra.gmra.mxu2 %v8703_v42  ;;  %4168 = vmatmul.bf16.vlgmr.msra.gmra.mxu3 %v8713_v46  ;;  %v7891_v8 = vld [vmem:[%s12094_s1 + $0xb74] sm:$0xf0]  ;;  %v6253_v2 = vor.u32 %v7827_v60, %v6252_v58  ;;  %v6204_v55 = vld [vmem:[%s12094_s1 + $0x908] sm:$0xf] }
 0x170   :  { %v7819_v29 = vld [vmem:[%s12094_s1 + $0x934] sm:$0xf0]  ;;  %v6332_v58 = vld [vmem:[%s12094_s1 + $0xa08] sm:$0xf] }
 0x171   :  { %4174 = vmatpush.bf16.msrb.mxu0 %v6173_v6  ;;  %4187 = vmatpush.bf16.msrb.mxu1 %v6301_v7  ;;  %v6236_v6 = vld [vmem:[%s12094_s1 + $0x948] sm:$0xf]  ;;  %v6509_v7 = vor.u32 %v7891_v8, %v6508_v0  ;;  %v3924_v18 = vpop.f32.mrf.mxu0  ;;  %v7851_v37 = vld [vmem:[%s12094_s1 + $0xa34] sm:$0xf0] }
 0x172   :  { %4200 = vmatpush.bf16.msrb.mxu2 %v6429_v10  ;;  %4213 = vmatpush.bf16.msrb.mxu3 %v6557_v13  ;;  %v3948_v10 = vpop.f32.mrf.mxu2  ;;  %v3961_v14 = vpop.f32.mrf.mxu3  ;;  %v7883_v41 = vld [vmem:[%s12094_s1 + $0xb34] sm:$0xf0]  ;;  %v6460_v60 = vld [vmem:[%s12094_s1 + $0xb08] sm:$0xf] }
 0x173   :  { %v3949_v13 = vadd.f32 %v3948_v10, %v3936_v59  ;;  %v7783_v52 = vld [vmem:[%s12094_s1 + $0x814] sm:$0xf0]  ;;  %v6700_v0 = vld [vmem:[%s12094_s1 + $0xce8] sm:$0xf] }
 0x174   :  { %v7815_v57 = vld [vmem:[%s12094_s1 + $0x914] sm:$0xf0]  ;;  %v6956_v5 = vld [vmem:[%s12094_s1 + $0xee8] sm:$0xf] }
 0x175   :  { %4175 = vmatpush.bf16.msrb.mxu0 %v6157_v22  ;;  %4188 = vmatpush.bf16.msrb.mxu1 %v6285_v23  ;;  %v3937_v22 = vpop.f32.mrf.mxu1  ;;  %v10687_v23 = vadd.f32 %v3961_v14, %v3949_v13  ;;  %v7847_v59 = vld [vmem:[%s12094_s1 + $0xa14] sm:$0xf0]  ;;  %v6684_v17 = vld [vmem:[%s12094_s1 + $0xcc8] sm:$0xf] }
 0x176   :  { %4201 = vmatpush.bf16.msrb.mxu2 %v6413_v24  ;;  %4214 = vmatpush.bf16.msrb.mxu3 %v6541_v28  ;;  %v6237_v24 = vor.u32 %v7823_v11, %v6236_v6  ;;  %v6220_v28 = vld [vmem:[%s12094_s1 + $0x928] sm:$0xf]  ;;  %v7879_v61 = vld [vmem:[%s12094_s1 + $0xb14] sm:$0xf0]  ;;  %v6333_v10 = vor.u32 %v7847_v59, %v6332_v58 }
 0x177   :  { %v7939_v8 = vld [vmem:[%s12094_s1 + $0xcf4] sm:$0xf0]  ;;  %v7084_v11 = vld [vmem:[%s12094_s1 + $0xfe8] sm:$0xf]  ;;  %v6461_v21 = vor.u32 %v7879_v61, %v6460_v60 }
 0x178   :  { %v7971_v4 = vld [vmem:[%s12094_s1 + $0xdf4] sm:$0xf0]  ;;  %v6701_v13 = vor.u32 %v7939_v8, %v6700_v0  ;;  %v7068_v27 = vld [vmem:[%s12094_s1 + $0xfc8] sm:$0xf] }
 0x179   :  { %4176 = vmatpush.bf16.msrb.mxu0 %v6141_v50  ;;  %4189 = vmatpush.bf16.msrb.mxu1 %v6269_v53  ;;  %v6076_v50 = vld [vmem:[%s12094_s1 + $0x808] sm:$0xf]  ;;  %v6221_v53 = vor.u32 %v7819_v29, %v6220_v28  ;;  %v8003_v6 = vld [vmem:[%s12094_s1 + $0xef4] sm:$0xf0] }
 0x17a   :  { %4202 = vmatpush.bf16.msrb.mxu2 %v6397_v54  ;;  %4215 = vmatpush.bf16.msrb.mxu3 %v6525_v63  ;;  %v6349_v54 = vor.u32 %v7851_v37, %v6348_v32  ;;  %v6477_v63 = vor.u32 %v7883_v41, %v6476_v56  ;;  %v3950_v62 = vpop.f32.mrf.mxu2  ;;  %v8035_v12 = vld [vmem:[%s12094_s1 + $0xff4] sm:$0xf0]  ;;  %v6957_v15 = vor.u32 %v8003_v6, %v6956_v5  ;;  %v6668_v37 = vld [vmem:[%s12094_s1 + $0xca8] sm:$0xf] }
 0x17b   :  { %v7935_v18 = vld [vmem:[%s12094_s1 + $0xcd4] sm:$0xf0]  ;;  %v7085_v22 = vor.u32 %v8035_v12, %v7084_v11  ;;  %v6796_v41 = vld [vmem:[%s12094_s1 + $0xda8] sm:$0xf] }
 0x17c   :  { %v7999_v26 = vld [vmem:[%s12094_s1 + $0xed4] sm:$0xf0]  ;;  %v6652_v59 = vld [vmem:[%s12094_s1 + $0xc88] sm:$0xf] }
 0x17d   :  { %4177 = vmatpush.bf16.msrb.mxu0 %v6125_v1  ;;  %4190 = vmatpush.bf16.msrb.mxu1 %v6253_v2  ;;  %v6828_v1 = vld [vmem:[%s12094_s1 + $0xde8] sm:$0xf]  ;;  %v3963_v2 = vpop.f32.mrf.mxu3  ;;  %v8031_v28 = vld [vmem:[%s12094_s1 + $0xfd4] sm:$0xf0] }
 0x17e   :  { %4203 = vmatpush.bf16.msrb.mxu2 %v6381_v3  ;;  %4216 = vmatpush.bf16.msrb.mxu3 %v6509_v7  ;;  %v6077_v3 = vor.u32 %v7783_v52, %v6076_v50  ;;  %v6205_v7 = vor.u32 %v7815_v57, %v6204_v55  ;;  %v6829_v14 = vor.u32 %v7971_v4, %v6828_v1  ;;  %v7931_v56 = vld [vmem:[%s12094_s1 + $0xcb4] sm:$0xf0]  ;;  %v6924_v52 = vld [vmem:[%s12094_s1 + $0xea8] sm:$0xf] }
 0x17f   :  { %v7963_v50 = vld [vmem:[%s12094_s1 + $0xdb4] sm:$0xf0]  ;;  %v6669_v57 = vor.u32 %v7931_v56, %v6668_v37  ;;  %v6780_v61 = vld [vmem:[%s12094_s1 + $0xd88] sm:$0xf] }
 0x180   :  { %v8027_v55 = vld [vmem:[%s12094_s1 + $0xfb4] sm:$0xf0]  ;;  %v6797_v58 = vor.u32 %v7963_v50, %v6796_v41  ;;  %v6908_v8 = vld [vmem:[%s12094_s1 + $0xe88] sm:$0xf] }
 0x181   :  { %4178 = vmatpush.bf16.msrb.mxu0 %v6109_v19  ;;  %4191 = vmatpush.bf16.msrb.mxu1 %v6237_v24  ;;  %v6812_v19 = vld [vmem:[%s12094_s1 + $0xdc8] sm:$0xf]  ;;  %v7967_v24 = vld [vmem:[%s12094_s1 + $0xdd4] sm:$0xf0] }
 0x182   :  { %4204 = vmatpush.bf16.msrb.mxu2 %v6365_v25  ;;  %4217 = vmatpush.bf16.msrb.mxu3 %v6493_v49  ;;  %v6940_v25 = vld [vmem:[%s12094_s1 + $0xec8] sm:$0xf]  ;;  %v6685_v49 = vor.u32 %v7935_v18, %v6684_v17  ;;  %v6813_v29 = vor.u32 %v7967_v24, %v6812_v19  ;;  %v7927_v60 = vld [vmem:[%s12094_s1 + $0xc94] sm:$0xf0] }
 0x183   :  { %v6941_v32 = vor.u32 %v7999_v26, %v6940_v25  ;;  %v7959_v0 = vld [vmem:[%s12094_s1 + $0xd94] sm:$0xf0]  ;;  %v6653_v6 = vor.u32 %v7927_v60, %v6652_v59  ;;  %v6636_v12 = vld [vmem:[%s12094_s1 + $0xc68] sm:$0xf] }
 0x184   :  { %v7991_v1 = vld [vmem:[%s12094_s1 + $0xe94] sm:$0xf0]  ;;  %v6892_v17 = vld [vmem:[%s12094_s1 + $0xe68] sm:$0xf] }
 0x185   :  { %4179 = vmatpush.bf16.msrb.mxu0 %v6093_v47  ;;  %4192 = vmatpush.bf16.msrb.mxu1 %v6221_v53  ;;  %v7069_v47 = vor.u32 %v8031_v28, %v7068_v27  ;;  %v7995_v53 = vld [vmem:[%s12094_s1 + $0xeb4] sm:$0xf0]  ;;  %v6909_v11 = vor.u32 %v7991_v1, %v6908_v8  ;;  %v7020_v19 = vld [vmem:[%s12094_s1 + $0xf68] sm:$0xf] }
 0x186   :  { %4205 = vmatpush.bf16.msrb.mxu2 %v6349_v54  ;;  %4218 = vmatpush.bf16.msrb.mxu3 %v6477_v63  ;;  %v7052_v54 = vld [vmem:[%s12094_s1 + $0xfa8] sm:$0xf]  ;;  %v6925_v63 = vor.u32 %v7995_v53, %v6924_v52  ;;  %v8023_v4 = vld [vmem:[%s12094_s1 + $0xf94] sm:$0xf0] }
 0x187   :  { %v7053_v62 = vor.u32 %v8027_v55, %v7052_v54  ;;  %v7987_v18 = vld [vmem:[%s12094_s1 + $0xe74] sm:$0xf0]  ;;  %v6620_v27 = vld [vmem:[%s12094_s1 + $0xc48] sm:$0xf] }
 0x188   :  { %v6893_v26 = vor.u32 %v7987_v18, %v6892_v17  ;;  %v7919_v28 = vld [vmem:[%s12094_s1 + $0xc54] sm:$0xf0]  ;;  %v6876_v56 = vld [vmem:[%s12094_s1 + $0xe48] sm:$0xf] }
 0x189   :  { %4180 = vmatpush.bf16.msrb.mxu0 %v6077_v3  ;;  %4193 = vmatpush.bf16.msrb.mxu1 %v6205_v7  ;;  %v3974_v2 = vpop.f32.mrf.mxu0  ;;  %v7036_v3 = vld [vmem:[%s12094_s1 + $0xf88] sm:$0xf]  ;;  %v3987_v7 = vpop.f32.mrf.mxu1  ;;  %v7951_v37 = vld [vmem:[%s12094_s1 + $0xd54] sm:$0xf0]  ;;  %v6621_v55 = vor.u32 %v7919_v28, %v6620_v27  ;;  %v7553_v28 = vld [vmem:[%s12094_s1 + $0xec] sm:$0xf] }
 0x18a   :  { %4206 = vmatpush.bf16.msrb.mxu2 %v6333_v10  ;;  %4219 = vmatpush.bf16.msrb.mxu3 %v6461_v21  ;;  %v3975_v5 = vadd.f32 %v3974_v2, %v10687_v23  ;;  %v6781_v10 = vor.u32 %v7959_v0, %v6780_v61  ;;  %v7923_v21 = vld [vmem:[%s12094_s1 + $0xc74] sm:$0xf0]  ;;  %v7037_v23 = vor.u32 %v8023_v4, %v7036_v3  ;;  %v7004_v52 = vld [vmem:[%s12094_s1 + $0xf48] sm:$0xf] }
 0x18b   :  { %v6637_v24 = vor.u32 %v7923_v21, %v6636_v12  ;;  %v7983_v41 = vld [vmem:[%s12094_s1 + $0xe54] sm:$0xf0]  ;;  %v6604_v60 = vld [vmem:[%s12094_s1 + $0xc28] sm:$0xf] }
 0x18c   :  { %4181 = vmatmul.bf16.vlgmr.msrb.gmra.mxu0 %v8922_v30  ;;  %4194 = vmatmul.bf16.vlgmr.msrb.gmra.mxu1 %v8935_v36  ;;  %v8015_v53 = vld [vmem:[%s12094_s1 + $0xf54] sm:$0xf0]  ;;  %v6877_v59 = vor.u32 %v7983_v41, %v6876_v56  ;;  %v6860_v1 = vld [vmem:[%s12094_s1 + $0xe28] sm:$0xf]  ;;  %v5294_v56 = vld [vmem:[%s12094_s1 + $0x1f8] sm:$0xf0] }
 0x18d   :  { %4225 = vmatpush.bf16.msra.mxu0 %v6701_v13  ;;  %4238 = vmatpush.bf16.msra.mxu1 %v6829_v14  ;;  %v6764_v13 = vld [vmem:[%s12094_s1 + $0xd68] sm:$0xf]  ;;  %v3988_v14 = vadd.f32 %v3987_v7, %v3975_v5  ;;  %v7915_v61 = vld [vmem:[%s12094_s1 + $0xc34] sm:$0xf0]  ;;  %v7005_v0 = vor.u32 %v8015_v53, %v7004_v52 }
 0x18e   :  { %4251 = vmatpush.bf16.msra.mxu2 %v6957_v15  ;;  %4264 = vmatpush.bf16.msra.mxu3 %v7085_v22  ;;  %v7955_v15 = vld [vmem:[%s12094_s1 + $0xd74] sm:$0xf0]  ;;  %v6988_v3 = vld [vmem:[%s12094_s1 + $0xf28] sm:$0xf]  ;;  %v6605_v5 = vor.u32 %v7915_v61, %v6604_v60  ;;  %v5150_v60 = vld [vmem:[%s12094_s1 + $0xd8] sm:$0xf0] }
 0x18f   :  { %4207 = vmatmul.bf16.vlgmr.msrb.gmra.mxu2 %v8933_v35  ;;  %4220 = vmatmul.bf16.vlgmr.msrb.gmra.mxu3 %v8943_v39  ;;  %v8019_v22 = vld [vmem:[%s12094_s1 + $0xf74] sm:$0xf0]  ;;  %v6765_v25 = vor.u32 %v7955_v15, %v6764_v13  ;;  %v6716_v12 = vld [vmem:[%s12094_s1 + $0xd08] sm:$0xf]  ;;  %v7581_v61 = vld [vmem:[%s12094_s1 + $0x1cc] sm:$0xf] }
 0x190   :  { %v7947_v8 = vld [vmem:[%s12094_s1 + $0xd34] sm:$0xf0]  ;;  %v6844_v13 = vld [vmem:[%s12094_s1 + $0xe08] sm:$0xf] }
 0x191   :  { %4226 = vmatpush.bf16.msra.mxu0 %v6685_v49  ;;  %4239 = vmatpush.bf16.msra.mxu1 %v6813_v29  ;;  %v6748_v49 = vld [vmem:[%s12094_s1 + $0xd48] sm:$0xf]  ;;  %v7021_v29 = vor.u32 %v8019_v22, %v7020_v19  ;;  %v3976_v54 = vpop.f32.mrf.mxu0  ;;  %v7979_v2 = vld [vmem:[%s12094_s1 + $0xe34] sm:$0xf0] }
 0x192   :  { %4252 = vmatpush.bf16.msra.mxu2 %v6941_v32  ;;  %4265 = vmatpush.bf16.msra.mxu3 %v7069_v47  ;;  %v4000_v32 = vpop.f32.mrf.mxu2  ;;  %v4013_v50 = vpop.f32.mrf.mxu3  ;;  %v8011_v4 = vld [vmem:[%s12094_s1 + $0xf34] sm:$0xf0]  ;;  %v6972_v15 = vld [vmem:[%s12094_s1 + $0xf08] sm:$0xf] }
 0x193   :  { %v4001_v47 = vadd.f32 %v4000_v32, %v3988_v14  ;;  %v7911_v7 = vld [vmem:[%s12094_s1 + $0xc14] sm:$0xf0]  ;;  %v7212_v19 = vld [vmem:[%s12094_s1 + $0x10e8] sm:$0xf] }
 0x194   :  { %v7943_v21 = vld [vmem:[%s12094_s1 + $0xd14] sm:$0xf0]  ;;  %v7196_v53 = vld [vmem:[%s12094_s1 + $0x10c8] sm:$0xf] }
 0x195   :  { %4227 = vmatpush.bf16.msra.mxu0 %v6669_v57  ;;  %4240 = vmatpush.bf16.msra.mxu1 %v6797_v58  ;;  %v3989_v57 = vpop.f32.mrf.mxu1  ;;  %v10886_v58 = vadd.f32 %v4013_v50, %v4001_v47  ;;  %v7975_v14 = vld [vmem:[%s12094_s1 + $0xe14] sm:$0xf0] }
 0x196   :  { %4253 = vmatpush.bf16.msra.mxu2 %v6925_v63  ;;  %4266 = vmatpush.bf16.msra.mxu3 %v7053_v62  ;;  %v6749_v63 = vor.u32 %v7951_v37, %v6748_v49  ;;  %v6732_v62 = vld [vmem:[%s12094_s1 + $0xd28] sm:$0xf]  ;;  %v8007_v17 = vld [vmem:[%s12094_s1 + $0xf14] sm:$0xf0]  ;;  %v5166_v49 = vld [vmem:[%s12094_s1 + $0xf8] sm:$0xf0]  ;;  %v6845_v32 = vor.u32 %v7975_v14, %v6844_v13 }
 0x197   :  { %v8067_v22 = vld [vmem:[%s12094_s1 + $0x10f4] sm:$0xf0]  ;;  %v7585_v37 = vld [vmem:[%s12094_s1 + $0x1ec] sm:$0xf]  ;;  %v6973_v41 = vor.u32 %v8007_v17, %v6972_v15  ;;  %v5169_v52 = vor.u32 %v7553_v28, %v5166_v49  ;;  %v7164_v14 = vld [vmem:[%s12094_s1 + $0x1088] sm:$0xf] }
 0x198   :  { %v8099_v27 = vld [vmem:[%s12094_s1 + $0x11f4] sm:$0xf0]  ;;  %v7213_v47 = vor.u32 %v8067_v22, %v7212_v19  ;;  %v5297_v57 = vor.u32 %v7585_v37, %v5294_v56  ;;  %v7292_v17 = vld [vmem:[%s12094_s1 + $0x1188] sm:$0xf]  ;;  %v7541_v22 = vld [vmem:[%s12094_s1 + $0x8c] sm:$0xf] }
 0x199   :  { %4228 = vmatpush.bf16.msra.mxu0 %v6653_v6  ;;  %4241 = vmatpush.bf16.msra.mxu1 %v6781_v10  ;;  %v6588_v6 = vld [vmem:[%s12094_s1 + $0xc08] sm:$0xf]  ;;  %v6733_v10 = vor.u32 %v7947_v8, %v6732_v62  ;;  %v8063_v54 = vld [vmem:[%s12094_s1 + $0x10d4] sm:$0xf0]  ;;  %v5278_v62 = vld [vmem:[%s12094_s1 + $0x1d8] sm:$0xf0] }
 0x19a   :  { %4254 = vmatpush.bf16.msra.mxu2 %v6909_v11  ;;  %4267 = vmatpush.bf16.msra.mxu3 %v7037_v23  ;;  %v6861_v11 = vor.u32 %v7979_v2, %v6860_v1  ;;  %v6989_v23 = vor.u32 %v8011_v4, %v6988_v3  ;;  %v4002_v18 = vpop.f32.mrf.mxu2  ;;  %v7180_v2 = vld [vmem:[%s12094_s1 + $0x10a8] sm:$0xf]  ;;  %v8059_v3 = vld [vmem:[%s12094_s1 + $0x10b4] sm:$0xf0] }
 0x19b   :  { %v7308_v4 = vld [vmem:[%s12094_s1 + $0x11a8] sm:$0xf]  ;;  %v8055_v15 = vld [vmem:[%s12094_s1 + $0x1094] sm:$0xf0] }
 0x19c   :  { %v8087_v19 = vld [vmem:[%s12094_s1 + $0x1194] sm:$0xf0]  ;;  %v7165_v49 = vor.u32 %v8055_v15, %v7164_v14  ;;  %v7148_v56 = vld [vmem:[%s12094_s1 + $0x1068] sm:$0xf] }
 0x19d   :  { %4229 = vmatpush.bf16.msra.mxu0 %v6637_v24  ;;  %4242 = vmatpush.bf16.msra.mxu1 %v6765_v25  ;;  %v7340_v24 = vld [vmem:[%s12094_s1 + $0x11e8] sm:$0xf]  ;;  %v4015_v25 = vpop.f32.mrf.mxu3 }
 0x19e   :  { %4255 = vmatpush.bf16.msra.mxu2 %v6893_v26  ;;  %4268 = vmatpush.bf16.msra.mxu3 %v7021_v29  ;;  %v6589_v26 = vor.u32 %v7911_v7, %v6588_v6  ;;  %v6717_v29 = vor.u32 %v7943_v21, %v6716_v12  ;;  %v7341_v50 = vor.u32 %v8099_v27, %v7340_v24  ;;  %v8091_v6 = vld [vmem:[%s12094_s1 + $0x11b4] sm:$0xf0]  ;;  %v7545_v7 = vld [vmem:[%s12094_s1 + $0xac] sm:$0xf]  ;;  %v5262_v12 = vld [vmem:[%s12094_s1 + $0x1b8] sm:$0xf0] }
 0x19f   :  { %v7181_v21 = vor.u32 %v8059_v3, %v7180_v2  ;;  %v7309_v13 = vor.u32 %v8091_v6, %v7308_v4  ;;  %v5118_v24 = vld [vmem:[%s12094_s1 + $0x98] sm:$0xf0]  ;;  %v8079_v2 = vld [vmem:[%s12094_s1 + $0x1154] sm:$0xf0]  ;;  %v7533_v3 = vld [vmem:[%s12094_s1 + $0x4c] sm:$0xf] }
 0x1a0   :  { %v5246_v27 = vld [vmem:[%s12094_s1 + $0x198] sm:$0xf0]  ;;  %v5121_v37 = vor.u32 %v7541_v22, %v5118_v24  ;;  %v7116_v15 = vld [vmem:[%s12094_s1 + $0x1028] sm:$0xf]  ;;  %v8075_v22 = vld [vmem:[%s12094_s1 + $0x1134] sm:$0xf0] }
 0x1a1   :  { %4230 = vmatpush.bf16.msra.mxu0 %v6621_v55  ;;  %4243 = vmatpush.bf16.msra.mxu1 %v6749_v63  ;;  %v7324_v55 = vld [vmem:[%s12094_s1 + $0x11c8] sm:$0xf]  ;;  %v8095_v63 = vld [vmem:[%s12094_s1 + $0x11d4] sm:$0xf0]  ;;  %v5086_v4 = vld [vmem:[%s12094_s1 + $0x58] sm:$0xf0] }
 0x1a2   :  { %4256 = vmatpush.bf16.msra.mxu2 %v6877_v59  ;;  %4269 = vmatpush.bf16.msra.mxu3 %v7005_v0  ;;  %v7549_v59 = vld [vmem:[%s12094_s1 + $0xcc] sm:$0xf]  ;;  %v7197_v0 = vor.u32 %v8063_v54, %v7196_v53  ;;  %v7325_v8 = vor.u32 %v8095_v63, %v7324_v55  ;;  %v5102_v54 = vld [vmem:[%s12094_s1 + $0x78] sm:$0xf0]  ;;  %v5089_v14 = vor.u32 %v7533_v3, %v5086_v4 }
 0x1a3   :  { %v5153_v1 = vor.u32 %v7549_v59, %v5150_v60  ;;  %v7537_v53 = vld [vmem:[%s12094_s1 + $0x6c] sm:$0xf]  ;;  %v5806_v3 = vld [vmem:[%s12094_s1 + $0x5f8] sm:$0xf0] }
 0x1a4   :  { %v7569_v55 = vld [vmem:[%s12094_s1 + $0x16c] sm:$0xf]  ;;  %v5105_v60 = vor.u32 %v7537_v53, %v5102_v54  ;;  %v5182_v53 = vld [vmem:[%s12094_s1 + $0x118] sm:$0xf0] }
 0x1a5   :  { %4231 = vmatpush.bf16.msra.mxu0 %v6605_v5  ;;  %4244 = vmatpush.bf16.msra.mxu1 %v6733_v10  ;;  %v5281_v5 = vor.u32 %v7581_v61, %v5278_v62  ;;  %v5134_v10 = vld [vmem:[%s12094_s1 + $0xb8] sm:$0xf0]  ;;  %v7132_v61 = vld [vmem:[%s12094_s1 + $0x1048] sm:$0xf]  ;;  %v8047_v62 = vld [vmem:[%s12094_s1 + $0x1054] sm:$0xf0] }
 0x1a6   :  { %4257 = vmatpush.bf16.msra.mxu2 %v6861_v11  ;;  %4270 = vmatpush.bf16.msra.mxu3 %v6989_v23  ;;  %v7577_v11 = vld [vmem:[%s12094_s1 + $0x1ac] sm:$0xf]  ;;  %v5137_v23 = vor.u32 %v7545_v7, %v5134_v10  ;;  %v5214_v10 = vld [vmem:[%s12094_s1 + $0x158] sm:$0xf0] }
 0x1a7   :  { %v5265_v18 = vor.u32 %v7577_v11, %v5262_v12  ;;  %v7565_v7 = vld [vmem:[%s12094_s1 + $0x14c] sm:$0xf]  ;;  %v7133_v12 = vor.u32 %v8047_v62, %v7132_v61  ;;  %v5550_v61 = vld [vmem:[%s12094_s1 + $0x3f8] sm:$0xf0] }
 0x1a8   :  { %v7529_v24 = vld [vmem:[%s12094_s1 + $0x2c] sm:$0xf] }
 0x1a9   :  { %4232 = vmatpush.bf16.msra.mxu0 %v6589_v26  ;;  %4245 = vmatpush.bf16.msra.mxu1 %v6717_v29  ;;  %v4026_v25 = vpop.f32.mrf.mxu0  ;;  %v7573_v26 = vld [vmem:[%s12094_s1 + $0x18c] sm:$0xf]  ;;  %v4039_v29 = vpop.f32.mrf.mxu1 }
 0x1aa   :  { %4258 = vmatpush.bf16.msra.mxu2 %v6845_v32  ;;  %4271 = vmatpush.bf16.msra.mxu3 %v6973_v41  ;;  %v4027_v28 = vadd.f32 %v4026_v25, %v10886_v58  ;;  %v7293_v32 = vor.u32 %v8087_v19, %v7292_v17  ;;  %v8051_v41 = vld [vmem:[%s12094_s1 + $0x1074] sm:$0xf0]  ;;  %v5249_v58 = vor.u32 %v7573_v26, %v5246_v27  ;;  %v5070_v25 = vld [vmem:[%s12094_s1 + $0x38] sm:$0xf0]  ;;  %v7561_v26 = vld [vmem:[%s12094_s1 + $0x12c] sm:$0xf] }
 0x1ab   :  { %v7149_v63 = vor.u32 %v8051_v41, %v7148_v56  ;;  %v8043_v17 = vld [vmem:[%s12094_s1 + $0x1034] sm:$0xf0]  ;;  %v5217_v19 = vor.u32 %v7565_v7, %v5214_v10  ;;  %v5198_v27 = vld [vmem:[%s12094_s1 + $0x138] sm:$0xf0]  ;;  %v7228_v56 = vld [vmem:[%s12094_s1 + $0x1108] sm:$0xf] }
 0x1ac   :  { %4233 = vmatmul.bf16.vlgmr.msra.gmra.mxu0 %v9150_v31  ;;  %4246 = vmatmul.bf16.vlgmr.msra.gmra.mxu1 %v9163_v40  ;;  %v8071_v41 = vld [vmem:[%s12094_s1 + $0x1114] sm:$0xf0]  ;;  %v7681_v62 = vld [vmem:[%s12094_s1 + $0x4ec] sm:$0xf] }
 0x1ad   :  { %4277 = vmatpush.bf16.msrb.mxu0 %v7213_v47  ;;  %4290 = vmatpush.bf16.msrb.mxu1 %v7341_v50  ;;  %v7276_v47 = vld [vmem:[%s12094_s1 + $0x1168] sm:$0xf]  ;;  %v4040_v50 = vadd.f32 %v4039_v29, %v4027_v28  ;;  %v7117_v28 = vor.u32 %v8043_v17, %v7116_v15  ;;  %v8039_v29 = vld [vmem:[%s12094_s1 + $0x1014] sm:$0xf0]  ;;  %v7613_v10 = vld [vmem:[%s12094_s1 + $0x2cc] sm:$0xf] }
 0x1ae   :  { %4303 = vmatpush.bf16.msrb.mxu2 %v5169_v52  ;;  %4316 = vmatpush.bf16.msrb.mxu3 %v5297_v57  ;;  %v8083_v52 = vld [vmem:[%s12094_s1 + $0x1174] sm:$0xf0]  ;;  %v5230_v57 = vld [vmem:[%s12094_s1 + $0x178] sm:$0xf0]  ;;  %v7709_v17 = vld [vmem:[%s12094_s1 + $0x5cc] sm:$0xf] }
 0x1af   :  { %4259 = vmatmul.bf16.vlgmr.msra.gmra.mxu2 %v9161_v38  ;;  %4272 = vmatmul.bf16.vlgmr.msra.gmra.mxu3 %v9171_v44  ;;  %v7277_v59 = vor.u32 %v8083_v52, %v7276_v47  ;;  %v7525_v47 = vld [vmem:[%s12094_s1 + $0xc] sm:$0xf]  ;;  %v5662_v15 = vld [vmem:[%s12094_s1 + $0x4d8] sm:$0xf0] }
 0x1b0   :  { %v7557_v52 = vld [vmem:[%s12094_s1 + $0x10c] sm:$0xf] }
 0x1b1   :  { %4278 = vmatpush.bf16.msrb.mxu0 %v7197_v0  ;;  %4291 = vmatpush.bf16.msrb.mxu1 %v7325_v8  ;;  %v7260_v0 = vld [vmem:[%s12094_s1 + $0x1148] sm:$0xf]  ;;  %v5233_v8 = vor.u32 %v7569_v55, %v5230_v57  ;;  %v4028_v11 = vpop.f32.mrf.mxu0  ;;  %v7617_v55 = vld [vmem:[%s12094_s1 + $0x2ec] sm:$0xf]  ;;  %v5422_v57 = vld [vmem:[%s12094_s1 + $0x2f8] sm:$0xf0]  ;;  %v5185_v4 = vor.u32 %v7557_v52, %v5182_v53 }
 0x1b2   :  { %4304 = vmatpush.bf16.msrb.mxu2 %v5153_v1  ;;  %4317 = vmatpush.bf16.msrb.mxu3 %v5281_v5  ;;  %v4052_v1 = vpop.f32.mrf.mxu2  ;;  %v4065_v6 = vpop.f32.mrf.mxu3  ;;  %v5406_v11 = vld [vmem:[%s12094_s1 + $0x2d8] sm:$0xf0]  ;;  %v8148_v53 = vld [vmem:[%s12095_s2] sm:$0xf] }
 0x1b3   :  { %v4053_v5 = vadd.f32 %v4052_v1, %v4040_v50  ;;  %v5054_v50 = vld [vmem:[%s12094_s1 + $0x18] sm:$0xf0] }
 0x1b4   :  { %v5057_v1 = vor.u32 %v7525_v47, %v5054_v50  ;;  %v7605_v47 = vld [vmem:[%s12094_s1 + $0x28c] sm:$0xf]  ;;  %v5374_v52 = vld [vmem:[%s12094_s1 + $0x298] sm:$0xf0] }
 0x1b5   :  { %4279 = vmatpush.bf16.msrb.mxu0 %v7181_v21  ;;  %4292 = vmatpush.bf16.msrb.mxu1 %v7309_v13  ;;  %v4041_v21 = vpop.f32.mrf.mxu1  ;;  %v11085_v13 = vadd.f32 %v4065_v6, %v4053_v5  ;;  %v5425_v5 = vor.u32 %v7617_v55, %v5422_v57  ;;  %v7669_v57 = vld [vmem:[%s12094_s1 + $0x48c] sm:$0xf] }
 0x1b6   :  { %4305 = vmatpush.bf16.msrb.mxu2 %v5137_v23  ;;  %4318 = vmatpush.bf16.msrb.mxu3 %v5265_v18  ;;  %v7261_v23 = vor.u32 %v8079_v2, %v7260_v0  ;;  %v7244_v18 = vld [vmem:[%s12094_s1 + $0x1128] sm:$0xf]  ;;  %v5678_v0 = vld [vmem:[%s12094_s1 + $0x4f8] sm:$0xf0]  ;;  %v7713_v2 = vld [vmem:[%s12094_s1 + $0x5ec] sm:$0xf] }
 0x1b7   :  { %v5681_v7 = vor.u32 %v7681_v62, %v5678_v0  ;;  %v5809_v21 = vor.u32 %v7713_v2, %v5806_v3  ;;  %v5358_v2 = vld [vmem:[%s12094_s1 + $0x278] sm:$0xf0]  ;;  %v7633_v3 = vld [vmem:[%s12094_s1 + $0x36c] sm:$0xf] }
 0x1b9   :  { %4280 = vmatpush.bf16.msrb.mxu0 %v7165_v49  ;;  %4293 = vmatpush.bf16.msrb.mxu1 %v7293_v32  ;;  %v7100_v49 = vld [vmem:[%s12094_s1 + $0x1008] sm:$0xf]  ;;  %v7245_v32 = vor.u32 %v8075_v22, %v7244_v18  ;;  %v5790_v18 = vld [vmem:[%s12094_s1 + $0x5d8] sm:$0xf0] }
 0x1ba   :  { %4306 = vmatpush.bf16.msrb.mxu2 %v5121_v37  ;;  %4319 = vmatpush.bf16.msrb.mxu3 %v5249_v58  ;;  %v5073_v37 = vor.u32 %v7529_v24, %v5070_v25  ;;  %v5201_v58 = vor.u32 %v7561_v26, %v5198_v27  ;;  %v4054_v54 = vpop.f32.mrf.mxu2  ;;  %v7609_v25 = vld [vmem:[%s12094_s1 + $0x2ac] sm:$0xf]  ;;  %v5390_v26 = vld [vmem:[%s12094_s1 + $0x2b8] sm:$0xf0] }
 0x1bb   :  { %v7641_v27 = vld [vmem:[%s12094_s1 + $0x3ac] sm:$0xf]  ;;  %v625_v54 = vperm.slane %v8148_v53, 2 }
 0x1bc   :  { %v7625_v53 = vld [vmem:[%s12094_s1 + $0x32c] sm:$0xf] }
 0x1bd   :  { %4281 = vmatpush.bf16.msrb.mxu0 %v7149_v63  ;;  %4294 = vmatpush.bf16.msrb.mxu1 %v7277_v59  ;;  %v7649_v63 = vld [vmem:[%s12094_s1 + $0x3ec] sm:$0xf]  ;;  %v4067_v59 = vpop.f32.mrf.mxu3 }
 0x1be   :  { %4307 = vmatpush.bf16.msrb.mxu2 %v5105_v60  ;;  %4320 = vmatpush.bf16.msrb.mxu3 %v5233_v8  ;;  %v7101_v60 = vor.u32 %v8039_v29, %v7100_v49  ;;  %v7229_v8 = vor.u32 %v8071_v41, %v7228_v56  ;;  %v5553_v6 = vor.u32 %v7649_v63, %v5550_v61  ;;  %v5518_v49 = vld [vmem:[%s12094_s1 + $0x3b8] sm:$0xf0]  ;;  %v7673_v29 = vld [vmem:[%s12094_s1 + $0x4ac] sm:$0xf] }
 0x1bf   :  { %v5774_v56 = vld [vmem:[%s12094_s1 + $0x5b8] sm:$0xf0]  ;;  %v5393_v41 = vor.u32 %v7609_v25, %v5390_v26  ;;  %v7701_v59 = vld [vmem:[%s12094_s1 + $0x58c] sm:$0xf]  ;;  %v5377_v61 = vor.u32 %v7605_v47, %v5374_v52 }
 0x1c0   :  { %v5630_v63 = vld [vmem:[%s12094_s1 + $0x498] sm:$0xf0]  ;;  %v7593_v52 = vld [vmem:[%s12094_s1 + $0x22c] sm:$0xf] }
 0x1c1   :  { %4282 = vmatpush.bf16.msrb.mxu0 %v7133_v12  ;;  %4295 = vmatpush.bf16.msrb.mxu1 %v7261_v23  ;;  %v7645_v12 = vld [vmem:[%s12094_s1 + $0x3cc] sm:$0xf]  ;;  %v5534_v23 = vld [vmem:[%s12094_s1 + $0x3d8] sm:$0xf0] }
 0x1c2   :  { %4308 = vmatpush.bf16.msrb.mxu2 %v5089_v14  ;;  %4321 = vmatpush.bf16.msrb.mxu3 %v5217_v19  ;;  %v7677_v14 = vld [vmem:[%s12094_s1 + $0x4cc] sm:$0xf]  ;;  %v5409_v19 = vor.u32 %v7613_v10, %v5406_v11  ;;  %v5537_v22 = vor.u32 %v7645_v12, %v5534_v23  ;;  %v5614_v11 = vld [vmem:[%s12094_s1 + $0x478] sm:$0xf0] }
 0x1c3   :  { %v5665_v24 = vor.u32 %v7677_v14, %v5662_v15  ;;  %v7665_v10 = vld [vmem:[%s12094_s1 + $0x46c] sm:$0xf]  ;;  %v5470_v26 = vld [vmem:[%s12094_s1 + $0x358] sm:$0xf0] }
 0x1c4   :  { %v7697_v12 = vld [vmem:[%s12094_s1 + $0x56c] sm:$0xf] }
 0x1c5   :  { %4283 = vmatpush.bf16.msrb.mxu0 %v7117_v28  ;;  %4296 = vmatpush.bf16.msrb.mxu1 %v7245_v32  ;;  %v5793_v28 = vor.u32 %v7709_v17, %v5790_v18  ;;  %v5646_v32 = vld [vmem:[%s12094_s1 + $0x4b8] sm:$0xf0]  ;;  %v5617_v17 = vor.u32 %v7665_v10, %v5614_v11  ;;  %v7597_v18 = vld [vmem:[%s12094_s1 + $0x24c] sm:$0xf] }
 0x1c6   :  { %4309 = vmatpush.bf16.msrb.mxu2 %v5073_v37  ;;  %4322 = vmatpush.bf16.msrb.mxu3 %v5201_v58  ;;  %v7705_v37 = vld [vmem:[%s12094_s1 + $0x5ac] sm:$0xf]  ;;  %v5521_v58 = vor.u32 %v7641_v27, %v5518_v49  ;;  %v5649_v50 = vor.u32 %v7673_v29, %v5646_v32  ;;  %v5694_v11 = vld [vmem:[%s12094_s1 + $0x518] sm:$0xf0] }
 0x1c7   :  { %v5777_v55 = vor.u32 %v7705_v37, %v5774_v56  ;;  %v7661_v27 = vld [vmem:[%s12094_s1 + $0x44c] sm:$0xf]  ;;  %v5726_v37 = vld [vmem:[%s12094_s1 + $0x558] sm:$0xf0] }
 0x1c8   :  { %v7693_v32 = vld [vmem:[%s12094_s1 + $0x54c] sm:$0xf] }
 0x1c9   :  { %4284 = vmatpush.bf16.msrb.mxu0 %v7101_v60  ;;  %4297 = vmatpush.bf16.msrb.mxu1 %v7229_v8  ;;  %v5758_v60 = vld [vmem:[%s12094_s1 + $0x598] sm:$0xf0]  ;;  %v4078_v62 = vpop.f32.mrf.mxu0  ;;  %v5633_v8 = vor.u32 %v7669_v57, %v5630_v63  ;;  %v7657_v57 = vld [vmem:[%s12094_s1 + $0x42c] sm:$0xf] }
 0x1ca   :  { %4310 = vmatpush.bf16.msrb.mxu2 %v5057_v1  ;;  %4323 = vmatpush.bf16.msrb.mxu3 %v5185_v4  ;;  %v7601_v1 = vld [vmem:[%s12094_s1 + $0x26c] sm:$0xf]  ;;  %v4079_v4 = vadd.f32 %v4078_v62, %v625_v54  ;;  %v5582_v63 = vld [vmem:[%s12094_s1 + $0x438] sm:$0xf0] }
 0x1cb   :  { %v5361_v14 = vor.u32 %v7601_v1, %v5358_v2  ;;  %v7589_v62 = vld [vmem:[%s12094_s1 + $0x20c] sm:$0xf]  ;;  %v5585_v1 = vor.u32 %v7657_v57, %v5582_v63  ;;  %v5902_v63 = vld [vmem:[%s12094_s1 + $0x6b8] sm:$0xf0] }
 0x1cc   :  { %4285 = vmatmul.bf16.vlgmr.msrb.gmra.mxu0 %v9366_v43  ;;  %4298 = vmatmul.bf16.vlgmr.msrb.gmra.mxu1 %v9377_v51  ;;  %v7621_v2 = vld [vmem:[%s12094_s1 + $0x30c] sm:$0xf] }
 0x1cd   :  { %4329 = vmatpush.bf16.msra.mxu0 %v5425_v5  ;;  %4342 = vmatpush.bf16.msra.mxu1 %v5553_v6  ;;  %v4091_v5 = vpop.f32.mrf.mxu1  ;;  %v5761_v6 = vor.u32 %v7701_v59, %v5758_v60  ;;  %v7689_v59 = vld [vmem:[%s12094_s1 + $0x52c] sm:$0xf]  ;;  %v5710_v60 = vld [vmem:[%s12094_s1 + $0x538] sm:$0xf0] }
 0x1ce   :  { %4355 = vmatpush.bf16.msra.mxu2 %v5681_v7  ;;  %4368 = vmatpush.bf16.msra.mxu3 %v5809_v21  ;;  %v5486_v7 = vld [vmem:[%s12094_s1 + $0x378] sm:$0xf0]  ;;  %v4092_v23 = vadd.f32 %v4091_v5, %v4079_v4  ;;  %v7653_v4 = vld [vmem:[%s12094_s1 + $0x40c] sm:$0xf] }
 0x1cf   :  { %4311 = vmatmul.bf16.vlgmr.msrb.gmra.mxu2 %v8516_v16  ;;  %4324 = vmatmul.bf16.vlgmr.msrb.gmra.mxu3 %v8555_v33  ;;  %v7637_v16 = vld [vmem:[%s12094_s1 + $0x38c] sm:$0xf]  ;;  %v5502_v33 = vld [vmem:[%s12094_s1 + $0x398] sm:$0xf0]  ;;  %v5489_v15 = vor.u32 %v7633_v3, %v5486_v7 }
 0x1d0   :  { %v5505_v0 = vor.u32 %v7637_v16, %v5502_v33  ;;  %v5742_v21 = vld [vmem:[%s12094_s1 + $0x578] sm:$0xf0]  ;;  %v7685_v10 = vld [vmem:[%s12094_s1 + $0x50c] sm:$0xf] }
 0x1d1   :  { %4330 = vmatpush.bf16.msra.mxu0 %v5409_v19  ;;  %4343 = vmatpush.bf16.msra.mxu1 %v5537_v22  ;;  %v5342_v19 = vld [vmem:[%s12094_s1 + $0x258] sm:$0xf0]  ;;  %v7629_v22 = vld [vmem:[%s12094_s1 + $0x34c] sm:$0xf]  ;;  %v5745_v25 = vor.u32 %v7697_v12, %v5742_v21  ;;  %v4080_v47 = vpop.f32.mrf.mxu0 }
 0x1d2   :  { %4356 = vmatpush.bf16.msra.mxu2 %v5665_v24  ;;  %4369 = vmatpush.bf16.msra.mxu3 %v5793_v28  ;;  %v4104_v24 = vpop.f32.mrf.mxu2  ;;  %v5598_v28 = vld [vmem:[%s12094_s1 + $0x458] sm:$0xf0]  ;;  %v4117_v29 = vpop.f32.mrf.mxu3  ;;  %v5345_v56 = vor.u32 %v7597_v18, %v5342_v19  ;;  %v7745_v21 = vld [vmem:[%s12094_s1 + $0x6ec] sm:$0xf] }
 0x1d3   :  { %v4105_v49 = vadd.f32 %v4104_v24, %v4092_v23  ;;  %v5326_v16 = vld [vmem:[%s12094_s1 + $0x238] sm:$0xf0]  ;;  %v7809_v18 = vld [vmem:[%s12094_s1 + $0x8ec] sm:$0xf] }
 0x1d4   :  { %v5454_v33 = vld [vmem:[%s12094_s1 + $0x338] sm:$0xf0]  ;;  %v7737_v57 = vld [vmem:[%s12094_s1 + $0x6ac] sm:$0xf] }
 0x1d5   :  { %4331 = vmatpush.bf16.msra.mxu0 %v5393_v41  ;;  %4344 = vmatpush.bf16.msra.mxu1 %v5521_v58  ;;  %v11286_v41 = vadd.f32 %v4117_v29, %v4105_v49  ;;  %v5473_v58 = vor.u32 %v7629_v22, %v5470_v26  ;;  %v4093_v54 = vpop.f32.mrf.mxu1  ;;  %v5438_v3 = vld [vmem:[%s12094_s1 + $0x318] sm:$0xf0] }
 0x1d6   :  { %4357 = vmatpush.bf16.msra.mxu2 %v5649_v50  ;;  %4370 = vmatpush.bf16.msra.mxu3 %v5777_v55  ;;  %v5601_v50 = vor.u32 %v7661_v27, %v5598_v28  ;;  %v5729_v55 = vor.u32 %v7693_v32, %v5726_v37  ;;  %v5566_v7 = vld [vmem:[%s12094_s1 + $0x418] sm:$0xf0]  ;;  %v5441_v22 = vor.u32 %v7621_v2, %v5438_v3  ;;  %v7741_v32 = vld [vmem:[%s12094_s1 + $0x6cc] sm:$0xf] }
 0x1d7   :  { %v5934_v23 = vld [vmem:[%s12094_s1 + $0x6f8] sm:$0xf0]  ;;  %v5569_v24 = vor.u32 %v7653_v4, %v5566_v7  ;;  %v5697_v27 = vor.u32 %v7685_v10, %v5694_v11  ;;  %v7733_v4 = vld [vmem:[%s12094_s1 + $0x68c] sm:$0xf] }
 0x1d8   :  { %v6190_v19 = vld [vmem:[%s12094_s1 + $0x8f8] sm:$0xf0]  ;;  %v5937_v28 = vor.u32 %v7745_v21, %v5934_v23  ;;  %v7829_v10 = vld [vmem:[%s12094_s1 + $0x98c] sm:$0xf] }
 0x1d9   :  { %4332 = vmatpush.bf16.msra.mxu0 %v5377_v61  ;;  %4345 = vmatpush.bf16.msra.mxu1 %v5505_v0  ;;  %v5329_v61 = vor.u32 %v7593_v52, %v5326_v16  ;;  %v5310_v0 = vld [vmem:[%s12094_s1 + $0x218] sm:$0xf0]  ;;  %v6193_v29 = vor.u32 %v7809_v18, %v6190_v19  ;;  %v7837_v16 = vld [vmem:[%s12094_s1 + $0x9cc] sm:$0xf] }
 0x1da   :  { %4358 = vmatpush.bf16.msra.mxu2 %v5633_v8  ;;  %4371 = vmatpush.bf16.msra.mxu3 %v5761_v6  ;;  %v5457_v8 = vor.u32 %v7625_v53, %v5454_v33  ;;  %v4106_v5 = vpop.f32.mrf.mxu2  ;;  %v5713_v6 = vor.u32 %v7689_v59, %v5710_v60  ;;  %v4119_v12 = vpop.f32.mrf.mxu3  ;;  %v6318_v26 = vld [vmem:[%s12094_s1 + $0x9f8] sm:$0xf0]  ;;  %v7769_v59 = vld [vmem:[%s12094_s1 + $0x7ac] sm:$0xf] }
 0x1db   :  { %v5918_v37 = vld [vmem:[%s12094_s1 + $0x6d8] sm:$0xf0]  ;;  %v7761_v18 = vld [vmem:[%s12094_s1 + $0x76c] sm:$0xf] }
 0x1dc   :  { %v6174_v52 = vld [vmem:[%s12094_s1 + $0x8d8] sm:$0xf0]  ;;  %v5921_v54 = vor.u32 %v7741_v32, %v5918_v37 }
 0x1dd   :  { %4333 = vmatpush.bf16.msra.mxu0 %v5361_v14  ;;  %4346 = vmatpush.bf16.msra.mxu1 %v5489_v15  ;;  %v7777_v14 = vld [vmem:[%s12094_s1 + $0x7ec] sm:$0xf]  ;;  %v5313_v15 = vor.u32 %v7589_v62, %v5310_v0  ;;  %v6302_v53 = vld [vmem:[%s12094_s1 + $0x9d8] sm:$0xf0] }
 0x1de   :  { %4359 = vmatpush.bf16.msra.mxu2 %v5617_v17  ;;  %4372 = vmatpush.bf16.msra.mxu3 %v5745_v25  ;;  %v6062_v17 = vld [vmem:[%s12094_s1 + $0x7f8] sm:$0xf0]  ;;  %v7841_v25 = vld [vmem:[%s12094_s1 + $0x9ec] sm:$0xf]  ;;  %v6305_v60 = vor.u32 %v7837_v16, %v6302_v53 }
 0x1df   :  { %v6065_v49 = vor.u32 %v7777_v14, %v6062_v17  ;;  %v6321_v47 = vor.u32 %v7841_v25, %v6318_v26  ;;  %v7801_v62 = vld [vmem:[%s12094_s1 + $0x8ac] sm:$0xf]  ;;  %v6158_v0 = vld [vmem:[%s12094_s1 + $0x8b8] sm:$0xf0] }
 0x1e0   :  { %v6161_v3 = vor.u32 %v7801_v62, %v6158_v0  ;;  %v5886_v5 = vld [vmem:[%s12094_s1 + $0x698] sm:$0xf0]  ;;  %v7793_v26 = vld [vmem:[%s12094_s1 + $0x86c] sm:$0xf] }
 0x1e1   :  { %4334 = vmatpush.bf16.msra.mxu0 %v5345_v56  ;;  %4347 = vmatpush.bf16.msra.mxu1 %v5473_v58  ;;  %v7773_v56 = vld [vmem:[%s12094_s1 + $0x7cc] sm:$0xf]  ;;  %v6046_v58 = vld [vmem:[%s12094_s1 + $0x7d8] sm:$0xf0]  ;;  %v5889_v12 = vor.u32 %v7733_v4, %v5886_v5 }
 0x1e2   :  { %4360 = vmatpush.bf16.msra.mxu2 %v5601_v50  ;;  %4373 = vmatpush.bf16.msra.mxu3 %v5729_v55  ;;  %v7805_v50 = vld [vmem:[%s12094_s1 + $0x8cc] sm:$0xf]  ;;  %v6049_v55 = vor.u32 %v7773_v56, %v6046_v58  ;;  %v6142_v7 = vld [vmem:[%s12094_s1 + $0x898] sm:$0xf0] }
 0x1e3   :  { %v6177_v33 = vor.u32 %v7805_v50, %v6174_v52  ;;  %v6270_v11 = vld [vmem:[%s12094_s1 + $0x998] sm:$0xf0]  ;;  %v7725_v56 = vld [vmem:[%s12094_s1 + $0x64c] sm:$0xf] }
 0x1e4   :  { %v5870_v17 = vld [vmem:[%s12094_s1 + $0x678] sm:$0xf0]  ;;  %v7757_v58 = vld [vmem:[%s12094_s1 + $0x74c] sm:$0xf] }
 0x1e5   :  { %4335 = vmatpush.bf16.msra.mxu0 %v5329_v61  ;;  %4348 = vmatpush.bf16.msra.mxu1 %v5457_v8  ;;  %v6030_v61 = vld [vmem:[%s12094_s1 + $0x7b8] sm:$0xf0]  ;;  %v7833_v8 = vld [vmem:[%s12094_s1 + $0x9ac] sm:$0xf] }
 0x1e6   :  { %4361 = vmatpush.bf16.msra.mxu2 %v5585_v1  ;;  %4374 = vmatpush.bf16.msra.mxu3 %v5713_v6  ;;  %v5905_v1 = vor.u32 %v7737_v57, %v5902_v63  ;;  %v6033_v2 = vor.u32 %v7769_v59, %v6030_v61  ;;  %v7797_v6 = vld [vmem:[%s12094_s1 + $0x88c] sm:$0xf]  ;;  %v5998_v25 = vld [vmem:[%s12094_s1 + $0x778] sm:$0xf0] }
 0x1e7   :  { %v6145_v14 = vor.u32 %v7797_v6, %v6142_v7  ;;  %v6001_v32 = vor.u32 %v7761_v18, %v5998_v25  ;;  %v5982_v16 = vld [vmem:[%s12094_s1 + $0x758] sm:$0xf0]  ;;  %v7789_v53 = vld [vmem:[%s12094_s1 + $0x84c] sm:$0xf] }
 0x1e8   :  { %v7821_v57 = vld [vmem:[%s12094_s1 + $0x94c] sm:$0xf]  ;;  %v6238_v63 = vld [vmem:[%s12094_s1 + $0x958] sm:$0xf0]  ;;  %v5985_v62 = vor.u32 %v7757_v58, %v5982_v16 }
 0x1e9   :  { %4336 = vmatpush.bf16.msra.mxu0 %v5313_v15  ;;  %4349 = vmatpush.bf16.msra.mxu1 %v5441_v22  ;;  %v4130_v21 = vpop.f32.mrf.mxu0  ;;  %v7729_v15 = vld [vmem:[%s12094_s1 + $0x66c] sm:$0xf]  ;;  %v4143_v22 = vpop.f32.mrf.mxu1  ;;  %v5966_v4 = vld [vmem:[%s12094_s1 + $0x738] sm:$0xf0] }
 0x1ea   :  { %4362 = vmatpush.bf16.msra.mxu2 %v5569_v24  ;;  %4375 = vmatpush.bf16.msra.mxu3 %v5697_v27  ;;  %v4131_v19 = vadd.f32 %v4130_v21, %v11286_v41  ;;  %v6273_v24 = vor.u32 %v7829_v10, %v6270_v11  ;;  %v6126_v27 = vld [vmem:[%s12094_s1 + $0x878] sm:$0xf0]  ;;  %v7785_v5 = vld [vmem:[%s12094_s1 + $0x82c] sm:$0xf] }
 0x1eb   :  { %v6254_v41 = vld [vmem:[%s12094_s1 + $0x978] sm:$0xf0]  ;;  %v6129_v37 = vor.u32 %v7793_v26, %v6126_v27  ;;  %v7717_v7 = vld [vmem:[%s12094_s1 + $0x60c] sm:$0xf] }
 0x1ec   :  { %4337 = vmatmul.bf16.vlgmr.msra.gmra.mxu0 %v8499_v9  ;;  %4350 = vmatmul.bf16.vlgmr.msra.gmra.mxu1 %v8528_v20  ;;  %v7765_v9 = vld [vmem:[%s12094_s1 + $0x78c] sm:$0xf]  ;;  %v6014_v20 = vld [vmem:[%s12094_s1 + $0x798] sm:$0xf0] }
 0x1ed   :  { %4381 = vmatpush.bf16.msrb.mxu0 %v5937_v28  ;;  %4394 = vmatpush.bf16.msrb.mxu1 %v6065_v49  ;;  %v6017_v23 = vor.u32 %v7765_v9, %v6014_v20  ;;  %v7825_v28 = vld [vmem:[%s12094_s1 + $0x96c] sm:$0xf]  ;;  %v4144_v49 = vadd.f32 %v4143_v22, %v4131_v19  ;;  %v6094_v9 = vld [vmem:[%s12094_s1 + $0x838] sm:$0xf0] }
 0x1ee   :  { %4407 = vmatpush.bf16.msrb.mxu2 %v6193_v29  ;;  %4420 = vmatpush.bf16.msrb.mxu3 %v6321_v47  ;;  %v5873_v29 = vor.u32 %v7729_v15, %v5870_v17  ;;  %v5854_v47 = vld [vmem:[%s12094_s1 + $0x658] sm:$0xf0]  ;;  %v6257_v52 = vor.u32 %v7825_v28, %v6254_v41  ;;  %v7749_v21 = vld [vmem:[%s12094_s1 + $0x70c] sm:$0xf] }
 0x1ef   :  { %4363 = vmatmul.bf16.vlgmr.msra.gmra.mxu2 %v8711_v45  ;;  %v6286_v45 = vld [vmem:[%s12094_s1 + $0x9b8] sm:$0xf0]  ;;  %4376 = vmatmul.bf16.vlgmr.msra.gmra.mxu3 %v8715_v48  ;;  %v5857_v59 = vor.u32 %v7725_v56, %v5854_v47  ;;  %v7813_v19 = vld [vmem:[%s12094_s1 + $0x90c] sm:$0xf] }
 0x1f0   :  { %v6289_v48 = vor.u32 %v7833_v8, %v6286_v45  ;;  %v7721_v8 = vld [vmem:[%s12094_s1 + $0x62c] sm:$0xf]  ;;  %v5838_v45 = vld [vmem:[%s12094_s1 + $0x638] sm:$0xf0] }
 0x1f1   :  { %4382 = vmatpush.bf16.msrb.mxu0 %v5921_v54  ;;  %4395 = vmatpush.bf16.msrb.mxu1 %v6049_v55  ;;  %v6110_v54 = vld [vmem:[%s12094_s1 + $0x858] sm:$0xf0]  ;;  %v4132_v61 = vpop.f32.mrf.mxu0  ;;  %v5841_v6 = vor.u32 %v7721_v8, %v5838_v45  ;;  %v7873_v25 = vld [vmem:[%s12094_s1 + $0xaec] sm:$0xf] }
 0x1f2   :  { %4408 = vmatpush.bf16.msrb.mxu2 %v6177_v33  ;;  %4421 = vmatpush.bf16.msrb.mxu3 %v6305_v60  ;;  %v4156_v50 = vpop.f32.mrf.mxu2  ;;  %v4169_v33 = vpop.f32.mrf.mxu3  ;;  %v6113_v0 = vor.u32 %v7789_v53, %v6110_v54  ;;  %v6222_v20 = vld [vmem:[%s12094_s1 + $0x938] sm:$0xf0]  ;;  %v7905_v27 = vld [vmem:[%s12094_s1 + $0xbec] sm:$0xf] }
 0x1f3   :  { %v4157_v55 = vadd.f32 %v4156_v50, %v4144_v49  ;;  %v5822_v10 = vld [vmem:[%s12094_s1 + $0x618] sm:$0xf0]  ;;  %v7937_v49 = vld [vmem:[%s12094_s1 + $0xcec] sm:$0xf] }
 0x1f4   :  { %v6078_v18 = vld [vmem:[%s12094_s1 + $0x818] sm:$0xf0]  ;;  %v5825_v28 = vor.u32 %v7717_v7, %v5822_v10  ;;  %v7969_v56 = vld [vmem:[%s12094_s1 + $0xdec] sm:$0xf] }
 0x1f5   :  { %4383 = vmatpush.bf16.msrb.mxu0 %v5905_v1  ;;  %4396 = vmatpush.bf16.msrb.mxu1 %v6033_v2  ;;  %v11485_v60 = vadd.f32 %v4169_v33, %v4157_v55  ;;  %v7753_v1 = vld [vmem:[%s12094_s1 + $0x72c] sm:$0xf]  ;;  %v4145_v2 = vpop.f32.mrf.mxu1  ;;  %v6206_v22 = vld [vmem:[%s12094_s1 + $0x918] sm:$0xf0] }
 0x1f6   :  { %4409 = vmatpush.bf16.msrb.mxu2 %v6161_v3  ;;  %4422 = vmatpush.bf16.msrb.mxu3 %v6289_v48  ;;  %v6241_v3 = vor.u32 %v7821_v57, %v6238_v63  ;;  %v7817_v48 = vld [vmem:[%s12094_s1 + $0x92c] sm:$0xf]  ;;  %v5969_v11 = vor.u32 %v7753_v1, %v5966_v4  ;;  %v6446_v26 = vld [vmem:[%s12094_s1 + $0xaf8] sm:$0xf0]  ;;  %v6209_v58 = vor.u32 %v7813_v19, %v6206_v22 }
 0x1f7   :  { %v6225_v17 = vor.u32 %v7817_v48, %v6222_v20  ;;  %v6574_v41 = vld [vmem:[%s12094_s1 + $0xbf8] sm:$0xf0]  ;;  %v6449_v50 = vor.u32 %v7873_v25, %v6446_v26  ;;  %v7869_v53 = vld [vmem:[%s12094_s1 + $0xacc] sm:$0xf] }
 0x1f8   :  { %v6830_v47 = vld [vmem:[%s12094_s1 + $0xdf8] sm:$0xf0]  ;;  %v7901_v55 = vld [vmem:[%s12094_s1 + $0xbcc] sm:$0xf] }
 0x1f9   :  { %4384 = vmatpush.bf16.msrb.mxu0 %v5889_v12  ;;  %4397 = vmatpush.bf16.msrb.mxu1 %v6017_v23  ;;  %v6097_v12 = vor.u32 %v7785_v5, %v6094_v9  ;;  %v5950_v23 = vld [vmem:[%s12094_s1 + $0x718] sm:$0xf0]  ;;  %v6833_v33 = vor.u32 %v7969_v56, %v6830_v47  ;;  %v7933_v63 = vld [vmem:[%s12094_s1 + $0xccc] sm:$0xf] }
 0x1fa   :  { %4410 = vmatpush.bf16.msrb.mxu2 %v6145_v14  ;;  %4423 = vmatpush.bf16.msrb.mxu3 %v6273_v24  ;;  %v7781_v14 = vld [vmem:[%s12094_s1 + $0x80c] sm:$0xf]  ;;  %v4158_v15 = vpop.f32.mrf.mxu2  ;;  %v4171_v24 = vpop.f32.mrf.mxu3  ;;  %v6430_v54 = vld [vmem:[%s12094_s1 + $0xad8] sm:$0xf0] }
 0x1fb   :  { %v6558_v57 = vld [vmem:[%s12094_s1 + $0xbd8] sm:$0xf0]  ;;  %v7965_v61 = vld [vmem:[%s12094_s1 + $0xdcc] sm:$0xf] }
 0x1fc   :  { %v6561_v8 = vor.u32 %v7901_v55, %v6558_v57  ;;  %v7865_v1 = vld [vmem:[%s12094_s1 + $0xaac] sm:$0xf]  ;;  %v6414_v2 = vld [vmem:[%s12094_s1 + $0xab8] sm:$0xf0] }
 0x1fd   :  { %4385 = vmatpush.bf16.msrb.mxu0 %v5873_v29  ;;  %4398 = vmatpush.bf16.msrb.mxu1 %v6001_v32  ;;  %v6702_v29 = vld [vmem:[%s12094_s1 + $0xcf8] sm:$0xf0]  ;;  %v5953_v32 = vor.u32 %v7749_v21, %v5950_v23  ;;  %v7929_v9 = vld [vmem:[%s12094_s1 + $0xcac] sm:$0xf] }
 0x1fe   :  { %4411 = vmatpush.bf16.msrb.mxu2 %v6129_v37  ;;  %4424 = vmatpush.bf16.msrb.mxu3 %v6257_v52  ;;  %v6081_v37 = vor.u32 %v7781_v14, %v6078_v18  ;;  %v6577_v52 = vor.u32 %v7905_v27, %v6574_v41  ;;  %v6705_v16 = vor.u32 %v7937_v49, %v6702_v29  ;;  %v6542_v5 = vld [vmem:[%s12094_s1 + $0xbb8] sm:$0xf0]  ;;  %v7925_v21 = vld [vmem:[%s12094_s1 + $0xc8c] sm:$0xf] }
 0x1ff   :  { %v6670_v48 = vld [vmem:[%s12094_s1 + $0xcb8] sm:$0xf0]  ;;  %v7957_v15 = vld [vmem:[%s12094_s1 + $0xd8c] sm:$0xf] }
 0x200   :  { %v6798_v20 = vld [vmem:[%s12094_s1 + $0xdb8] sm:$0xf0]  ;;  %v6673_v10 = vor.u32 %v7929_v9, %v6670_v48  ;;  %v7857_v25 = vld [vmem:[%s12094_s1 + $0xa6c] sm:$0xf] }
 0x201   :  { %4386 = vmatpush.bf16.msrb.mxu0 %v5857_v59  ;;  %4399 = vmatpush.bf16.msrb.mxu1 %v5985_v62  ;;  %v6686_v59 = vld [vmem:[%s12094_s1 + $0xcd8] sm:$0xf0]  ;;  %v7889_v27 = vld [vmem:[%s12094_s1 + $0xb6c] sm:$0xf] }
 0x202   :  { %4412 = vmatpush.bf16.msrb.mxu2 %v6113_v0  ;;  %4425 = vmatpush.bf16.msrb.mxu3 %v6241_v3  ;;  %v6814_v62 = vld [vmem:[%s12094_s1 + $0xdd8] sm:$0xf0]  ;;  %v6433_v0 = vor.u32 %v7869_v53, %v6430_v54  ;;  %v6689_v45 = vor.u32 %v7933_v63, %v6686_v59  ;;  %v7897_v3 = vld [vmem:[%s12094_s1 + $0xbac] sm:$0xf] }
 0x203   :  { %v6817_v4 = vor.u32 %v7965_v61, %v6814_v62  ;;  %v6545_v7 = vor.u32 %v7897_v3, %v6542_v5  ;;  %v6654_v23 = vld [vmem:[%s12094_s1 + $0xc98] sm:$0xf0]  ;;  %v7921_v49 = vld [vmem:[%s12094_s1 + $0xc6c] sm:$0xf] }
 0x204   :  { %v6657_v24 = vor.u32 %v7925_v21, %v6654_v23  ;;  %v6382_v26 = vld [vmem:[%s12094_s1 + $0xa78] sm:$0xf0]  ;;  %v7949_v59 = vld [vmem:[%s12094_s1 + $0xd4c] sm:$0xf] }
 0x205   :  { %4387 = vmatpush.bf16.msrb.mxu0 %v5841_v6  ;;  %4400 = vmatpush.bf16.msrb.mxu1 %v5969_v11  ;;  %v6417_v6 = vor.u32 %v7865_v1, %v6414_v2  ;;  %v7893_v11 = vld [vmem:[%s12094_s1 + $0xb8c] sm:$0xf]  ;;  %v6510_v41 = vld [vmem:[%s12094_s1 + $0xb78] sm:$0xf0]  ;;  %v6385_v56 = vor.u32 %v7857_v25, %v6382_v26 }
 0x206   :  { %4413 = vmatpush.bf16.msrb.mxu2 %v6097_v12  ;;  %4426 = vmatpush.bf16.msrb.mxu3 %v6225_v17  ;;  %v6526_v12 = vld [vmem:[%s12094_s1 + $0xb98] sm:$0xf0]  ;;  %v6513_v47 = vor.u32 %v7889_v27, %v6510_v41  ;;  %v7849_v2 = vld [vmem:[%s12094_s1 + $0xa2c] sm:$0xf] }
 0x207   :  { %v6782_v17 = vld [vmem:[%s12094_s1 + $0xd98] sm:$0xf0]  ;;  %v6529_v22 = vor.u32 %v7893_v11, %v6526_v12  ;;  %v7913_v48 = vld [vmem:[%s12094_s1 + $0xc2c] sm:$0xf] }
 0x208   :  { %v6638_v29 = vld [vmem:[%s12094_s1 + $0xc78] sm:$0xf0]  ;;  %v7909_v21 = vld [vmem:[%s12094_s1 + $0xc0c] sm:$0xf] }
 0x209   :  { %4388 = vmatpush.bf16.msrb.mxu0 %v5825_v28  ;;  %4401 = vmatpush.bf16.msrb.mxu1 %v5953_v32  ;;  %v11629_v14 = vpop.f32.mrf.mxu0  ;;  %v11637_v19 = vpop.f32.mrf.mxu1  ;;  %v6785_v28 = vor.u32 %v7957_v15, %v6782_v17  ;;  %v7953_v32 = vld [vmem:[%s12094_s1 + $0xd6c] sm:$0xf]  ;;  %v6494_v55 = vld [vmem:[%s12094_s1 + $0xb58] sm:$0xf0] }
 0x20a   :  { %4414 = vmatpush.bf16.msrb.mxu2 %v6081_v37  ;;  %4427 = vmatpush.bf16.msrb.mxu3 %v6209_v58  ;;  %v6766_v37 = vld [vmem:[%s12094_s1 + $0xd78] sm:$0xf0]  ;;  %v6641_v58 = vor.u32 %v7921_v49, %v6638_v29  ;;  %v7941_v17 = vld [vmem:[%s12094_s1 + $0xd0c] sm:$0xf] }
 0x20b   :  { %v6769_v53 = vor.u32 %v7953_v32, %v6766_v37  ;;  %v6622_v57 = vld [vmem:[%s12094_s1 + $0xc58] sm:$0xf0]  ;;  %v8033_v26 = vld [vmem:[%s12094_s1 + $0xfec] sm:$0xf] }
 0x20c   :  { %4389 = vmatmul.bf16.vlgmr.msrb.gmra.mxu0 %v8703_v42  ;;  %4402 = vmatmul.bf16.vlgmr.msrb.gmra.mxu1 %v8713_v46  ;;  %v7961_v42 = vld [vmem:[%s12094_s1 + $0xdac] sm:$0xf]  ;;  %v6750_v61 = vld [vmem:[%s12094_s1 + $0xd58] sm:$0xf0] }
 0x20d   :  { %4433 = vmatpush.bf16.msra.mxu0 %v6449_v50  ;;  %4446 = vmatpush.bf16.msra.mxu1 %v6577_v52  ;;  %v7861_v46 = vld [vmem:[%s12094_s1 + $0xa8c] sm:$0xf]  ;;  %v6366_v52 = vld [vmem:[%s12094_s1 + $0xa58] sm:$0xf0]  ;;  %v6753_v5 = vor.u32 %v7949_v59, %v6750_v61 }
 0x20e   :  { %4459 = vmatpush.bf16.msra.mxu2 %v6705_v16  ;;  %4472 = vmatpush.bf16.msra.mxu3 %v6833_v33  ;;  %v7853_v50 = vld [vmem:[%s12094_s1 + $0xa4c] sm:$0xf]  ;;  %v6350_v3 = vld [vmem:[%s12094_s1 + $0xa38] sm:$0xf0] }
 0x20f   :  { %4415 = vmatmul.bf16.vlgmr.msrb.gmra.mxu2 %v8922_v30  ;;  %4428 = vmatmul.bf16.vlgmr.msrb.gmra.mxu3 %v8935_v36  ;;  %v6398_v30 = vld [vmem:[%s12094_s1 + $0xa98] sm:$0xf0]  ;;  %v6801_v36 = vor.u32 %v7961_v42, %v6798_v20  ;;  %v7885_v16 = vld [vmem:[%s12094_s1 + $0xb4c] sm:$0xf] }
 0x210   :  { %v6401_v18 = vor.u32 %v7861_v46, %v6398_v30  ;;  %v7917_v33 = vld [vmem:[%s12094_s1 + $0xc4c] sm:$0xf]  ;;  %v6478_v9 = vld [vmem:[%s12094_s1 + $0xb38] sm:$0xf0] }
 0x211   :  { %4434 = vmatpush.bf16.msra.mxu0 %v6433_v0  ;;  %4447 = vmatpush.bf16.msra.mxu1 %v6561_v8  ;;  %v4184_v62 = vpop.f32.mrf.mxu0  ;;  %v6369_v0 = vor.u32 %v7853_v50, %v6366_v52  ;;  %v4197_v8 = vpop.f32.mrf.mxu1  ;;  %v6625_v1 = vor.u32 %v7917_v33, %v6622_v57  ;;  %v6606_v42 = vld [vmem:[%s12094_s1 + $0xc38] sm:$0xf0]  ;;  %v7945_v20 = vld [vmem:[%s12094_s1 + $0xd2c] sm:$0xf] }
 0x212   :  { %4460 = vmatpush.bf16.msra.mxu2 %v6689_v45  ;;  %4473 = vmatpush.bf16.msra.mxu3 %v6817_v4  ;;  %v11672_v54 = vpop.f32.mrf.mxu2  ;;  %v11683_v63 = vpop.f32.mrf.mxu3  ;;  %v6497_v45 = vor.u32 %v7885_v16, %v6494_v55  ;;  %v7881_v4 = vld [vmem:[%s12094_s1 + $0xb2c] sm:$0xf]  ;;  %v6334_v46 = vld [vmem:[%s12094_s1 + $0xa18] sm:$0xf0]  ;;  %v6609_v11 = vor.u32 %v7913_v48, %v6606_v42 }
 0x213   :  { %v6481_v30 = vor.u32 %v7881_v4, %v6478_v9  ;;  %v6462_v12 = vld [vmem:[%s12094_s1 + $0xb18] sm:$0xf0]  ;;  %v8065_v49 = vld [vmem:[%s12094_s1 + $0x10ec] sm:$0xf] }
 0x214   :  { %v6590_v15 = vld [vmem:[%s12094_s1 + $0xc18] sm:$0xf0]  ;;  %v8029_v33 = vld [vmem:[%s12094_s1 + $0xfcc] sm:$0xf] }
 0x215   :  { %4435 = vmatpush.bf16.msra.mxu0 %v6417_v6  ;;  %4448 = vmatpush.bf16.msra.mxu1 %v6545_v7  ;;  %v6734_v6 = vld [vmem:[%s12094_s1 + $0xd38] sm:$0xf0]  ;;  %v6353_v7 = vor.u32 %v7849_v2, %v6350_v3  ;;  %v6593_v37 = vor.u32 %v7909_v21, %v6590_v15  ;;  %v8061_v61 = vld [vmem:[%s12094_s1 + $0x10cc] sm:$0xf] }
 0x216   :  { %4461 = vmatpush.bf16.msra.mxu2 %v6673_v10  ;;  %4474 = vmatpush.bf16.msra.mxu3 %v6801_v36  ;;  %v7845_v10 = vld [vmem:[%s12094_s1 + $0xa0c] sm:$0xf]  ;;  %v6737_v23 = vor.u32 %v7945_v20, %v6734_v6  ;;  %v6958_v25 = vld [vmem:[%s12094_s1 + $0xef8] sm:$0xf0] }
 0x217   :  { %v7877_v36 = vld [vmem:[%s12094_s1 + $0xb0c] sm:$0xf]  ;;  %v7086_v41 = vld [vmem:[%s12094_s1 + $0xff8] sm:$0xf0] }
 0x218   :  { %v7214_v29 = vld [vmem:[%s12094_s1 + $0x10f8] sm:$0xf0]  ;;  %v6465_v32 = vor.u32 %v7877_v36, %v6462_v12  ;;  %v7089_v52 = vor.u32 %v8033_v26, %v7086_v41  ;;  %v7993_v3 = vld [vmem:[%s12094_s1 + $0xeac] sm:$0xf] }
 0x219   :  { %4436 = vmatpush.bf16.msra.mxu0 %v6401_v18  ;;  %4449 = vmatpush.bf16.msra.mxu1 %v6529_v22  ;;  %v6718_v18 = vld [vmem:[%s12094_s1 + $0xd18] sm:$0xf0]  ;;  %v7217_v16 = vor.u32 %v8065_v49, %v7214_v29  ;;  %v8057_v42 = vld [vmem:[%s12094_s1 + $0x10ac] sm:$0xf] }
 0x21a   :  { %4462 = vmatpush.bf16.msra.mxu2 %v6657_v24  ;;  %4475 = vmatpush.bf16.msra.mxu3 %v6785_v28  ;;  %v4210_v22 = vpop.f32.mrf.mxu2  ;;  %v8001_v24 = vld [vmem:[%s12094_s1 + $0xeec] sm:$0xf]  ;;  %v4223_v27 = vpop.f32.mrf.mxu3  ;;  %v6337_v28 = vor.u32 %v7845_v10, %v6334_v46  ;;  %v6942_v55 = vld [vmem:[%s12094_s1 + $0xed8] sm:$0xf0] }
 0x21b   :  { %v6961_v50 = vor.u32 %v8001_v24, %v6958_v25  ;;  %v7070_v59 = vld [vmem:[%s12094_s1 + $0xfd8] sm:$0xf0]  ;;  %v8053_v36 = vld [vmem:[%s12094_s1 + $0x108c] sm:$0xf] }
 0x21c   :  { %v7198_v62 = vld [vmem:[%s12094_s1 + $0x10d8] sm:$0xf0]  ;;  %v7985_v25 = vld [vmem:[%s12094_s1 + $0xe6c] sm:$0xf] }
 0x21d   :  { %4437 = vmatpush.bf16.msra.mxu0 %v6385_v56  ;;  %4450 = vmatpush.bf16.msra.mxu1 %v6513_v47  ;;  %v8097_v56 = vld [vmem:[%s12094_s1 + $0x11ec] sm:$0xf]  ;;  %v7342_v47 = vld [vmem:[%s12094_s1 + $0x11f8] sm:$0xf0]  ;;  %v7201_v2 = vor.u32 %v8061_v61, %v7198_v62 }
 0x21e   :  { %4463 = vmatpush.bf16.msra.mxu2 %v6641_v58  ;;  %4476 = vmatpush.bf16.msra.mxu3 %v6769_v53  ;;  %v6721_v58 = vor.u32 %v7941_v17, %v6718_v18  ;;  %v7997_v53 = vld [vmem:[%s12094_s1 + $0xecc] sm:$0xf]  ;;  %v7345_v57 = vor.u32 %v8097_v56, %v7342_v47  ;;  %v7326_v8 = vld [vmem:[%s12094_s1 + $0x11d8] sm:$0xf0] }
 0x21f   :  { %v6926_v4 = vld [vmem:[%s12094_s1 + $0xeb8] sm:$0xf0]  ;;  %v8017_v27 = vld [vmem:[%s12094_s1 + $0xf6c] sm:$0xf] }
 0x220   :  { %v7054_v48 = vld [vmem:[%s12094_s1 + $0xfb8] sm:$0xf0]  ;;  %v8049_v49 = vld [vmem:[%s12094_s1 + $0x106c] sm:$0xf] }
 0x221   :  { %4438 = vmatpush.bf16.msra.mxu0 %v6369_v0  ;;  %4451 = vmatpush.bf16.msra.mxu1 %v6497_v45  ;;  %v8093_v0 = vld [vmem:[%s12094_s1 + $0x11cc] sm:$0xf]  ;;  %v6945_v45 = vor.u32 %v7997_v53, %v6942_v55  ;;  %v7182_v20 = vld [vmem:[%s12094_s1 + $0x10b8] sm:$0xf0] }
 0x222   :  { %4464 = vmatpush.bf16.msra.mxu2 %v6625_v1  ;;  %4477 = vmatpush.bf16.msra.mxu3 %v6753_v5  ;;  %v7073_v1 = vor.u32 %v8029_v33, %v7070_v59  ;;  %v8025_v5 = vld [vmem:[%s12094_s1 + $0xfac] sm:$0xf]  ;;  %v7329_v9 = vor.u32 %v8093_v0, %v7326_v8  ;;  %v7310_v6 = vld [vmem:[%s12094_s1 + $0x11b8] sm:$0xf0]  ;;  %v7185_v46 = vor.u32 %v8057_v42, %v7182_v20 }
 0x223   :  { %v7057_v10 = vor.u32 %v8025_v5, %v7054_v48  ;;  %v7166_v12 = vld [vmem:[%s12094_s1 + $0x1098] sm:$0xf0]  ;;  %v8077_v62 = vld [vmem:[%s12094_s1 + $0x114c] sm:$0xf] }
 0x224   :  { %v7294_v15 = vld [vmem:[%s12094_s1 + $0x1198] sm:$0xf0]  ;;  %v7169_v24 = vor.u32 %v8053_v36, %v7166_v12  ;;  %v8041_v20 = vld [vmem:[%s12094_s1 + $0x102c] sm:$0xf] }
 0x225   :  { %4439 = vmatpush.bf16.msra.mxu0 %v6353_v7  ;;  %4452 = vmatpush.bf16.msra.mxu1 %v6481_v30  ;;  %v6929_v7 = vor.u32 %v7993_v3, %v6926_v4  ;;  %v8021_v30 = vld [vmem:[%s12094_s1 + $0xf8c] sm:$0xf]  ;;  %v6894_v26 = vld [vmem:[%s12094_s1 + $0xe78] sm:$0xf0] }
 0x226   :  { %4465 = vmatpush.bf16.msra.mxu2 %v6609_v11  ;;  %4478 = vmatpush.bf16.msra.mxu3 %v6737_v23  ;;  %v7038_v11 = vld [vmem:[%s12094_s1 + $0xf98] sm:$0xf0]  ;;  %v8085_v23 = vld [vmem:[%s12094_s1 + $0x118c] sm:$0xf]  ;;  %v6897_v56 = vor.u32 %v7985_v25, %v6894_v26  ;;  %v4183_v25 = vadd.f32 %v11629_v14, %v11485_v60 }
 0x227   :  { %v7041_v22 = vor.u32 %v8021_v30, %v7038_v11  ;;  %v7022_v41 = vld [vmem:[%s12094_s1 + $0xf78] sm:$0xf0]  ;;  %v7977_v4 = vld [vmem:[%s12094_s1 + $0xe2c] sm:$0xf] }
 0x228   :  { %v7150_v29 = vld [vmem:[%s12094_s1 + $0x1078] sm:$0xf0]  ;;  %v7025_v47 = vor.u32 %v8017_v27, %v7022_v41  ;;  %v8037_v12 = vld [vmem:[%s12094_s1 + $0x100c] sm:$0xf]  ;;  %v4196_v14 = vadd.f32 %v11637_v19, %v4183_v25  ;;  %v8122_v19 = vld [vmem:[%s12096_s3 + $0xb0] sm:$0xff] }
 0x229   :  { %4440 = vmatpush.bf16.msra.mxu0 %v6337_v28  ;;  %4453 = vmatpush.bf16.msra.mxu1 %v6465_v32  ;;  %v11833_v21 = vpop.f32.mrf.mxu0  ;;  %v11841_v18 = vpop.f32.mrf.mxu1  ;;  %v7297_v28 = vor.u32 %v8085_v23, %v7294_v15  ;;  %v8081_v32 = vld [vmem:[%s12094_s1 + $0x116c] sm:$0xf]  ;;  %v7006_v33 = vld [vmem:[%s12094_s1 + $0xf58] sm:$0xf0] }
 0x22a   :  { %4466 = vmatpush.bf16.msra.mxu2 %v6593_v37  ;;  %4479 = vmatpush.bf16.msra.mxu3 %v6721_v58  ;;  %v7278_v37 = vld [vmem:[%s12094_s1 + $0x1178] sm:$0xf0]  ;;  %v7153_v58 = vor.u32 %v8049_v49, %v7150_v29 }
 0x22b   :  { %v7281_v53 = vor.u32 %v8081_v32, %v7278_v37  ;;  %v7134_v59 = vld [vmem:[%s12094_s1 + $0x1058] sm:$0xf0]  ;;  %v4209_v32 = vadd.f32 %v11672_v54, %v4196_v14  ;;  %v8106_v37 = vld [vmem:[%s12096_s3 + $0x30] sm:$0xff] }
 0x22c   :  { %4441 = vmatmul.bf16.vlgmr.msra.gmra.mxu0 %v8933_v35  ;;  %4454 = vmatmul.bf16.vlgmr.msra.gmra.mxu1 %v8943_v39  ;;  %v8089_v35 = vld [vmem:[%s12094_s1 + $0x11ac] sm:$0xf]  ;;  %v7262_v0 = vld [vmem:[%s12094_s1 + $0x1158] sm:$0xf0] }
 0x22d   :  { %4485 = vmatpush.bf16.msrb.mxu0 %v6961_v50  ;;  %4498 = vmatpush.bf16.msrb.mxu1 %v7089_v52  ;;  %v7989_v39 = vld [vmem:[%s12094_s1 + $0xe8c] sm:$0xf]  ;;  %v6878_v52 = vld [vmem:[%s12094_s1 + $0xe58] sm:$0xf0]  ;;  %v7265_v48 = vor.u32 %v8077_v62, %v7262_v0  ;;  %v4222_v54 = vadd.f32 %v11683_v63, %v4209_v32 }
 0x22e   :  { %4511 = vmatpush.bf16.msrb.mxu2 %v7217_v16  ;;  %4524 = vmatpush.bf16.msrb.mxu3 %v7345_v57  ;;  %v7981_v50 = vld [vmem:[%s12094_s1 + $0xe4c] sm:$0xf]  ;;  %v6862_v5 = vld [vmem:[%s12094_s1 + $0xe38] sm:$0xf0] }
 0x22f   :  { %4467 = vmatmul.bf16.vlgmr.msra.gmra.mxu2 %v9150_v31  ;;  %4480 = vmatmul.bf16.vlgmr.msra.gmra.mxu3 %v9163_v40  ;;  %v6910_v31 = vld [vmem:[%s12094_s1 + $0xe98] sm:$0xf0]  ;;  %v7313_v40 = vor.u32 %v8089_v35, %v7310_v6  ;;  %v8013_v16 = vld [vmem:[%s12094_s1 + $0xf4c] sm:$0xf] }
 0x230   :  { %v6913_v17 = vor.u32 %v7989_v39, %v6910_v31  ;;  %v8045_v57 = vld [vmem:[%s12094_s1 + $0x104c] sm:$0xf]  ;;  %v6990_v42 = vld [vmem:[%s12094_s1 + $0xf38] sm:$0xf0] }
 0x231   :  { %4486 = vmatpush.bf16.msrb.mxu0 %v6945_v45  ;;  %4499 = vmatpush.bf16.msrb.mxu1 %v7073_v1  ;;  %v4236_v8 = vpop.f32.mrf.mxu0  ;;  %v6881_v45 = vor.u32 %v7981_v50, %v6878_v52  ;;  %v4249_v1 = vpop.f32.mrf.mxu1  ;;  %v7137_v3 = vor.u32 %v8045_v57, %v7134_v59  ;;  %v7118_v35 = vld [vmem:[%s12094_s1 + $0x1038] sm:$0xf0]  ;;  %v8073_v6 = vld [vmem:[%s12094_s1 + $0x112c] sm:$0xf]  ;;  %v8112_v50 = vld [vmem:[%s12096_s3 + $0x60] sm:$0xff] }
 0x232   :  { %4512 = vmatpush.bf16.msrb.mxu2 %v7201_v2  ;;  %4525 = vmatpush.bf16.msrb.mxu3 %v7329_v9  ;;  %v11876_v55 = vpop.f32.mrf.mxu2  ;;  %v11887_v61 = vpop.f32.mrf.mxu3  ;;  %v7009_v2 = vor.u32 %v8013_v16, %v7006_v33  ;;  %v8009_v9 = vld [vmem:[%s12094_s1 + $0xf2c] sm:$0xf]  ;;  %v7121_v39 = vor.u32 %v8041_v20, %v7118_v35  ;;  %v6846_v30 = vld [vmem:[%s12094_s1 + $0xe18] sm:$0xf0]  ;;  %v8120_v52 = vld [vmem:[%s12096_s3 + $0xa0] sm:$0xff] }
 0x233   :  { %v7973_v31 = vld [vmem:[%s12094_s1 + $0xe0c] sm:$0xf]  ;;  %v6974_v36 = vld [vmem:[%s12094_s1 + $0xf18] sm:$0xf0]  ;;  %v8102_v1 = vld [vmem:[%s12096_s3 + $0x10] sm:$0xff] }
 0x234   :  { %v7102_v23 = vld [vmem:[%s12094_s1 + $0x1018] sm:$0xf0]  ;;  %v6849_v26 = vor.u32 %v7973_v31, %v6846_v30  ;;  %v4538_v31 = vmax.f32 %v11085_v13, 0.0 }
 0x235   :  { %4487 = vmatpush.bf16.msrb.mxu0 %v6929_v7  ;;  %4500 = vmatpush.bf16.msrb.mxu1 %v7057_v10  ;;  %v7246_v7 = vld [vmem:[%s12094_s1 + $0x1138] sm:$0xf0]  ;;  %v6865_v10 = vor.u32 %v7977_v4, %v6862_v5  ;;  %v8118_v4 = vld [vmem:[%s12096_s3 + $0x90] sm:$0xff] }
 0x236   :  { %4513 = vmatpush.bf16.msrb.mxu2 %v7185_v46  ;;  %4526 = vmatpush.bf16.msrb.mxu3 %v7313_v40  ;;  %v6993_v46 = vor.u32 %v8009_v9, %v6990_v42  ;;  %v8005_v40 = vld [vmem:[%s12094_s1 + $0xf0c] sm:$0xf]  ;;  %v7249_v11 = vor.u32 %v8073_v6, %v7246_v7  ;;  %v8107_v49 = vld [vmem:[%s12096_s3 + $0x38] sm:$0xff]  ;;  %v8100_v7 = vld [vmem:[%s12096_s3] sm:$0xff] }
 0x237   :  { %v6977_v27 = vor.u32 %v8005_v40, %v6974_v36  ;;  %v8115_v29 = vld [vmem:[%s12096_s3 + $0x78] sm:$0xff]  ;;  %v8117_v42 = vld [vmem:[%s12096_s3 + $0x88] sm:$0xff] }
 0x238   :  { %v8123_v60 = vld [vmem:[%s12096_s3 + $0xb8] sm:$0xff] }
 0x239   :  { %4488 = vmatpush.bf16.msrb.mxu0 %v6913_v17  ;;  %4501 = vmatpush.bf16.msrb.mxu1 %v7041_v22  ;;  %v8069_v17 = vld [vmem:[%s12094_s1 + $0x110c] sm:$0xf]  ;;  %v7230_v22 = vld [vmem:[%s12094_s1 + $0x1118] sm:$0xf0] }
 0x23a   :  { %4514 = vmatpush.bf16.msrb.mxu2 %v7169_v24  ;;  %4527 = vmatpush.bf16.msrb.mxu3 %v7297_v28  ;;  %v4262_v15 = vpop.f32.mrf.mxu2  ;;  %v4275_v24 = vpop.f32.mrf.mxu3  ;;  %v7105_v28 = vor.u32 %v8037_v12, %v7102_v23  ;;  %v7233_v41 = vor.u32 %v8069_v17, %v7230_v22  ;;  %v8103_v57 = vld [vmem:[%s12096_s3 + $0x18] sm:$0xff] }
 0x23b   :  { %v8111_v59 = vld [vmem:[%s12096_s3 + $0x58] sm:$0xff] }
 0x23c   :  { %v8131_v32 = vld [vmem:[%s12096_s3 + $0xf8] sm:$0xff] }
 0x23d   :  { %4489 = vmatpush.bf16.msrb.mxu0 %v6897_v56  ;;  %4502 = vmatpush.bf16.msrb.mxu1 %v7025_v47  ;;  %v8114_v56 = vld [vmem:[%s12096_s3 + $0x70] sm:$0xff]  ;;  %v8105_v47 = vld [vmem:[%s12096_s3 + $0x28] sm:$0xff] }
 0x23e   :  { %4515 = vmatpush.bf16.msrb.mxu2 %v7153_v58  ;;  %4528 = vmatpush.bf16.msrb.mxu3 %v7281_v53  ;;  %v8113_v58 = vld [vmem:[%s12096_s3 + $0x68] sm:$0xff] }
 0x241   :  { %4490 = vmatpush.bf16.msrb.mxu0 %v6881_v45  ;;  %4503 = vmatpush.bf16.msrb.mxu1 %v7009_v2 }
 0x242   :  { %4516 = vmatpush.bf16.msrb.mxu2 %v7137_v3  ;;  %4529 = vmatpush.bf16.msrb.mxu3 %v7265_v48  ;;  %v8110_v3 = vld [vmem:[%s12096_s3 + $0x50] sm:$0xff]  ;;  %v8109_v48 = vld [vmem:[%s12096_s3 + $0x48] sm:$0xff] }
 0x245   :  { %4491 = vmatpush.bf16.msrb.mxu0 %v6865_v10  ;;  %4504 = vmatpush.bf16.msrb.mxu1 %v6993_v46  ;;  %v4537_v10 = vmax.f32 %v10245_v34, 0.0  ;;  %v8108_v46 = vld [vmem:[%s12096_s3 + $0x40] sm:$0xff] }
 0x246   :  { %4517 = vmatpush.bf16.msrb.mxu2 %v7121_v39  ;;  %4530 = vmatpush.bf16.msrb.mxu3 %v7249_v11  ;;  %v8116_v39 = vld [vmem:[%s12096_s3 + $0x80] sm:$0xff]  ;;  %v4542_v11 = vpack.c.bf16 %v4538_v31, %v4538_v31 }
 0x247   :  { %v4541_v40 = vpack.c.bf16 %v4537_v10, %v4537_v10 }
 0x249   :  { %4492 = vmatpush.bf16.msrb.mxu0 %v6849_v26  ;;  %4505 = vmatpush.bf16.msrb.mxu1 %v6977_v27  ;;  %v4299_v63 = vpop.f32.mrf.mxu1 }
 0x24a   :  { %4518 = vmatpush.bf16.msrb.mxu2 %v7105_v28  ;;  %4531 = vmatpush.bf16.msrb.mxu3 %v7233_v41 }
 0x24c   :  { %4493 = vmatmul.bf16.vlgmr.msrb.gmra.mxu0 %v9161_v38  ;;  %4506 = vmatmul.bf16.vlgmr.msrb.gmra.mxu1 %v9171_v44  ;;  %v8121_v38 = vld [vmem:[%s12096_s3 + $0xa8] sm:$0xff]  ;;  %v4235_v44 = vadd.f32 %v11833_v21, %v4222_v54  ;;  %v8149_v21 = vld [vmem:[%s12095_s2] sm:$0xf] }
 0x24d   :  { %4805 = vmatpush.bf16.msra.mxu0 %v8107_v49  ;;  %4818 = vmatpush.bf16.msra.mxu1 %v8115_v29  ;;  %v626_v53 = vperm.slane %v8149_v21, 3 }
 0x24e   :  { %4831 = vmatpush.bf16.msra.mxu2 %v8123_v60  ;;  %4532 = vmatmul.bf16.vlgmr.msrb.gmra.mxu3 %v9377_v51  ;;  %v8104_v51 = vld [vmem:[%s12096_s3 + $0x20] sm:$0xff]  ;;  %v4248_v16 = vadd.f32 %v11841_v18, %v4235_v44  ;;  %v8119_v18 = vld [vmem:[%s12096_s3 + $0x98] sm:$0xff] }
 0x24f   :  { %4519 = vmatmul.bf16.vlgmr.msrb.gmra.mxu2 %v9366_v43  ;;  %v4286_v43 = vpop.f32.mrf.mxu0  ;;  %4844 = vmatpush.bf16.msra.mxu3 %v8131_v32  ;;  %v8142_v32 = vld [vmem:[%s12099_s6] ss:$0 sm:$0xff] }
 0x250   :  { %v4261_v33 = vadd.f32 %v11876_v55, %v4248_v16 }
 0x251   :  { %4806 = vmatpush.bf16.msra.mxu0 %v8106_v37  ;;  %4819 = vmatpush.bf16.msra.mxu1 %v8114_v56  ;;  %v4301_v2 = vpop.f32.mrf.mxu1  ;;  %v8130_v56 = vld [vmem:[%s12096_s3 + $0xf0] sm:$0xff] }
 0x252   :  { %4832 = vmatpush.bf16.msra.mxu2 %v8122_v19  ;;  %v4312_v62 = vpop.f32.mrf.mxu2  ;;  %v4325_v8 = vpop.f32.mrf.mxu3  ;;  %v4274_v55 = vadd.f32 %v11887_v61, %v4261_v33  ;;  %v8101_v61 = vld [vmem:[%s12096_s3 + $0x8] sm:$0xff]  ;;  %v8124_v33 = vld [vmem:[%s12096_s3 + $0xc0] sm:$0xff] }
 0x253   :  { %v4313_v0 = vadd.f32 %v4312_v62, %v626_v53  ;;  %4845 = vmatpush.bf16.msra.mxu3 %v8130_v56  ;;  %v8129_v19 = vld [vmem:[%s12096_s3 + $0xe8] sm:$0xff] }
 0x254   :  { %v4287_v9 = vadd.f32 %v4286_v43, %v4274_v55 }
 0x255   :  { %4807 = vmatpush.bf16.msra.mxu0 %v8105_v47  ;;  %4820 = vmatpush.bf16.msra.mxu1 %v8113_v58  ;;  %v4326_v5 = vadd.f32 %v4325_v8, %v4313_v0  ;;  %v8128_v58 = vld [vmem:[%s12096_s3 + $0xe0] sm:$0xff] }
 0x256   :  { %4833 = vmatpush.bf16.msra.mxu2 %v8121_v38  ;;  %v4300_v20 = vadd.f32 %v4299_v63, %v4287_v9  ;;  %v8127_v38 = vld [vmem:[%s12096_s3 + $0xd8] sm:$0xff]  ;;  %v8125_v63 = vld [vmem:[%s12096_s3 + $0xc8] sm:$0xff] }
 0x257   :  { %v4288_v45 = vpop.f32.mrf.mxu0  ;;  %4846 = vmatpush.bf16.msra.mxu3 %v8129_v19 }
 0x258   :  { %v4539_v30 = vmax.f32 %v4300_v20, 0.0 }
 0x259   :  { %4808 = vmatpush.bf16.msra.mxu0 %v8104_v51  ;;  %4821 = vmatpush.bf16.msra.mxu1 %v8112_v50  ;;  %v8126_v51 = vld [vmem:[%s12096_s3 + $0xd0] sm:$0xff] }
 0x25a   :  { %4834 = vmatpush.bf16.msra.mxu2 %v8120_v52  ;;  %v4314_v35 = vpop.f32.mrf.mxu2  ;;  %v4327_v6 = vpop.f32.mrf.mxu3  ;;  %v4543_v36 = vpack.c.bf16 %v4539_v30, %v4539_v30  ;;  %v8137_v30 = vld [vmem:[%s12098_s5 + $0x28] sm:$0xff] }
 0x25b   :  { %4847 = vmatpush.bf16.msra.mxu3 %v8128_v58 }
 0x25d   :  { %4809 = vmatpush.bf16.msra.mxu0 %v8103_v57  ;;  %4822 = vmatpush.bf16.msra.mxu1 %v8111_v59 }
 0x25e   :  { %4835 = vmatpush.bf16.msra.mxu2 %v8119_v18 }
 0x25f   :  { %4848 = vmatpush.bf16.msra.mxu3 %v8127_v38 }
 0x261   :  { %4810 = vmatpush.bf16.msra.mxu0 %v8102_v1  ;;  %4823 = vmatpush.bf16.msra.mxu1 %v8110_v3 }
 0x262   :  { %4836 = vmatpush.bf16.msra.mxu2 %v8118_v4 }
 0x263   :  { %4849 = vmatpush.bf16.msra.mxu3 %v8126_v51 }
 0x265   :  { %4811 = vmatpush.bf16.msra.mxu0 %v8101_v61  ;;  %4824 = vmatpush.bf16.msra.mxu1 %v8109_v48 }
 0x266   :  { %4837 = vmatpush.bf16.msra.mxu2 %v8117_v42 }
 0x267   :  { %4850 = vmatpush.bf16.msra.mxu3 %v8125_v63 }
 0x269   :  { %4812 = vmatpush.bf16.msra.mxu0 %v8100_v7  ;;  %4825 = vmatpush.bf16.msra.mxu1 %v8108_v46  ;;  %v4338_v34 = vpop.f32.mrf.mxu0  ;;  %v4351_v23 = vpop.f32.mrf.mxu1  ;;  %v8139_v7 = vld [vmem:[%s12098_s5 + $0x38] sm:$0xff]  ;;  %v8138_v46 = vld [vmem:[%s12098_s5 + $0x30] sm:$0xff] }
 0x26a   :  { %4838 = vmatpush.bf16.msra.mxu2 %v8116_v39  ;;  %v4339_v12 = vadd.f32 %v4338_v34, %v4326_v5 }
 0x26b   :  { %4851 = vmatpush.bf16.msra.mxu3 %v8124_v33 }
 0x26c   :  { %4813 = vmatmul.bf16.vlgmr.msra.gmra.mxu0 %v4541_v40  ;;  %4826 = vmatmul.bf16.vlgmr.msra.gmra.mxu1 %v4542_v11  ;;  %v4352_v15 = vadd.f32 %v4351_v23, %v4339_v12  ;;  %v8136_v40 = vld [vmem:[%s12098_s5 + $0x20] sm:$0xff] }
 0x26d   :  { %4839 = vmatmul.bf16.vlgmr.msra.gmra.mxu2 %v4543_v36  ;;  %4927 = vmatpush.bf16.msrb.mxu0 %v8139_v7  ;;  %v8141_v11 = vld [vmem:[%s12097_s4] ss:$0 sm:$0xff]  ;;  %v8135_v36 = vld [vmem:[%s12098_s5 + $0x18] sm:$0xff] }
 0x271   :  { %v4340_v26 = vpop.f32.mrf.mxu0  ;;  %v4353_v13 = vpop.f32.mrf.mxu1  ;;  %4928 = vmatpush.bf16.msrb.mxu0 %v8138_v46 }
 0x272   :  { %v4364_v17 = vpop.f32.mrf.mxu2  ;;  %v4377_v24 = vpop.f32.mrf.mxu3 }
 0x273   :  { %v4365_v22 = vadd.f32 %v4364_v17, %v4352_v15  ;;  %v8134_v15 = vld [vmem:[%s12098_s5 + $0x10] sm:$0xff] }
 0x275   :  { %v4378_v25 = vadd.f32 %v4377_v24, %v4365_v22  ;;  %4929 = vmatpush.bf16.msrb.mxu0 %v8137_v30 }
 0x279   :  { %4930 = vmatpush.bf16.msrb.mxu0 %v8136_v40 }
 0x27a   :  { %v4366_v27 = vpop.f32.mrf.mxu2  ;;  %v4379_v28 = vpop.f32.mrf.mxu3 }
 0x27b   :  { %v8133_v27 = vld [vmem:[%s12098_s5 + $0x8] sm:$0xff]  ;;  %v8132_v28 = vld [vmem:[%s12098_s5] sm:$0xff]  ;;  %s8176_s5 = smov [#allocation2]  }
 0x27c   :  { %s4959_s6 = sshll.u32 %s8176_s5, 4  ;;  %s4960_s6 = int_to_ptr.vmem [resolvable:$true] %s4959_s6 }
 0x27d   :  { %4931 = vmatpush.bf16.msrb.mxu0 %v8135_v36 }
 0x281   :  { %4932 = vmatpush.bf16.msrb.mxu0 %v8134_v15 }
 0x285   :  { %4933 = vmatpush.bf16.msrb.mxu0 %v8133_v27 }
 0x289   :  { %v4390_v41 = vpop.f32.mrf.mxu0  ;;  %v4403_v49 = vpop.f32.mrf.mxu1  ;;  %4934 = vmatpush.bf16.msrb.mxu0 %v8132_v28 }
 0x28a   :  { %v4391_v52 = vadd.f32 %v4390_v41, %v4378_v25 }
 0x28c   :  { %v4404_v57 = vadd.f32 %v4403_v49, %v4391_v52 }
 0x291   :  { %v4392_v14 = vpop.f32.mrf.mxu0  ;;  %v4405_v37 = vpop.f32.mrf.mxu1 }
 0x292   :  { %v4416_v29 = vpop.f32.mrf.mxu2  ;;  %v4429_v60 = vpop.f32.mrf.mxu3 }
 0x293   :  { %v4417_v59 = vadd.f32 %v4416_v29, %v4404_v57 }
 0x295   :  { %v4430_v0 = vadd.f32 %v4429_v60, %v4417_v59 }
 0x29a   :  { %v4418_v54 = vpop.f32.mrf.mxu2  ;;  %v4431_v47 = vpop.f32.mrf.mxu3 }
 0x2a9   :  { %v4442_v44 = vpop.f32.mrf.mxu0  ;;  %v4455_v43 = vpop.f32.mrf.mxu1 }
 0x2aa   :  { %v4443_v8 = vadd.f32 %v4442_v44, %v4430_v0 }
 0x2ac   :  { %v4456_v45 = vadd.f32 %v4455_v43, %v4443_v8 }
 0x2b1   :  { %v4444_v21 = vpop.f32.mrf.mxu0  ;;  %v4457_v53 = vpop.f32.mrf.mxu1 }
 0x2b2   :  { %v4468_v50 = vpop.f32.mrf.mxu2  ;;  %v4481_v16 = vpop.f32.mrf.mxu3 }
 0x2b3   :  { %v4469_v55 = vadd.f32 %v4468_v50, %v4456_v45 }
 0x2b5   :  { %v4482_v1 = vadd.f32 %v4481_v16, %v4469_v55 }
 0x2ba   :  { %v4470_v18 = vpop.f32.mrf.mxu2  ;;  %v4483_v62 = vpop.f32.mrf.mxu3 }
 0x2c9   :  { %v4494_v2 = vpop.f32.mrf.mxu0  ;;  %v4507_v3 = vpop.f32.mrf.mxu1 }
 0x2ca   :  { %v4495_v4 = vadd.f32 %v4494_v2, %v4482_v1 }
 0x2cc   :  { %v4508_v5 = vadd.f32 %v4507_v3, %v4495_v4 }
 0x2d1   :  { %v4533_v61 = vpop.f32.mrf.mxu3  ;;  %v4496_v42 = vpop.f32.mrf.mxu0 }
 0x2d2   :  { %v4520_v9 = vpop.f32.mrf.mxu2  ;;  %v4509_v20 = vpop.f32.mrf.mxu1 }
 0x2d3   :  { %v4521_v48 = vadd.f32 %v4520_v9, %v4508_v5 }
 0x2d5   :  { %v4534_v35 = vadd.f32 %v4533_v61, %v4521_v48 }
 0x2d7   :  { %v4540_v6 = vmax.f32 %v4534_v35, 0.0 }
 0x2d9   :  { %v4544_v10 = vpack.c.bf16 %v4540_v6, %v4540_v6  ;;  %v4535_v31 = vpop.f32.mrf.mxu3 }
 0x2da   :  { %v4522_v39 = vpop.f32.mrf.mxu2 }
 0x2db   :  { %4852 = vmatmul.bf16.vlgmr.msra.gmra.mxu3 %v4544_v10 }
 0x2e9   :  { %v4814_v34 = vpop.f32.mrf.mxu0  ;;  %v4827_v23 = vpop.f32.mrf.mxu1 }
 0x2ea   :  { %v4815_v12 = vadd.f32 %v8141_v11, %v4814_v34 }
 0x2ec   :  { %v4828_v17 = vadd.f32 %v4827_v23, %v4815_v12 }
 0x2f0   :  { %v4840_v22 = vpop.f32.mrf.mxu2 }
 0x2f1   :  { %v4841_v24 = vadd.f32 %v4840_v22, %v4828_v17  ;;  %v4816_v25 = vpop.f32.mrf.mxu0  ;;  %v4829_v26 = vpop.f32.mrf.mxu1 }
 0x2f8   :  { %v4842_v13 = vpop.f32.mrf.mxu2 }
 0x35e   :  { %v4853_v41 = vpop.f32.mrf.mxu3 }
 0x35f   :  { %v4854_v49 = vadd.f32 %v4853_v41, %v4841_v24 }
 0x361   :  { %v4857_v29 = vmax.f32 %v4854_v49, 0.0 }
 0x363   :  { %v4858_v60 = vpack.c.bf16 %v4857_v29, %v4857_v29 }
 0x365   :  { %4935 = vmatmul.bf16.vlgmr.msrb.gmra.mxu0 %v4858_v60 }
 0x366   :  { %v4855_v14 = vpop.f32.mrf.mxu3 }
 0x3e2   :  { %v4936_v37 = vpop.f32.mrf.mxu0 }
 0x3e3   :  { %v4937_v56 = vadd.f32 %v8142_v32, %v4936_v37 }
 0x3e5   :  { %v4941_v19 = vsel %vm4940_vm0, %v4937_v56, -inf }
 0x3e6   :  { %4942 = vmax.xlane.f32.xlu0 %v4941_v19 }
 0x3ea   :  { %v4938_v54 = vpop.f32.mrf.mxu0 }
 0x459   :  { %v4943_v47 = vpop.xlane.xlu0 %4942 }
 0x45a   :  { %v4944_v58 = vsub.f32 %v4937_v56, %v4943_v47 }
 0x45c   :  { %v4945_v38 = vmul.f32 1.442695, %v4944_v58 }
 0x45e   :  { %8143 = vpow2.f32 %v4945_v38 }
 0x464   :  { %v8144_v44 = vpop.eup %8143 }
 0x465   :  { %v4947_v43 = vsel %vm4940_vm0, %v8144_v44, 0.0 }
 0x466   :  { %4948 = vadd.xlane.f32.xlu0 %v4947_v43 }
 0x4d9   :  { %v4949_v51 = vpop.xlane.xlu0 %4948 }
 0x4da   :  { %8145 = vlog2.f32 %v4949_v51 }
 0x4e0   :  { %v8146_v63 = vpop.eup %8145 }
 0x4e1   :  { %v4951_v50 = vmul.f32 0.6931472, %v8146_v63 }
 0x4e3   :  { %v4952_v52 = vsub.f32 %v4944_v58, %v4951_v50 }
 0x4e5   :  { %4953 = vst.msk [vmem:[#allocation2] sm:$0x3] %vm4940_vm0, %v4952_v52 }
 0x4e6   :  { %4964 = dma.vmem_to_hbm [thread:$0]  %s4960_s6, 32, %s4962_s21, [#allocation3]  }
 0x4e7   :  { %8174 = dma.done.wait [#allocation3], 32  }
 0x4e8   :  { %8175 = vsyncadd [#allocation3], 4294967264 }
 0x4e9   :  { %4969 = vsyncpa [#allocation3], 1 }

</bundles_post_ra>
